<compile_context>
chip_gen: v7x
topology: tpu7x:2x2x1
jax: 0.10.0
libtpu: 0.0.40
codegen_flags: <defaults>
</compile_context>

<pallas_src>
import jax
import jax.numpy as jnp
import numpy as np
from jax import lax
from jax.experimental import pallas as pl
from jax.experimental.pallas import tpu as pltpu

KS = 5            # Conv3d kernel size (5, 5, 5), padding='same', bias=False
PAD = KS // 2     # 'same' padding = 2 on every side (odd kernel, stride 1)

# Only matmuls are 50 tiny banded (D, D+4) @ (D+4, H*Wp) contractions on an
# otherwise-idle MXU, so f32 (HIGHEST) accuracy is kept for them; all other
# work (channel reduce, taps, sigmoid) is f32 VPU/EUP.
PREC = lax.Precision.HIGHEST


def _pick_wp(H, W):
    """Padded row width.  Prefer one that makes the flat lane axis H*Wp a
    multiple of 128 (unmasked vector stores) if the extra padding is modest."""
    base = W + 2 * PAD
    for wp in range(base, base + 128):
        if (H * wp) % 128 == 0:
            if wp - base <= max(8, base // 2):
                return wp
            break
    return base


def _make_kernel(C, D, H, Wp):
    LA = H * Wp                        # accumulator / output lane width

    def kernel(x_ref, band_ref, out_ref):
        # x_ref block: (1, C, D+4, (H+5)*Wp) -- spatially pre-padded, flat.
        # Channel reduction (sum & max) over the leading axis: pure VPU on
        # lane-dense slabs; no concatenation of the two attention channels.
        xc = x_ref[0, 0]
        s_acc = xc
        m_acc = xc
        for c in range(1, C):
            xc = x_ref[0, c]
            s_acc = s_acc + xc
            m_acc = jnp.maximum(m_acc, xc)
        # NOTE: 1/C of the mean is pre-folded into band_ref channel 0, so the
        # raw channel sum s_acc is used directly.

        # 5x5x5 'same' conv over the [mean, max] pair.
        # Each (kh, kw) tap: one hoisted static lane slice; the 5 kd taps (and
        # the zero depth padding) are encoded in band_ref, so the depth
        # contraction is a single small MXU matmul per tap.
        acc = jnp.zeros((D, LA), jnp.float32)
        for kh in range(KS):
            for kw in range(KS):
                i = kh * KS + kw
                s = kh * Wp + kw                          # static lane offset
                acc = acc + jnp.dot(band_ref[0, i], s_acc[:, s:s + LA],
                                    preferred_element_type=jnp.float32,
                                    precision=PREC)
                acc = acc + jnp.dot(band_ref[1, i], m_acc[:, s:s + LA],
                                    preferred_element_type=jnp.float32,
                                    precision=PREC)

        # Lane-dense H*Wp-wide store (multiple of 128 when possible); the
        # W-padding columns are stripped in the wrapper.
        out_ref[0] = (1.0 / (1.0 + jnp.exp(-acc))).astype(out_ref.dtype)

    return kernel


def _build_band(weight, D):
    """Fold the conv's depth (kd) taps into banded matrices.

    weight: (2, KS, KS, KS) = (in_channel=[mean, max], kd, kh, kw)
            (channel 0 already scaled by 1/C).
    returns band: (2, KS*KS, D, D + KS - 1) with
        band[c, kh*KS + kw, d, d + kd] = weight[c, kd, kh, kw]
    Built with an exact gather + mask (no matmul rounding).
    """
    D4 = D + KS - 1
    kd_idx = np.arange(D4)[None, :] - np.arange(D)[:, None]     # (D, D4)
    valid = (kd_idx >= 0) & (kd_idx < KS)
    kd_clip = np.clip(kd_idx, 0, KS - 1)

    wt = jnp.transpose(weight.astype(jnp.float32), (0, 2, 3, 1))  # (2,kh,kw,kd)
    band = wt[:, :, :, kd_clip]                                   # (2,kh,kw,D,D4)
    band = jnp.where(valid[None, None, None], band, 0.0)
    return band.reshape(2, KS * KS, D, D4)


@jax.jit
def spatial_attention3d(x, weight):
    """CBAM SpatialAttention3D forward.

    x:      (B, C, D, H, W) float32
    weight: (2, KS, KS, KS) float32  -- Conv3d(2, 1, 5, padding='same',
            bias=False) weight with the out-channel dim squeezed.
    returns (B, 1, D, H, W) float32.
    """
    B, C, D, H, W = x.shape
    Wp = _pick_wp(H, W)               # padded row width (>= W + 4)
    PH = H + 2 * PAD + 1              # one extra zero guard row for flat tap slices
    PF = PH * Wp
    LA = H * Wp

    # One-time HBM-side zero pad + (H, W) -> flat lane-dense axis.  The kernel
    # then never touches sub-(8,128) tiles or reshapes.
    # NOTE: for very large D*H*W volumes, add D-axis tiling with 2-row halos
    # so per-step VMEM stays bounded (especially on v7x's 64 MiB VMEM).
    xp = jnp.pad(x.astype(jnp.float32),
                 ((0, 0), (0, 0), (PAD, PAD), (PAD, PAD + 1),
                  (PAD, Wp - W - PAD)))
    xp = xp.reshape(B, C, D + 2 * PAD, PF)

    # Fold the mean's 1/C into the "avg" channel of the conv weights.
    scale = jnp.array([1.0 / C, 1.0], jnp.float32)[:, None, None, None]
    band = _build_band(weight.astype(jnp.float32) * scale, D)

    kernel = _make_kernel(C, D, H, Wp)

    out_flat = pl.pallas_call(
        kernel,
        out_shape=jax.ShapeDtypeStruct((B, D, LA), x.dtype),
        grid=(B,),
        in_specs=[
            pl.BlockSpec((1, C, D + 2 * PAD, PF), lambda b: (b, 0, 0, 0)),
            pl.BlockSpec(band.shape, lambda b: (0, 0, 0, 0)),
        ],
        out_specs=pl.BlockSpec((1, D, LA), lambda b: (b, 0, 0)),
        compiler_params=pltpu.CompilerParams(
            # Independent per-image work -> shard the batch axis across v7x's
            # two TensorCores; harmless on single-core v5e/v6e.
            dimension_semantics=("parallel",),
            # VMEM per step < 0.5 MiB: stay under the default scoped limit on
            # all generations.
        ),
    )(xp, band)

    # Strip the inter-row padding columns and restore the channel dim
    # (wrapper-side layout plumbing, not compute).
    out = out_flat.reshape(B, D, H, Wp)[..., :W]
    return out[:, None]


# ---------------- pure-JAX reference (independent correctness check) --------
def ref_forward(x, weight):
    avg = jnp.mean(x, axis=1, keepdims=True)
    mx = jnp.max(x, axis=1, keepdims=True)
    s = jnp.concatenate([avg, mx], axis=1)                    # (B, 2, D, H, W)
    y = lax.conv_general_dilated(
        s, weight[None].astype(jnp.float32),                  # (1, 2, 5, 5, 5)
        window_strides=(1, 1, 1), padding=[(PAD, PAD)] * 3,
        dimension_numbers=('NCDHW', 'OIDHW', 'NCDHW'),
        precision=lax.Precision.HIGHEST)
    return 1.0 / (1.0 + jnp.exp(-y))


if __name__ == "__main__":
    B, C, D, H, W = 2, 4, 8, 16, 16
    key = jax.random.PRNGKey(0)
    kx, kw_ = jax.random.split(key)
    x = jax.random.normal(kx, (B, C, D, H, W), jnp.float32)
    weight = (0.2 * jax.random.normal(kw_, (2, KS, KS, KS))).astype(jnp.float32)

    out = spatial_attention3d(x, weight)
    out = jax.block_until_ready(out)
    assert out.shape == (B, 1, D, H, W), out.shape

    ref = ref_forward(x, weight)
    max_err = float(jnp.max(jnp.abs(out - ref)))
    assert max_err < 1e-3, f"mismatch vs reference: max abs err {max_err}"
    print("KERNEL_OK")
</pallas_src>

<mosaic_0001>
module attributes {stable_mosaic.version = 11 : i64} {
  func.func @kernel(%arg0: i32, %arg1: memref<1x4x12x504xf32, #tpu.memory_space<vmem>>, %arg2: memref<2x25x8x12xf32, #tpu.memory_space<vmem>>, %arg3: memref<1x8x384xf32, #tpu.memory_space<vmem>>) attributes {dimension_semantics = [#tpu.dimension_semantics<parallel>], iteration_bounds = array<i64: 2>, scalar_prefetch = 0 : i64, scratch_operands = 0 : i64, tpu.core_type = #tpu.core_type<tc>, window_params = [{transform_indices = @transform_0, window_bounds = array<i64: 1, 4, 12, 504>}, {pipeline_mode = #tpu.pipeline_mode<synchronous>, transform_indices = @transform_1, window_bounds = array<i64: 2, 25, 8, 12>}, {transform_indices = @transform_2, window_bounds = array<i64: 1, 8, 384>}]} {
    %c0 = arith.constant 0 : index
    %c0_0 = arith.constant 0 : index
    %c0_1 = arith.constant 0 : index
    %c0_2 = arith.constant 0 : index
    %0 = vector.load %arg1[%c0, %c0_0, %c0_1, %c0_2] : memref<1x4x12x504xf32, #tpu.memory_space<vmem>>, vector<1x1x12x504xf32>
    %1 = vector.shape_cast %0 : vector<1x1x12x504xf32> to vector<12x504xf32>
    %c0_3 = arith.constant 0 : index
    %c1 = arith.constant 1 : index
    %c0_4 = arith.constant 0 : index
    %c0_5 = arith.constant 0 : index
    %2 = vector.load %arg1[%c0_3, %c1, %c0_4, %c0_5] : memref<1x4x12x504xf32, #tpu.memory_space<vmem>>, vector<1x1x12x504xf32>
    %3 = vector.shape_cast %2 : vector<1x1x12x504xf32> to vector<12x504xf32>
    %4 = arith.addf %1, %3 : vector<12x504xf32>
    %5 = arith.maximumf %1, %3 : vector<12x504xf32>
    %c0_6 = arith.constant 0 : index
    %c2 = arith.constant 2 : index
    %c0_7 = arith.constant 0 : index
    %c0_8 = arith.constant 0 : index
    %6 = vector.load %arg1[%c0_6, %c2, %c0_7, %c0_8] : memref<1x4x12x504xf32, #tpu.memory_space<vmem>>, vector<1x1x12x504xf32>
    %7 = vector.shape_cast %6 : vector<1x1x12x504xf32> to vector<12x504xf32>
    %8 = arith.addf %4, %7 : vector<12x504xf32>
    %9 = arith.maximumf %5, %7 : vector<12x504xf32>
    %c0_9 = arith.constant 0 : index
    %c3 = arith.constant 3 : index
    %c0_10 = arith.constant 0 : index
    %c0_11 = arith.constant 0 : index
    %10 = vector.load %arg1[%c0_9, %c3, %c0_10, %c0_11] : memref<1x4x12x504xf32, #tpu.memory_space<vmem>>, vector<1x1x12x504xf32>
    %11 = vector.shape_cast %10 : vector<1x1x12x504xf32> to vector<12x504xf32>
    %12 = arith.addf %8, %11 : vector<12x504xf32>
    %13 = arith.maximumf %9, %11 : vector<12x504xf32>
    %cst = arith.constant 0.000000e+00 : f32
    %14 = vector.broadcast %cst : f32 to vector<8x384xf32>
    %c0_12 = arith.constant 0 : index
    %c0_13 = arith.constant 0 : index
    %c0_14 = arith.constant 0 : index
    %c0_15 = arith.constant 0 : index
    %15 = vector.load %arg2[%c0_12, %c0_13, %c0_14, %c0_15] : memref<2x25x8x12xf32, #tpu.memory_space<vmem>>, vector<1x1x8x12xf32>
    %16 = vector.shape_cast %15 : vector<1x1x8x12xf32> to vector<8x12xf32>
    %17 = vector.extract_strided_slice %12 {offsets = [0, 0], sizes = [12, 384], strides = [1, 1]} : vector<12x504xf32> to vector<12x384xf32>
    %cst_16 = arith.constant dense<0.000000e+00> : vector<8x384xf32>
    %18 = tpu.matmul %16, %17, %cst_16 {dimension_numbers = #tpu.dot_dimension_numbers<[1], [0], [0], [1], [0, 0, 1, 1], [], []>, precision = #tpu.contract_precision<fp32>} : vector<8x12xf32>, vector<12x384xf32>, vector<8x384xf32> -> vector<8x384xf32>
    %19 = arith.addf %14, %18 : vector<8x384xf32>
    %c1_17 = arith.constant 1 : index
    %c0_18 = arith.constant 0 : index
    %c0_19 = arith.constant 0 : index
    %c0_20 = arith.constant 0 : index
    %20 = vector.load %arg2[%c1_17, %c0_18, %c0_19, %c0_20] : memref<2x25x8x12xf32, #tpu.memory_space<vmem>>, vector<1x1x8x12xf32>
    %21 = vector.shape_cast %20 : vector<1x1x8x12xf32> to vector<8x12xf32>
    %22 = vector.extract_strided_slice %13 {offsets = [0, 0], sizes = [12, 384], strides = [1, 1]} : vector<12x504xf32> to vector<12x384xf32>
    %cst_21 = arith.constant dense<0.000000e+00> : vector<8x384xf32>
    %23 = tpu.matmul %21, %22, %cst_21 {dimension_numbers = #tpu.dot_dimension_numbers<[1], [0], [0], [1], [0, 0, 1, 1], [], []>, precision = #tpu.contract_precision<fp32>} : vector<8x12xf32>, vector<12x384xf32>, vector<8x384xf32> -> vector<8x384xf32>
    %24 = arith.addf %19, %23 : vector<8x384xf32>
    %c0_22 = arith.constant 0 : index
    %c1_23 = arith.constant 1 : index
    %c0_24 = arith.constant 0 : index
    %c0_25 = arith.constant 0 : index
    %25 = vector.load %arg2[%c0_22, %c1_23, %c0_24, %c0_25] : memref<2x25x8x12xf32, #tpu.memory_space<vmem>>, vector<1x1x8x12xf32>
    %26 = vector.shape_cast %25 : vector<1x1x8x12xf32> to vector<8x12xf32>
    %27 = vector.extract_strided_slice %12 {offsets = [0, 1], sizes = [12, 384], strides = [1, 1]} : vector<12x504xf32> to vector<12x384xf32>
    %cst_26 = arith.constant dense<0.000000e+00> : vector<8x384xf32>
    %28 = tpu.matmul %26, %27, %cst_26 {dimension_numbers = #tpu.dot_dimension_numbers<[1], [0], [0], [1], [0, 0, 1, 1], [], []>, precision = #tpu.contract_precision<fp32>} : vector<8x12xf32>, vector<12x384xf32>, vector<8x384xf32> -> vector<8x384xf32>
    %29 = arith.addf %24, %28 : vector<8x384xf32>
    %c1_27 = arith.constant 1 : index
    %c1_28 = arith.constant 1 : index
    %c0_29 = arith.constant 0 : index
    %c0_30 = arith.constant 0 : index
    %30 = vector.load %arg2[%c1_27, %c1_28, %c0_29, %c0_30] : memref<2x25x8x12xf32, #tpu.memory_space<vmem>>, vector<1x1x8x12xf32>
    %31 = vector.shape_cast %30 : vector<1x1x8x12xf32> to vector<8x12xf32>
    %32 = vector.extract_strided_slice %13 {offsets = [0, 1], sizes = [12, 384], strides = [1, 1]} : vector<12x504xf32> to vector<12x384xf32>
    %cst_31 = arith.constant dense<0.000000e+00> : vector<8x384xf32>
    %33 = tpu.matmul %31, %32, %cst_31 {dimension_numbers = #tpu.dot_dimension_numbers<[1], [0], [0], [1], [0, 0, 1, 1], [], []>, precision = #tpu.contract_precision<fp32>} : vector<8x12xf32>, vector<12x384xf32>, vector<8x384xf32> -> vector<8x384xf32>
    %34 = arith.addf %29, %33 : vector<8x384xf32>
    %c0_32 = arith.constant 0 : index
    %c2_33 = arith.constant 2 : index
    %c0_34 = arith.constant 0 : index
    %c0_35 = arith.constant 0 : index
    %35 = vector.load %arg2[%c0_32, %c2_33, %c0_34, %c0_35] : memref<2x25x8x12xf32, #tpu.memory_space<vmem>>, vector<1x1x8x12xf32>
    %36 = vector.shape_cast %35 : vector<1x1x8x12xf32> to vector<8x12xf32>
    %37 = vector.extract_strided_slice %12 {offsets = [0, 2], sizes = [12, 384], strides = [1, 1]} : vector<12x504xf32> to vector<12x384xf32>
    %cst_36 = arith.constant dense<0.000000e+00> : vector<8x384xf32>
    %38 = tpu.matmul %36, %37, %cst_36 {dimension_numbers = #tpu.dot_dimension_numbers<[1], [0], [0], [1], [0, 0, 1, 1], [], []>, precision = #tpu.contract_precision<fp32>} : vector<8x12xf32>, vector<12x384xf32>, vector<8x384xf32> -> vector<8x384xf32>
    %39 = arith.addf %34, %38 : vector<8x384xf32>
    %c1_37 = arith.constant 1 : index
    %c2_38 = arith.constant 2 : index
    %c0_39 = arith.constant 0 : index
    %c0_40 = arith.constant 0 : index
    %40 = vector.load %arg2[%c1_37, %c2_38, %c0_39, %c0_40] : memref<2x25x8x12xf32, #tpu.memory_space<vmem>>, vector<1x1x8x12xf32>
    %41 = vector.shape_cast %40 : vector<1x1x8x12xf32> to vector<8x12xf32>
    %42 = vector.extract_strided_slice %13 {offsets = [0, 2], sizes = [12, 384], strides = [1, 1]} : vector<12x504xf32> to vector<12x384xf32>
    %cst_41 = arith.constant dense<0.000000e+00> : vector<8x384xf32>
    %43 = tpu.matmul %41, %42, %cst_41 {dimension_numbers = #tpu.dot_dimension_numbers<[1], [0], [0], [1], [0, 0, 1, 1], [], []>, precision = #tpu.contract_precision<fp32>} : vector<8x12xf32>, vector<12x384xf32>, vector<8x384xf32> -> vector<8x384xf32>
    %44 = arith.addf %39, %43 : vector<8x384xf32>
    %c0_42 = arith.constant 0 : index
    %c3_43 = arith.constant 3 : index
    %c0_44 = arith.constant 0 : index
    %c0_45 = arith.constant 0 : index
    %45 = vector.load %arg2[%c0_42, %c3_43, %c0_44, %c0_45] : memref<2x25x8x12xf32, #tpu.memory_space<vmem>>, vector<1x1x8x12xf32>
    %46 = vector.shape_cast %45 : vector<1x1x8x12xf32> to vector<8x12xf32>
    %47 = vector.extract_strided_slice %12 {offsets = [0, 3], sizes = [12, 384], strides = [1, 1]} : vector<12x504xf32> to vector<12x384xf32>
    %cst_46 = arith.constant dense<0.000000e+00> : vector<8x384xf32>
    %48 = tpu.matmul %46, %47, %cst_46 {dimension_numbers = #tpu.dot_dimension_numbers<[1], [0], [0], [1], [0, 0, 1, 1], [], []>, precision = #tpu.contract_precision<fp32>} : vector<8x12xf32>, vector<12x384xf32>, vector<8x384xf32> -> vector<8x384xf32>
    %49 = arith.addf %44, %48 : vector<8x384xf32>
    %c1_47 = arith.constant 1 : index
    %c3_48 = arith.constant 3 : index
    %c0_49 = arith.constant 0 : index
    %c0_50 = arith.constant 0 : index
    %50 = vector.load %arg2[%c1_47, %c3_48, %c0_49, %c0_50] : memref<2x25x8x12xf32, #tpu.memory_space<vmem>>, vector<1x1x8x12xf32>
    %51 = vector.shape_cast %50 : vector<1x1x8x12xf32> to vector<8x12xf32>
    %52 = vector.extract_strided_slice %13 {offsets = [0, 3], sizes = [12, 384], strides = [1, 1]} : vector<12x504xf32> to vector<12x384xf32>
    %cst_51 = arith.constant dense<0.000000e+00> : vector<8x384xf32>
    %53 = tpu.matmul %51, %52, %cst_51 {dimension_numbers = #tpu.dot_dimension_numbers<[1], [0], [0], [1], [0, 0, 1, 1], [], []>, precision = #tpu.contract_precision<fp32>} : vector<8x12xf32>, vector<12x384xf32>, vector<8x384xf32> -> vector<8x384xf32>
    %54 = arith.addf %49, %53 : vector<8x384xf32>
    %c0_52 = arith.constant 0 : index
    %c4 = arith.constant 4 : index
    %c0_53 = arith.constant 0 : index
    %c0_54 = arith.constant 0 : index
    %55 = vector.load %arg2[%c0_52, %c4, %c0_53, %c0_54] : memref<2x25x8x12xf32, #tpu.memory_space<vmem>>, vector<1x1x8x12xf32>
    %56 = vector.shape_cast %55 : vector<1x1x8x12xf32> to vector<8x12xf32>
    %57 = vector.extract_strided_slice %12 {offsets = [0, 4], sizes = [12, 384], strides = [1, 1]} : vector<12x504xf32> to vector<12x384xf32>
    %cst_55 = arith.constant dense<0.000000e+00> : vector<8x384xf32>
    %58 = tpu.matmul %56, %57, %cst_55 {dimension_numbers = #tpu.dot_dimension_numbers<[1], [0], [0], [1], [0, 0, 1, 1], [], []>, precision = #tpu.contract_precision<fp32>} : vector<8x12xf32>, vector<12x384xf32>, vector<8x384xf32> -> vector<8x384xf32>
    %59 = arith.addf %54, %58 : vector<8x384xf32>
    %c1_56 = arith.constant 1 : index
    %c4_57 = arith.constant 4 : index
    %c0_58 = arith.constant 0 : index
    %c0_59 = arith.constant 0 : index
    %60 = vector.load %arg2[%c1_56, %c4_57, %c0_58, %c0_59] : memref<2x25x8x12xf32, #tpu.memory_space<vmem>>, vector<1x1x8x12xf32>
    %61 = vector.shape_cast %60 : vector<1x1x8x12xf32> to vector<8x12xf32>
    %62 = vector.extract_strided_slice %13 {offsets = [0, 4], sizes = [12, 384], strides = [1, 1]} : vector<12x504xf32> to vector<12x384xf32>
    %cst_60 = arith.constant dense<0.000000e+00> : vector<8x384xf32>
    %63 = tpu.matmul %61, %62, %cst_60 {dimension_numbers = #tpu.dot_dimension_numbers<[1], [0], [0], [1], [0, 0, 1, 1], [], []>, precision = #tpu.contract_precision<fp32>} : vector<8x12xf32>, vector<12x384xf32>, vector<8x384xf32> -> vector<8x384xf32>
    %64 = arith.addf %59, %63 : vector<8x384xf32>
    %c0_61 = arith.constant 0 : index
    %c5 = arith.constant 5 : index
    %c0_62 = arith.constant 0 : index
    %c0_63 = arith.constant 0 : index
    %65 = vector.load %arg2[%c0_61, %c5, %c0_62, %c0_63] : memref<2x25x8x12xf32, #tpu.memory_space<vmem>>, vector<1x1x8x12xf32>
    %66 = vector.shape_cast %65 : vector<1x1x8x12xf32> to vector<8x12xf32>
    %67 = vector.extract_strided_slice %12 {offsets = [0, 24], sizes = [12, 384], strides = [1, 1]} : vector<12x504xf32> to vector<12x384xf32>
    %cst_64 = arith.constant dense<0.000000e+00> : vector<8x384xf32>
    %68 = tpu.matmul %66, %67, %cst_64 {dimension_numbers = #tpu.dot_dimension_numbers<[1], [0], [0], [1], [0, 0, 1, 1], [], []>, precision = #tpu.contract_precision<fp32>} : vector<8x12xf32>, vector<12x384xf32>, vector<8x384xf32> -> vector<8x384xf32>
    %69 = arith.addf %64, %68 : vector<8x384xf32>
    %c1_65 = arith.constant 1 : index
    %c5_66 = arith.constant 5 : index
    %c0_67 = arith.constant 0 : index
    %c0_68 = arith.constant 0 : index
    %70 = vector.load %arg2[%c1_65, %c5_66, %c0_67, %c0_68] : memref<2x25x8x12xf32, #tpu.memory_space<vmem>>, vector<1x1x8x12xf32>
    %71 = vector.shape_cast %70 : vector<1x1x8x12xf32> to vector<8x12xf32>
    %72 = vector.extract_strided_slice %13 {offsets = [0, 24], sizes = [12, 384], strides = [1, 1]} : vector<12x504xf32> to vector<12x384xf32>
    %cst_69 = arith.constant dense<0.000000e+00> : vector<8x384xf32>
    %73 = tpu.matmul %71, %72, %cst_69 {dimension_numbers = #tpu.dot_dimension_numbers<[1], [0], [0], [1], [0, 0, 1, 1], [], []>, precision = #tpu.contract_precision<fp32>} : vector<8x12xf32>, vector<12x384xf32>, vector<8x384xf32> -> vector<8x384xf32>
    %74 = arith.addf %69, %73 : vector<8x384xf32>
    %c0_70 = arith.constant 0 : index
    %c6 = arith.constant 6 : index
    %c0_71 = arith.constant 0 : index
    %c0_72 = arith.constant 0 : index
    %75 = vector.load %arg2[%c0_70, %c6, %c0_71, %c0_72] : memref<2x25x8x12xf32, #tpu.memory_space<vmem>>, vector<1x1x8x12xf32>
    %76 = vector.shape_cast %75 : vector<1x1x8x12xf32> to vector<8x12xf32>
    %77 = vector.extract_strided_slice %12 {offsets = [0, 25], sizes = [12, 384], strides = [1, 1]} : vector<12x504xf32> to vector<12x384xf32>
    %cst_73 = arith.constant dense<0.000000e+00> : vector<8x384xf32>
    %78 = tpu.matmul %76, %77, %cst_73 {dimension_numbers = #tpu.dot_dimension_numbers<[1], [0], [0], [1], [0, 0, 1, 1], [], []>, precision = #tpu.contract_precision<fp32>} : vector<8x12xf32>, vector<12x384xf32>, vector<8x384xf32> -> vector<8x384xf32>
    %79 = arith.addf %74, %78 : vector<8x384xf32>
    %c1_74 = arith.constant 1 : index
    %c6_75 = arith.constant 6 : index
    %c0_76 = arith.constant 0 : index
    %c0_77 = arith.constant 0 : index
    %80 = vector.load %arg2[%c1_74, %c6_75, %c0_76, %c0_77] : memref<2x25x8x12xf32, #tpu.memory_space<vmem>>, vector<1x1x8x12xf32>
    %81 = vector.shape_cast %80 : vector<1x1x8x12xf32> to vector<8x12xf32>
    %82 = vector.extract_strided_slice %13 {offsets = [0, 25], sizes = [12, 384], strides = [1, 1]} : vector<12x504xf32> to vector<12x384xf32>
    %cst_78 = arith.constant dense<0.000000e+00> : vector<8x384xf32>
    %83 = tpu.matmul %81, %82, %cst_78 {dimension_numbers = #tpu.dot_dimension_numbers<[1], [0], [0], [1], [0, 0, 1, 1], [], []>, precision = #tpu.contract_precision<fp32>} : vector<8x12xf32>, vector<12x384xf32>, vector<8x384xf32> -> vector<8x384xf32>
    %84 = arith.addf %79, %83 : vector<8x384xf32>
    %c0_79 = arith.constant 0 : index
    %c7 = arith.constant 7 : index
    %c0_80 = arith.constant 0 : index
    %c0_81 = arith.constant 0 : index
    %85 = vector.load %arg2[%c0_79, %c7, %c0_80, %c0_81] : memref<2x25x8x12xf32, #tpu.memory_space<vmem>>, vector<1x1x8x12xf32>
    %86 = vector.shape_cast %85 : vector<1x1x8x12xf32> to vector<8x12xf32>
    %87 = vector.extract_strided_slice %12 {offsets = [0, 26], sizes = [12, 384], strides = [1, 1]} : vector<12x504xf32> to vector<12x384xf32>
    %cst_82 = arith.constant dense<0.000000e+00> : vector<8x384xf32>
    %88 = tpu.matmul %86, %87, %cst_82 {dimension_numbers = #tpu.dot_dimension_numbers<[1], [0], [0], [1], [0, 0, 1, 1], [], []>, precision = #tpu.contract_precision<fp32>} : vector<8x12xf32>, vector<12x384xf32>, vector<8x384xf32> -> vector<8x384xf32>
    %89 = arith.addf %84, %88 : vector<8x384xf32>
    %c1_83 = arith.constant 1 : index
    %c7_84 = arith.constant 7 : index
    %c0_85 = arith.constant 0 : index
    %c0_86 = arith.constant 0 : index
    %90 = vector.load %arg2[%c1_83, %c7_84, %c0_85, %c0_86] : memref<2x25x8x12xf32, #tpu.memory_space<vmem>>, vector<1x1x8x12xf32>
    %91 = vector.shape_cast %90 : vector<1x1x8x12xf32> to vector<8x12xf32>
    %92 = vector.extract_strided_slice %13 {offsets = [0, 26], sizes = [12, 384], strides = [1, 1]} : vector<12x504xf32> to vector<12x384xf32>
    %cst_87 = arith.constant dense<0.000000e+00> : vector<8x384xf32>
    %93 = tpu.matmul %91, %92, %cst_87 {dimension_numbers = #tpu.dot_dimension_numbers<[1], [0], [0], [1], [0, 0, 1, 1], [], []>, precision = #tpu.contract_precision<fp32>} : vector<8x12xf32>, vector<12x384xf32>, vector<8x384xf32> -> vector<8x384xf32>
    %94 = arith.addf %89, %93 : vector<8x384xf32>
    %c0_88 = arith.constant 0 : index
    %c8 = arith.constant 8 : index
    %c0_89 = arith.constant 0 : index
    %c0_90 = arith.constant 0 : index
    %95 = vector.load %arg2[%c0_88, %c8, %c0_89, %c0_90] : memref<2x25x8x12xf32, #tpu.memory_space<vmem>>, vector<1x1x8x12xf32>
    %96 = vector.shape_cast %95 : vector<1x1x8x12xf32> to vector<8x12xf32>
    %97 = vector.extract_strided_slice %12 {offsets = [0, 27], sizes = [12, 384], strides = [1, 1]} : vector<12x504xf32> to vector<12x384xf32>
    %cst_91 = arith.constant dense<0.000000e+00> : vector<8x384xf32>
    %98 = tpu.matmul %96, %97, %cst_91 {dimension_numbers = #tpu.dot_dimension_numbers<[1], [0], [0], [1], [0, 0, 1, 1], [], []>, precision = #tpu.contract_precision<fp32>} : vector<8x12xf32>, vector<12x384xf32>, vector<8x384xf32> -> vector<8x384xf32>
    %99 = arith.addf %94, %98 : vector<8x384xf32>
    %c1_92 = arith.constant 1 : index
    %c8_93 = arith.constant 8 : index
    %c0_94 = arith.constant 0 : index
    %c0_95 = arith.constant 0 : index
    %100 = vector.load %arg2[%c1_92, %c8_93, %c0_94, %c0_95] : memref<2x25x8x12xf32, #tpu.memory_space<vmem>>, vector<1x1x8x12xf32>
    %101 = vector.shape_cast %100 : vector<1x1x8x12xf32> to vector<8x12xf32>
    %102 = vector.extract_strided_slice %13 {offsets = [0, 27], sizes = [12, 384], strides = [1, 1]} : vector<12x504xf32> to vector<12x384xf32>
    %cst_96 = arith.constant dense<0.000000e+00> : vector<8x384xf32>
    %103 = tpu.matmul %101, %102, %cst_96 {dimension_numbers = #tpu.dot_dimension_numbers<[1], [0], [0], [1], [0, 0, 1, 1], [], []>, precision = #tpu.contract_precision<fp32>} : vector<8x12xf32>, vector<12x384xf32>, vector<8x384xf32> -> vector<8x384xf32>
    %104 = arith.addf %99, %103 : vector<8x384xf32>
    %c0_97 = arith.constant 0 : index
    %c9 = arith.constant 9 : index
    %c0_98 = arith.constant 0 : index
    %c0_99 = arith.constant 0 : index
    %105 = vector.load %arg2[%c0_97, %c9, %c0_98, %c0_99] : memref<2x25x8x12xf32, #tpu.memory_space<vmem>>, vector<1x1x8x12xf32>
    %106 = vector.shape_cast %105 : vector<1x1x8x12xf32> to vector<8x12xf32>
    %107 = vector.extract_strided_slice %12 {offsets = [0, 28], sizes = [12, 384], strides = [1, 1]} : vector<12x504xf32> to vector<12x384xf32>
    %cst_100 = arith.constant dense<0.000000e+00> : vector<8x384xf32>
    %108 = tpu.matmul %106, %107, %cst_100 {dimension_numbers = #tpu.dot_dimension_numbers<[1], [0], [0], [1], [0, 0, 1, 1], [], []>, precision = #tpu.contract_precision<fp32>} : vector<8x12xf32>, vector<12x384xf32>, vector<8x384xf32> -> vector<8x384xf32>
    %109 = arith.addf %104, %108 : vector<8x384xf32>
    %c1_101 = arith.constant 1 : index
    %c9_102 = arith.constant 9 : index
    %c0_103 = arith.constant 0 : index
    %c0_104 = arith.constant 0 : index
    %110 = vector.load %arg2[%c1_101, %c9_102, %c0_103, %c0_104] : memref<2x25x8x12xf32, #tpu.memory_space<vmem>>, vector<1x1x8x12xf32>
    %111 = vector.shape_cast %110 : vector<1x1x8x12xf32> to vector<8x12xf32>
    %112 = vector.extract_strided_slice %13 {offsets = [0, 28], sizes = [12, 384], strides = [1, 1]} : vector<12x504xf32> to vector<12x384xf32>
    %cst_105 = arith.constant dense<0.000000e+00> : vector<8x384xf32>
    %113 = tpu.matmul %111, %112, %cst_105 {dimension_numbers = #tpu.dot_dimension_numbers<[1], [0], [0], [1], [0, 0, 1, 1], [], []>, precision = #tpu.contract_precision<fp32>} : vector<8x12xf32>, vector<12x384xf32>, vector<8x384xf32> -> vector<8x384xf32>
    %114 = arith.addf %109, %113 : vector<8x384xf32>
    %c0_106 = arith.constant 0 : index
    %c10 = arith.constant 10 : index
    %c0_107 = arith.constant 0 : index
    %c0_108 = arith.constant 0 : index
    %115 = vector.load %arg2[%c0_106, %c10, %c0_107, %c0_108] : memref<2x25x8x12xf32, #tpu.memory_space<vmem>>, vector<1x1x8x12xf32>
    %116 = vector.shape_cast %115 : vector<1x1x8x12xf32> to vector<8x12xf32>
    %117 = vector.extract_strided_slice %12 {offsets = [0, 48], sizes = [12, 384], strides = [1, 1]} : vector<12x504xf32> to vector<12x384xf32>
    %cst_109 = arith.constant dense<0.000000e+00> : vector<8x384xf32>
    %118 = tpu.matmul %116, %117, %cst_109 {dimension_numbers = #tpu.dot_dimension_numbers<[1], [0], [0], [1], [0, 0, 1, 1], [], []>, precision = #tpu.contract_precision<fp32>} : vector<8x12xf32>, vector<12x384xf32>, vector<8x384xf32> -> vector<8x384xf32>
    %119 = arith.addf %114, %118 : vector<8x384xf32>
    %c1_110 = arith.constant 1 : index
    %c10_111 = arith.constant 10 : index
    %c0_112 = arith.constant 0 : index
    %c0_113 = arith.constant 0 : index
    %120 = vector.load %arg2[%c1_110, %c10_111, %c0_112, %c0_113] : memref<2x25x8x12xf32, #tpu.memory_space<vmem>>, vector<1x1x8x12xf32>
    %121 = vector.shape_cast %120 : vector<1x1x8x12xf32> to vector<8x12xf32>
    %122 = vector.extract_strided_slice %13 {offsets = [0, 48], sizes = [12, 384], strides = [1, 1]} : vector<12x504xf32> to vector<12x384xf32>
    %cst_114 = arith.constant dense<0.000000e+00> : vector<8x384xf32>
    %123 = tpu.matmul %121, %122, %cst_114 {dimension_numbers = #tpu.dot_dimension_numbers<[1], [0], [0], [1], [0, 0, 1, 1], [], []>, precision = #tpu.contract_precision<fp32>} : vector<8x12xf32>, vector<12x384xf32>, vector<8x384xf32> -> vector<8x384xf32>
    %124 = arith.addf %119, %123 : vector<8x384xf32>
    %c0_115 = arith.constant 0 : index
    %c11 = arith.constant 11 : index
    %c0_116 = arith.constant 0 : index
    %c0_117 = arith.constant 0 : index
    %125 = vector.load %arg2[%c0_115, %c11, %c0_116, %c0_117] : memref<2x25x8x12xf32, #tpu.memory_space<vmem>>, vector<1x1x8x12xf32>
    %126 = vector.shape_cast %125 : vector<1x1x8x12xf32> to vector<8x12xf32>
    %127 = vector.extract_strided_slice %12 {offsets = [0, 49], sizes = [12, 384], strides = [1, 1]} : vector<12x504xf32> to vector<12x384xf32>
    %cst_118 = arith.constant dense<0.000000e+00> : vector<8x384xf32>
    %128 = tpu.matmul %126, %127, %cst_118 {dimension_numbers = #tpu.dot_dimension_numbers<[1], [0], [0], [1], [0, 0, 1, 1], [], []>, precision = #tpu.contract_precision<fp32>} : vector<8x12xf32>, vector<12x384xf32>, vector<8x384xf32> -> vector<8x384xf32>
    %129 = arith.addf %124, %128 : vector<8x384xf32>
    %c1_119 = arith.constant 1 : index
    %c11_120 = arith.constant 11 : index
    %c0_121 = arith.constant 0 : index
    %c0_122 = arith.constant 0 : index
    %130 = vector.load %arg2[%c1_119, %c11_120, %c0_121, %c0_122] : memref<2x25x8x12xf32, #tpu.memory_space<vmem>>, vector<1x1x8x12xf32>
    %131 = vector.shape_cast %130 : vector<1x1x8x12xf32> to vector<8x12xf32>
    %132 = vector.extract_strided_slice %13 {offsets = [0, 49], sizes = [12, 384], strides = [1, 1]} : vector<12x504xf32> to vector<12x384xf32>
    %cst_123 = arith.constant dense<0.000000e+00> : vector<8x384xf32>
    %133 = tpu.matmul %131, %132, %cst_123 {dimension_numbers = #tpu.dot_dimension_numbers<[1], [0], [0], [1], [0, 0, 1, 1], [], []>, precision = #tpu.contract_precision<fp32>} : vector<8x12xf32>, vector<12x384xf32>, vector<8x384xf32> -> vector<8x384xf32>
    %134 = arith.addf %129, %133 : vector<8x384xf32>
    %c0_124 = arith.constant 0 : index
    %c12 = arith.constant 12 : index
    %c0_125 = arith.constant 0 : index
    %c0_126 = arith.constant 0 : index
    %135 = vector.load %arg2[%c0_124, %c12, %c0_125, %c0_126] : memref<2x25x8x12xf32, #tpu.memory_space<vmem>>, vector<1x1x8x12xf32>
    %136 = vector.shape_cast %135 : vector<1x1x8x12xf32> to vector<8x12xf32>
    %137 = vector.extract_strided_slice %12 {offsets = [0, 50], sizes = [12, 384], strides = [1, 1]} : vector<12x504xf32> to vector<12x384xf32>
    %cst_127 = arith.constant dense<0.000000e+00> : vector<8x384xf32>
    %138 = tpu.matmul %136, %137, %cst_127 {dimension_numbers = #tpu.dot_dimension_numbers<[1], [0], [0], [1], [0, 0, 1, 1], [], []>, precision = #tpu.contract_precision<fp32>} : vector<8x12xf32>, vector<12x384xf32>, vector<8x384xf32> -> vector<8x384xf32>
    %139 = arith.addf %134, %138 : vector<8x384xf32>
    %c1_128 = arith.constant 1 : index
    %c12_129 = arith.constant 12 : index
    %c0_130 = arith.constant 0 : index
    %c0_131 = arith.constant 0 : index
    %140 = vector.load %arg2[%c1_128, %c12_129, %c0_130, %c0_131] : memref<2x25x8x12xf32, #tpu.memory_space<vmem>>, vector<1x1x8x12xf32>
    %141 = vector.shape_cast %140 : vector<1x1x8x12xf32> to vector<8x12xf32>
    %142 = vector.extract_strided_slice %13 {offsets = [0, 50], sizes = [12, 384], strides = [1, 1]} : vector<12x504xf32> to vector<12x384xf32>
    %cst_132 = arith.constant dense<0.000000e+00> : vector<8x384xf32>
    %143 = tpu.matmul %141, %142, %cst_132 {dimension_numbers = #tpu.dot_dimension_numbers<[1], [0], [0], [1], [0, 0, 1, 1], [], []>, precision = #tpu.contract_precision<fp32>} : vector<8x12xf32>, vector<12x384xf32>, vector<8x384xf32> -> vector<8x384xf32>
    %144 = arith.addf %139, %143 : vector<8x384xf32>
    %c0_133 = arith.constant 0 : index
    %c13 = arith.constant 13 : index
    %c0_134 = arith.constant 0 : index
    %c0_135 = arith.constant 0 : index
    %145 = vector.load %arg2[%c0_133, %c13, %c0_134, %c0_135] : memref<2x25x8x12xf32, #tpu.memory_space<vmem>>, vector<1x1x8x12xf32>
    %146 = vector.shape_cast %145 : vector<1x1x8x12xf32> to vector<8x12xf32>
    %147 = vector.extract_strided_slice %12 {offsets = [0, 51], sizes = [12, 384], strides = [1, 1]} : vector<12x504xf32> to vector<12x384xf32>
    %cst_136 = arith.constant dense<0.000000e+00> : vector<8x384xf32>
    %148 = tpu.matmul %146, %147, %cst_136 {dimension_numbers = #tpu.dot_dimension_numbers<[1], [0], [0], [1], [0, 0, 1, 1], [], []>, precision = #tpu.contract_precision<fp32>} : vector<8x12xf32>, vector<12x384xf32>, vector<8x384xf32> -> vector<8x384xf32>
    %149 = arith.addf %144, %148 : vector<8x384xf32>
    %c1_137 = arith.constant 1 : index
    %c13_138 = arith.constant 13 : index
    %c0_139 = arith.constant 0 : index
    %c0_140 = arith.constant 0 : index
    %150 = vector.load %arg2[%c1_137, %c13_138, %c0_139, %c0_140] : memref<2x25x8x12xf32, #tpu.memory_space<vmem>>, vector<1x1x8x12xf32>
    %151 = vector.shape_cast %150 : vector<1x1x8x12xf32> to vector<8x12xf32>
    %152 = vector.extract_strided_slice %13 {offsets = [0, 51], sizes = [12, 384], strides = [1, 1]} : vector<12x504xf32> to vector<12x384xf32>
    %cst_141 = arith.constant dense<0.000000e+00> : vector<8x384xf32>
    %153 = tpu.matmul %151, %152, %cst_141 {dimension_numbers = #tpu.dot_dimension_numbers<[1], [0], [0], [1], [0, 0, 1, 1], [], []>, precision = #tpu.contract_precision<fp32>} : vector<8x12xf32>, vector<12x384xf32>, vector<8x384xf32> -> vector<8x384xf32>
    %154 = arith.addf %149, %153 : vector<8x384xf32>
    %c0_142 = arith.constant 0 : index
    %c14 = arith.constant 14 : index
    %c0_143 = arith.constant 0 : index
    %c0_144 = arith.constant 0 : index
    %155 = vector.load %arg2[%c0_142, %c14, %c0_143, %c0_144] : memref<2x25x8x12xf32, #tpu.memory_space<vmem>>, vector<1x1x8x12xf32>
    %156 = vector.shape_cast %155 : vector<1x1x8x12xf32> to vector<8x12xf32>
    %157 = vector.extract_strided_slice %12 {offsets = [0, 52], sizes = [12, 384], strides = [1, 1]} : vector<12x504xf32> to vector<12x384xf32>
    %cst_145 = arith.constant dense<0.000000e+00> : vector<8x384xf32>
    %158 = tpu.matmul %156, %157, %cst_145 {dimension_numbers = #tpu.dot_dimension_numbers<[1], [0], [0], [1], [0, 0, 1, 1], [], []>, precision = #tpu.contract_precision<fp32>} : vector<8x12xf32>, vector<12x384xf32>, vector<8x384xf32> -> vector<8x384xf32>
    %159 = arith.addf %154, %158 : vector<8x384xf32>
    %c1_146 = arith.constant 1 : index
    %c14_147 = arith.constant 14 : index
    %c0_148 = arith.constant 0 : index
    %c0_149 = arith.constant 0 : index
    %160 = vector.load %arg2[%c1_146, %c14_147, %c0_148, %c0_149] : memref<2x25x8x12xf32, #tpu.memory_space<vmem>>, vector<1x1x8x12xf32>
    %161 = vector.shape_cast %160 : vector<1x1x8x12xf32> to vector<8x12xf32>
    %162 = vector.extract_strided_slice %13 {offsets = [0, 52], sizes = [12, 384], strides = [1, 1]} : vector<12x504xf32> to vector<12x384xf32>
    %cst_150 = arith.constant dense<0.000000e+00> : vector<8x384xf32>
    %163 = tpu.matmul %161, %162, %cst_150 {dimension_numbers = #tpu.dot_dimension_numbers<[1], [0], [0], [1], [0, 0, 1, 1], [], []>, precision = #tpu.contract_precision<fp32>} : vector<8x12xf32>, vector<12x384xf32>, vector<8x384xf32> -> vector<8x384xf32>
    %164 = arith.addf %159, %163 : vector<8x384xf32>
    %c0_151 = arith.constant 0 : index
    %c15 = arith.constant 15 : index
    %c0_152 = arith.constant 0 : index
    %c0_153 = arith.constant 0 : index
    %165 = vector.load %arg2[%c0_151, %c15, %c0_152, %c0_153] : memref<2x25x8x12xf32, #tpu.memory_space<vmem>>, vector<1x1x8x12xf32>
    %166 = vector.shape_cast %165 : vector<1x1x8x12xf32> to vector<8x12xf32>
    %167 = vector.extract_strided_slice %12 {offsets = [0, 72], sizes = [12, 384], strides = [1, 1]} : vector<12x504xf32> to vector<12x384xf32>
    %cst_154 = arith.constant dense<0.000000e+00> : vector<8x384xf32>
    %168 = tpu.matmul %166, %167, %cst_154 {dimension_numbers = #tpu.dot_dimension_numbers<[1], [0], [0], [1], [0, 0, 1, 1], [], []>, precision = #tpu.contract_precision<fp32>} : vector<8x12xf32>, vector<12x384xf32>, vector<8x384xf32> -> vector<8x384xf32>
    %169 = arith.addf %164, %168 : vector<8x384xf32>
    %c1_155 = arith.constant 1 : index
    %c15_156 = arith.constant 15 : index
    %c0_157 = arith.constant 0 : index
    %c0_158 = arith.constant 0 : index
    %170 = vector.load %arg2[%c1_155, %c15_156, %c0_157, %c0_158] : memref<2x25x8x12xf32, #tpu.memory_space<vmem>>, vector<1x1x8x12xf32>
    %171 = vector.shape_cast %170 : vector<1x1x8x12xf32> to vector<8x12xf32>
    %172 = vector.extract_strided_slice %13 {offsets = [0, 72], sizes = [12, 384], strides = [1, 1]} : vector<12x504xf32> to vector<12x384xf32>
    %cst_159 = arith.constant dense<0.000000e+00> : vector<8x384xf32>
    %173 = tpu.matmul %171, %172, %cst_159 {dimension_numbers = #tpu.dot_dimension_numbers<[1], [0], [0], [1], [0, 0, 1, 1], [], []>, precision = #tpu.contract_precision<fp32>} : vector<8x12xf32>, vector<12x384xf32>, vector<8x384xf32> -> vector<8x384xf32>
    %174 = arith.addf %169, %173 : vector<8x384xf32>
    %c0_160 = arith.constant 0 : index
    %c16 = arith.constant 16 : index
    %c0_161 = arith.constant 0 : index
    %c0_162 = arith.constant 0 : index
    %175 = vector.load %arg2[%c0_160, %c16, %c0_161, %c0_162] : memref<2x25x8x12xf32, #tpu.memory_space<vmem>>, vector<1x1x8x12xf32>
    %176 = vector.shape_cast %175 : vector<1x1x8x12xf32> to vector<8x12xf32>
    %177 = vector.extract_strided_slice %12 {offsets = [0, 73], sizes = [12, 384], strides = [1, 1]} : vector<12x504xf32> to vector<12x384xf32>
    %cst_163 = arith.constant dense<0.000000e+00> : vector<8x384xf32>
    %178 = tpu.matmul %176, %177, %cst_163 {dimension_numbers = #tpu.dot_dimension_numbers<[1], [0], [0], [1], [0, 0, 1, 1], [], []>, precision = #tpu.contract_precision<fp32>} : vector<8x12xf32>, vector<12x384xf32>, vector<8x384xf32> -> vector<8x384xf32>
    %179 = arith.addf %174, %178 : vector<8x384xf32>
    %c1_164 = arith.constant 1 : index
    %c16_165 = arith.constant 16 : index
    %c0_166 = arith.constant 0 : index
    %c0_167 = arith.constant 0 : index
    %180 = vector.load %arg2[%c1_164, %c16_165, %c0_166, %c0_167] : memref<2x25x8x12xf32, #tpu.memory_space<vmem>>, vector<1x1x8x12xf32>
    %181 = vector.shape_cast %180 : vector<1x1x8x12xf32> to vector<8x12xf32>
    %182 = vector.extract_strided_slice %13 {offsets = [0, 73], sizes = [12, 384], strides = [1, 1]} : vector<12x504xf32> to vector<12x384xf32>
    %cst_168 = arith.constant dense<0.000000e+00> : vector<8x384xf32>
    %183 = tpu.matmul %181, %182, %cst_168 {dimension_numbers = #tpu.dot_dimension_numbers<[1], [0], [0], [1], [0, 0, 1, 1], [], []>, precision = #tpu.contract_precision<fp32>} : vector<8x12xf32>, vector<12x384xf32>, vector<8x384xf32> -> vector<8x384xf32>
    %184 = arith.addf %179, %183 : vector<8x384xf32>
    %c0_169 = arith.constant 0 : index
    %c17 = arith.constant 17 : index
    %c0_170 = arith.constant 0 : index
    %c0_171 = arith.constant 0 : index
    %185 = vector.load %arg2[%c0_169, %c17, %c0_170, %c0_171] : memref<2x25x8x12xf32, #tpu.memory_space<vmem>>, vector<1x1x8x12xf32>
    %186 = vector.shape_cast %185 : vector<1x1x8x12xf32> to vector<8x12xf32>
    %187 = vector.extract_strided_slice %12 {offsets = [0, 74], sizes = [12, 384], strides = [1, 1]} : vector<12x504xf32> to vector<12x384xf32>
    %cst_172 = arith.constant dense<0.000000e+00> : vector<8x384xf32>
    %188 = tpu.matmul %186, %187, %cst_172 {dimension_numbers = #tpu.dot_dimension_numbers<[1], [0], [0], [1], [0, 0, 1, 1], [], []>, precision = #tpu.contract_precision<fp32>} : vector<8x12xf32>, vector<12x384xf32>, vector<8x384xf32> -> vector<8x384xf32>
    %189 = arith.addf %184, %188 : vector<8x384xf32>
    %c1_173 = arith.constant 1 : index
    %c17_174 = arith.constant 17 : index
    %c0_175 = arith.constant 0 : index
    %c0_176 = arith.constant 0 : index
    %190 = vector.load %arg2[%c1_173, %c17_174, %c0_175, %c0_176] : memref<2x25x8x12xf32, #tpu.memory_space<vmem>>, vector<1x1x8x12xf32>
    %191 = vector.shape_cast %190 : vector<1x1x8x12xf32> to vector<8x12xf32>
    %192 = vector.extract_strided_slice %13 {offsets = [0, 74], sizes = [12, 384], strides = [1, 1]} : vector<12x504xf32> to vector<12x384xf32>
    %cst_177 = arith.constant dense<0.000000e+00> : vector<8x384xf32>
    %193 = tpu.matmul %191, %192, %cst_177 {dimension_numbers = #tpu.dot_dimension_numbers<[1], [0], [0], [1], [0, 0, 1, 1], [], []>, precision = #tpu.contract_precision<fp32>} : vector<8x12xf32>, vector<12x384xf32>, vector<8x384xf32> -> vector<8x384xf32>
    %194 = arith.addf %189, %193 : vector<8x384xf32>
    %c0_178 = arith.constant 0 : index
    %c18 = arith.constant 18 : index
    %c0_179 = arith.constant 0 : index
    %c0_180 = arith.constant 0 : index
    %195 = vector.load %arg2[%c0_178, %c18, %c0_179, %c0_180] : memref<2x25x8x12xf32, #tpu.memory_space<vmem>>, vector<1x1x8x12xf32>
    %196 = vector.shape_cast %195 : vector<1x1x8x12xf32> to vector<8x12xf32>
    %197 = vector.extract_strided_slice %12 {offsets = [0, 75], sizes = [12, 384], strides = [1, 1]} : vector<12x504xf32> to vector<12x384xf32>
    %cst_181 = arith.constant dense<0.000000e+00> : vector<8x384xf32>
    %198 = tpu.matmul %196, %197, %cst_181 {dimension_numbers = #tpu.dot_dimension_numbers<[1], [0], [0], [1], [0, 0, 1, 1], [], []>, precision = #tpu.contract_precision<fp32>} : vector<8x12xf32>, vector<12x384xf32>, vector<8x384xf32> -> vector<8x384xf32>
    %199 = arith.addf %194, %198 : vector<8x384xf32>
    %c1_182 = arith.constant 1 : index
    %c18_183 = arith.constant 18 : index
    %c0_184 = arith.constant 0 : index
    %c0_185 = arith.constant 0 : index
    %200 = vector.load %arg2[%c1_182, %c18_183, %c0_184, %c0_185] : memref<2x25x8x12xf32, #tpu.memory_space<vmem>>, vector<1x1x8x12xf32>
    %201 = vector.shape_cast %200 : vector<1x1x8x12xf32> to vector<8x12xf32>
    %202 = vector.extract_strided_slice %13 {offsets = [0, 75], sizes = [12, 384], strides = [1, 1]} : vector<12x504xf32> to vector<12x384xf32>
    %cst_186 = arith.constant dense<0.000000e+00> : vector<8x384xf32>
    %203 = tpu.matmul %201, %202, %cst_186 {dimension_numbers = #tpu.dot_dimension_numbers<[1], [0], [0], [1], [0, 0, 1, 1], [], []>, precision = #tpu.contract_precision<fp32>} : vector<8x12xf32>, vector<12x384xf32>, vector<8x384xf32> -> vector<8x384xf32>
    %204 = arith.addf %199, %203 : vector<8x384xf32>
    %c0_187 = arith.constant 0 : index
    %c19 = arith.constant 19 : index
    %c0_188 = arith.constant 0 : index
    %c0_189 = arith.constant 0 : index
    %205 = vector.load %arg2[%c0_187, %c19, %c0_188, %c0_189] : memref<2x25x8x12xf32, #tpu.memory_space<vmem>>, vector<1x1x8x12xf32>
    %206 = vector.shape_cast %205 : vector<1x1x8x12xf32> to vector<8x12xf32>
    %207 = vector.extract_strided_slice %12 {offsets = [0, 76], sizes = [12, 384], strides = [1, 1]} : vector<12x504xf32> to vector<12x384xf32>
    %cst_190 = arith.constant dense<0.000000e+00> : vector<8x384xf32>
    %208 = tpu.matmul %206, %207, %cst_190 {dimension_numbers = #tpu.dot_dimension_numbers<[1], [0], [0], [1], [0, 0, 1, 1], [], []>, precision = #tpu.contract_precision<fp32>} : vector<8x12xf32>, vector<12x384xf32>, vector<8x384xf32> -> vector<8x384xf32>
    %209 = arith.addf %204, %208 : vector<8x384xf32>
    %c1_191 = arith.constant 1 : index
    %c19_192 = arith.constant 19 : index
    %c0_193 = arith.constant 0 : index
    %c0_194 = arith.constant 0 : index
    %210 = vector.load %arg2[%c1_191, %c19_192, %c0_193, %c0_194] : memref<2x25x8x12xf32, #tpu.memory_space<vmem>>, vector<1x1x8x12xf32>
    %211 = vector.shape_cast %210 : vector<1x1x8x12xf32> to vector<8x12xf32>
    %212 = vector.extract_strided_slice %13 {offsets = [0, 76], sizes = [12, 384], strides = [1, 1]} : vector<12x504xf32> to vector<12x384xf32>
    %cst_195 = arith.constant dense<0.000000e+00> : vector<8x384xf32>
    %213 = tpu.matmul %211, %212, %cst_195 {dimension_numbers = #tpu.dot_dimension_numbers<[1], [0], [0], [1], [0, 0, 1, 1], [], []>, precision = #tpu.contract_precision<fp32>} : vector<8x12xf32>, vector<12x384xf32>, vector<8x384xf32> -> vector<8x384xf32>
    %214 = arith.addf %209, %213 : vector<8x384xf32>
    %c0_196 = arith.constant 0 : index
    %c20 = arith.constant 20 : index
    %c0_197 = arith.constant 0 : index
    %c0_198 = arith.constant 0 : index
    %215 = vector.load %arg2[%c0_196, %c20, %c0_197, %c0_198] : memref<2x25x8x12xf32, #tpu.memory_space<vmem>>, vector<1x1x8x12xf32>
    %216 = vector.shape_cast %215 : vector<1x1x8x12xf32> to vector<8x12xf32>
    %217 = vector.extract_strided_slice %12 {offsets = [0, 96], sizes = [12, 384], strides = [1, 1]} : vector<12x504xf32> to vector<12x384xf32>
    %cst_199 = arith.constant dense<0.000000e+00> : vector<8x384xf32>
    %218 = tpu.matmul %216, %217, %cst_199 {dimension_numbers = #tpu.dot_dimension_numbers<[1], [0], [0], [1], [0, 0, 1, 1], [], []>, precision = #tpu.contract_precision<fp32>} : vector<8x12xf32>, vector<12x384xf32>, vector<8x384xf32> -> vector<8x384xf32>
    %219 = arith.addf %214, %218 : vector<8x384xf32>
    %c1_200 = arith.constant 1 : index
    %c20_201 = arith.constant 20 : index
    %c0_202 = arith.constant 0 : index
    %c0_203 = arith.constant 0 : index
    %220 = vector.load %arg2[%c1_200, %c20_201, %c0_202, %c0_203] : memref<2x25x8x12xf32, #tpu.memory_space<vmem>>, vector<1x1x8x12xf32>
    %221 = vector.shape_cast %220 : vector<1x1x8x12xf32> to vector<8x12xf32>
    %222 = vector.extract_strided_slice %13 {offsets = [0, 96], sizes = [12, 384], strides = [1, 1]} : vector<12x504xf32> to vector<12x384xf32>
    %cst_204 = arith.constant dense<0.000000e+00> : vector<8x384xf32>
    %223 = tpu.matmul %221, %222, %cst_204 {dimension_numbers = #tpu.dot_dimension_numbers<[1], [0], [0], [1], [0, 0, 1, 1], [], []>, precision = #tpu.contract_precision<fp32>} : vector<8x12xf32>, vector<12x384xf32>, vector<8x384xf32> -> vector<8x384xf32>
    %224 = arith.addf %219, %223 : vector<8x384xf32>
    %c0_205 = arith.constant 0 : index
    %c21 = arith.constant 21 : index
    %c0_206 = arith.constant 0 : index
    %c0_207 = arith.constant 0 : index
    %225 = vector.load %arg2[%c0_205, %c21, %c0_206, %c0_207] : memref<2x25x8x12xf32, #tpu.memory_space<vmem>>, vector<1x1x8x12xf32>
    %226 = vector.shape_cast %225 : vector<1x1x8x12xf32> to vector<8x12xf32>
    %227 = vector.extract_strided_slice %12 {offsets = [0, 97], sizes = [12, 384], strides = [1, 1]} : vector<12x504xf32> to vector<12x384xf32>
    %cst_208 = arith.constant dense<0.000000e+00> : vector<8x384xf32>
    %228 = tpu.matmul %226, %227, %cst_208 {dimension_numbers = #tpu.dot_dimension_numbers<[1], [0], [0], [1], [0, 0, 1, 1], [], []>, precision = #tpu.contract_precision<fp32>} : vector<8x12xf32>, vector<12x384xf32>, vector<8x384xf32> -> vector<8x384xf32>
    %229 = arith.addf %224, %228 : vector<8x384xf32>
    %c1_209 = arith.constant 1 : index
    %c21_210 = arith.constant 21 : index
    %c0_211 = arith.constant 0 : index
    %c0_212 = arith.constant 0 : index
    %230 = vector.load %arg2[%c1_209, %c21_210, %c0_211, %c0_212] : memref<2x25x8x12xf32, #tpu.memory_space<vmem>>, vector<1x1x8x12xf32>
    %231 = vector.shape_cast %230 : vector<1x1x8x12xf32> to vector<8x12xf32>
    %232 = vector.extract_strided_slice %13 {offsets = [0, 97], sizes = [12, 384], strides = [1, 1]} : vector<12x504xf32> to vector<12x384xf32>
    %cst_213 = arith.constant dense<0.000000e+00> : vector<8x384xf32>
    %233 = tpu.matmul %231, %232, %cst_213 {dimension_numbers = #tpu.dot_dimension_numbers<[1], [0], [0], [1], [0, 0, 1, 1], [], []>, precision = #tpu.contract_precision<fp32>} : vector<8x12xf32>, vector<12x384xf32>, vector<8x384xf32> -> vector<8x384xf32>
    %234 = arith.addf %229, %233 : vector<8x384xf32>
    %c0_214 = arith.constant 0 : index
    %c22 = arith.constant 22 : index
    %c0_215 = arith.constant 0 : index
    %c0_216 = arith.constant 0 : index
    %235 = vector.load %arg2[%c0_214, %c22, %c0_215, %c0_216] : memref<2x25x8x12xf32, #tpu.memory_space<vmem>>, vector<1x1x8x12xf32>
    %236 = vector.shape_cast %235 : vector<1x1x8x12xf32> to vector<8x12xf32>
    %237 = vector.extract_strided_slice %12 {offsets = [0, 98], sizes = [12, 384], strides = [1, 1]} : vector<12x504xf32> to vector<12x384xf32>
    %cst_217 = arith.constant dense<0.000000e+00> : vector<8x384xf32>
    %238 = tpu.matmul %236, %237, %cst_217 {dimension_numbers = #tpu.dot_dimension_numbers<[1], [0], [0], [1], [0, 0, 1, 1], [], []>, precision = #tpu.contract_precision<fp32>} : vector<8x12xf32>, vector<12x384xf32>, vector<8x384xf32> -> vector<8x384xf32>
    %239 = arith.addf %234, %238 : vector<8x384xf32>
    %c1_218 = arith.constant 1 : index
    %c22_219 = arith.constant 22 : index
    %c0_220 = arith.constant 0 : index
    %c0_221 = arith.constant 0 : index
    %240 = vector.load %arg2[%c1_218, %c22_219, %c0_220, %c0_221] : memref<2x25x8x12xf32, #tpu.memory_space<vmem>>, vector<1x1x8x12xf32>
    %241 = vector.shape_cast %240 : vector<1x1x8x12xf32> to vector<8x12xf32>
    %242 = vector.extract_strided_slice %13 {offsets = [0, 98], sizes = [12, 384], strides = [1, 1]} : vector<12x504xf32> to vector<12x384xf32>
    %cst_222 = arith.constant dense<0.000000e+00> : vector<8x384xf32>
    %243 = tpu.matmul %241, %242, %cst_222 {dimension_numbers = #tpu.dot_dimension_numbers<[1], [0], [0], [1], [0, 0, 1, 1], [], []>, precision = #tpu.contract_precision<fp32>} : vector<8x12xf32>, vector<12x384xf32>, vector<8x384xf32> -> vector<8x384xf32>
    %244 = arith.addf %239, %243 : vector<8x384xf32>
    %c0_223 = arith.constant 0 : index
    %c23 = arith.constant 23 : index
    %c0_224 = arith.constant 0 : index
    %c0_225 = arith.constant 0 : index
    %245 = vector.load %arg2[%c0_223, %c23, %c0_224, %c0_225] : memref<2x25x8x12xf32, #tpu.memory_space<vmem>>, vector<1x1x8x12xf32>
    %246 = vector.shape_cast %245 : vector<1x1x8x12xf32> to vector<8x12xf32>
    %247 = vector.extract_strided_slice %12 {offsets = [0, 99], sizes = [12, 384], strides = [1, 1]} : vector<12x504xf32> to vector<12x384xf32>
    %cst_226 = arith.constant dense<0.000000e+00> : vector<8x384xf32>
    %248 = tpu.matmul %246, %247, %cst_226 {dimension_numbers = #tpu.dot_dimension_numbers<[1], [0], [0], [1], [0, 0, 1, 1], [], []>, precision = #tpu.contract_precision<fp32>} : vector<8x12xf32>, vector<12x384xf32>, vector<8x384xf32> -> vector<8x384xf32>
    %249 = arith.addf %244, %248 : vector<8x384xf32>
    %c1_227 = arith.constant 1 : index
    %c23_228 = arith.constant 23 : index
    %c0_229 = arith.constant 0 : index
    %c0_230 = arith.constant 0 : index
    %250 = vector.load %arg2[%c1_227, %c23_228, %c0_229, %c0_230] : memref<2x25x8x12xf32, #tpu.memory_space<vmem>>, vector<1x1x8x12xf32>
    %251 = vector.shape_cast %250 : vector<1x1x8x12xf32> to vector<8x12xf32>
    %252 = vector.extract_strided_slice %13 {offsets = [0, 99], sizes = [12, 384], strides = [1, 1]} : vector<12x504xf32> to vector<12x384xf32>
    %cst_231 = arith.constant dense<0.000000e+00> : vector<8x384xf32>
    %253 = tpu.matmul %251, %252, %cst_231 {dimension_numbers = #tpu.dot_dimension_numbers<[1], [0], [0], [1], [0, 0, 1, 1], [], []>, precision = #tpu.contract_precision<fp32>} : vector<8x12xf32>, vector<12x384xf32>, vector<8x384xf32> -> vector<8x384xf32>
    %254 = arith.addf %249, %253 : vector<8x384xf32>
    %c0_232 = arith.constant 0 : index
    %c24 = arith.constant 24 : index
    %c0_233 = arith.constant 0 : index
    %c0_234 = arith.constant 0 : index
    %255 = vector.load %arg2[%c0_232, %c24, %c0_233, %c0_234] : memref<2x25x8x12xf32, #tpu.memory_space<vmem>>, vector<1x1x8x12xf32>
    %256 = vector.shape_cast %255 : vector<1x1x8x12xf32> to vector<8x12xf32>
    %257 = vector.extract_strided_slice %12 {offsets = [0, 100], sizes = [12, 384], strides = [1, 1]} : vector<12x504xf32> to vector<12x384xf32>
    %cst_235 = arith.constant dense<0.000000e+00> : vector<8x384xf32>
    %258 = tpu.matmul %256, %257, %cst_235 {dimension_numbers = #tpu.dot_dimension_numbers<[1], [0], [0], [1], [0, 0, 1, 1], [], []>, precision = #tpu.contract_precision<fp32>} : vector<8x12xf32>, vector<12x384xf32>, vector<8x384xf32> -> vector<8x384xf32>
    %259 = arith.addf %254, %258 : vector<8x384xf32>
    %c1_236 = arith.constant 1 : index
    %c24_237 = arith.constant 24 : index
    %c0_238 = arith.constant 0 : index
    %c0_239 = arith.constant 0 : index
    %260 = vector.load %arg2[%c1_236, %c24_237, %c0_238, %c0_239] : memref<2x25x8x12xf32, #tpu.memory_space<vmem>>, vector<1x1x8x12xf32>
    %261 = vector.shape_cast %260 : vector<1x1x8x12xf32> to vector<8x12xf32>
    %262 = vector.extract_strided_slice %13 {offsets = [0, 100], sizes = [12, 384], strides = [1, 1]} : vector<12x504xf32> to vector<12x384xf32>
    %cst_240 = arith.constant dense<0.000000e+00> : vector<8x384xf32>
    %263 = tpu.matmul %261, %262, %cst_240 {dimension_numbers = #tpu.dot_dimension_numbers<[1], [0], [0], [1], [0, 0, 1, 1], [], []>, precision = #tpu.contract_precision<fp32>} : vector<8x12xf32>, vector<12x384xf32>, vector<8x384xf32> -> vector<8x384xf32>
    %264 = arith.addf %259, %263 : vector<8x384xf32>
    %cst_241 = arith.constant 0.000000e+00 : f32
    %265 = vector.broadcast %cst_241 : f32 to vector<8x384xf32>
    %266 = arith.subf %265, %264 : vector<8x384xf32>
    %267 = math.exp %266 : vector<8x384xf32>
    %cst_242 = arith.constant 1.000000e+00 : f32
    %268 = vector.broadcast %cst_242 : f32 to vector<8x384xf32>
    %269 = arith.addf %268, %267 : vector<8x384xf32>
    %cst_243 = arith.constant 1.000000e+00 : f32
    %270 = vector.broadcast %cst_243 : f32 to vector<8x384xf32>
    %271 = arith.divf %270, %269 : vector<8x384xf32>
    %c0_244 = arith.constant 0 : index
    %c0_245 = arith.constant 0 : index
    %c0_246 = arith.constant 0 : index
    %272 = vector.load %arg3[%c0_244, %c0_245, %c0_246] : memref<1x8x384xf32, #tpu.memory_space<vmem>>, vector<1x8x384xf32>
    %273 = vector.shape_cast %272 : vector<1x8x384xf32> to vector<8x384xf32>
    %274 = vector.shape_cast %271 : vector<8x384xf32> to vector<1x8x384xf32>
    tpu.vector_store %arg3[%c0_244, %c0_245, %c0_246], %274 {strides = array<i32>} : memref<1x8x384xf32, #tpu.memory_space<vmem>>, vector<1x8x384xf32>,
    return
  }
  func.func @transform_0(%arg0: i32) -> (i32, i32, i32, i32) {
    %c0_i32 = arith.constant 0 : i32
    %c0_i32_0 = arith.constant 0 : i32
    %c0_i32_1 = arith.constant 0 : i32
    %c0_i32_2 = arith.constant 0 : i32
    return %arg0, %c0_i32, %c0_i32_0, %c0_i32_1 : i32, i32, i32, i32
  }
  func.func @transform_1(%arg0: i32) -> (i32, i32, i32, i32) {
    %c0_i32 = arith.constant 0 : i32
    %c0_i32_0 = arith.constant 0 : i32
    %c0_i32_1 = arith.constant 0 : i32
    %c0_i32_2 = arith.constant 0 : i32
    %c0_i32_3 = arith.constant 0 : i32
    return %c0_i32, %c0_i32_0, %c0_i32_1, %c0_i32_2 : i32, i32, i32, i32
  }
  func.func @transform_2(%arg0: i32) -> (i32, i32, i32) {
    %c0_i32 = arith.constant 0 : i32
    %c0_i32_0 = arith.constant 0 : i32
    %c0_i32_1 = arith.constant 0 : i32
    return %arg0, %c0_i32, %c0_i32_0 : i32, i32, i32
  }
}

</mosaic_0001>

<bundles_post_ra>
// kernel: spatial_attention3d.1
= control target key start
LH: loop header
LB: loop body
LE: loop exit
PB: predicated region body
PF: predicated region fallthrough
CT: control target
= control target key end

     0   :  { %s56216_s9 = smov 0   ;;  %s63391_s0 = inlined_call_operand.vmem [shape: f32[2,4,12,504], index: 0, kind: input, shape index: {}]   ;;  %s63392_s1 = inlined_call_operand.vmem [shape: f32[2,25,8,12], index: 1, kind: input, shape index: {}]   ;;  %s63393_s2 = inlined_call_operand.vmem [shape: f32[2,8,384], index: 2, kind: output, shape index: {}]  }
   0x1 LB: > { %s49738_s10 = sadd.s32 4294967295, %s56172_s9   ;;  %p49742_p0 = scmp.ge.s32.totalorder %s56172_s9, 1  ;;  %s56172_s9 = sphi %s56216_s9, %s12_s9  }
   0x2   : > { %p112_p1 = scmp.lt.s32.totalorder %s56172_s9, 3 }
   0x4   : > { %p113_p2 = pnand %p49742_p0, %p112_p1 }
   0x5   : > { %p134_p3 = scmp.lt.s32.totalorder (!%p113_p2), %s49738_s10, 1  ;;  %v49770_v0 = vld [vmem:[%s63392_s1 + $0xc8] sm:$0xff] (!%p113_p2)  ;;  %vm230_vm0 = vcmask (!%p113_p2), 97280   ;;  %v56174_v1 = vmov (!%p113_p2), 0.0   ;;  %v56175_v4 = vmov (!%p113_p2), 0.0|0.0   ;;  %vm56176_vm1 = vmmov (!%p113_p2), 0  }
   0x6   : > { %116 = sbr.rel (%p113_p2) target bundleno = 2700 (0xa8c), region = 28  ;;  %312 = vmatprep.mubr.f32.mxu0 (!%p113_p2), %v56174_v1  ;;  %v232_v2 = vsel (!%p113_p2), %vm230_vm0, %v49770_v0, 0  ;;  %52846 = vmatprep.subr.bf16.mxu1 (!%p113_p2), %v56175_v4  ;;  %vm234_vm2 = vcmask (!%p113_p2), 1043456   ;;  %s56177_s17 = smov (!%p113_p2), 127   ;;  %vm2179_vm3 = vcmask (!%p113_p2), 1039360   ;;  %vm4163_vm4 = vcmask (!%p113_p2), 1031168  }
   0x7   : > { %v56231_v3 = vand.u32 (!%p113_p2), 4294901760, %v232_v2  ;;  %50726 = vmatprep.mubr.msk.f32.mxu1 (!%p113_p2), %vm56176_vm1, %v56174_v1  ;;  %s56178_s18 = smov (!%p113_p2), 126   ;;  %s56179_s21 = smov (!%p113_p2), 125   ;;  %vm6142_vm5 = vcmask (!%p113_p2), 1022976   ;;  %vm8121_vm6 = vcmask (!%p113_p2), 1014784   ;;  %vm10100_vm7 = vcmask (!%p113_p2), 850944  }
   0x8   : > { %s56180_s24 = smov (!%p113_p2), 124   ;;  %s56181_s29 = smov (!%p113_p2), 104   ;;  %vm12079_vm8 = vcmask (!%p113_p2), 842752   ;;  %vm14058_vm9 = vcmask (!%p113_p2), 834560   ;;  %vm16037_vm10 = vcmask (!%p113_p2), 826368   ;;  %vm18016_vm11 = vcmask (!%p113_p2), 818176  }
   0x9   : > { %v56243_v5 = vsub.f32 (!%p113_p2), %v232_v2, %v56231_v3  ;;  %s56182_s6 = smov (!%p113_p2), 103   ;;  %s56185_s23 = smov (!%p113_p2), 100   ;;  %vm19995_vm12 = vcmask (!%p113_p2), 654336   ;;  %vm21974_vm13 = vcmask (!%p113_p2), 646144   ;;  %vm23953_vm14 = vcmask (!%p113_p2), 637952  }
   0xa   : > { %s56186_s28 = smov (!%p113_p2), 80   ;;  %s56187_s5 = smov (!%p113_p2), 79   ;;  %vm25932_vm15 = vcmask (!%p113_p2), 629760  }
   0xb   : > { %v56261_v23 = vand.u32 (!%p113_p2), 4294901760, %v56243_v5  ;;  %s56188_s12 = smov (!%p113_p2), 78   ;;  %s56190_s22 = smov (!%p113_p2), 76  }
   0xc   : > { %s56191_s27 = smov (!%p113_p2), 56   ;;  %s56192_s4 = smov (!%p113_p2), 55  }
   0xd   : > { %s63395_s10 = smov (!%p134_p3, %s49738_s10), 1  ;;  %s56193_s11 = smov 54  }
   0xe   : > { %s49821_s13 = sshll.u32 %s63395_s10, 8  ;;  %s56196_s26 = smov 32  }
   0xf   : > { %s56240_s16 = scalar_lea.vmem %s63391_s0, %s49821_s13  ;;  %s56183_s13 = smov 102  }
  0x10   : > { %v149_v6 = vld [vmem:[%s56240_s16 + $0x28] sm:$0xf]  ;;  %v56253_v17 = vld [vmem:[%s56240_s16 + $0x30] sm:$0xf]  ;;  %v148_v36 = vld [vmem:[%s56240_s16 + $0x20] sm:$0xf] }
  0x11   : > { %v49751_v7 = vld [vmem:[%s56240_s16 + $0x68] sm:$0xf]  ;;  %v56257_v21 = vld [vmem:[%s56240_s16 + $0x70] sm:$0xf]  ;;  %v49750_v37 = vld [vmem:[%s56240_s16 + $0x60] sm:$0xf] }
  0x12   : > { %v49759_v8 = vld [vmem:[%s56240_s16 + $0xa8] sm:$0xf]  ;;  %v166_v9 = vadd.f32 %v49751_v7, %v149_v6  ;;  %v174_v10 = vmax.f32 %v149_v6, %v49751_v7  ;;  %v49760_v22 = vld [vmem:[%s56240_s16 + $0xb0] sm:$0xf]  ;;  %v167_v26 = vadd.f32 %v56257_v21, %v56253_v17  ;;  %v175_v30 = vmax.f32 %v56253_v17, %v56257_v21  ;;  %v49758_v43 = vld [vmem:[%s56240_s16 + $0xa0] sm:$0xf] }
  0x13   : > { %v145_v11 = vld [vmem:[%s56240_s16 + $0x8] sm:$0xff]  ;;  %v146_v27 = vld [vmem:[%s56240_s16 + $0x10] sm:$0xff]  ;;  %v165_v42 = vadd.f32 %v49750_v37, %v148_v36  ;;  %v144_v44 = vld [vmem:[%s56240_s16] sm:$0xff]  ;;  %v173_v47 = vmax.f32 %v148_v36, %v49750_v37  ;;  %s56197_s3 = smov 31   ;;  %s56198_s8 = smov 30  }
  0x14   : > { %v49747_v12 = vld [vmem:[%s56240_s16 + $0x48] sm:$0xff]  ;;  %v191_v18 = vadd.f32 %v49759_v8, %v166_v9  ;;  %v199_v19 = vmax.f32 %v174_v10, %v49759_v8  ;;  %v49748_v28 = vld [vmem:[%s56240_s16 + $0x50] sm:$0xff]  ;;  %v192_v40 = vadd.f32 %v49760_v22, %v167_v26  ;;  %v49766_v48 = vld [vmem:[%s56240_s16 + $0xe0] sm:$0xf]  ;;  %s56199_s15 = smov 29   ;;  %s56200_s20 = smov 28  }
  0x15   : > { %v49767_v13 = vld [vmem:[%s56240_s16 + $0xe8] sm:$0xf]  ;;  %v162_v14 = vadd.f32 %v49747_v12, %v145_v11  ;;  %v170_v15 = vmax.f32 %v145_v11, %v49747_v12  ;;  %v49756_v29 = vld [vmem:[%s56240_s16 + $0x90] sm:$0xff]  ;;  %v163_v34 = vadd.f32 %v49748_v28, %v146_v27  ;;  %v171_v35 = vmax.f32 %v146_v27, %v49748_v28  ;;  %v49746_v49 = vld [vmem:[%s56240_s16 + $0x40] sm:$0xff]  ;;  %s56118_s7 = smul.u32 24, %s63395_s10 }
  0x16   : > { %v49755_v16 = vld [vmem:[%s56240_s16 + $0x88] sm:$0xff]  ;;  %v56270_v31 = vadd.f32 %v49767_v13, %v191_v18  ;;  %v56272_v32 = vmax.f32 %v199_v19, %v49767_v13  ;;  %v49768_v33 = vld [vmem:[%s56240_s16 + $0xf0] sm:$0xf]  ;;  %v49754_v50 = vld [vmem:[%s56240_s16 + $0x80] sm:$0xff]  ;;  %v190_v53 = vadd.f32 %v49758_v43, %v165_v42  ;;  %v161_v54 = vadd.f32 %v49746_v49, %v144_v44 }
  0x17   : > { %v49763_v20 = vld [vmem:[%s56240_s16 + $0xc8] sm:$0xff]  ;;  %v187_v24 = vadd.f32 %v49755_v16, %v162_v14  ;;  %v195_v25 = vmax.f32 %v170_v15, %v49755_v16  ;;  %v49764_v41 = vld [vmem:[%s56240_s16 + $0xd0] sm:$0xff]  ;;  %v188_v45 = vadd.f32 %v49756_v29, %v163_v34  ;;  %v196_v46 = vmax.f32 %v171_v35, %v49756_v29  ;;  %v56296_v56 = vld [vmem:[%s56240_s16 + $0x38] sm:$0xf] }
  0x18   : > { %2173 = vrot.lane.b32.xlu0 %v56270_v31, %s56177_s17  ;;  %v239_v51 = vsel %vm234_vm2, %v56272_v32, 0  ;;  %v56293_v52 = vadd.f32 %v49768_v33, %v192_v40  ;;  %v169_v55 = vmax.f32 %v144_v44, %v49746_v49  ;;  %v56299_v57 = vld [vmem:[%s56240_s16 + $0x78] sm:$0xf]  ;;  %v198_v61 = vmax.f32 %v173_v47, %v49758_v43  ;;  %v49762_v62 = vld [vmem:[%s56240_s16 + $0xc0] sm:$0xff] }
  0x19   : > { %v56277_v38 = vadd.f32 %v49763_v20, %v187_v24  ;;  %v56279_v39 = vmax.f32 %v195_v25, %v49763_v20  ;;  %v56302_v58 = vld [vmem:[%s56240_s16 + $0xb8] sm:$0xf]  ;;  %v56304_v59 = vadd.f32 %v49764_v41, %v188_v45  ;;  %v56306_v60 = vmax.f32 %v196_v46, %v49764_v41 }
  0x1a   : > { %v168_v63 = vadd.f32 %v56299_v57, %v56296_v56  ;;  %v56312_v0 = vld [vmem:[%s56240_s16 + $0x18] sm:$0xff]  ;;  %v56317_v6 = vadd.f32 %v49766_v48, %v190_v53  ;;  %v186_v7 = vadd.f32 %v49754_v50, %v161_v54  ;;  %v194_v8 = vmax.f32 %v169_v55, %v49754_v50 }
  0x1b   : > { %2165 = vrot.lane.b32.xlu1 %v56277_v38, %s56177_s17  ;;  %v56315_v2 = vld [vmem:[%s56240_s16 + $0x58] sm:$0xff]  ;;  %v56326_v11 = vmax.f32 %v198_v61, %v49766_v48  ;;  %v244_v13 = vand.u32 4294901760, %v56279_v39  ;;  %v248_v14 = vand.u32 4294901760, %v239_v51  ;;  %v200_v19 = vmax.f32 %v175_v30, %v49760_v22 }
  0x1c   : > { %v164_v9 = vadd.f32 %v56315_v2, %v56312_v0  ;;  %v56322_v10 = vld [vmem:[%s56240_s16 + $0x98] sm:$0xff]  ;;  %2175 = vrot.lane.b32.xlu0 %v56293_v52, %s56177_s17  ;;  %v193_v12 = vadd.f32 %v56302_v58, %v168_v63  ;;  %v56332_v15 = vadd.f32 %v49762_v62, %v186_v7  ;;  %v56334_v16 = vmax.f32 %v194_v8, %v49762_v62 }
  0x1d   : > { %v56337_v17 = vld [vmem:[%s56240_s16 + $0xf8] sm:$0xf]  ;;  %v56343_v21 = vpack.c.bf16 %v248_v14, %v244_v13  ;;  %v56346_v24 = vsub.f32 %v56279_v39, %v244_v13  ;;  %v56348_v25 = vsub.f32 %v239_v51, %v248_v14  ;;  %v236_v26 = vsel %vm234_vm2, %v56326_v11, 0 }
  0x1e   : > { %v189_v18 = vadd.f32 %v56322_v10, %v164_v9  ;;  %v56341_v20 = vld [vmem:[%s56240_s16 + $0xd8] sm:$0xff]  ;;  %v246_v27 = vand.u32 4294901760, %v56334_v16  ;;  %v56353_v28 = vmax.f32 %v200_v19, %v49768_v33  ;;  %v316_v29 = vsub.f32 %v56243_v5, %v56261_v23  ;;  %s56194_s16 = smov 53  }
  0x1f   : > { %2167 = vrot.lane.b32.xlu1 %v56304_v59, %s56177_s17  ;;  %v56360_v22 = vadd.f32 %v56337_v17, %v193_v12  ;;  %52823 = vmatprep.subr.bf16.mxu0 %v56343_v21  ;;  %v250_v30 = vand.u32 4294901760, %v236_v26  ;;  %v736_v34 = vand.u32 4294901760, %v56306_v60  ;;  %v326_v35 = vand.u32 4294901760, %v56346_v24 }
  0x20   : > { %2171 = vrot.lane.b32.xlu0 %v56317_v6, %s56177_s17  ;;  %v56368_v33 = vadd.f32 %v56341_v20, %v189_v18  ;;  %v56371_v36 = vsub.f32 %v56334_v16, %v246_v27  ;;  %v242_v37 = vsel %vm234_vm2, %v56353_v28, 0  ;;  %v338_v40 = vand.u32 4294901760, %v56348_v25 }
  0x21   : > { %v56376_v41 = vpack.c.bf16 %v250_v30, %v246_v27  ;;  %v56378_v42 = vsub.f32 %v236_v26, %v250_v30  ;;  %v739_v43 = vand.u32 4294901760, %v242_v37  ;;  %v56381_v44 = vsub.f32 %v56306_v60, %v736_v34 }
  0x22   : > { %v317_v45 = vand.u32 4294901760, %v316_v29  ;;  %v327_v46 = vsub.f32 %v56346_v24, %v326_v35  ;;  %v339_v47 = vsub.f32 %v56348_v25, %v338_v40  ;;  %v332_v48 = vand.u32 4294901760, %v56371_v36 }
  0x23   : > { %2163 = vrot.lane.b32.xlu1 %v56332_v15, %s56177_s17  ;;  %52825 = vmatpush1.bf16.msra.mxu0 %v56376_v41  ;;  %v56393_v49 = vpack.c.bf16 %v739_v43, %v736_v34  ;;  %v56395_v50 = vsub.f32 %v242_v37, %v739_v43  ;;  %v344_v51 = vand.u32 4294901760, %v56378_v42  ;;  %v815_v53 = vand.u32 4294901760, %v56381_v44 }
  0x24   : > { %2177 = vrot.lane.b32.xlu0 %v56360_v22, %s56177_s17  ;;  %v328_v54 = vand.u32 4294901760, %v327_v46  ;;  %v340_v55 = vand.u32 4294901760, %v339_v47  ;;  %v333_v61 = vsub.f32 %v56371_v36, %v332_v48  ;;  %v176_v18 = vmax.f32 %v56296_v56, %v56299_v57 }
  0x25   : > { %52848 = vmatpush3.bf16.msra.mxu1 %v56393_v49  ;;  %v345_v62 = vsub.f32 %v56378_v42, %v344_v51  ;;  %v816_v63 = vsub.f32 %v56381_v44, %v815_v53  ;;  %v822_v7 = vand.u32 4294901760, %v56395_v50  ;;  %v172_v19 = vmax.f32 %v56312_v0, %v56315_v2 }
  0x26   : > { %318 = vmatmul.mubr.f32.vlgmr.msra.gmra.mrb[0].mxu0 %v317_v45  ;;  %v52826_v8 = vpack.c.bf16 %v340_v55, %v328_v54  ;;  %v334_v9 = vand.u32 4294901760, %v333_v61  ;;  %52849 = vmatprep.subr.bf16.mxu1 %v56175_v4  ;;  %v52830_v26 = vpack.c.bf16 %v56348_v25, %v56346_v24  ;;  %v201_v57 = vmax.f32 %v176_v18, %v56302_v58 }
  0x27   : > { %2169 = vrot.lane.b32.xlu1 %v56368_v33, %s56177_s17  ;;  %v346_v12 = vand.u32 4294901760, %v345_v62  ;;  %408 = vmatprep.mubr.f32.mxu0 %v56174_v1  ;;  %v817_v13 = vand.u32 4294901760, %v816_v63  ;;  %v823_v14 = vsub.f32 %v56395_v50, %v822_v7  ;;  %v52832_v30 = vpack.c.bf16 %v56378_v42, %v56371_v36 }
  0x28   : > { %3168 = vrot.lane.b32.xlu0 %v56272_v32, %s56177_s17  ;;  %52827 = vmatprep.subr.bf16.mxu0 %v52826_v8  ;;  %v197_v0 = vmax.f32 %v172_v19, %v56322_v10  ;;  %v52853_v2 = vpack.c.bf16 %v56395_v50, %v56381_v44  ;;  %v56444_v58 = vmax.f32 %v201_v57, %v56337_v17  ;;  %v1206_v34 = vand.u32 4294901760, %v56277_v38 }
  0x29   : > { %50727 = vmatmul.mubr.f32.vlgmr.msra.gmra.mrb[0].mxu1 %v317_v45  ;;  %v52828_v27 = vpack.c.bf16 %v346_v12, %v334_v9  ;;  %v824_v29 = vand.u32 4294901760, %v823_v14  ;;  %v52838_v17 = vpack.c.bf16 %v338_v40, %v326_v35  ;;  %v52840_v24 = vpack.c.bf16 %v344_v51, %v332_v48  ;;  %v227_v40 = vld [vmem:[%s63392_s1] sm:$0xff] }
  0x2a   : > { %50733 = vmatprep.mubr.msk.f32.mxu1 %vm56176_vm1, %v56174_v1  ;;  %v56449_v10 = vmax.f32 %v197_v0, %v56341_v20  ;;  %v1201_v20 = vsel %vm234_vm2, %v56270_v31, 0  ;;  %v56485_v25 = vsub.f32 %v56277_v38, %v1206_v34  ;;  %v52859_v36 = vpack.c.bf16 %v822_v7, %v815_v53 }
  0x2b   : > { %3170 = vrot.lane.b32.xlu1 %v56353_v28, %s56177_s17  ;;  %52829 = vmatpush1.bf16.msra.mxu0 %v52828_v27  ;;  %v52850_v56 = vpack.c.bf16 %v824_v29, %v817_v13  ;;  %v1210_v37 = vand.u32 4294901760, %v1201_v20  ;;  %v1208_v42 = vand.u32 4294901760, %v56332_v15  ;;  %v1195_v45 = vsel %vm230_vm0, %v227_v40, 0 }
  0x2c   : > { %3160 = vrot.lane.b32.xlu0 %v56279_v39, %s56177_s17  ;;  %52831 = vmatprep.subr.bf16.mxu0 %v52830_v26  ;;  %v1204_v46 = vsel %vm234_vm2, %v56293_v52, 0  ;;  %v1288_v47 = vand.u32 4294901760, %v56485_v25  ;;  %v56518_v48 = vand.u32 4294901760, %v1195_v45 }
  0x2d   : > { %52851 = vmatpush3.bf16.msra.mxu1 %v52850_v56  ;;  %v56487_v35 = vsub.f32 %v1201_v20, %v1210_v37  ;;  %v1701_v50 = vand.u32 4294901760, %v1204_v46  ;;  %v56523_v51 = vsub.f32 %v56332_v15, %v1208_v42 }
  0x2e   : > { %410 = vmatmul.mubr.f32.vlgmr.msra.gmra.mrb[0].mxu0 %v56231_v3  ;;  %52852 = vmatprep.subr.bf16.mxu1 %v56175_v4  ;;  %v1289_v54 = vsub.f32 %v56485_v25, %v1288_v47  ;;  %v56541_v61 = vsub.f32 %v1195_v45, %v56518_v48 }
  0x2f   : > { %3162 = vrot.lane.b32.xlu1 %v56306_v60, %s56177_s17  ;;  %52833 = vmatpush1.bf16.msra.mxu0 %v52832_v30  ;;  %v1300_v44 = vand.u32 4294901760, %v56487_v35  ;;  %v56546_v63 = vsub.f32 %v1204_v46, %v1701_v50  ;;  %v1294_v7 = vand.u32 4294901760, %v56523_v51 }
  0x30   : > { %3166 = vrot.lane.b32.xlu0 %v56326_v11, %s56177_s17  ;;  %488 = vmatprep.mubr.f32.mxu0 %v56174_v1  ;;  %v1290_v9 = vand.u32 4294901760, %v1289_v54 }
  0x31   : > { %50734 = vmatmul.mubr.f32.vlgmr.msra.gmra.mrb[0].mxu1 %v56231_v3  ;;  %52835 = vmatprep.subr.bf16.mxu0 %v56343_v21  ;;  %v1301_v55 = vsub.f32 %v56487_v35, %v1300_v44  ;;  %v1784_v14 = vand.u32 4294901760, %v56546_v63  ;;  %v1295_v19 = vsub.f32 %v56523_v51, %v1294_v7  ;;  %v52880_v40 = vpack.c.bf16 %v1300_v44, %v1288_v47 }
  0x32   : > { %52854 = vmatpush3.bf16.msra.mxu1 %v52853_v2  ;;  %50740 = vmatprep.mubr.msk.f32.mxu1 %vm56176_vm1, %v56174_v1 }
  0x33   : > { %3158 = vrot.lane.b32.xlu1 %v56334_v16, %s56177_s17  ;;  %52855 = vmatprep.subr.bf16.mxu1 %v56175_v4  ;;  %v1302_v12 = vand.u32 4294901760, %v1301_v55  ;;  %v1785_v57 = vsub.f32 %v56546_v63, %v1784_v14  ;;  %v1296_v30 = vand.u32 4294901760, %v1295_v19 }
  0x34   : > { %3172 = vrot.lane.b32.xlu0 %v56444_v58, %s56177_s17 }
  0x35   : > { %v52868_v26 = vpack.c.bf16 %v1302_v12, %v1290_v9  ;;  %v1786_v20 = vand.u32 4294901760, %v1785_v57 }
  0x36   : > { %491 = vmatmul.mubr.f32.vlgmr.msra.gmra.mrb[0].mxu0 %v56243_v5 }
  0x37   : > { %3164 = vrot.lane.b32.xlu1 %v56449_v10, %s56177_s17  ;;  %52837 = vmatpush1.bf16.msra.mxu0 %v56376_v41  ;;  %s56189_s17 = smov 77  }
  0x38   : > { %565 = vmatprep.mubr.f32.mxu0 %v56174_v1  ;;  %52839 = vmatprep.subr.bf16.mxu0 %v52838_v17 }
  0x39   : > { %4157 = vrot.lane.b32.xlu0 %v56270_v31, %s56178_s18  ;;  %50741 = vmatmul.mubr.f32.vlgmr.msra.gmra.mrb[0].mxu1 %v56243_v5  ;;  %v1198_v5 = vsel %vm234_vm2, %v56317_v6, 0 }
  0x3a   : > { %52857 = vmatpush3.bf16.msra.mxu1 %v56393_v49  ;;  %50747 = vmatprep.mubr.msk.f32.mxu1 %vm56176_vm1, %v56174_v1  ;;  %v1212_v43 = vand.u32 4294901760, %v1198_v5 }
  0x3b   : > { %4159 = vrot.lane.b32.xlu1 %v56293_v52, %s56178_s18  ;;  %52858 = vmatprep.subr.bf16.mxu1 %v56175_v4 }
  0x3c   : > { %v56525_v53 = vsub.f32 %v1198_v5, %v1212_v43  ;;  %v56566_v18 = vpack.c.bf16 %v1212_v43, %v1208_v42 }
  0x3d   : > { %4149 = vrot.lane.b32.xlu0 %v56277_v38, %s56178_s18 }
  0x3e   : > { %569 = vmatmul.mubr.f32.vlgmr.msra.gmra.mrb[0].mxu0 %v56261_v23  ;;  %v1306_v8 = vand.u32 4294901760, %v56525_v53 }
  0x3f   : > { %4151 = vrot.lane.b32.xlu1 %v56304_v59, %s56178_s18  ;;  %52841 = vmatpush1.bf16.msra.mxu0 %v52840_v24  ;;  %v52874_v24 = vpack.c.bf16 %v56525_v53, %v56523_v51 }
  0x40   : > { %651 = vmatprep.mubr.f32.mxu0 %v56174_v1  ;;  %52843 = vmatprep.subr.bf16.mxu0 %v56343_v21  ;;  %v1698_v21 = vand.u32 4294901760, %v56304_v59 }
  0x41   : > { %4155 = vrot.lane.b32.xlu0 %v56317_v6, %s56178_s18  ;;  %50748 = vmatmul.mubr.f32.vlgmr.msra.gmra.mrb[0].mxu1 %v56261_v23  ;;  %v56527_v23 = vpack.c.bf16 %v1210_v37, %v1206_v34  ;;  %v52872_v37 = vpack.c.bf16 %v56487_v35, %v56485_v25  ;;  %v52882_v25 = vpack.c.bf16 %v1306_v8, %v1294_v7 }
  0x42   : > { %52860 = vmatpush3.bf16.msra.mxu1 %v52859_v36  ;;  %50754 = vmatprep.mubr.msk.f32.mxu1 %vm56176_vm1, %v56174_v1  ;;  %v56544_v62 = vsub.f32 %v56304_v59, %v1698_v21  ;;  %v56582_v29 = vpack.c.bf16 %v1701_v50, %v1698_v21  ;;  %v49771_v36 = vld [vmem:[%s63392_s1 + $0x8] sm:$0xff] }
  0x43   : > { %4147 = vrot.lane.b32.xlu1 %v56332_v15, %s56178_s18  ;;  %52861 = vmatprep.subr.bf16.mxu1 %v56175_v4  ;;  %v2190_v42 = vsel %vm230_vm0, %v49771_v36, 0 }
  0x44   : > { %v1777_v13 = vand.u32 4294901760, %v56544_v62  ;;  %v52895_v5 = vpack.c.bf16 %v56546_v63, %v56544_v62  ;;  %v56698_v43 = vand.u32 4294901760, %v2190_v42 }
  0x45   : > { %4161 = vrot.lane.b32.xlu0 %v56360_v22, %s56178_s18 }
  0x46   : > { %653 = vmatmul.mubr.f32.vlgmr.msra.gmra.mrb[0].mxu0 %v56231_v3  ;;  %v1778_v56 = vsub.f32 %v56544_v62, %v1777_v13  ;;  %v52901_v35 = vpack.c.bf16 %v1784_v14, %v1777_v13  ;;  %v56701_v46 = vsub.f32 %v2190_v42, %v56698_v43 }
  0x47   : > { %4153 = vrot.lane.b32.xlu1 %v56368_v33, %s56178_s18  ;;  %52845 = vmatpush1.bf16.msra.mxu0 %v56376_v41  ;;  %v56562_v41 = vand.u32 4294901760, %v56541_v61 }
  0x48   : > { %727 = vmatprep.mubr.f32.mxu0 %v56174_v1  ;;  %52865 = vmatprep.subr.bf16.mxu0 %v56527_v23  ;;  %v1779_v17 = vand.u32 4294901760, %v1778_v56  ;;  %v56704_v21 = vand.u32 4294901760, %v56701_v46 }
  0x49   : > { %5147 = vrot.lane.b32.xlu0 %v56272_v32, %s56178_s18  ;;  %50755 = vmatmul.mubr.f32.vlgmr.msra.gmra.mrb[0].mxu1 %v56231_v3  ;;  %v1278_v27 = vsub.f32 %v56541_v61, %v56562_v41 }
  0x4a   : > { %52863 = vmatpush3.bf16.msra.mxu1 %v56393_v49  ;;  %50761 = vmatprep.mubr.msk.f32.mxu1 %vm56176_vm1, %v56174_v1  ;;  %v1307_v49 = vsub.f32 %v56525_v53, %v1306_v8 }
  0x4b   : > { %5149 = vrot.lane.b32.xlu1 %v56353_v28, %s56178_s18  ;;  %52888 = vmatprep.subr.bf16.mxu1 %v56175_v4  ;;  %v1279_v2 = vand.u32 4294901760, %v1278_v27 }
  0x4c   : > { %v1308_v0 = vand.u32 4294901760, %v1307_v49 }
  0x4d   : > { %5139 = vrot.lane.b32.xlu0 %v56279_v39, %s56178_s18 }
  0x4e   : > { %729 = vmatmul.mubr.f32.vlgmr.msra.gmra.mrb[0].mxu0 %v56231_v3  ;;  %v52870_v34 = vpack.c.bf16 %v1308_v0, %v1296_v30 }
  0x4f   : > { %5141 = vrot.lane.b32.xlu1 %v56306_v60, %s56178_s18  ;;  %52867 = vmatpush1.bf16.msra.mxu0 %v56566_v18 }
  0x50   : > { %1274 = vmatprep.mubr.f32.mxu0 %v56174_v1  ;;  %52869 = vmatprep.subr.bf16.mxu0 %v52868_v26 }
  0x51   : > { %5145 = vrot.lane.b32.xlu0 %v56326_v11, %s56178_s18  ;;  %50762 = vmatmul.mubr.f32.vlgmr.msra.gmra.mrb[0].mxu1 %v56231_v3  ;;  %v52892_v3 = vpack.c.bf16 %v1786_v20, %v1779_v17 }
  0x52   : > { %52890 = vmatpush3.bf16.msra.mxu1 %v56582_v29  ;;  %50768 = vmatprep.mubr.msk.f32.mxu1 %vm56176_vm1, %v56174_v1 }
  0x53   : > { %5137 = vrot.lane.b32.xlu1 %v56334_v16, %s56178_s18  ;;  %52891 = vmatprep.subr.bf16.mxu1 %v56175_v4 }
  0x55   : > { %5151 = vrot.lane.b32.xlu0 %v56444_v58, %s56178_s18 }
  0x56   : > { %1280 = vmatmul.mubr.f32.vlgmr.msra.gmra.mrb[0].mxu0 %v1279_v2 }
  0x57   : > { %5143 = vrot.lane.b32.xlu1 %v56449_v10, %s56178_s18  ;;  %52871 = vmatpush1.bf16.msra.mxu0 %v52870_v34  ;;  %s56184_s18 = smov 101  }
  0x58   : > { %1370 = vmatprep.mubr.f32.mxu0 %v56174_v1  ;;  %52873 = vmatprep.subr.bf16.mxu0 %v52872_v37 }
  0x59   : > { %6136 = vrot.lane.b32.xlu0 %v56270_v31, %s56179_s21  ;;  %50769 = vmatmul.mubr.f32.vlgmr.msra.gmra.mrb[0].mxu1 %v1279_v2 }
  0x5a   : > { %52893 = vmatpush3.bf16.msra.mxu1 %v52892_v3  ;;  %50775 = vmatprep.mubr.msk.f32.mxu1 %vm56176_vm1, %v56174_v1 }
  0x5b   : > { %6138 = vrot.lane.b32.xlu1 %v56293_v52, %s56179_s21  ;;  %52894 = vmatprep.subr.bf16.mxu1 %v56175_v4 }
  0x5d   : > { %6128 = vrot.lane.b32.xlu0 %v56277_v38, %s56179_s21 }
  0x5e   : > { %1372 = vmatmul.mubr.f32.vlgmr.msra.gmra.mrb[0].mxu0 %v56518_v48 }
  0x5f   : > { %6130 = vrot.lane.b32.xlu1 %v56304_v59, %s56179_s21  ;;  %52875 = vmatpush1.bf16.msra.mxu0 %v52874_v24 }
  0x60   : > { %1450 = vmatprep.mubr.f32.mxu0 %v56174_v1  ;;  %52877 = vmatprep.subr.bf16.mxu0 %v56527_v23 }
  0x61   : > { %6134 = vrot.lane.b32.xlu0 %v56317_v6, %s56179_s21  ;;  %50776 = vmatmul.mubr.f32.vlgmr.msra.gmra.mrb[0].mxu1 %v56518_v48 }
  0x62   : > { %52896 = vmatpush3.bf16.msra.mxu1 %v52895_v5  ;;  %50782 = vmatprep.mubr.msk.f32.mxu1 %vm56176_vm1, %v56174_v1 }
  0x63   : > { %6126 = vrot.lane.b32.xlu1 %v56332_v15, %s56179_s21  ;;  %52897 = vmatprep.subr.bf16.mxu1 %v56175_v4 }
  0x65   : > { %6140 = vrot.lane.b32.xlu0 %v56360_v22, %s56179_s21 }
  0x66   : > { %1453 = vmatmul.mubr.f32.vlgmr.msra.gmra.mrb[0].mxu0 %v56541_v61 }
  0x67   : > { %6132 = vrot.lane.b32.xlu1 %v56368_v33, %s56179_s21  ;;  %52879 = vmatpush1.bf16.msra.mxu0 %v56566_v18 }
  0x68   : > { %1527 = vmatprep.mubr.f32.mxu0 %v56174_v1  ;;  %52881 = vmatprep.subr.bf16.mxu0 %v52880_v40 }
  0x69   : > { %7126 = vrot.lane.b32.xlu0 %v56272_v32, %s56179_s21  ;;  %50783 = vmatmul.mubr.f32.vlgmr.msra.gmra.mrb[0].mxu1 %v56541_v61  ;;  %v2270_v61 = vsub.f32 %v56701_v46, %v56704_v21 }
  0x6a   : > { %52899 = vmatpush3.bf16.msra.mxu1 %v56582_v29  ;;  %50789 = vmatprep.mubr.msk.f32.mxu1 %vm56176_vm1, %v56174_v1 }
  0x6b   : > { %7128 = vrot.lane.b32.xlu1 %v56353_v28, %s56179_s21  ;;  %52900 = vmatprep.subr.bf16.mxu1 %v56175_v4  ;;  %v2271_v26 = vand.u32 4294901760, %v2270_v61 }
  0x6d   : > { %7118 = vrot.lane.b32.xlu0 %v56279_v39, %s56179_s21 }
  0x6e   : > { %1531 = vmatmul.mubr.f32.vlgmr.msra.gmra.mrb[0].mxu0 %v56562_v41 }
  0x6f   : > { %7120 = vrot.lane.b32.xlu1 %v56306_v60, %s56179_s21  ;;  %52883 = vmatpush1.bf16.msra.mxu0 %v52882_v25 }
  0x70   : > { %1613 = vmatprep.mubr.f32.mxu0 %v56174_v1  ;;  %52885 = vmatprep.subr.bf16.mxu0 %v56527_v23 }
  0x71   : > { %7124 = vrot.lane.b32.xlu0 %v56326_v11, %s56179_s21  ;;  %50790 = vmatmul.mubr.f32.vlgmr.msra.gmra.mrb[0].mxu1 %v56562_v41 }
  0x72   : > { %52902 = vmatpush3.bf16.msra.mxu1 %v52901_v35  ;;  %50796 = vmatprep.mubr.msk.f32.mxu1 %vm56176_vm1, %v56174_v1 }
  0x73   : > { %7116 = vrot.lane.b32.xlu1 %v56334_v16, %s56179_s21  ;;  %52903 = vmatprep.subr.bf16.mxu1 %v56175_v4 }
  0x75   : > { %7130 = vrot.lane.b32.xlu0 %v56444_v58, %s56179_s21 }
  0x76   : > { %1615 = vmatmul.mubr.f32.vlgmr.msra.gmra.mrb[0].mxu0 %v56518_v48 }
  0x77   : > { %7122 = vrot.lane.b32.xlu1 %v56449_v10, %s56179_s21  ;;  %52887 = vmatpush1.bf16.msra.mxu0 %v56566_v18  ;;  %s56195_s21 = smov 52  }
  0x78   : > { %1689 = vmatprep.mubr.f32.mxu0 %v56174_v1 }
  0x79   : > { %50797 = vmatmul.mubr.f32.vlgmr.msra.gmra.mrb[0].mxu1 %v56518_v48  ;;  %8115 = vrot.lane.b32.xlu0 %v56270_v31, %s56180_s24 }
  0x7a   : > { %52905 = vmatpush3.bf16.msra.mxu1 %v56582_v29  ;;  %50803 = vmatprep.mubr.msk.f32.mxu1 %vm56176_vm1, %v56174_v1 }
  0x7b   : > { %52930 = vmatprep.subr.bf16.mxu1 %v56175_v4  ;;  %8117 = vrot.lane.b32.xlu1 %v56293_v52, %s56180_s24 }
  0x7d   : > { %8107 = vrot.lane.b32.xlu0 %v56277_v38, %s56180_s24 }
  0x7e   : > { %1691 = vmatmul.mubr.f32.vlgmr.msra.gmra.mrb[0].mxu0 %v56518_v48 }
  0x7f   : > { %2266 = vmatprep.mubr.f32.mxu0 %v56174_v1  ;;  %8109 = vrot.lane.b32.xlu1 %v56304_v59, %s56180_s24 }
  0x81   : > { %50804 = vmatmul.mubr.f32.vlgmr.msra.gmra.mrb[0].mxu1 %v56518_v48  ;;  %8113 = vrot.lane.b32.xlu0 %v56317_v6, %s56180_s24 }
  0x82   : > { %50810 = vmatprep.mubr.msk.f32.mxu1 %vm56176_vm1, %v56174_v1 }
  0x83   : > { %8105 = vrot.lane.b32.xlu1 %v56332_v15, %s56180_s24 }
  0x85   : > { %8119 = vrot.lane.b32.xlu0 %v56360_v22, %s56180_s24 }
  0x87   : > { %8111 = vrot.lane.b32.xlu1 %v56368_v33, %s56180_s24 }
  0x89   : > { %9105 = vrot.lane.b32.xlu0 %v56272_v32, %s56180_s24 }
  0x8a   : > { %v2174_v45 = vpop.permute.xlu0 %2173 }
  0x8b   : > { %9107 = vrot.lane.b32.xlu1 %v56353_v28, %s56180_s24 }
  0x8d   : > { %v2166_v47 = vpop.permute.xlu1 %2165  ;;  %9097 = vrot.lane.b32.xlu0 %v56279_v39, %s56180_s24 }
  0x8e   : > { %v2176_v44 = vpop.permute.xlu0 %2175 }
  0x8f   : > { %v2184_v50 = vsel %vm2179_vm3, %v2174_v45, %v2176_v44  ;;  %9099 = vrot.lane.b32.xlu1 %v56306_v60, %s56180_s24 }
  0x90   : > { %v2194_v51 = vsel %vm234_vm2, %v2184_v50, 0 }
  0x91   : > { %v2168_v48 = vpop.permute.xlu1 %2167  ;;  %v2202_v23 = vand.u32 4294901760, %v2194_v51  ;;  %9103 = vrot.lane.b32.xlu0 %v56326_v11, %s56180_s24 }
  0x92   : > { %v2181_v53 = vsel %vm2179_vm3, %v2166_v47, %v2168_v48  ;;  %v2172_v55 = vpop.permute.xlu0 %2171 }
  0x93   : > { %v2198_v54 = vand.u32 4294901760, %v2181_v53  ;;  %v56711_v62 = vsub.f32 %v2194_v51, %v2202_v23  ;;  %v2183_v7 = vsel %vm2179_vm3, %v2172_v55, %v2174_v45  ;;  %9095 = vrot.lane.b32.xlu1 %v56334_v16, %s56180_s24 }
  0x94   : > { %v2192_v12 = vsel %vm234_vm2, %v2183_v7, 0 }
  0x95   : > { %v56713_v63 = vsub.f32 %v2181_v53, %v2198_v54  ;;  %v2164_v8 = vpop.permute.xlu1 %2163  ;;  %v56716_v9 = vpack.c.bf16 %v2202_v23, %v2198_v54  ;;  %v2204_v13 = vand.u32 4294901760, %v2192_v12  ;;  %v2292_v19 = vand.u32 4294901760, %v56711_v62  ;;  %9109 = vrot.lane.b32.xlu0 %v56444_v58, %s56180_s24 }
  0x96   : > { %v2180_v41 = vsel %vm2179_vm3, %v2164_v8, %v2166_v47  ;;  %v2178_v49 = vpop.permute.xlu0 %2177 }
  0x97   : > { %v2200_v14 = vand.u32 4294901760, %v2180_v41  ;;  %52907 = vmatprep.subr.bf16.mxu0 %v56716_v9  ;;  %v2280_v18 = vand.u32 4294901760, %v56713_v63  ;;  %v56723_v27 = vsub.f32 %v2192_v12, %v2204_v13  ;;  %v2185_v57 = vsel %vm2179_vm3, %v2176_v44, %v2178_v49  ;;  %9101 = vrot.lane.b32.xlu1 %v56449_v10, %s56180_s24 }
  0x98   : > { %v2196_v0 = vsel %vm234_vm2, %v2185_v57, 0  ;;  %v2293_v20 = vsub.f32 %v56711_v62, %v2292_v19  ;;  %v52914_v55 = vpack.c.bf16 %v56711_v62, %v56713_v63 }
  0x99   : > { %v56725_v29 = vpack.c.bf16 %v2204_v13, %v2200_v14  ;;  %v56727_v56 = vsub.f32 %v2180_v41, %v2200_v14  ;;  %v2170_v30 = vpop.permute.xlu1 %2169  ;;  %v2281_v17 = vsub.f32 %v56713_v63, %v2280_v18  ;;  %v2298_v34 = vand.u32 4294901760, %v56723_v27  ;;  %10094 = vrot.lane.b32.xlu0 %v56270_v31, %s56181_s29 }
  0x9a   : > { %v2182_v2 = vsel %vm2179_vm3, %v2168_v48, %v2170_v30  ;;  %v2693_v3 = vand.u32 4294901760, %v2196_v0  ;;  %v2294_v40 = vand.u32 4294901760, %v2293_v20  ;;  %v3169_v7 = vpop.permute.xlu0 %3168 }
  0x9b   : > { %v2286_v37 = vand.u32 4294901760, %v56727_v56  ;;  %52909 = vmatpush1.bf16.msra.mxu0 %v56725_v29  ;;  %v2690_v24 = vand.u32 4294901760, %v2182_v2  ;;  %v2282_v5 = vand.u32 4294901760, %v2281_v17  ;;  %v2299_v25 = vsub.f32 %v56723_v27, %v2298_v34  ;;  %10096 = vrot.lane.b32.xlu1 %v56293_v52, %s56181_s29 }
  0x9c   : > { %v56747_v36 = vsub.f32 %v2196_v0, %v2693_v3  ;;  %v52916_v12 = vpack.c.bf16 %v56723_v27, %v56727_v56 }
  0x9d   : > { %v2287_v35 = vsub.f32 %v56727_v56, %v2286_v37  ;;  %v56749_v42 = vpack.c.bf16 %v2693_v3, %v2690_v24  ;;  %v56751_v45 = vsub.f32 %v2182_v2, %v2690_v24  ;;  %v52910_v47 = vpack.c.bf16 %v2294_v40, %v2282_v5  ;;  %v3171_v13 = vpop.permute.xlu1 %3170  ;;  %10086 = vrot.lane.b32.xlu0 %v56277_v38, %s56181_s29 }
  0x9e   : > { %2272 = vmatmul.mubr.f32.vlgmr.msra.gmra.mrb[0].mxu0 %v2271_v26  ;;  %v2300_v44 = vand.u32 4294901760, %v2299_v25  ;;  %v2776_v48 = vand.u32 4294901760, %v56747_v36  ;;  %v3161_v14 = vpop.permute.xlu0 %3160  ;;  %v52922_v2 = vpack.c.bf16 %v2292_v19, %v2280_v18  ;;  %v49772_v19 = vld [vmem:[%s63392_s1 + $0xd0] sm:$0xff] }
  0x9f   : > { %v2288_v50 = vand.u32 4294901760, %v2287_v35  ;;  %2362 = vmatprep.mubr.f32.mxu0 %v56174_v1  ;;  %v2769_v51 = vand.u32 4294901760, %v56751_v45  ;;  %52911 = vmatprep.subr.bf16.mxu0 %v52910_v47  ;;  %v52937_v49 = vpack.c.bf16 %v56747_v36, %v56751_v45  ;;  %v3184_v56 = vsel %vm230_vm0, %v49772_v19, 0 }
  0xa0   : > { %52932 = vmatpush3.bf16.msra.mxu1 %v56749_v42  ;;  %v2777_v53 = vsub.f32 %v56747_v36, %v2776_v48  ;;  %10088 = vrot.lane.b32.xlu1 %v56304_v59, %s56181_s29 }
  0xa1   : > { %v52912_v23 = vpack.c.bf16 %v2300_v44, %v2288_v50  ;;  %52933 = vmatprep.subr.bf16.mxu1 %v56175_v4  ;;  %v2770_v54 = vsub.f32 %v56751_v45, %v2769_v51  ;;  %v3163_v57 = vpop.permute.xlu1 %3162  ;;  %v56832_v50 = vand.u32 4294901760, %v3184_v56  ;;  %10092 = vrot.lane.b32.xlu0 %v56317_v6, %s56181_s29 }
  0xa2   : > { %v2778_v61 = vand.u32 4294901760, %v2777_v53  ;;  %v3175_v0 = vsel %vm2179_vm3, %v3161_v14, %v3163_v57  ;;  %v3167_v17 = vpop.permute.xlu0 %3166 }
  0xa3   : > { %50811 = vmatmul.mubr.f32.vlgmr.msra.gmra.mrb[0].mxu1 %v2271_v26  ;;  %52913 = vmatpush1.bf16.msra.mxu0 %v52912_v23  ;;  %v2771_v8 = vand.u32 4294901760, %v2770_v54  ;;  %v3178_v26 = vsel %vm2179_vm3, %v3169_v7, %v3171_v13  ;;  %v3192_v3 = vand.u32 4294901760, %v3175_v0  ;;  %v3177_v62 = vsel %vm2179_vm3, %v3167_v17, %v3169_v7 }
  0xa4   : > { %52915 = vmatprep.subr.bf16.mxu0 %v52914_v55  ;;  %50817 = vmatprep.mubr.msk.f32.mxu1 %vm56176_vm1, %v56174_v1  ;;  %v3188_v30 = vsel %vm234_vm2, %v3178_v26, 0  ;;  %v3186_v40 = vsel %vm234_vm2, %v3177_v62, 0 }
  0xa5   : > { %v52934_v41 = vpack.c.bf16 %v2778_v61, %v2771_v8  ;;  %v3196_v20 = vand.u32 4294901760, %v3188_v30  ;;  %v3159_v24 = vpop.permute.xlu1 %3158  ;;  %v56801_v18 = vsub.f32 %v3175_v0, %v3192_v3  ;;  %v3198_v47 = vand.u32 4294901760, %v3186_v40  ;;  %10084 = vrot.lane.b32.xlu1 %v56332_v15, %s56181_s29  ;;  %10098 = vrot.lane.b32.xlu0 %v56360_v22, %s56181_s29 }
  0xa6   : > { %2364 = vmatmul.mubr.f32.vlgmr.msra.gmra.mrb[0].mxu0 %v56698_v43  ;;  %v3173_v5 = vpop.permute.xlu0 %3172  ;;  %v3174_v25 = vsel %vm2179_vm3, %v3159_v24, %v3161_v14  ;;  %v56856_v61 = vsub.f32 %v3184_v56, %v56832_v50 }
  0xa7   : > { %52917 = vmatpush1.bf16.msra.mxu0 %v52916_v12  ;;  %2442 = vmatprep.mubr.f32.mxu0 %v56174_v1  ;;  %v56798_v63 = vsub.f32 %v3188_v30, %v3196_v20  ;;  %v3179_v27 = vsel %vm2179_vm3, %v3171_v13, %v3173_v5  ;;  %v3194_v44 = vand.u32 4294901760, %v3174_v25  ;;  %v56839_v54 = vpack.c.bf16 %v3196_v20, %v3192_v3 }
  0xa8   : > { %52935 = vmatpush3.bf16.msra.mxu1 %v52934_v41  ;;  %52919 = vmatprep.subr.bf16.mxu0 %v56716_v9  ;;  %v3190_v53 = vsel %vm234_vm2, %v3179_v27, 0 }
  0xa9   : > { %52936 = vmatprep.subr.bf16.mxu1 %v56175_v4  ;;  %v3286_v35 = vand.u32 4294901760, %v56798_v63  ;;  %10090 = vrot.lane.b32.xlu1 %v56368_v33, %s56181_s29 }
  0xaa   : > { %11084 = vrot.lane.b32.xlu0 %v56272_v32, %s56181_s29 }
  0xab   : > { %50818 = vmatmul.mubr.f32.vlgmr.msra.gmra.mrb[0].mxu1 %v56698_v43  ;;  %v3287_v36 = vsub.f32 %v56798_v63, %v3286_v35  ;;  %v4158_v56 = vpop.permute.xlu0 %4157 }
  0xac   : > { %52938 = vmatpush3.bf16.msra.mxu1 %v52937_v49  ;;  %50824 = vmatprep.mubr.msk.f32.mxu1 %vm56176_vm1, %v56174_v1 }
  0xad   : > { %52939 = vmatprep.subr.bf16.mxu1 %v56175_v4  ;;  %v3288_v8 = vand.u32 4294901760, %v3287_v36  ;;  %11086 = vrot.lane.b32.xlu1 %v56353_v28, %s56181_s29 }
  0xae   : > { %2445 = vmatmul.mubr.f32.vlgmr.msra.gmra.mrb[0].mxu0 %v56701_v46  ;;  %11076 = vrot.lane.b32.xlu0 %v56279_v39, %s56181_s29 }
  0xaf   : > { %52921 = vmatpush1.bf16.msra.mxu0 %v56725_v29  ;;  %2519 = vmatprep.mubr.f32.mxu0 %v56174_v1 }
  0xb0   : > { %52923 = vmatprep.subr.bf16.mxu0 %v52922_v2 }
  0xb1   : > { %11078 = vrot.lane.b32.xlu1 %v56306_v60, %s56181_s29 }
  0xb2   : > { %11082 = vrot.lane.b32.xlu0 %v56326_v11, %s56181_s29 }
  0xb3   : > { %50825 = vmatmul.mubr.f32.vlgmr.msra.gmra.mrb[0].mxu1 %v56701_v46  ;;  %v52924_v46 = vpack.c.bf16 %v2298_v34, %v2286_v37  ;;  %v3165_v34 = vpop.permute.xlu1 %3164  ;;  %v3274_v37 = vand.u32 4294901760, %v56801_v18 }
  0xb4   : > { %52941 = vmatpush3.bf16.msra.mxu1 %v56749_v42  ;;  %50831 = vmatprep.mubr.msk.f32.mxu1 %vm56176_vm1, %v56174_v1  ;;  %v3176_v23 = vsel %vm2179_vm3, %v3163_v57, %v3165_v34  ;;  %v56881_v57 = vpack.c.bf16 %v3198_v47, %v3194_v44  ;;  %vm27911_vm3 = vcmask 621568  }
  0xb5   : > { %52942 = vmatprep.subr.bf16.mxu1 %v56175_v4  ;;  %v3275_v45 = vsub.f32 %v56801_v18, %v3274_v37  ;;  %v3684_v55 = vand.u32 4294901760, %v3176_v23  ;;  %v52964_v36 = vpack.c.bf16 %v3286_v35, %v3274_v37  ;;  %11074 = vrot.lane.b32.xlu1 %v56334_v16, %s56181_s29 }
  0xb6   : > { %2523 = vmatmul.mubr.f32.vlgmr.msra.gmra.mrb[0].mxu0 %v56704_v21  ;;  %11088 = vrot.lane.b32.xlu0 %v56444_v58, %s56181_s29 }
  0xb7   : > { %52925 = vmatpush1.bf16.msra.mxu0 %v52924_v46  ;;  %2605 = vmatprep.mubr.f32.mxu0 %v56174_v1  ;;  %v3276_v7 = vand.u32 4294901760, %v3275_v45  ;;  %v56869_v14 = vsub.f32 %v3176_v23, %v3684_v55  ;;  %v4160_v34 = vpop.permute.xlu1 %4159 }
  0xb8   : > { %52927 = vmatprep.subr.bf16.mxu0 %v56716_v9  ;;  %v52943_v9 = vpack.c.bf16 %v2776_v48, %v2769_v51  ;;  %v56847_v48 = vsub.f32 %v3186_v40, %v3198_v47  ;;  %v56849_v51 = vsub.f32 %v3174_v25, %v3194_v44  ;;  %v52956_v25 = vpack.c.bf16 %v56798_v63, %v56801_v18  ;;  %v4150_v47 = vpop.permute.xlu0 %4149  ;;  %v49773_v63 = vld [vmem:[%s63392_s1 + $0x10] sm:$0xff] }
  0xb9   : > { %v52952_v49 = vpack.c.bf16 %v3288_v8, %v3276_v7  ;;  %v3763_v0 = vand.u32 4294901760, %v56869_v14  ;;  %11080 = vrot.lane.b32.xlu1 %v56449_v10, %s56181_s29 }
  0xba   : > { %v3292_v12 = vand.u32 4294901760, %v56847_v48  ;;  %v3280_v41 = vand.u32 4294901760, %v56849_v51  ;;  %v52958_v27 = vpack.c.bf16 %v56847_v48, %v56849_v51  ;;  %12073 = vrot.lane.b32.xlu0 %v56270_v31, %s56182_s6 }
  0xbb   : > { %50832 = vmatmul.mubr.f32.vlgmr.msra.gmra.mrb[0].mxu1 %v56704_v21  ;;  %v3687_v21 = vand.u32 4294901760, %v3190_v53  ;;  %v3764_v62 = vsub.f32 %v56869_v14, %v3763_v0 }
  0xbc   : > { %52944 = vmatpush3.bf16.msra.mxu1 %v52943_v9  ;;  %50838 = vmatprep.mubr.msk.f32.mxu1 %vm56176_vm1, %v56174_v1  ;;  %v3293_v26 = vsub.f32 %v56847_v48, %v3292_v12  ;;  %v3281_v30 = vsub.f32 %v56849_v51, %v3280_v41  ;;  %v4168_v9 = vsel %vm4163_vm4, %v4158_v56, %v4160_v34 }
  0xbd   : > { %52945 = vmatprep.subr.bf16.mxu1 %v56175_v4  ;;  %v56867_v13 = vsub.f32 %v3190_v53, %v3687_v21  ;;  %v56903_v24 = vpack.c.bf16 %v3687_v21, %v3684_v55  ;;  %v3765_v40 = vand.u32 4294901760, %v3764_v62  ;;  %v4152_v53 = vpop.permute.xlu1 %4151  ;;  %v4178_v23 = vsel %vm234_vm2, %v4168_v9, 0  ;;  %v4156_v21 = vpop.permute.xlu0 %4155  ;;  %12075 = vrot.lane.b32.xlu1 %v56293_v52, %s56182_s6 }
  0xbe   : > { %2607 = vmatmul.mubr.f32.vlgmr.msra.gmra.mrb[0].mxu0 %v56698_v43  ;;  %v3294_v17 = vand.u32 4294901760, %v3293_v26  ;;  %v3282_v20 = vand.u32 4294901760, %v3281_v30  ;;  %v4165_v45 = vsel %vm4163_vm4, %v4150_v47, %v4152_v53  ;;  %v4186_v55 = vand.u32 4294901760, %v4178_v23  ;;  %12065 = vrot.lane.b32.xlu0 %v56277_v38, %s56182_s6 }
  0xbf   : > { %52929 = vmatpush1.bf16.msra.mxu0 %v56725_v29  ;;  %2681 = vmatprep.mubr.f32.mxu0 %v56174_v1  ;;  %v56872_v29 = vand.u32 4294901760, %v56856_v61  ;;  %v52979_v44 = vpack.c.bf16 %v56867_v13, %v56869_v14  ;;  %v4182_v7 = vand.u32 4294901760, %v4165_v45  ;;  %v52966_v37 = vpack.c.bf16 %v3292_v12, %v3280_v41 }
  0xc0   : > { %52949 = vmatprep.subr.bf16.mxu0 %v56839_v54  ;;  %v52954_v46 = vpack.c.bf16 %v3294_v17, %v3282_v20  ;;  %v56950_v26 = vsub.f32 %v4178_v23, %v4186_v55 }
  0xc1   : > { %v3264_v2 = vsub.f32 %v56856_v61, %v56872_v29  ;;  %v4148_v8 = vpop.permute.xlu1 %4147  ;;  %v56953_v18 = vsub.f32 %v4165_v45, %v4182_v7  ;;  %v4162_v35 = vpop.permute.xlu0 %4161  ;;  %12067 = vrot.lane.b32.xlu1 %v56304_v59, %s56182_s6 }
  0xc2   : > { %v4164_v30 = vsel %vm4163_vm4, %v4148_v8, %v4150_v47  ;;  %v4169_v51 = vsel %vm4163_vm4, %v4160_v34, %v4162_v35  ;;  %v4276_v41 = vand.u32 4294901760, %v56950_v26  ;;  %12071 = vrot.lane.b32.xlu0 %v56317_v6, %s56182_s6 }
  0xc3   : > { %50839 = vmatmul.mubr.f32.vlgmr.msra.gmra.mrb[0].mxu1 %v56698_v43  ;;  %v3265_v19 = vand.u32 4294901760, %v3264_v2  ;;  %v4174_v2 = vsel %vm230_vm0, %v49773_v63, 0  ;;  %v4264_v12 = vand.u32 4294901760, %v56953_v18  ;;  %v4184_v20 = vand.u32 4294901760, %v4164_v30 }
  0xc4   : > { %52947 = vmatpush3.bf16.msra.mxu1 %v56749_v42  ;;  %50845 = vmatprep.mubr.msk.f32.mxu1 %vm56176_vm1, %v56174_v1  ;;  %v3770_v42 = vand.u32 4294901760, %v56867_v13  ;;  %v56978_v62 = vand.u32 4294901760, %v4174_v2 }
  0xc5   : > { %52972 = vmatprep.subr.bf16.mxu1 %v56175_v4  ;;  %v4154_v48 = vpop.permute.xlu1 %4153  ;;  %v4265_v14 = vsub.f32 %v56953_v18, %v4264_v12  ;;  %12063 = vrot.lane.b32.xlu1 %v56332_v15, %s56182_s6 }
  0xc6   : > { %2683 = vmatmul.mubr.f32.vlgmr.msra.gmra.mrb[0].mxu0 %v56698_v43  ;;  %v3771_v3 = vsub.f32 %v56867_v13, %v3770_v42  ;;  %v4277_v13 = vsub.f32 %v56950_v26, %v4276_v41  ;;  %12077 = vrot.lane.b32.xlu0 %v56360_v22, %s56182_s6 }
  0xc7   : > { %52951 = vmatpush1.bf16.msra.mxu0 %v56881_v57  ;;  %3260 = vmatprep.mubr.f32.mxu0 %v56174_v1 }
  0xc8   : > { %52953 = vmatprep.subr.bf16.mxu0 %v52952_v49  ;;  %v3772_v5 = vand.u32 4294901760, %v3771_v3  ;;  %v4167_v49 = vsel %vm4163_vm4, %v4156_v21, %v4158_v56  ;;  %v52985_v3 = vpack.c.bf16 %v3770_v42, %v3763_v0  ;;  %v56995_v0 = vsub.f32 %v4164_v30, %v4184_v20 }
  0xc9   : > { %v52998_v30 = vpack.c.bf16 %v56950_v26, %v56953_v18  ;;  %12069 = vrot.lane.b32.xlu1 %v56368_v33, %s56182_s6 }
  0xca   : > { %13063 = vrot.lane.b32.xlu0 %v56272_v32, %s56182_s6 }
  0xcb   : > { %50846 = vmatmul.mubr.f32.vlgmr.msra.gmra.mrb[0].mxu1 %v56698_v43  ;;  %v52976_v43 = vpack.c.bf16 %v3772_v5, %v3765_v40  ;;  %v57000_v40 = vsub.f32 %v4174_v2, %v56978_v62 }
  0xcc   : > { %52974 = vmatpush3.bf16.msra.mxu1 %v56903_v24  ;;  %50852 = vmatprep.mubr.msk.f32.mxu1 %vm56176_vm1, %v56174_v1 }
  0xcd   : > { %52975 = vmatprep.subr.bf16.mxu1 %v56175_v4  ;;  %13065 = vrot.lane.b32.xlu1 %v56353_v28, %s56182_s6 }
  0xce   : > { %3266 = vmatmul.mubr.f32.vlgmr.msra.gmra.mrb[0].mxu0 %v3265_v19  ;;  %13055 = vrot.lane.b32.xlu0 %v56279_v39, %s56182_s6 }
  0xcf   : > { %52955 = vmatpush1.bf16.msra.mxu0 %v52954_v46  ;;  %3356 = vmatprep.mubr.f32.mxu0 %v56174_v1  ;;  %v56985_v46 = vpack.c.bf16 %v4186_v55, %v4182_v7 }
  0xd0   : > { %52957 = vmatprep.subr.bf16.mxu0 %v52956_v25  ;;  %v4266_v25 = vand.u32 4294901760, %v4265_v14 }
  0xd1   : > { %13057 = vrot.lane.b32.xlu1 %v56306_v60, %s56182_s6 }
  0xd2   : > { %13061 = vrot.lane.b32.xlu0 %v56326_v11, %s56182_s6 }
  0xd3   : > { %50853 = vmatmul.mubr.f32.vlgmr.msra.gmra.mrb[0].mxu1 %v3265_v19  ;;  %v4180_v19 = vsel %vm234_vm2, %v4169_v51, 0 }
  0xd4   : > { %52977 = vmatpush3.bf16.msra.mxu1 %v52976_v43  ;;  %50859 = vmatprep.mubr.msk.f32.mxu1 %vm56176_vm1, %v56174_v1  ;;  %v4278_v43 = vand.u32 4294901760, %v4277_v13  ;;  %v53006_v13 = vpack.c.bf16 %v4276_v41, %v4264_v12  ;;  %v49774_v41 = vld [vmem:[%s63392_s1 + $0xd8] sm:$0xff] }
  0xd5   : > { %52978 = vmatprep.subr.bf16.mxu1 %v56175_v4  ;;  %13053 = vrot.lane.b32.xlu1 %v56334_v16, %s56182_s6 }
  0xd6   : > { %3358 = vmatmul.mubr.f32.vlgmr.msra.gmra.mrb[0].mxu0 %v56832_v50  ;;  %13067 = vrot.lane.b32.xlu0 %v56444_v58, %s56182_s6 }
  0xd7   : > { %52959 = vmatpush1.bf16.msra.mxu0 %v52958_v27  ;;  %3436 = vmatprep.mubr.f32.mxu0 %v56174_v1  ;;  %v4270_v27 = vand.u32 4294901760, %v56995_v0 }
  0xd8   : > { %52961 = vmatprep.subr.bf16.mxu0 %v56839_v54 }
  0xd9   : > { %v4271_v23 = vsub.f32 %v56995_v0, %v4270_v27  ;;  %13059 = vrot.lane.b32.xlu1 %v56449_v10, %s56182_s6 }
  0xda   : > { %14052 = vrot.lane.b32.xlu0 %v56270_v31, %s56183_s13 }
  0xdb   : > { %50860 = vmatmul.mubr.f32.vlgmr.msra.gmra.mrb[0].mxu1 %v56832_v50  ;;  %v4272_v55 = vand.u32 4294901760, %v4271_v23 }
  0xdc   : > { %52980 = vmatpush3.bf16.msra.mxu1 %v52979_v44  ;;  %50866 = vmatprep.mubr.msk.f32.mxu1 %vm56176_vm1, %v56174_v1  ;;  %v57012_v44 = vand.u32 4294901760, %v57000_v40 }
  0xdd   : > { %52981 = vmatprep.subr.bf16.mxu1 %v56175_v4  ;;  %14054 = vrot.lane.b32.xlu1 %v56293_v52, %s56183_s13 }
  0xde   : > { %3439 = vmatmul.mubr.f32.vlgmr.msra.gmra.mrb[0].mxu0 %v56856_v61  ;;  %14044 = vrot.lane.b32.xlu0 %v56277_v38, %s56183_s13 }
  0xdf   : > { %52963 = vmatpush1.bf16.msra.mxu0 %v56881_v57  ;;  %3513 = vmatprep.mubr.f32.mxu0 %v56174_v1 }
  0xe0   : > { %52965 = vmatprep.subr.bf16.mxu0 %v52964_v36  ;;  %v4254_v36 = vsub.f32 %v57000_v40, %v57012_v44 }
  0xe1   : > { %14046 = vrot.lane.b32.xlu1 %v56304_v59, %s56183_s13 }
  0xe2   : > { %v4255_v63 = vand.u32 4294901760, %v4254_v36  ;;  %14050 = vrot.lane.b32.xlu0 %v56317_v6, %s56183_s13 }
  0xe3   : > { %50867 = vmatmul.mubr.f32.vlgmr.msra.gmra.mrb[0].mxu1 %v56856_v61  ;;  %v4176_v61 = vsel %vm234_vm2, %v4167_v49, 0 }
  0xe4   : > { %52983 = vmatpush3.bf16.msra.mxu1 %v56903_v24  ;;  %50873 = vmatprep.mubr.msk.f32.mxu1 %vm56176_vm1, %v56174_v1  ;;  %v4188_v17 = vand.u32 4294901760, %v4176_v61 }
  0xe5   : > { %52984 = vmatprep.subr.bf16.mxu1 %v56175_v4  ;;  %14042 = vrot.lane.b32.xlu1 %v56332_v15, %s56183_s13 }
  0xe6   : > { %3517 = vmatmul.mubr.f32.vlgmr.msra.gmra.mrb[0].mxu0 %v56872_v29  ;;  %v56993_v42 = vsub.f32 %v4176_v61, %v4188_v17  ;;  %14056 = vrot.lane.b32.xlu0 %v56360_v22, %s56183_s13 }
  0xe7   : > { %52967 = vmatpush1.bf16.msra.mxu0 %v52966_v37  ;;  %3599 = vmatprep.mubr.f32.mxu0 %v56174_v1 }
  0xe8   : > { %52969 = vmatprep.subr.bf16.mxu0 %v56839_v54  ;;  %v4166_v54 = vsel %vm4163_vm4, %v4152_v53, %v4154_v48  ;;  %v4282_v56 = vand.u32 4294901760, %v56993_v42  ;;  %v57021_v53 = vpack.c.bf16 %v4188_v17, %v4184_v20  ;;  %v53000_v51 = vpack.c.bf16 %v56993_v42, %v56995_v0  ;;  %v5150_v48 = vpop.permute.xlu1 %5149 }
  0xe9   : > { %v4674_v5 = vand.u32 4294901760, %v4166_v54  ;;  %14048 = vrot.lane.b32.xlu1 %v56368_v33, %s56183_s13 }
  0xea   : > { %v4283_v9 = vsub.f32 %v56993_v42, %v4282_v56  ;;  %v5163_v42 = vsel %vm230_vm0, %v49774_v41, 0  ;;  %15042 = vrot.lane.b32.xlu0 %v56272_v32, %s56183_s13 }
  0xeb   : > { %50874 = vmatmul.mubr.f32.vlgmr.msra.gmra.mrb[0].mxu1 %v56872_v29  ;;  %v4677_v29 = vand.u32 4294901760, %v4180_v19  ;;  %v57009_v47 = vsub.f32 %v4166_v54, %v4674_v5 }
  0xec   : > { %52986 = vmatpush3.bf16.msra.mxu1 %v52985_v3  ;;  %50880 = vmatprep.mubr.msk.f32.mxu1 %vm56176_vm1, %v56174_v1  ;;  %v4284_v21 = vand.u32 4294901760, %v4283_v9 }
  0xed   : > { %52987 = vmatprep.subr.bf16.mxu1 %v56175_v4  ;;  %v57007_v34 = vsub.f32 %v4180_v19, %v4677_v29  ;;  %v57037_v8 = vpack.c.bf16 %v4677_v29, %v4674_v5  ;;  %v5142_v19 = vpop.permute.xlu1 %5141  ;;  %15044 = vrot.lane.b32.xlu1 %v56353_v28, %s56183_s13 }
  0xee   : > { %3601 = vmatmul.mubr.f32.vlgmr.msra.gmra.mrb[0].mxu0 %v56832_v50  ;;  %v52996_v37 = vpack.c.bf16 %v4284_v21, %v4272_v55  ;;  %15034 = vrot.lane.b32.xlu0 %v56279_v39, %s56183_s13 }
  0xef   : > { %52971 = vmatpush1.bf16.msra.mxu0 %v56881_v57  ;;  %3675 = vmatprep.mubr.f32.mxu0 %v56174_v1  ;;  %v52994_v57 = vpack.c.bf16 %v4278_v43, %v4266_v25  ;;  %v4760_v45 = vand.u32 4294901760, %v57007_v34  ;;  %v53021_v20 = vpack.c.bf16 %v57007_v34, %v57009_v47 }
  0xf0   : > { %52991 = vmatprep.subr.bf16.mxu0 %v56985_v46 }
  0xf1   : > { %v4761_v7 = vsub.f32 %v57007_v34, %v4760_v45  ;;  %v5138_v43 = vpop.permute.xlu1 %5137  ;;  %15036 = vrot.lane.b32.xlu1 %v56306_v60, %s56183_s13 }
  0xf2   : > { %15040 = vrot.lane.b32.xlu0 %v56326_v11, %s56183_s13 }
  0xf3   : > { %50881 = vmatmul.mubr.f32.vlgmr.msra.gmra.mrb[0].mxu1 %v56832_v50  ;;  %v4762_v35 = vand.u32 4294901760, %v4761_v7 }
  0xf4   : > { %52989 = vmatpush3.bf16.msra.mxu1 %v56903_v24  ;;  %50887 = vmatprep.mubr.msk.f32.mxu1 %vm56176_vm1, %v56174_v1  ;;  %v4753_v24 = vand.u32 4294901760, %v57009_v47 }
  0xf5   : > { %53014 = vmatprep.subr.bf16.mxu1 %v56175_v4  ;;  %15032 = vrot.lane.b32.xlu1 %v56334_v16, %s56183_s13 }
  0xf6   : > { %3677 = vmatmul.mubr.f32.vlgmr.msra.gmra.mrb[0].mxu0 %v56832_v50  ;;  %v4754_v49 = vsub.f32 %v57009_v47, %v4753_v24  ;;  %v53027_v7 = vpack.c.bf16 %v4760_v45, %v4753_v24  ;;  %15046 = vrot.lane.b32.xlu0 %v56444_v58, %s56183_s13 }
  0xf7   : > { %52993 = vmatpush1.bf16.msra.mxu0 %v57021_v53  ;;  %4250 = vmatprep.mubr.f32.mxu0 %v56174_v1 }
  0xf8   : > { %52995 = vmatprep.subr.bf16.mxu0 %v52994_v57  ;;  %v4755_v61 = vand.u32 4294901760, %v4754_v49  ;;  %v57118_v49 = vand.u32 4294901760, %v5163_v42 }
  0xf9   : > { %15038 = vrot.lane.b32.xlu1 %v56449_v10, %s56183_s13 }
  0xfa   : > { %v53018_v2 = vpack.c.bf16 %v4762_v35, %v4755_v61  ;;  %v57144_v61 = vsub.f32 %v5163_v42, %v57118_v49  ;;  %16031 = vrot.lane.b32.xlu0 %v56270_v31, %s56184_s18 }
  0xfb   : > { %50888 = vmatmul.mubr.f32.vlgmr.msra.gmra.mrb[0].mxu1 %v56832_v50  ;;  %v5148_v50 = vpop.permute.xlu0 %5147 }
  0xfc   : > { %53016 = vmatpush3.bf16.msra.mxu1 %v57037_v8  ;;  %50894 = vmatprep.mubr.msk.f32.mxu1 %vm56176_vm1, %v56174_v1  ;;  %v5157_v3 = vsel %vm4163_vm4, %v5148_v50, %v5150_v48 }
  0xfd   : > { %53017 = vmatprep.subr.bf16.mxu1 %v56175_v4  ;;  %v5167_v54 = vsel %vm234_vm2, %v5157_v3, 0  ;;  %16033 = vrot.lane.b32.xlu1 %v56293_v52, %s56184_s18 }
  0xfe   : > { %4256 = vmatmul.mubr.f32.vlgmr.msra.gmra.mrb[0].mxu0 %v4255_v63  ;;  %v5175_v5 = vand.u32 4294901760, %v5167_v54  ;;  %16023 = vrot.lane.b32.xlu0 %v56277_v38, %s56184_s18 }
  0xff   : > { %52997 = vmatpush1.bf16.msra.mxu0 %v52996_v37  ;;  %4346 = vmatprep.mubr.f32.mxu0 %v56174_v1  ;;  %v5140_v17 = vpop.permute.xlu0 %5139 }
 0x100   : > { %52999 = vmatprep.subr.bf16.mxu0 %v52998_v30  ;;  %v5154_v14 = vsel %vm4163_vm4, %v5140_v17, %v5142_v19  ;;  %v57084_v18 = vsub.f32 %v5167_v54, %v5175_v5  ;;  %v5153_v23 = vsel %vm4163_vm4, %v5138_v43, %v5140_v17 }
 0x101   : > { %v5171_v25 = vand.u32 4294901760, %v5154_v14  ;;  %v5173_v55 = vand.u32 4294901760, %v5153_v23  ;;  %16025 = vrot.lane.b32.xlu1 %v56304_v59, %s56184_s18 }
 0x102   : > { %v5265_v36 = vand.u32 4294901760, %v57084_v18  ;;  %16029 = vrot.lane.b32.xlu0 %v56317_v6, %s56184_s18 }
 0x103   : > { %50895 = vmatmul.mubr.f32.vlgmr.msra.gmra.mrb[0].mxu1 %v4255_v63  ;;  %v5146_v29 = vpop.permute.xlu0 %5145  ;;  %v57087_v12 = vsub.f32 %v5154_v14, %v5171_v25  ;;  %v57127_v37 = vpack.c.bf16 %v5175_v5, %v5171_v25  ;;  %v57137_v24 = vsub.f32 %v5153_v23, %v5173_v55 }
 0x104   : > { %53019 = vmatpush3.bf16.msra.mxu1 %v53018_v2  ;;  %50901 = vmatprep.mubr.msk.f32.mxu1 %vm56176_vm1, %v56174_v1  ;;  %v5156_v26 = vsel %vm4163_vm4, %v5146_v29, %v5148_v50  ;;  %v5266_v47 = vsub.f32 %v57084_v18, %v5265_v36 }
 0x105   : > { %53020 = vmatprep.subr.bf16.mxu1 %v56175_v4  ;;  %v5165_v9 = vsel %vm234_vm2, %v5156_v26, 0  ;;  %v53040_v23 = vpack.c.bf16 %v57084_v18, %v57087_v12  ;;  %v49775_v18 = vld [vmem:[%s63392_s1 + $0x18] sm:$0xff]  ;;  %16021 = vrot.lane.b32.xlu1 %v56332_v15, %s56184_s18 }
 0x106   : > { %4348 = vmatmul.mubr.f32.vlgmr.msra.gmra.mrb[0].mxu0 %v56978_v62  ;;  %v5177_v21 = vand.u32 4294901760, %v5165_v9  ;;  %v5267_v2 = vand.u32 4294901760, %v5266_v47  ;;  %16035 = vrot.lane.b32.xlu0 %v56360_v22, %s56184_s18 }
 0x107   : > { %53001 = vmatpush1.bf16.msra.mxu0 %v53000_v51  ;;  %4426 = vmatprep.mubr.f32.mxu0 %v56174_v1  ;;  %v5152_v57 = vpop.permute.xlu0 %5151  ;;  %v5259_v51 = vand.u32 4294901760, %v57137_v24 }
 0x108   : > { %53003 = vmatprep.subr.bf16.mxu0 %v56985_v46  ;;  %v5158_v0 = vsel %vm4163_vm4, %v5150_v48, %v5152_v57  ;;  %v57135_v45 = vsub.f32 %v5165_v9, %v5177_v21 }
 0x109   : > { %v5260_v54 = vsub.f32 %v57137_v24, %v5259_v51  ;;  %16027 = vrot.lane.b32.xlu1 %v56368_v33, %s56184_s18 }
 0x10a   : > { %v5271_v50 = vand.u32 4294901760, %v57135_v45  ;;  %17021 = vrot.lane.b32.xlu0 %v56272_v32, %s56184_s18 }
 0x10b   : > { %50902 = vmatmul.mubr.f32.vlgmr.msra.gmra.mrb[0].mxu1 %v56978_v62  ;;  %v5261_v5 = vand.u32 4294901760, %v5260_v54 }
 0x10c   : > { %53022 = vmatpush3.bf16.msra.mxu1 %v53021_v20  ;;  %50908 = vmatprep.mubr.msk.f32.mxu1 %vm56176_vm1, %v56174_v1  ;;  %v57160_v20 = vand.u32 4294901760, %v57144_v61  ;;  %v5272_v3 = vsub.f32 %v57135_v45, %v5271_v50 }
 0x10d   : > { %53023 = vmatprep.subr.bf16.mxu1 %v56175_v4  ;;  %17023 = vrot.lane.b32.xlu1 %v56353_v28, %s56184_s18 }
 0x10e   : > { %4429 = vmatmul.mubr.f32.vlgmr.msra.gmra.mrb[0].mxu0 %v57000_v40  ;;  %v5273_v29 = vand.u32 4294901760, %v5272_v3  ;;  %17013 = vrot.lane.b32.xlu0 %v56279_v39, %s56184_s18 }
 0x10f   : > { %53005 = vmatpush1.bf16.msra.mxu0 %v57021_v53  ;;  %4503 = vmatprep.mubr.f32.mxu0 %v56174_v1 }
 0x110   : > { %53007 = vmatprep.subr.bf16.mxu0 %v53006_v13  ;;  %v5243_v13 = vsub.f32 %v57144_v61, %v57160_v20 }
 0x111   : > { %17015 = vrot.lane.b32.xlu1 %v56306_v60, %s56184_s18 }
 0x112   : > { %v5244_v41 = vand.u32 4294901760, %v5243_v13  ;;  %v6153_v13 = vsel %vm230_vm0, %v49775_v18, 0  ;;  %17019 = vrot.lane.b32.xlu0 %v56326_v11, %s56184_s18 }
 0x113   : > { %50909 = vmatmul.mubr.f32.vlgmr.msra.gmra.mrb[0].mxu1 %v57000_v40  ;;  %v53008_v40 = vpack.c.bf16 %v4282_v56, %v4270_v27  ;;  %v5144_v56 = vpop.permute.xlu1 %5143  ;;  %v5253_v27 = vand.u32 4294901760, %v57087_v12 }
 0x114   : > { %53025 = vmatpush3.bf16.msra.mxu1 %v57037_v8  ;;  %50915 = vmatprep.mubr.msk.f32.mxu1 %vm56176_vm1, %v56174_v1  ;;  %v5155_v63 = vsel %vm4163_vm4, %v5142_v19, %v5144_v56  ;;  %v57171_v19 = vpack.c.bf16 %v5177_v21, %v5173_v55  ;;  %vm29890_vm4 = vcmask 457728  }
 0x115   : > { %53026 = vmatprep.subr.bf16.mxu1 %v56175_v4  ;;  %v5254_v34 = vsub.f32 %v57087_v12, %v5253_v27  ;;  %v5663_v35 = vand.u32 4294901760, %v5155_v63  ;;  %v53048_v47 = vpack.c.bf16 %v5265_v36, %v5253_v27  ;;  %v53050_v27 = vpack.c.bf16 %v5271_v50, %v5259_v51  ;;  %17011 = vrot.lane.b32.xlu1 %v56334_v16, %s56184_s18 }
 0x116   : > { %4507 = vmatmul.mubr.f32.vlgmr.msra.gmra.mrb[0].mxu0 %v57012_v44  ;;  %17025 = vrot.lane.b32.xlu0 %v56444_v58, %s56184_s18 }
 0x117   : > { %53009 = vmatpush1.bf16.msra.mxu0 %v53008_v40  ;;  %4589 = vmatprep.mubr.f32.mxu0 %v56174_v1  ;;  %v5255_v30 = vand.u32 4294901760, %v5254_v34  ;;  %v57157_v17 = vsub.f32 %v5155_v63, %v5663_v35  ;;  %v53038_v40 = vpack.c.bf16 %v5273_v29, %v5261_v5  ;;  %v6139_v56 = vpop.permute.xlu1 %6138 }
 0x118   : > { %53011 = vmatprep.subr.bf16.mxu0 %v56985_v46  ;;  %v5169_v46 = vsel %vm234_vm2, %v5158_v0, 0  ;;  %v53042_v0 = vpack.c.bf16 %v57135_v45, %v57137_v24 }
 0x119   : > { %v5742_v14 = vand.u32 4294901760, %v57157_v17  ;;  %17017 = vrot.lane.b32.xlu1 %v56449_v10, %s56184_s18 }
 0x11a   : > { %18010 = vrot.lane.b32.xlu0 %v56270_v31, %s56185_s23 }
 0x11b   : > { %50916 = vmatmul.mubr.f32.vlgmr.msra.gmra.mrb[0].mxu1 %v57012_v44  ;;  %v5666_v44 = vand.u32 4294901760, %v5169_v46  ;;  %v5743_v26 = vsub.f32 %v57157_v17, %v5742_v14 }
 0x11c   : > { %53028 = vmatpush3.bf16.msra.mxu1 %v53027_v7  ;;  %50922 = vmatprep.mubr.msk.f32.mxu1 %vm56176_vm1, %v56174_v1 }
 0x11d   : > { %53029 = vmatprep.subr.bf16.mxu1 %v56175_v4  ;;  %v57155_v48 = vsub.f32 %v5169_v46, %v5666_v44  ;;  %v57193_v43 = vpack.c.bf16 %v5666_v44, %v5663_v35  ;;  %v5744_v9 = vand.u32 4294901760, %v5743_v26  ;;  %v6131_v46 = vpop.permute.xlu1 %6130  ;;  %v57262_v26 = vand.u32 4294901760, %v6153_v13  ;;  %18012 = vrot.lane.b32.xlu1 %v56293_v52, %s56185_s23 }
 0x11e   : > { %4591 = vmatmul.mubr.f32.vlgmr.msra.gmra.mrb[0].mxu0 %v56978_v62 }
 0x11f   : > { %53013 = vmatpush1.bf16.msra.mxu0 %v57021_v53  ;;  %4665 = vmatprep.mubr.f32.mxu0 %v56174_v1  ;;  %v53036_v53 = vpack.c.bf16 %v5267_v2, %v5255_v30  ;;  %v53063_v55 = vpack.c.bf16 %v57155_v48, %v57157_v17 }
 0x120   : > { %53033 = vmatprep.subr.bf16.mxu0 %v57127_v37 }
 0x121   : > { %v6127_v2 = vpop.permute.xlu1 %6126  ;;  %18004 = vrot.lane.b32.xlu1 %v56304_v59, %s56185_s23 }
 0x123   : > { %50923 = vmatmul.mubr.f32.vlgmr.msra.gmra.mrb[0].mxu1 %v56978_v62 }
 0x124   : > { %53031 = vmatpush3.bf16.msra.mxu1 %v57037_v8  ;;  %50929 = vmatprep.mubr.msk.f32.mxu1 %vm56176_vm1, %v56174_v1  ;;  %v5749_v8 = vand.u32 4294901760, %v57155_v48 }
 0x125   : > { %53056 = vmatprep.subr.bf16.mxu1 %v56175_v4  ;;  %v6133_v45 = vpop.permute.xlu1 %6132  ;;  %18000 = vrot.lane.b32.xlu1 %v56332_v15, %s56185_s23 }
 0x126   : > { %4667 = vmatmul.mubr.f32.vlgmr.msra.gmra.mrb[0].mxu0 %v56978_v62  ;;  %v5750_v25 = vsub.f32 %v57155_v48, %v5749_v8 }
 0x127   : > { %53035 = vmatpush1.bf16.msra.mxu0 %v57171_v19  ;;  %5239 = vmatprep.mubr.f32.mxu0 %v56174_v1 }
 0x128   : > { %53037 = vmatprep.subr.bf16.mxu0 %v53036_v53  ;;  %v5751_v57 = vand.u32 4294901760, %v5750_v25  ;;  %v53069_v25 = vpack.c.bf16 %v5749_v8, %v5742_v14 }
 0x129   : > { %18006 = vrot.lane.b32.xlu1 %v56368_v33, %s56185_s23 }
 0x12a   : > { %v53060_v42 = vpack.c.bf16 %v5751_v57, %v5744_v9  ;;  %v57284_v9 = vsub.f32 %v6153_v13, %v57262_v26 }
 0x12b   : > { %50930 = vmatmul.mubr.f32.vlgmr.msra.gmra.mrb[0].mxu1 %v56978_v62  ;;  %v6137_v62 = vpop.permute.xlu0 %6136  ;;  %18002 = vrot.lane.b32.xlu0 %v56277_v38, %s56185_s23 }
 0x12c   : > { %53058 = vmatpush3.bf16.msra.mxu1 %v57193_v43  ;;  %50936 = vmatprep.mubr.msk.f32.mxu1 %vm56176_vm1, %v56174_v1  ;;  %v6147_v7 = vsel %vm6142_vm5, %v6137_v62, %v6139_v56 }
 0x12d   : > { %53059 = vmatprep.subr.bf16.mxu1 %v56175_v4  ;;  %v6157_v63 = vsel %vm234_vm2, %v6147_v7, 0  ;;  %19002 = vrot.lane.b32.xlu1 %v56353_v28, %s56185_s23 }
 0x12e   : > { %5245 = vmatmul.mubr.f32.vlgmr.msra.gmra.mrb[0].mxu0 %v5244_v41  ;;  %v6165_v35 = vand.u32 4294901760, %v6157_v63 }
 0x12f   : > { %53039 = vmatpush1.bf16.msra.mxu0 %v53038_v40  ;;  %5335 = vmatprep.mubr.f32.mxu0 %v56174_v1  ;;  %v6129_v21 = vpop.permute.xlu0 %6128 }
 0x130   : > { %53041 = vmatprep.subr.bf16.mxu0 %v53040_v23  ;;  %v6144_v34 = vsel %vm6142_vm5, %v6129_v21, %v6131_v46  ;;  %v57234_v3 = vsub.f32 %v6157_v63, %v6165_v35  ;;  %v6143_v54 = vsel %vm6142_vm5, %v6127_v2, %v6129_v21  ;;  %18008 = vrot.lane.b32.xlu0 %v56317_v6, %s56185_s23 }
 0x131   : > { %v6161_v30 = vand.u32 4294901760, %v6144_v34  ;;  %v6163_v5 = vand.u32 4294901760, %v6143_v54 }
 0x132   : > { %v6255_v51 = vand.u32 4294901760, %v57234_v3 }
 0x133   : > { %50937 = vmatmul.mubr.f32.vlgmr.msra.gmra.mrb[0].mxu1 %v5244_v41  ;;  %v6135_v44 = vpop.permute.xlu0 %6134  ;;  %v57237_v12 = vsub.f32 %v6144_v34, %v6161_v30  ;;  %v57269_v40 = vpack.c.bf16 %v6165_v35, %v6161_v30  ;;  %v57279_v14 = vsub.f32 %v6143_v54, %v6163_v5 }
 0x134   : > { %53061 = vmatpush3.bf16.msra.mxu1 %v53060_v42  ;;  %50943 = vmatprep.mubr.msk.f32.mxu1 %vm56176_vm1, %v56174_v1  ;;  %v6146_v53 = vsel %vm6142_vm5, %v6135_v44, %v6137_v62  ;;  %v6256_v48 = vsub.f32 %v57234_v3, %v6255_v51 }
 0x135   : > { %53062 = vmatprep.subr.bf16.mxu1 %v56175_v4  ;;  %v6243_v50 = vand.u32 4294901760, %v57237_v12  ;;  %v53082_v54 = vpack.c.bf16 %v57234_v3, %v57237_v12  ;;  %18014 = vrot.lane.b32.xlu0 %v56360_v22, %s56185_s23 }
 0x136   : > { %5337 = vmatmul.mubr.f32.vlgmr.msra.gmra.mrb[0].mxu0 %v57118_v49  ;;  %v6257_v42 = vand.u32 4294901760, %v6256_v48 }
 0x137   : > { %53043 = vmatpush1.bf16.msra.mxu0 %v53042_v0  ;;  %5415 = vmatprep.mubr.f32.mxu0 %v56174_v1  ;;  %v6141_v36 = vpop.permute.xlu0 %6140  ;;  %v6244_v17 = vsub.f32 %v57237_v12, %v6243_v50  ;;  %v6249_v0 = vand.u32 4294901760, %v57279_v14  ;;  %v53090_v48 = vpack.c.bf16 %v6255_v51, %v6243_v50  ;;  %v49776_v51 = vld [vmem:[%s63392_s1 + $0xe0] sm:$0xff] }
 0x138   : > { %53045 = vmatprep.subr.bf16.mxu0 %v57127_v37  ;;  %v6148_v24 = vsel %vm6142_vm5, %v6139_v56, %v6141_v36 }
 0x139   : > { %v6159_v41 = vsel %vm234_vm2, %v6148_v24, 0  ;;  %v6245_v23 = vand.u32 4294901760, %v6244_v17  ;;  %v6250_v63 = vsub.f32 %v57279_v14, %v6249_v0  ;;  %19000 = vrot.lane.b32.xlu0 %v56272_v32, %s56185_s23 }
 0x13b   : > { %50944 = vmatmul.mubr.f32.vlgmr.msra.gmra.mrb[0].mxu1 %v57118_v49  ;;  %v6251_v35 = vand.u32 4294901760, %v6250_v63 }
 0x13c   : > { %53064 = vmatpush3.bf16.msra.mxu1 %v53063_v55  ;;  %50950 = vmatprep.mubr.msk.f32.mxu1 %vm56176_vm1, %v56174_v1  ;;  %v57296_v55 = vand.u32 4294901760, %v57284_v9 }
 0x13d   : > { %53065 = vmatprep.subr.bf16.mxu1 %v56175_v4 }
 0x13e   : > { %5418 = vmatmul.mubr.f32.vlgmr.msra.gmra.mrb[0].mxu0 %v57144_v61 }
 0x13f   : > { %53047 = vmatpush1.bf16.msra.mxu0 %v57171_v19  ;;  %5492 = vmatprep.mubr.f32.mxu0 %v56174_v1 }
 0x140   : > { %53049 = vmatprep.subr.bf16.mxu0 %v53048_v47  ;;  %v6233_v47 = vsub.f32 %v57284_v9, %v57296_v55 }
 0x142   : > { %v6234_v18 = vand.u32 4294901760, %v6233_v47 }
 0x143   : > { %50951 = vmatmul.mubr.f32.vlgmr.msra.gmra.mrb[0].mxu1 %v57144_v61  ;;  %v6155_v61 = vsel %vm234_vm2, %v6146_v53, 0 }
 0x144   : > { %53067 = vmatpush3.bf16.msra.mxu1 %v57193_v43  ;;  %50957 = vmatprep.mubr.msk.f32.mxu1 %vm56176_vm1, %v56174_v1  ;;  %v6167_v29 = vand.u32 4294901760, %v6155_v61 }
 0x145   : > { %53068 = vmatprep.subr.bf16.mxu1 %v56175_v4 }
 0x146   : > { %5496 = vmatmul.mubr.f32.vlgmr.msra.gmra.mrb[0].mxu0 %v57160_v20  ;;  %v57277_v8 = vsub.f32 %v6155_v61, %v6167_v29 }
 0x147   : > { %53051 = vmatpush1.bf16.msra.mxu0 %v53050_v27  ;;  %5578 = vmatprep.mubr.f32.mxu0 %v56174_v1 }
 0x148   : > { %53053 = vmatprep.subr.bf16.mxu0 %v57127_v37  ;;  %v6145_v37 = vsel %vm6142_vm5, %v6131_v46, %v6133_v45  ;;  %v6261_v62 = vand.u32 4294901760, %v57277_v8  ;;  %v57305_v46 = vpack.c.bf16 %v6167_v29, %v6163_v5  ;;  %v53084_v24 = vpack.c.bf16 %v57277_v8, %v57279_v14  ;;  %v7129_v45 = vpop.permute.xlu1 %7128  ;;  %18994 = vrot.lane.b32.xlu1 %v56306_v60, %s56185_s23 }
 0x149   : > { %v6653_v57 = vand.u32 4294901760, %v6145_v37 }
 0x14a   : > { %v6262_v7 = vsub.f32 %v57277_v8, %v6261_v62  ;;  %v7142_v8 = vsel %vm230_vm0, %v49776_v51, 0 }
 0x14b   : > { %50958 = vmatmul.mubr.f32.vlgmr.msra.gmra.mrb[0].mxu1 %v57160_v20  ;;  %v6656_v20 = vand.u32 4294901760, %v6159_v41  ;;  %v57293_v21 = vsub.f32 %v6145_v37, %v6653_v57 }
 0x14c   : > { %53070 = vmatpush3.bf16.msra.mxu1 %v53069_v25  ;;  %50964 = vmatprep.mubr.msk.f32.mxu1 %vm56176_vm1, %v56174_v1  ;;  %v6263_v44 = vand.u32 4294901760, %v6262_v7 }
 0x14d   : > { %53071 = vmatprep.subr.bf16.mxu1 %v56175_v4  ;;  %v57291_v56 = vsub.f32 %v6159_v41, %v6656_v20  ;;  %v57321_v2 = vpack.c.bf16 %v6656_v20, %v6653_v57  ;;  %v7121_v41 = vpop.permute.xlu1 %7120  ;;  %18990 = vrot.lane.b32.xlu1 %v56334_v16, %s56185_s23 }
 0x14e   : > { %5580 = vmatmul.mubr.f32.vlgmr.msra.gmra.mrb[0].mxu0 %v57118_v49  ;;  %v53080_v27 = vpack.c.bf16 %v6263_v44, %v6251_v35 }
 0x14f   : > { %53055 = vmatpush1.bf16.msra.mxu0 %v57171_v19  ;;  %5654 = vmatprep.mubr.f32.mxu0 %v56174_v1  ;;  %v53078_v19 = vpack.c.bf16 %v6257_v42, %v6245_v23  ;;  %v6739_v34 = vand.u32 4294901760, %v57291_v56  ;;  %v53105_v5 = vpack.c.bf16 %v57291_v56, %v57293_v21 }
 0x150   : > { %53075 = vmatprep.subr.bf16.mxu0 %v57269_v40 }
 0x151   : > { %v6740_v30 = vsub.f32 %v57291_v56, %v6739_v34  ;;  %v7117_v42 = vpop.permute.xlu1 %7116  ;;  %18996 = vrot.lane.b32.xlu1 %v56449_v10, %s56185_s23 }
 0x153   : > { %50965 = vmatmul.mubr.f32.vlgmr.msra.gmra.mrb[0].mxu1 %v57118_v49  ;;  %v6741_v36 = vand.u32 4294901760, %v6740_v30 }
 0x154   : > { %53073 = vmatpush3.bf16.msra.mxu1 %v57193_v43  ;;  %50971 = vmatprep.mubr.msk.f32.mxu1 %vm56176_vm1, %v56174_v1  ;;  %v6732_v43 = vand.u32 4294901760, %v57293_v21 }
 0x155   : > { %53098 = vmatprep.subr.bf16.mxu1 %v56175_v4 }
 0x156   : > { %5656 = vmatmul.mubr.f32.vlgmr.msra.gmra.mrb[0].mxu0 %v57118_v49  ;;  %v6733_v53 = vsub.f32 %v57293_v21, %v6732_v43  ;;  %v53111_v30 = vpack.c.bf16 %v6739_v34, %v6732_v43 }
 0x157   : > { %53077 = vmatpush1.bf16.msra.mxu0 %v57305_v46  ;;  %6229 = vmatprep.mubr.f32.mxu0 %v56174_v1 }
 0x158   : > { %53079 = vmatprep.subr.bf16.mxu0 %v53078_v19  ;;  %v6734_v61 = vand.u32 4294901760, %v6733_v53  ;;  %v57402_v53 = vand.u32 4294901760, %v7142_v8 }
 0x15a   : > { %v53102_v13 = vpack.c.bf16 %v6741_v36, %v6734_v61  ;;  %v57428_v61 = vsub.f32 %v7142_v8, %v57402_v53 }
 0x15b   : > { %50972 = vmatmul.mubr.f32.vlgmr.msra.gmra.mrb[0].mxu1 %v57118_v49  ;;  %v7127_v49 = vpop.permute.xlu0 %7126  ;;  %18992 = vrot.lane.b32.xlu0 %v56279_v39, %s56185_s23 }
 0x15c   : > { %53100 = vmatpush3.bf16.msra.mxu1 %v57321_v2  ;;  %50978 = vmatprep.mubr.msk.f32.mxu1 %vm56176_vm1, %v56174_v1  ;;  %v7136_v25 = vsel %vm6142_vm5, %v7127_v49, %v7129_v45 }
 0x15d   : > { %53101 = vmatprep.subr.bf16.mxu1 %v56175_v4  ;;  %v7146_v37 = vsel %vm234_vm2, %v7136_v25, 0 }
 0x15e   : > { %6235 = vmatmul.mubr.f32.vlgmr.msra.gmra.mrb[0].mxu0 %v6234_v18  ;;  %v7154_v57 = vand.u32 4294901760, %v7146_v37 }
 0x15f   : > { %53081 = vmatpush1.bf16.msra.mxu0 %v53080_v27  ;;  %6325 = vmatprep.mubr.f32.mxu0 %v56174_v1  ;;  %v7119_v29 = vpop.permute.xlu0 %7118 }
 0x160   : > { %53083 = vmatprep.subr.bf16.mxu0 %v53082_v54  ;;  %v7133_v17 = vsel %vm6142_vm5, %v7119_v29, %v7121_v41  ;;  %v57368_v12 = vsub.f32 %v7146_v37, %v7154_v57  ;;  %v7132_v63 = vsel %vm6142_vm5, %v7117_v42, %v7119_v29  ;;  %18998 = vrot.lane.b32.xlu0 %v56326_v11, %s56185_s23 }
 0x161   : > { %v7150_v23 = vand.u32 4294901760, %v7133_v17  ;;  %v7152_v35 = vand.u32 4294901760, %v7132_v63 }
 0x162   : > { %v7244_v47 = vand.u32 4294901760, %v57368_v12 }
 0x163   : > { %50979 = vmatmul.mubr.f32.vlgmr.msra.gmra.mrb[0].mxu1 %v6234_v18  ;;  %v7125_v20 = vpop.permute.xlu0 %7124  ;;  %v57371_v50 = vsub.f32 %v7133_v17, %v7150_v23  ;;  %v57411_v27 = vpack.c.bf16 %v7154_v57, %v7150_v23  ;;  %v57421_v43 = vsub.f32 %v7132_v63, %v7152_v35 }
 0x164   : > { %53103 = vmatpush3.bf16.msra.mxu1 %v53102_v13  ;;  %50985 = vmatprep.mubr.msk.f32.mxu1 %vm56176_vm1, %v56174_v1  ;;  %v7135_v3 = vsel %vm6142_vm5, %v7125_v20, %v7127_v49  ;;  %v7245_v21 = vsub.f32 %v57368_v12, %v7244_v47 }
 0x165   : > { %53104 = vmatprep.subr.bf16.mxu1 %v56175_v4  ;;  %v7144_v7 = vsel %vm234_vm2, %v7135_v3, 0  ;;  %v53124_v63 = vpack.c.bf16 %v57368_v12, %v57371_v50  ;;  %v49777_v12 = vld [vmem:[%s63392_s1 + $0x20] sm:$0xff]  ;;  %19004 = vrot.lane.b32.xlu0 %v56444_v58, %s56185_s23 }
 0x166   : > { %6327 = vmatmul.mubr.f32.vlgmr.msra.gmra.mrb[0].mxu0 %v57262_v26  ;;  %v7156_v44 = vand.u32 4294901760, %v7144_v7  ;;  %v7246_v13 = vand.u32 4294901760, %v7245_v21 }
 0x167   : > { %53085 = vmatpush1.bf16.msra.mxu0 %v53084_v24  ;;  %6405 = vmatprep.mubr.f32.mxu0 %v56174_v1  ;;  %v7131_v19 = vpop.permute.xlu0 %7130  ;;  %v7238_v24 = vand.u32 4294901760, %v57421_v43 }
 0x168   : > { %53087 = vmatprep.subr.bf16.mxu0 %v57269_v40  ;;  %v7137_v14 = vsel %vm6142_vm5, %v7129_v45, %v7131_v19  ;;  %v57419_v34 = vsub.f32 %v7144_v7, %v7156_v44 }
 0x169   : > { %v7239_v37 = vsub.f32 %v57421_v43, %v7238_v24  ;;  %19989 = vrot.lane.b32.xlu0 %v56270_v31, %s56186_s28 }
 0x16a   : > { %v7250_v49 = vand.u32 4294901760, %v57419_v34 }
 0x16b   : > { %50986 = vmatmul.mubr.f32.vlgmr.msra.gmra.mrb[0].mxu1 %v57262_v26  ;;  %v7240_v57 = vand.u32 4294901760, %v7239_v37 }
 0x16c   : > { %53106 = vmatpush3.bf16.msra.mxu1 %v53105_v5  ;;  %50992 = vmatprep.mubr.msk.f32.mxu1 %vm56176_vm1, %v56174_v1  ;;  %v57444_v5 = vand.u32 4294901760, %v57428_v61  ;;  %v7251_v25 = vsub.f32 %v57419_v34, %v7250_v49 }
 0x16d   : > { %53107 = vmatprep.subr.bf16.mxu1 %v56175_v4 }
 0x16e   : > { %6408 = vmatmul.mubr.f32.vlgmr.msra.gmra.mrb[0].mxu0 %v57284_v9  ;;  %v7252_v20 = vand.u32 4294901760, %v7251_v25 }
 0x16f   : > { %53089 = vmatpush1.bf16.msra.mxu0 %v57305_v46  ;;  %6482 = vmatprep.mubr.f32.mxu0 %v56174_v1 }
 0x170   : > { %53091 = vmatprep.subr.bf16.mxu0 %v53090_v48  ;;  %v7222_v48 = vsub.f32 %v57428_v61, %v57444_v5 }
 0x172   : > { %v7223_v51 = vand.u32 4294901760, %v7222_v48  ;;  %v8132_v48 = vsel %vm230_vm0, %v49777_v12, 0 }
 0x173   : > { %50993 = vmatmul.mubr.f32.vlgmr.msra.gmra.mrb[0].mxu1 %v57284_v9  ;;  %v53092_v9 = vpack.c.bf16 %v6261_v62, %v6249_v0  ;;  %v7123_v62 = vpop.permute.xlu1 %7122  ;;  %v7232_v0 = vand.u32 4294901760, %v57371_v50  ;;  %19991 = vrot.lane.b32.xlu1 %v56293_v52, %s56186_s28 }
 0x174   : > { %53109 = vmatpush3.bf16.msra.mxu1 %v57321_v2  ;;  %50999 = vmatprep.mubr.msk.f32.mxu1 %vm56176_vm1, %v56174_v1  ;;  %v7134_v18 = vsel %vm6142_vm5, %v7121_v41, %v7123_v62  ;;  %v57455_v41 = vpack.c.bf16 %v7156_v44, %v7152_v35  ;;  %vm31869_vm5 = vcmask 449536  }
 0x175   : > { %53110 = vmatprep.subr.bf16.mxu1 %v56175_v4  ;;  %v7233_v56 = vsub.f32 %v57371_v50, %v7232_v0  ;;  %v7642_v36 = vand.u32 4294901760, %v7134_v18  ;;  %v53132_v21 = vpack.c.bf16 %v7244_v47, %v7232_v0  ;;  %v53134_v0 = vpack.c.bf16 %v7250_v49, %v7238_v24 }
 0x176   : > { %6486 = vmatmul.mubr.f32.vlgmr.msra.gmra.mrb[0].mxu0 %v57296_v55 }
 0x177   : > { %53093 = vmatpush1.bf16.msra.mxu0 %v53092_v9  ;;  %6568 = vmatprep.mubr.f32.mxu0 %v56174_v1  ;;  %v7234_v54 = vand.u32 4294901760, %v7233_v56  ;;  %v57441_v29 = vsub.f32 %v7134_v18, %v7642_v36  ;;  %v53122_v9 = vpack.c.bf16 %v7252_v20, %v7240_v57  ;;  %v8118_v62 = vpop.permute.xlu1 %8117 }
 0x178   : > { %53095 = vmatprep.subr.bf16.mxu0 %v57269_v40  ;;  %v7148_v40 = vsel %vm234_vm2, %v7137_v14, 0  ;;  %v53126_v14 = vpack.c.bf16 %v57419_v34, %v57421_v43  ;;  %19983 = vrot.lane.b32.xlu1 %v56304_v59, %s56186_s28 }
 0x179   : > { %v7721_v17 = vand.u32 4294901760, %v57441_v29 }
 0x17b   : > { %51000 = vmatmul.mubr.f32.vlgmr.msra.gmra.mrb[0].mxu1 %v57296_v55  ;;  %v7645_v55 = vand.u32 4294901760, %v7148_v40  ;;  %v7722_v3 = vsub.f32 %v57441_v29, %v7721_v17 }
 0x17c   : > { %53112 = vmatpush3.bf16.msra.mxu1 %v53111_v30  ;;  %51006 = vmatprep.mubr.msk.f32.mxu1 %vm56176_vm1, %v56174_v1 }
 0x17d   : > { %53113 = vmatprep.subr.bf16.mxu1 %v56175_v4  ;;  %v57439_v45 = vsub.f32 %v7148_v40, %v7645_v55  ;;  %v57477_v42 = vpack.c.bf16 %v7645_v55, %v7642_v36  ;;  %v7723_v7 = vand.u32 4294901760, %v7722_v3  ;;  %v8110_v40 = vpop.permute.xlu1 %8109  ;;  %v57546_v3 = vand.u32 4294901760, %v8132_v48  ;;  %19979 = vrot.lane.b32.xlu1 %v56332_v15, %s56186_s28 }
 0x17e   : > { %6570 = vmatmul.mubr.f32.vlgmr.msra.gmra.mrb[0].mxu0 %v57262_v26 }
 0x17f   : > { %53097 = vmatpush1.bf16.msra.mxu0 %v57305_v46  ;;  %6644 = vmatprep.mubr.f32.mxu0 %v56174_v1  ;;  %v53120_v46 = vpack.c.bf16 %v7246_v13, %v7234_v54  ;;  %v53147_v35 = vpack.c.bf16 %v57439_v45, %v57441_v29 }
 0x180   : > { %53117 = vmatprep.subr.bf16.mxu0 %v57411_v27 }
 0x181   : > { %v8106_v13 = vpop.permute.xlu1 %8105  ;;  %19985 = vrot.lane.b32.xlu1 %v56368_v33, %s56186_s28 }
 0x183   : > { %51007 = vmatmul.mubr.f32.vlgmr.msra.gmra.mrb[0].mxu1 %v57262_v26 }
 0x184   : > { %53115 = vmatpush3.bf16.msra.mxu1 %v57321_v2  ;;  %51013 = vmatprep.mubr.msk.f32.mxu1 %vm56176_vm1, %v56174_v1  ;;  %v7728_v2 = vand.u32 4294901760, %v57439_v45 }
 0x185   : > { %53140 = vmatprep.subr.bf16.mxu1 %v56175_v4  ;;  %v8112_v34 = vpop.permute.xlu1 %8111  ;;  %20981 = vrot.lane.b32.xlu1 %v56353_v28, %s56186_s28 }
 0x186   : > { %6646 = vmatmul.mubr.f32.vlgmr.msra.gmra.mrb[0].mxu0 %v57262_v26  ;;  %v7729_v23 = vsub.f32 %v57439_v45, %v7728_v2 }
 0x187   : > { %53119 = vmatpush1.bf16.msra.mxu0 %v57455_v41  ;;  %7218 = vmatprep.mubr.f32.mxu0 %v56174_v1 }
 0x188   : > { %53121 = vmatprep.subr.bf16.mxu0 %v53120_v46  ;;  %v7730_v19 = vand.u32 4294901760, %v7729_v23  ;;  %v53153_v23 = vpack.c.bf16 %v7728_v2, %v7721_v17 }
 0x18a   : > { %v53144_v8 = vpack.c.bf16 %v7730_v19, %v7723_v7  ;;  %v57568_v7 = vsub.f32 %v8132_v48, %v57546_v3 }
 0x18b   : > { %51014 = vmatmul.mubr.f32.vlgmr.msra.gmra.mrb[0].mxu1 %v57262_v26  ;;  %v8116_v26 = vpop.permute.xlu0 %8115  ;;  %19981 = vrot.lane.b32.xlu0 %v56277_v38, %s56186_s28 }
 0x18c   : > { %53142 = vmatpush3.bf16.msra.mxu1 %v57477_v42  ;;  %51020 = vmatprep.mubr.msk.f32.mxu1 %vm56176_vm1, %v56174_v1  ;;  %v8126_v30 = vsel %vm8121_vm6, %v8116_v26, %v8118_v62 }
 0x18d   : > { %53143 = vmatprep.subr.bf16.mxu1 %v56175_v4  ;;  %v8136_v18 = vsel %vm234_vm2, %v8126_v30, 0 }
 0x18e   : > { %7224 = vmatmul.mubr.f32.vlgmr.msra.gmra.mrb[0].mxu0 %v7223_v51  ;;  %v8144_v36 = vand.u32 4294901760, %v8136_v18 }
 0x18f   : > { %53123 = vmatpush1.bf16.msra.mxu0 %v53122_v9  ;;  %7314 = vmatprep.mubr.f32.mxu0 %v56174_v1  ;;  %v8108_v44 = vpop.permute.xlu0 %8107 }
 0x190   : > { %53125 = vmatprep.subr.bf16.mxu0 %v53124_v63  ;;  %v8123_v56 = vsel %vm8121_vm6, %v8108_v44, %v8110_v40  ;;  %v57518_v25 = vsub.f32 %v8136_v18, %v8144_v36  ;;  %v8122_v37 = vsel %vm8121_vm6, %v8106_v13, %v8108_v44  ;;  %19987 = vrot.lane.b32.xlu0 %v56317_v6, %s56186_s28 }
 0x191   : > { %v8140_v54 = vand.u32 4294901760, %v8123_v56  ;;  %v8142_v57 = vand.u32 4294901760, %v8122_v37 }
 0x192   : > { %v8234_v24 = vand.u32 4294901760, %v57518_v25 }
 0x193   : > { %51021 = vmatmul.mubr.f32.vlgmr.msra.gmra.mrb[0].mxu1 %v7223_v51  ;;  %v8114_v55 = vpop.permute.xlu0 %8113  ;;  %v57521_v50 = vsub.f32 %v8123_v56, %v8140_v54  ;;  %v57553_v9 = vpack.c.bf16 %v8144_v36, %v8140_v54  ;;  %v57563_v17 = vsub.f32 %v8122_v37, %v8142_v57 }
 0x194   : > { %53145 = vmatpush3.bf16.msra.mxu1 %v53144_v8  ;;  %51027 = vmatprep.mubr.msk.f32.mxu1 %vm56176_vm1, %v56174_v1  ;;  %v8125_v46 = vsel %vm8121_vm6, %v8114_v55, %v8116_v26  ;;  %v8235_v45 = vsub.f32 %v57518_v25, %v8234_v24 }
 0x195   : > { %53146 = vmatprep.subr.bf16.mxu1 %v56175_v4  ;;  %v8222_v49 = vand.u32 4294901760, %v57521_v50  ;;  %v53166_v37 = vpack.c.bf16 %v57518_v25, %v57521_v50  ;;  %19993 = vrot.lane.b32.xlu0 %v56360_v22, %s56186_s28 }
 0x196   : > { %7316 = vmatmul.mubr.f32.vlgmr.msra.gmra.mrb[0].mxu0 %v57402_v53  ;;  %v8236_v8 = vand.u32 4294901760, %v8235_v45 }
 0x197   : > { %53127 = vmatpush1.bf16.msra.mxu0 %v53126_v14  ;;  %7394 = vmatprep.mubr.f32.mxu0 %v56174_v1  ;;  %v8120_v47 = vpop.permute.xlu0 %8119  ;;  %v8223_v29 = vsub.f32 %v57521_v50, %v8222_v49  ;;  %v8228_v14 = vand.u32 4294901760, %v57563_v17  ;;  %v53174_v45 = vpack.c.bf16 %v8234_v24, %v8222_v49  ;;  %v49778_v24 = vld [vmem:[%s63392_s1 + $0xe8] sm:$0xff] }
 0x198   : > { %53129 = vmatprep.subr.bf16.mxu0 %v57411_v27  ;;  %v8127_v43 = vsel %vm8121_vm6, %v8118_v62, %v8120_v47 }
 0x199   : > { %v8138_v51 = vsel %vm234_vm2, %v8127_v43, 0  ;;  %v8224_v63 = vand.u32 4294901760, %v8223_v29  ;;  %v8229_v18 = vsub.f32 %v57563_v17, %v8228_v14  ;;  %20979 = vrot.lane.b32.xlu0 %v56272_v32, %s56186_s28 }
 0x19b   : > { %51028 = vmatmul.mubr.f32.vlgmr.msra.gmra.mrb[0].mxu1 %v57402_v53  ;;  %v8230_v36 = vand.u32 4294901760, %v8229_v18 }
 0x19c   : > { %53148 = vmatpush3.bf16.msra.mxu1 %v53147_v35  ;;  %51034 = vmatprep.mubr.msk.f32.mxu1 %vm56176_vm1, %v56174_v1  ;;  %v57580_v35 = vand.u32 4294901760, %v57568_v7 }
 0x19d   : > { %53149 = vmatprep.subr.bf16.mxu1 %v56175_v4 }
 0x19e   : > { %7397 = vmatmul.mubr.f32.vlgmr.msra.gmra.mrb[0].mxu0 %v57428_v61 }
 0x19f   : > { %53131 = vmatpush1.bf16.msra.mxu0 %v57455_v41  ;;  %7471 = vmatprep.mubr.f32.mxu0 %v56174_v1 }
 0x1a0   : > { %53133 = vmatprep.subr.bf16.mxu0 %v53132_v21  ;;  %v8212_v21 = vsub.f32 %v57568_v7, %v57580_v35 }
 0x1a2   : > { %v8213_v12 = vand.u32 4294901760, %v8212_v21 }
 0x1a3   : > { %51035 = vmatmul.mubr.f32.vlgmr.msra.gmra.mrb[0].mxu1 %v57428_v61  ;;  %v8134_v61 = vsel %vm234_vm2, %v8125_v46, 0 }
 0x1a4   : > { %53151 = vmatpush3.bf16.msra.mxu1 %v57477_v42  ;;  %51041 = vmatprep.mubr.msk.f32.mxu1 %vm56176_vm1, %v56174_v1  ;;  %v8146_v20 = vand.u32 4294901760, %v8134_v61 }
 0x1a5   : > { %53152 = vmatprep.subr.bf16.mxu1 %v56175_v4 }
 0x1a6   : > { %7475 = vmatmul.mubr.f32.vlgmr.msra.gmra.mrb[0].mxu0 %v57444_v5  ;;  %v57561_v2 = vsub.f32 %v8134_v61, %v8146_v20 }
 0x1a7   : > { %53135 = vmatpush1.bf16.msra.mxu0 %v53134_v0  ;;  %7557 = vmatprep.mubr.f32.mxu0 %v56174_v1 }
 0x1a8   : > { %53137 = vmatprep.subr.bf16.mxu0 %v57411_v27  ;;  %v8124_v27 = vsel %vm8121_vm6, %v8110_v40, %v8112_v34  ;;  %v8240_v26 = vand.u32 4294901760, %v57561_v2  ;;  %v57589_v40 = vpack.c.bf16 %v8146_v20, %v8142_v57  ;;  %v53168_v43 = vpack.c.bf16 %v57561_v2, %v57563_v17  ;;  %v9108_v34 = vpop.permute.xlu1 %9107  ;;  %20973 = vrot.lane.b32.xlu1 %v56306_v60, %s56186_s28 }
 0x1a9   : > { %v8632_v19 = vand.u32 4294901760, %v8124_v27 }
 0x1aa   : > { %v8241_v30 = vsub.f32 %v57561_v2, %v8240_v26  ;;  %v9121_v2 = vsel %vm230_vm0, %v49778_v24, 0 }
 0x1ab   : > { %51042 = vmatmul.mubr.f32.vlgmr.msra.gmra.mrb[0].mxu1 %v57444_v5  ;;  %v8635_v5 = vand.u32 4294901760, %v8138_v51  ;;  %v57577_v44 = vsub.f32 %v8124_v27, %v8632_v19 }
 0x1ac   : > { %53154 = vmatpush3.bf16.msra.mxu1 %v53153_v23  ;;  %51048 = vmatprep.mubr.msk.f32.mxu1 %vm56176_vm1, %v56174_v1  ;;  %v8242_v55 = vand.u32 4294901760, %v8241_v30 }
 0x1ad   : > { %53155 = vmatprep.subr.bf16.mxu1 %v56175_v4  ;;  %v57575_v62 = vsub.f32 %v8138_v51, %v8635_v5  ;;  %v57605_v13 = vpack.c.bf16 %v8635_v5, %v8632_v19  ;;  %v9100_v51 = vpop.permute.xlu1 %9099  ;;  %20969 = vrot.lane.b32.xlu1 %v56334_v16, %s56186_s28 }
 0x1ae   : > { %7559 = vmatmul.mubr.f32.vlgmr.msra.gmra.mrb[0].mxu0 %v57402_v53  ;;  %v53164_v0 = vpack.c.bf16 %v8242_v55, %v8230_v36 }
 0x1af   : > { %53139 = vmatpush1.bf16.msra.mxu0 %v57455_v41  ;;  %7633 = vmatprep.mubr.f32.mxu0 %v56174_v1  ;;  %v53162_v41 = vpack.c.bf16 %v8236_v8, %v8224_v63  ;;  %v8718_v56 = vand.u32 4294901760, %v57575_v62  ;;  %v53189_v57 = vpack.c.bf16 %v57575_v62, %v57577_v44 }
 0x1b0   : > { %53159 = vmatprep.subr.bf16.mxu0 %v57553_v9 }
 0x1b1   : > { %v8719_v54 = vsub.f32 %v57575_v62, %v8718_v56  ;;  %v9096_v8 = vpop.permute.xlu1 %9095  ;;  %20975 = vrot.lane.b32.xlu1 %v56449_v10, %s56186_s28 }
 0x1b3   : > { %51049 = vmatmul.mubr.f32.vlgmr.msra.gmra.mrb[0].mxu1 %v57402_v53  ;;  %v8720_v47 = vand.u32 4294901760, %v8719_v54 }
 0x1b4   : > { %53157 = vmatpush3.bf16.msra.mxu1 %v57477_v42  ;;  %51055 = vmatprep.mubr.msk.f32.mxu1 %vm56176_vm1, %v56174_v1  ;;  %v8711_v42 = vand.u32 4294901760, %v57577_v44 }
 0x1b5   : > { %53182 = vmatprep.subr.bf16.mxu1 %v56175_v4 }
 0x1b6   : > { %7635 = vmatmul.mubr.f32.vlgmr.msra.gmra.mrb[0].mxu0 %v57402_v53  ;;  %v8712_v46 = vsub.f32 %v57577_v44, %v8711_v42  ;;  %v53195_v54 = vpack.c.bf16 %v8718_v56, %v8711_v42 }
 0x1b7   : > { %53161 = vmatpush1.bf16.msra.mxu0 %v57589_v40  ;;  %8208 = vmatprep.mubr.f32.mxu0 %v56174_v1 }
 0x1b8   : > { %53163 = vmatprep.subr.bf16.mxu0 %v53162_v41  ;;  %v8713_v61 = vand.u32 4294901760, %v8712_v46  ;;  %v57686_v46 = vand.u32 4294901760, %v9121_v2 }
 0x1ba   : > { %v53186_v48 = vpack.c.bf16 %v8720_v47, %v8713_v61  ;;  %v57712_v61 = vsub.f32 %v9121_v2, %v57686_v46 }
 0x1bb   : > { %51056 = vmatmul.mubr.f32.vlgmr.msra.gmra.mrb[0].mxu1 %v57402_v53  ;;  %v9106_v53 = vpop.permute.xlu0 %9105  ;;  %20971 = vrot.lane.b32.xlu0 %v56279_v39, %s56186_s28 }
 0x1bc   : > { %53184 = vmatpush3.bf16.msra.mxu1 %v57605_v13  ;;  %51062 = vmatprep.mubr.msk.f32.mxu1 %vm56176_vm1, %v56174_v1  ;;  %v9115_v23 = vsel %vm8121_vm6, %v9106_v53, %v9108_v34 }
 0x1bd   : > { %53185 = vmatprep.subr.bf16.mxu1 %v56175_v4  ;;  %v9125_v27 = vsel %vm234_vm2, %v9115_v23, 0 }
 0x1be   : > { %8214 = vmatmul.mubr.f32.vlgmr.msra.gmra.mrb[0].mxu0 %v8213_v12  ;;  %v9133_v19 = vand.u32 4294901760, %v9125_v27 }
 0x1bf   : > { %53165 = vmatpush1.bf16.msra.mxu0 %v53164_v0  ;;  %8304 = vmatprep.mubr.f32.mxu0 %v56174_v1  ;;  %v9098_v20 = vpop.permute.xlu0 %9097 }
 0x1c0   : > { %53167 = vmatprep.subr.bf16.mxu0 %v53166_v37  ;;  %v9112_v29 = vsel %vm8121_vm6, %v9098_v20, %v9100_v51  ;;  %v57652_v50 = vsub.f32 %v9125_v27, %v9133_v19  ;;  %v9111_v18 = vsel %vm8121_vm6, %v9096_v8, %v9098_v20  ;;  %20977 = vrot.lane.b32.xlu0 %v56326_v11, %s56186_s28 }
 0x1c1   : > { %v9129_v63 = vand.u32 4294901760, %v9112_v29  ;;  %v9131_v36 = vand.u32 4294901760, %v9111_v18 }
 0x1c2   : > { %v9223_v21 = vand.u32 4294901760, %v57652_v50 }
 0x1c3   : > { %51063 = vmatmul.mubr.f32.vlgmr.msra.gmra.mrb[0].mxu1 %v8213_v12  ;;  %v9104_v5 = vpop.permute.xlu0 %9103  ;;  %v57655_v49 = vsub.f32 %v9112_v29, %v9129_v63  ;;  %v57695_v0 = vpack.c.bf16 %v9133_v19, %v9129_v63  ;;  %v57705_v42 = vsub.f32 %v9111_v18, %v9131_v36 }
 0x1c4   : > { %53187 = vmatpush3.bf16.msra.mxu1 %v53186_v48  ;;  %51069 = vmatprep.mubr.msk.f32.mxu1 %vm56176_vm1, %v56174_v1  ;;  %v9114_v25 = vsel %vm8121_vm6, %v9104_v5, %v9106_v53  ;;  %v9224_v44 = vsub.f32 %v57652_v50, %v9223_v21 }
 0x1c5   : > { %53188 = vmatprep.subr.bf16.mxu1 %v56175_v4  ;;  %v9123_v30 = vsel %vm234_vm2, %v9114_v25, 0  ;;  %v53208_v18 = vpack.c.bf16 %v57652_v50, %v57655_v49  ;;  %v49779_v50 = vld [vmem:[%s63392_s1 + $0x28] sm:$0xff]  ;;  %20983 = vrot.lane.b32.xlu0 %v56444_v58, %s56186_s28 }
 0x1c6   : > { %8306 = vmatmul.mubr.f32.vlgmr.msra.gmra.mrb[0].mxu0 %v57546_v3  ;;  %v9135_v55 = vand.u32 4294901760, %v9123_v30  ;;  %v9225_v48 = vand.u32 4294901760, %v9224_v44 }
 0x1c7   : > { %53169 = vmatpush1.bf16.msra.mxu0 %v53168_v43  ;;  %8384 = vmatprep.mubr.f32.mxu0 %v56174_v1  ;;  %v9110_v41 = vpop.permute.xlu0 %9109  ;;  %v9217_v43 = vand.u32 4294901760, %v57705_v42 }
 0x1c8   : > { %53171 = vmatprep.subr.bf16.mxu0 %v57553_v9  ;;  %v9116_v17 = vsel %vm8121_vm6, %v9108_v34, %v9110_v41  ;;  %v57703_v56 = vsub.f32 %v9123_v30, %v9135_v55 }
 0x1c9   : > { %v9218_v27 = vsub.f32 %v57705_v42, %v9217_v43  ;;  %21968 = vrot.lane.b32.xlu0 %v56270_v31, %s56187_s5 }
 0x1ca   : > { %v9229_v53 = vand.u32 4294901760, %v57703_v56 }
 0x1cb   : > { %51070 = vmatmul.mubr.f32.vlgmr.msra.gmra.mrb[0].mxu1 %v57546_v3  ;;  %v9219_v19 = vand.u32 4294901760, %v9218_v27 }
 0x1cc   : > { %53190 = vmatpush3.bf16.msra.mxu1 %v53189_v57  ;;  %51076 = vmatprep.mubr.msk.f32.mxu1 %vm56176_vm1, %v56174_v1  ;;  %v57728_v57 = vand.u32 4294901760, %v57712_v61  ;;  %v9230_v23 = vsub.f32 %v57703_v56, %v9229_v53 }
 0x1cd   : > { %53191 = vmatprep.subr.bf16.mxu1 %v56175_v4 }
 0x1ce   : > { %8387 = vmatmul.mubr.f32.vlgmr.msra.gmra.mrb[0].mxu0 %v57568_v7  ;;  %v9231_v5 = vand.u32 4294901760, %v9230_v23 }
 0x1cf   : > { %53173 = vmatpush1.bf16.msra.mxu0 %v57589_v40  ;;  %8461 = vmatprep.mubr.f32.mxu0 %v56174_v1 }
 0x1d0   : > { %53175 = vmatprep.subr.bf16.mxu0 %v53174_v45  ;;  %v9201_v45 = vsub.f32 %v57712_v61, %v57728_v57 }
 0x1d2   : > { %v9202_v24 = vand.u32 4294901760, %v9201_v45  ;;  %v10111_v45 = vsel %vm230_vm0, %v49779_v50, 0 }
 0x1d3   : > { %51077 = vmatmul.mubr.f32.vlgmr.msra.gmra.mrb[0].mxu1 %v57568_v7  ;;  %v53176_v7 = vpack.c.bf16 %v8240_v26, %v8228_v14  ;;  %v9102_v26 = vpop.permute.xlu1 %9101  ;;  %v9211_v14 = vand.u32 4294901760, %v57655_v49  ;;  %21970 = vrot.lane.b32.xlu1 %v56293_v52, %s56187_s5 }
 0x1d4   : > { %53193 = vmatpush3.bf16.msra.mxu1 %v57605_v13  ;;  %51083 = vmatprep.mubr.msk.f32.mxu1 %vm56176_vm1, %v56174_v1  ;;  %v9113_v12 = vsel %vm8121_vm6, %v9100_v51, %v9102_v26  ;;  %v57739_v51 = vpack.c.bf16 %v9135_v55, %v9131_v36  ;;  %vm33848_vm6 = vcmask 441344  }
 0x1d5   : > { %53194 = vmatprep.subr.bf16.mxu1 %v56175_v4  ;;  %v9212_v62 = vsub.f32 %v57655_v49, %v9211_v14  ;;  %v9621_v47 = vand.u32 4294901760, %v9113_v12  ;;  %v53216_v44 = vpack.c.bf16 %v9223_v21, %v9211_v14  ;;  %v53218_v14 = vpack.c.bf16 %v9229_v53, %v9217_v43 }
 0x1d6   : > { %8465 = vmatmul.mubr.f32.vlgmr.msra.gmra.mrb[0].mxu0 %v57580_v35 }
 0x1d7   : > { %53177 = vmatpush1.bf16.msra.mxu0 %v53176_v7  ;;  %8547 = vmatprep.mubr.f32.mxu0 %v56174_v1  ;;  %v9213_v37 = vand.u32 4294901760, %v9212_v62  ;;  %v57725_v20 = vsub.f32 %v9113_v12, %v9621_v47  ;;  %v53206_v7 = vpack.c.bf16 %v9231_v5, %v9219_v19  ;;  %v10097_v26 = vpop.permute.xlu1 %10096 }
 0x1d8   : > { %53179 = vmatprep.subr.bf16.mxu0 %v57553_v9  ;;  %v9127_v9 = vsel %vm234_vm2, %v9116_v17, 0  ;;  %v53210_v17 = vpack.c.bf16 %v57703_v56, %v57705_v42  ;;  %21962 = vrot.lane.b32.xlu1 %v56304_v59, %s56187_s5 }
 0x1d9   : > { %v9700_v29 = vand.u32 4294901760, %v57725_v20 }
 0x1db   : > { %51084 = vmatmul.mubr.f32.vlgmr.msra.gmra.mrb[0].mxu1 %v57580_v35  ;;  %v9624_v35 = vand.u32 4294901760, %v9127_v9  ;;  %v9701_v25 = vsub.f32 %v57725_v20, %v9700_v29 }
 0x1dc   : > { %53196 = vmatpush3.bf16.msra.mxu1 %v53195_v54  ;;  %51090 = vmatprep.mubr.msk.f32.mxu1 %vm56176_vm1, %v56174_v1 }
 0x1dd   : > { %53197 = vmatprep.subr.bf16.mxu1 %v56175_v4  ;;  %v57723_v34 = vsub.f32 %v9127_v9, %v9624_v35  ;;  %v57761_v8 = vpack.c.bf16 %v9624_v35, %v9621_v47  ;;  %v9702_v30 = vand.u32 4294901760, %v9701_v25  ;;  %v10089_v9 = vpop.permute.xlu1 %10088  ;;  %v57830_v25 = vand.u32 4294901760, %v10111_v45  ;;  %21958 = vrot.lane.b32.xlu1 %v56332_v15, %s56187_s5 }
 0x1de   : > { %8549 = vmatmul.mubr.f32.vlgmr.msra.gmra.mrb[0].mxu0 %v57546_v3 }
 0x1df   : > { %53181 = vmatpush1.bf16.msra.mxu0 %v57589_v40  ;;  %8623 = vmatprep.mubr.f32.mxu0 %v56174_v1  ;;  %v53204_v40 = vpack.c.bf16 %v9225_v48, %v9213_v37  ;;  %v53231_v36 = vpack.c.bf16 %v57723_v34, %v57725_v20 }
 0x1e0   : > { %53201 = vmatprep.subr.bf16.mxu0 %v57695_v0 }
 0x1e1   : > { %v10085_v48 = vpop.permute.xlu1 %10084  ;;  %21964 = vrot.lane.b32.xlu1 %v56368_v33, %s56187_s5 }
 0x1e3   : > { %51091 = vmatmul.mubr.f32.vlgmr.msra.gmra.mrb[0].mxu1 %v57546_v3 }
 0x1e4   : > { %53199 = vmatpush3.bf16.msra.mxu1 %v57605_v13  ;;  %51097 = vmatprep.mubr.msk.f32.mxu1 %vm56176_vm1, %v56174_v1  ;;  %v9707_v13 = vand.u32 4294901760, %v57723_v34 }
 0x1e5   : > { %53224 = vmatprep.subr.bf16.mxu1 %v56175_v4  ;;  %v10091_v56 = vpop.permute.xlu1 %10090  ;;  %22960 = vrot.lane.b32.xlu1 %v56353_v28, %s56187_s5 }
 0x1e6   : > { %8625 = vmatmul.mubr.f32.vlgmr.msra.gmra.mrb[0].mxu0 %v57546_v3  ;;  %v9708_v63 = vsub.f32 %v57723_v34, %v9707_v13 }
 0x1e7   : > { %53203 = vmatpush1.bf16.msra.mxu0 %v57739_v51  ;;  %9197 = vmatprep.mubr.f32.mxu0 %v56174_v1 }
 0x1e8   : > { %53205 = vmatprep.subr.bf16.mxu0 %v53204_v40  ;;  %v9709_v41 = vand.u32 4294901760, %v9708_v63  ;;  %v53237_v63 = vpack.c.bf16 %v9707_v13, %v9700_v29 }
 0x1ea   : > { %v53228_v2 = vpack.c.bf16 %v9709_v41, %v9702_v30  ;;  %v57852_v30 = vsub.f32 %v10111_v45, %v57830_v25 }
 0x1eb   : > { %51098 = vmatmul.mubr.f32.vlgmr.msra.gmra.mrb[0].mxu1 %v57546_v3  ;;  %v10095_v3 = vpop.permute.xlu0 %10094  ;;  %21960 = vrot.lane.b32.xlu0 %v56277_v38, %s56187_s5 }
 0x1ec   : > { %53226 = vmatpush3.bf16.msra.mxu1 %v57761_v8  ;;  %51104 = vmatprep.mubr.msk.f32.mxu1 %vm56176_vm1, %v56174_v1  ;;  %v10105_v54 = vsel %vm10100_vm7, %v10095_v3, %v10097_v26 }
 0x1ed   : > { %53227 = vmatprep.subr.bf16.mxu1 %v56175_v4  ;;  %v10115_v12 = vsel %vm234_vm2, %v10105_v54, 0 }
 0x1ee   : > { %9203 = vmatmul.mubr.f32.vlgmr.msra.gmra.mrb[0].mxu0 %v9202_v24  ;;  %v10123_v47 = vand.u32 4294901760, %v10115_v12 }
 0x1ef   : > { %53207 = vmatpush1.bf16.msra.mxu0 %v53206_v7  ;;  %9293 = vmatprep.mubr.f32.mxu0 %v56174_v1  ;;  %v10087_v55 = vpop.permute.xlu0 %10086 }
 0x1f0   : > { %53209 = vmatprep.subr.bf16.mxu0 %v53208_v18  ;;  %v10102_v62 = vsel %vm10100_vm7, %v10087_v55, %v10089_v9  ;;  %v57802_v23 = vsub.f32 %v10115_v12, %v10123_v47  ;;  %v10101_v27 = vsel %vm10100_vm7, %v10085_v48, %v10087_v55  ;;  %21966 = vrot.lane.b32.xlu0 %v56317_v6, %s56187_s5 }
 0x1f1   : > { %v10119_v37 = vand.u32 4294901760, %v10102_v62  ;;  %v10121_v19 = vand.u32 4294901760, %v10101_v27 }
 0x1f2   : > { %v10213_v43 = vand.u32 4294901760, %v57802_v23 }
 0x1f3   : > { %51105 = vmatmul.mubr.f32.vlgmr.msra.gmra.mrb[0].mxu1 %v9202_v24  ;;  %v10093_v35 = vpop.permute.xlu0 %10092  ;;  %v57805_v49 = vsub.f32 %v10102_v62, %v10119_v37  ;;  %v57837_v7 = vpack.c.bf16 %v10123_v47, %v10119_v37  ;;  %v57847_v29 = vsub.f32 %v10101_v27, %v10121_v19 }
 0x1f4   : > { %53229 = vmatpush3.bf16.msra.mxu1 %v53228_v2  ;;  %51111 = vmatprep.mubr.msk.f32.mxu1 %vm56176_vm1, %v56174_v1  ;;  %v10104_v40 = vsel %vm10100_vm7, %v10093_v35, %v10095_v3  ;;  %v10214_v34 = vsub.f32 %v57802_v23, %v10213_v43 }
 0x1f5   : > { %53230 = vmatprep.subr.bf16.mxu1 %v56175_v4  ;;  %v10201_v53 = vand.u32 4294901760, %v57805_v49  ;;  %v53250_v27 = vpack.c.bf16 %v57802_v23, %v57805_v49  ;;  %21972 = vrot.lane.b32.xlu0 %v56360_v22, %s56187_s5 }
 0x1f6   : > { %9295 = vmatmul.mubr.f32.vlgmr.msra.gmra.mrb[0].mxu0 %v57686_v46  ;;  %v10215_v2 = vand.u32 4294901760, %v10214_v34 }
 0x1f7   : > { %53211 = vmatpush1.bf16.msra.mxu0 %v53210_v17  ;;  %9373 = vmatprep.mubr.f32.mxu0 %v56174_v1  ;;  %v10099_v21 = vpop.permute.xlu0 %10098  ;;  %v10202_v20 = vsub.f32 %v57805_v49, %v10201_v53  ;;  %v10207_v17 = vand.u32 4294901760, %v57847_v29  ;;  %v53258_v34 = vpack.c.bf16 %v10213_v43, %v10201_v53  ;;  %v49780_v43 = vld [vmem:[%s63392_s1 + $0xf0] sm:$0xff] }
 0x1f8   : > { %53213 = vmatprep.subr.bf16.mxu0 %v57695_v0  ;;  %v10106_v42 = vsel %vm10100_vm7, %v10097_v26, %v10099_v21 }
 0x1f9   : > { %v10117_v24 = vsel %vm234_vm2, %v10106_v42, 0  ;;  %v10203_v18 = vand.u32 4294901760, %v10202_v20  ;;  %v10208_v12 = vsub.f32 %v57847_v29, %v10207_v17  ;;  %22958 = vrot.lane.b32.xlu0 %v56272_v32, %s56187_s5 }
 0x1fb   : > { %51112 = vmatmul.mubr.f32.vlgmr.msra.gmra.mrb[0].mxu1 %v57686_v46  ;;  %v10209_v47 = vand.u32 4294901760, %v10208_v12 }
 0x1fc   : > { %53232 = vmatpush3.bf16.msra.mxu1 %v53231_v36  ;;  %51118 = vmatprep.mubr.msk.f32.mxu1 %vm56176_vm1, %v56174_v1  ;;  %v57864_v36 = vand.u32 4294901760, %v57852_v30 }
 0x1fd   : > { %53233 = vmatprep.subr.bf16.mxu1 %v56175_v4 }
 0x1fe   : > { %9376 = vmatmul.mubr.f32.vlgmr.msra.gmra.mrb[0].mxu0 %v57712_v61 }
 0x1ff   : > { %53215 = vmatpush1.bf16.msra.mxu0 %v57739_v51  ;;  %9450 = vmatprep.mubr.f32.mxu0 %v56174_v1 }
 0x200   : > { %53217 = vmatprep.subr.bf16.mxu0 %v53216_v44  ;;  %v10191_v44 = vsub.f32 %v57852_v30, %v57864_v36 }
 0x202   : > { %v10192_v50 = vand.u32 4294901760, %v10191_v44 }
 0x203   : > { %51119 = vmatmul.mubr.f32.vlgmr.msra.gmra.mrb[0].mxu1 %v57712_v61  ;;  %v10113_v61 = vsel %vm234_vm2, %v10104_v40, 0 }
 0x204   : > { %53235 = vmatpush3.bf16.msra.mxu1 %v57761_v8  ;;  %51125 = vmatprep.mubr.msk.f32.mxu1 %vm56176_vm1, %v56174_v1  ;;  %v10125_v5 = vand.u32 4294901760, %v10113_v61 }
 0x205   : > { %53236 = vmatprep.subr.bf16.mxu1 %v56175_v4 }
 0x206   : > { %9454 = vmatmul.mubr.f32.vlgmr.msra.gmra.mrb[0].mxu0 %v57728_v57  ;;  %v57845_v13 = vsub.f32 %v10113_v61, %v10125_v5 }
 0x207   : > { %53219 = vmatpush1.bf16.msra.mxu0 %v53218_v14  ;;  %9536 = vmatprep.mubr.f32.mxu0 %v56174_v1 }
 0x208   : > { %53221 = vmatprep.subr.bf16.mxu0 %v57695_v0  ;;  %v10103_v0 = vsel %vm10100_vm7, %v10089_v9, %v10091_v56  ;;  %v10219_v3 = vand.u32 4294901760, %v57845_v13  ;;  %v57873_v9 = vpack.c.bf16 %v10125_v5, %v10121_v19  ;;  %v53252_v42 = vpack.c.bf16 %v57845_v13, %v57847_v29  ;;  %v11087_v56 = vpop.permute.xlu1 %11086  ;;  %22952 = vrot.lane.b32.xlu1 %v56306_v60, %s56187_s5 }
 0x209   : > { %v10611_v41 = vand.u32 4294901760, %v10103_v0 }
 0x20a   : > { %v10220_v54 = vsub.f32 %v57845_v13, %v10219_v3  ;;  %v11100_v13 = vsel %vm230_vm0, %v49780_v43, 0 }
 0x20b   : > { %51126 = vmatmul.mubr.f32.vlgmr.msra.gmra.mrb[0].mxu1 %v57728_v57  ;;  %v10614_v57 = vand.u32 4294901760, %v10117_v24  ;;  %v57861_v55 = vsub.f32 %v10103_v0, %v10611_v41 }
 0x20c   : > { %53238 = vmatpush3.bf16.msra.mxu1 %v53237_v63  ;;  %51132 = vmatprep.mubr.msk.f32.mxu1 %vm56176_vm1, %v56174_v1  ;;  %v10221_v35 = vand.u32 4294901760, %v10220_v54 }
 0x20d   : > { %53239 = vmatprep.subr.bf16.mxu1 %v56175_v4  ;;  %v57859_v26 = vsub.f32 %v10117_v24, %v10614_v57  ;;  %v57889_v48 = vpack.c.bf16 %v10614_v57, %v10611_v41  ;;  %v11079_v24 = vpop.permute.xlu1 %11078  ;;  %22948 = vrot.lane.b32.xlu1 %v56334_v16, %s56187_s5 }
 0x20e   : > { %9538 = vmatmul.mubr.f32.vlgmr.msra.gmra.mrb[0].mxu0 %v57686_v46  ;;  %v53248_v14 = vpack.c.bf16 %v10221_v35, %v10209_v47 }
 0x20f   : > { %53223 = vmatpush1.bf16.msra.mxu0 %v57739_v51  ;;  %9612 = vmatprep.mubr.f32.mxu0 %v56174_v1  ;;  %v53246_v51 = vpack.c.bf16 %v10215_v2, %v10203_v18  ;;  %v10697_v62 = vand.u32 4294901760, %v57859_v26  ;;  %v53273_v19 = vpack.c.bf16 %v57859_v26, %v57861_v55 }
 0x210   : > { %53243 = vmatprep.subr.bf16.mxu0 %v57837_v7 }
 0x211   : > { %v10698_v37 = vsub.f32 %v57859_v26, %v10697_v62  ;;  %v11075_v2 = vpop.permute.xlu1 %11074  ;;  %22954 = vrot.lane.b32.xlu1 %v56449_v10, %s56187_s5 }
 0x213   : > { %51133 = vmatmul.mubr.f32.vlgmr.msra.gmra.mrb[0].mxu1 %v57686_v46  ;;  %v10699_v21 = vand.u32 4294901760, %v10698_v37 }
 0x214   : > { %53241 = vmatpush3.bf16.msra.mxu1 %v57761_v8  ;;  %51139 = vmatprep.mubr.msk.f32.mxu1 %vm56176_vm1, %v56174_v1  ;;  %v10690_v8 = vand.u32 4294901760, %v57861_v55 }
 0x215   : > { %53266 = vmatprep.subr.bf16.mxu1 %v56175_v4 }
 0x216   : > { %9614 = vmatmul.mubr.f32.vlgmr.msra.gmra.mrb[0].mxu0 %v57686_v46  ;;  %v10691_v40 = vsub.f32 %v57861_v55, %v10690_v8  ;;  %v53279_v37 = vpack.c.bf16 %v10697_v62, %v10690_v8 }
 0x217   : > { %53245 = vmatpush1.bf16.msra.mxu0 %v57873_v9  ;;  %10187 = vmatprep.mubr.f32.mxu0 %v56174_v1 }
 0x218   : > { %53247 = vmatprep.subr.bf16.mxu0 %v53246_v51  ;;  %v10692_v61 = vand.u32 4294901760, %v10691_v40  ;;  %v57970_v40 = vand.u32 4294901760, %v11100_v13 }
 0x21a   : > { %v53270_v45 = vpack.c.bf16 %v10699_v21, %v10692_v61  ;;  %v57996_v61 = vsub.f32 %v11100_v13, %v57970_v40 }
 0x21b   : > { %51140 = vmatmul.mubr.f32.vlgmr.msra.gmra.mrb[0].mxu1 %v57686_v46  ;;  %v11085_v46 = vpop.permute.xlu0 %11084  ;;  %22950 = vrot.lane.b32.xlu0 %v56279_v39, %s56187_s5 }
 0x21c   : > { %53268 = vmatpush3.bf16.msra.mxu1 %v57889_v48  ;;  %51146 = vmatprep.mubr.msk.f32.mxu1 %vm56176_vm1, %v56174_v1  ;;  %v11094_v63 = vsel %vm10100_vm7, %v11085_v46, %v11087_v56 }
 0x21d   : > { %53269 = vmatprep.subr.bf16.mxu1 %v56175_v4  ;;  %v11104_v0 = vsel %vm234_vm2, %v11094_v63, 0 }
 0x21e   : > { %10193 = vmatmul.mubr.f32.vlgmr.msra.gmra.mrb[0].mxu0 %v10192_v50  ;;  %v11112_v41 = vand.u32 4294901760, %v11104_v0 }
 0x21f   : > { %53249 = vmatpush1.bf16.msra.mxu0 %v53248_v14  ;;  %10283 = vmatprep.mubr.f32.mxu0 %v56174_v1  ;;  %v11077_v5 = vpop.permute.xlu0 %11076 }
 0x220   : > { %53251 = vmatprep.subr.bf16.mxu0 %v53250_v27  ;;  %v11091_v20 = vsel %vm10100_vm7, %v11077_v5, %v11079_v24  ;;  %v57936_v49 = vsub.f32 %v11104_v0, %v11112_v41  ;;  %v11090_v12 = vsel %vm10100_vm7, %v11075_v2, %v11077_v5  ;;  %22956 = vrot.lane.b32.xlu0 %v56326_v11, %s56187_s5 }
 0x221   : > { %v11108_v18 = vand.u32 4294901760, %v11091_v20  ;;  %v11110_v47 = vand.u32 4294901760, %v11090_v12 }
 0x222   : > { %v11202_v44 = vand.u32 4294901760, %v57936_v49 }
 0x223   : > { %51147 = vmatmul.mubr.f32.vlgmr.msra.gmra.mrb[0].mxu1 %v10192_v50  ;;  %v11083_v57 = vpop.permute.xlu0 %11082  ;;  %v57939_v53 = vsub.f32 %v11091_v20, %v11108_v18  ;;  %v57979_v14 = vpack.c.bf16 %v11112_v41, %v11108_v18  ;;  %v57989_v8 = vsub.f32 %v11090_v12, %v11110_v47 }
 0x224   : > { %53271 = vmatpush3.bf16.msra.mxu1 %v53270_v45  ;;  %51153 = vmatprep.mubr.msk.f32.mxu1 %vm56176_vm1, %v56174_v1  ;;  %v11093_v23 = vsel %vm10100_vm7, %v11083_v57, %v11085_v46  ;;  %v11203_v55 = vsub.f32 %v57936_v49, %v11202_v44 }
 0x225   : > { %53272 = vmatprep.subr.bf16.mxu1 %v56175_v4  ;;  %v11102_v54 = vsel %vm234_vm2, %v11093_v23, 0  ;;  %v53292_v12 = vpack.c.bf16 %v57936_v49, %v57939_v53  ;;  %v49781_v49 = vld [vmem:[%s63392_s1 + $0x30] sm:$0xff]  ;;  %22962 = vrot.lane.b32.xlu0 %v56444_v58, %s56187_s5 }
 0x226   : > { %10285 = vmatmul.mubr.f32.vlgmr.msra.gmra.mrb[0].mxu0 %v57830_v25  ;;  %v11114_v35 = vand.u32 4294901760, %v11102_v54  ;;  %v11204_v45 = vand.u32 4294901760, %v11203_v55 }
 0x227   : > { %53253 = vmatpush1.bf16.msra.mxu0 %v53252_v42  ;;  %10363 = vmatprep.mubr.f32.mxu0 %v56174_v1  ;;  %v11089_v51 = vpop.permute.xlu0 %11088  ;;  %v11196_v42 = vand.u32 4294901760, %v57989_v8 }
 0x228   : > { %53255 = vmatprep.subr.bf16.mxu0 %v57837_v7  ;;  %v11095_v29 = vsel %vm10100_vm7, %v11087_v56, %v11089_v51  ;;  %v57987_v62 = vsub.f32 %v11102_v54, %v11114_v35 }
 0x229   : > { %v11197_v0 = vsub.f32 %v57989_v8, %v11196_v42  ;;  %23947 = vrot.lane.b32.xlu0 %v56270_v31, %s56188_s12 }
 0x22a   : > { %v11208_v46 = vand.u32 4294901760, %v57987_v62 }
 0x22b   : > { %51154 = vmatmul.mubr.f32.vlgmr.msra.gmra.mrb[0].mxu1 %v57830_v25  ;;  %v11198_v41 = vand.u32 4294901760, %v11197_v0 }
 0x22c   : > { %53274 = vmatpush3.bf16.msra.mxu1 %v53273_v19  ;;  %51160 = vmatprep.mubr.msk.f32.mxu1 %vm56176_vm1, %v56174_v1  ;;  %v58012_v19 = vand.u32 4294901760, %v57996_v61  ;;  %v11209_v63 = vsub.f32 %v57987_v62, %v11208_v46 }
 0x22d   : > { %53275 = vmatprep.subr.bf16.mxu1 %v56175_v4 }
 0x22e   : > { %10366 = vmatmul.mubr.f32.vlgmr.msra.gmra.mrb[0].mxu0 %v57852_v30  ;;  %v11210_v57 = vand.u32 4294901760, %v11209_v63 }
 0x22f   : > { %53257 = vmatpush1.bf16.msra.mxu0 %v57873_v9  ;;  %10440 = vmatprep.mubr.f32.mxu0 %v56174_v1 }
 0x230   : > { %53259 = vmatprep.subr.bf16.mxu0 %v53258_v34  ;;  %v11180_v34 = vsub.f32 %v57996_v61, %v58012_v19 }
 0x232   : > { %v11181_v43 = vand.u32 4294901760, %v11180_v34  ;;  %v12090_v34 = vsel %vm230_vm0, %v49781_v49, 0 }
 0x233   : > { %51161 = vmatmul.mubr.f32.vlgmr.msra.gmra.mrb[0].mxu1 %v57852_v30  ;;  %v53260_v30 = vpack.c.bf16 %v10219_v3, %v10207_v17  ;;  %v11081_v3 = vpop.permute.xlu1 %11080  ;;  %v11190_v17 = vand.u32 4294901760, %v57939_v53  ;;  %23949 = vrot.lane.b32.xlu1 %v56293_v52, %s56188_s12 }
 0x234   : > { %53277 = vmatpush3.bf16.msra.mxu1 %v57889_v48  ;;  %51167 = vmatprep.mubr.msk.f32.mxu1 %vm56176_vm1, %v56174_v1  ;;  %v11092_v50 = vsel %vm10100_vm7, %v11079_v24, %v11081_v3  ;;  %v58023_v24 = vpack.c.bf16 %v11114_v35, %v11110_v47  ;;  %vm35827_vm7 = vcmask 433152  }
 0x235   : > { %53278 = vmatprep.subr.bf16.mxu1 %v56175_v4  ;;  %v11191_v26 = vsub.f32 %v57939_v53, %v11190_v17  ;;  %v11600_v21 = vand.u32 4294901760, %v11092_v50  ;;  %v53300_v55 = vpack.c.bf16 %v11202_v44, %v11190_v17  ;;  %v53302_v17 = vpack.c.bf16 %v11208_v46, %v11196_v42 }
 0x236   : > { %10444 = vmatmul.mubr.f32.vlgmr.msra.gmra.mrb[0].mxu0 %v57864_v36 }
 0x237   : > { %53261 = vmatpush1.bf16.msra.mxu0 %v53260_v30  ;;  %10526 = vmatprep.mubr.f32.mxu0 %v56174_v1  ;;  %v11192_v27 = vand.u32 4294901760, %v11191_v26  ;;  %v58009_v5 = vsub.f32 %v11092_v50, %v11600_v21  ;;  %v53290_v30 = vpack.c.bf16 %v11210_v57, %v11198_v41  ;;  %v12076_v3 = vpop.permute.xlu1 %12075 }
 0x238   : > { %53263 = vmatprep.subr.bf16.mxu0 %v57837_v7  ;;  %v11106_v7 = vsel %vm234_vm2, %v11095_v29, 0  ;;  %v53294_v29 = vpack.c.bf16 %v57987_v62, %v57989_v8  ;;  %23941 = vrot.lane.b32.xlu1 %v56304_v59, %s56188_s12 }
 0x239   : > { %v11679_v20 = vand.u32 4294901760, %v58009_v5 }
 0x23b   : > { %51168 = vmatmul.mubr.f32.vlgmr.msra.gmra.mrb[0].mxu1 %v57864_v36  ;;  %v11603_v36 = vand.u32 4294901760, %v11106_v7  ;;  %v11680_v23 = vsub.f32 %v58009_v5, %v11679_v20 }
 0x23c   : > { %53280 = vmatpush3.bf16.msra.mxu1 %v53279_v37  ;;  %51174 = vmatprep.mubr.msk.f32.mxu1 %vm56176_vm1, %v56174_v1 }
 0x23d   : > { %53281 = vmatprep.subr.bf16.mxu1 %v56175_v4  ;;  %v58007_v56 = vsub.f32 %v11106_v7, %v11603_v36  ;;  %v58045_v2 = vpack.c.bf16 %v11603_v36, %v11600_v21  ;;  %v11681_v54 = vand.u32 4294901760, %v11680_v23  ;;  %v12068_v7 = vpop.permute.xlu1 %12067  ;;  %v58114_v23 = vand.u32 4294901760, %v12090_v34  ;;  %23937 = vrot.lane.b32.xlu1 %v56332_v15, %s56188_s12 }
 0x23e   : > { %10528 = vmatmul.mubr.f32.vlgmr.msra.gmra.mrb[0].mxu0 %v57830_v25 }
 0x23f   : > { %53265 = vmatpush1.bf16.msra.mxu0 %v57873_v9  ;;  %10602 = vmatprep.mubr.f32.mxu0 %v56174_v1  ;;  %v53288_v9 = vpack.c.bf16 %v11204_v45, %v11192_v27  ;;  %v53315_v47 = vpack.c.bf16 %v58007_v56, %v58009_v5 }
 0x240   : > { %53285 = vmatprep.subr.bf16.mxu0 %v57979_v14 }
 0x241   : > { %v12064_v45 = vpop.permute.xlu1 %12063  ;;  %23943 = vrot.lane.b32.xlu1 %v56368_v33, %s56188_s12 }
 0x243   : > { %51175 = vmatmul.mubr.f32.vlgmr.msra.gmra.mrb[0].mxu1 %v57830_v25 }
 0x244   : > { %53283 = vmatpush3.bf16.msra.mxu1 %v57889_v48  ;;  %51181 = vmatprep.mubr.msk.f32.mxu1 %vm56176_vm1, %v56174_v1  ;;  %v11686_v48 = vand.u32 4294901760, %v58007_v56 }
 0x245   : > { %53308 = vmatprep.subr.bf16.mxu1 %v56175_v4  ;;  %v12070_v62 = vpop.permute.xlu1 %12069  ;;  %24939 = vrot.lane.b32.xlu1 %v56353_v28, %s56188_s12 }
 0x246   : > { %10604 = vmatmul.mubr.f32.vlgmr.msra.gmra.mrb[0].mxu0 %v57830_v25  ;;  %v11687_v18 = vsub.f32 %v58007_v56, %v11686_v48 }
 0x247   : > { %53287 = vmatpush1.bf16.msra.mxu0 %v58023_v24  ;;  %11176 = vmatprep.mubr.f32.mxu0 %v56174_v1 }
 0x248   : > { %53289 = vmatprep.subr.bf16.mxu0 %v53288_v9  ;;  %v11688_v51 = vand.u32 4294901760, %v11687_v18  ;;  %v53321_v18 = vpack.c.bf16 %v11686_v48, %v11679_v20 }
 0x24a   : > { %v53312_v13 = vpack.c.bf16 %v11688_v51, %v11681_v54  ;;  %v58136_v54 = vsub.f32 %v12090_v34, %v58114_v23 }
 0x24b   : > { %51182 = vmatmul.mubr.f32.vlgmr.msra.gmra.mrb[0].mxu1 %v57830_v25  ;;  %v12074_v25 = vpop.permute.xlu0 %12073  ;;  %23939 = vrot.lane.b32.xlu0 %v56277_v38, %s56188_s12 }
 0x24c   : > { %53310 = vmatpush3.bf16.msra.mxu1 %v58045_v2  ;;  %51188 = vmatprep.mubr.msk.f32.mxu1 %vm56176_vm1, %v56174_v1  ;;  %v12084_v37 = vsel %vm12079_vm8, %v12074_v25, %v12076_v3 }
 0x24d   : > { %53311 = vmatprep.subr.bf16.mxu1 %v56175_v4  ;;  %v12094_v50 = vsel %vm234_vm2, %v12084_v37, 0 }
 0x24e   : > { %11182 = vmatmul.mubr.f32.vlgmr.msra.gmra.mrb[0].mxu0 %v11181_v43  ;;  %v12102_v21 = vand.u32 4294901760, %v12094_v50 }
 0x24f   : > { %53291 = vmatpush1.bf16.msra.mxu0 %v53290_v30  ;;  %11272 = vmatprep.mubr.f32.mxu0 %v56174_v1  ;;  %v12066_v35 = vpop.permute.xlu0 %12065 }
 0x250   : > { %53293 = vmatprep.subr.bf16.mxu0 %v53292_v12  ;;  %v12081_v26 = vsel %vm12079_vm8, %v12066_v35, %v12068_v7  ;;  %v58086_v63 = vsub.f32 %v12094_v50, %v12102_v21  ;;  %v12080_v0 = vsel %vm12079_vm8, %v12064_v45, %v12066_v35  ;;  %23945 = vrot.lane.b32.xlu0 %v56317_v6, %s56188_s12 }
 0x251   : > { %v12098_v27 = vand.u32 4294901760, %v12081_v26  ;;  %v12100_v41 = vand.u32 4294901760, %v12080_v0 }
 0x252   : > { %v12192_v42 = vand.u32 4294901760, %v58086_v63 }
 0x253   : > { %51189 = vmatmul.mubr.f32.vlgmr.msra.gmra.mrb[0].mxu1 %v11181_v43  ;;  %v12072_v36 = vpop.permute.xlu0 %12071  ;;  %v58089_v53 = vsub.f32 %v12081_v26, %v12098_v27  ;;  %v58121_v30 = vpack.c.bf16 %v12102_v21, %v12098_v27  ;;  %v58131_v20 = vsub.f32 %v12080_v0, %v12100_v41 }
 0x254   : > { %53313 = vmatpush3.bf16.msra.mxu1 %v53312_v13  ;;  %51195 = vmatprep.mubr.msk.f32.mxu1 %vm56176_vm1, %v56174_v1  ;;  %v12083_v9 = vsel %vm12079_vm8, %v12072_v36, %v12074_v25  ;;  %v12193_v56 = vsub.f32 %v58086_v63, %v12192_v42 }
 0x255   : > { %53314 = vmatprep.subr.bf16.mxu1 %v56175_v4  ;;  %v12180_v46 = vand.u32 4294901760, %v58089_v53  ;;  %v53334_v0 = vpack.c.bf16 %v58086_v63, %v58089_v53  ;;  %23951 = vrot.lane.b32.xlu0 %v56360_v22, %s56188_s12 }
 0x256   : > { %11274 = vmatmul.mubr.f32.vlgmr.msra.gmra.mrb[0].mxu0 %v57970_v40  ;;  %v12194_v13 = vand.u32 4294901760, %v12193_v56 }
 0x257   : > { %53295 = vmatpush1.bf16.msra.mxu0 %v53294_v29  ;;  %11352 = vmatprep.mubr.f32.mxu0 %v56174_v1  ;;  %v12078_v44 = vpop.permute.xlu0 %12077  ;;  %v12181_v5 = vsub.f32 %v58089_v53, %v12180_v46  ;;  %v12186_v29 = vand.u32 4294901760, %v58131_v20  ;;  %v53342_v56 = vpack.c.bf16 %v12192_v42, %v12180_v46  ;;  %v49782_v42 = vld [vmem:[%s63392_s1 + $0xf8] sm:$0xff] }
 0x258   : > { %53297 = vmatprep.subr.bf16.mxu0 %v57979_v14  ;;  %v12085_v8 = vsel %vm12079_vm8, %v12076_v3, %v12078_v44 }
 0x259   : > { %v12096_v43 = vsel %vm234_vm2, %v12085_v8, 0  ;;  %v12182_v12 = vand.u32 4294901760, %v12181_v5  ;;  %v12187_v50 = vsub.f32 %v58131_v20, %v12186_v29  ;;  %24937 = vrot.lane.b32.xlu0 %v56272_v32, %s56188_s12 }
 0x25b   : > { %51196 = vmatmul.mubr.f32.vlgmr.msra.gmra.mrb[0].mxu1 %v57970_v40  ;;  %v12188_v21 = vand.u32 4294901760, %v12187_v50 }
 0x25c   : > { %53316 = vmatpush3.bf16.msra.mxu1 %v53315_v47  ;;  %51202 = vmatprep.mubr.msk.f32.mxu1 %vm56176_vm1, %v56174_v1  ;;  %v58148_v47 = vand.u32 4294901760, %v58136_v54 }
 0x25d   : > { %53317 = vmatprep.subr.bf16.mxu1 %v56175_v4 }
 0x25e   : > { %11355 = vmatmul.mubr.f32.vlgmr.msra.gmra.mrb[0].mxu0 %v57996_v61 }
 0x25f   : > { %53299 = vmatpush1.bf16.msra.mxu0 %v58023_v24  ;;  %11429 = vmatprep.mubr.f32.mxu0 %v56174_v1 }
 0x260   : > { %53301 = vmatprep.subr.bf16.mxu0 %v53300_v55  ;;  %v12170_v55 = vsub.f32 %v58136_v54, %v58148_v47 }
 0x262   : > { %v12171_v49 = vand.u32 4294901760, %v12170_v55 }
 0x263   : > { %51203 = vmatmul.mubr.f32.vlgmr.msra.gmra.mrb[0].mxu1 %v57996_v61  ;;  %v12092_v61 = vsel %vm234_vm2, %v12083_v9, 0 }
 0x264   : > { %53319 = vmatpush3.bf16.msra.mxu1 %v58045_v2  ;;  %51209 = vmatprep.mubr.msk.f32.mxu1 %vm56176_vm1, %v56174_v1  ;;  %v12104_v57 = vand.u32 4294901760, %v12092_v61 }
 0x265   : > { %53320 = vmatprep.subr.bf16.mxu1 %v56175_v4 }
 0x266   : > { %11433 = vmatmul.mubr.f32.vlgmr.msra.gmra.mrb[0].mxu0 %v58012_v19  ;;  %v58129_v48 = vsub.f32 %v12092_v61, %v12104_v57 }
 0x267   : > { %53303 = vmatpush1.bf16.msra.mxu0 %v53302_v17  ;;  %11515 = vmatprep.mubr.f32.mxu0 %v56174_v1 }
 0x268   : > { %53305 = vmatprep.subr.bf16.mxu0 %v57979_v14  ;;  %v12082_v14 = vsel %vm12079_vm8, %v12068_v7, %v12070_v62  ;;  %v12198_v25 = vand.u32 4294901760, %v58129_v48  ;;  %v58157_v7 = vpack.c.bf16 %v12104_v57, %v12100_v41  ;;  %v53336_v8 = vpack.c.bf16 %v58129_v48, %v58131_v20  ;;  %v13066_v62 = vpop.permute.xlu1 %13065  ;;  %24931 = vrot.lane.b32.xlu1 %v56306_v60, %s56188_s12 }
 0x269   : > { %v12590_v51 = vand.u32 4294901760, %v12082_v14 }
 0x26a   : > { %v12199_v37 = vsub.f32 %v58129_v48, %v12198_v25  ;;  %v13079_v48 = vsel %vm230_vm0, %v49782_v42, 0 }
 0x26b   : > { %51210 = vmatmul.mubr.f32.vlgmr.msra.gmra.mrb[0].mxu1 %v58012_v19  ;;  %v12593_v19 = vand.u32 4294901760, %v12096_v43  ;;  %v58145_v35 = vsub.f32 %v12082_v14, %v12590_v51 }
 0x26c   : > { %53322 = vmatpush3.bf16.msra.mxu1 %v53321_v18  ;;  %51216 = vmatprep.mubr.msk.f32.mxu1 %vm56176_vm1, %v56174_v1  ;;  %v12200_v36 = vand.u32 4294901760, %v12199_v37 }
 0x26d   : > { %53323 = vmatprep.subr.bf16.mxu1 %v56175_v4  ;;  %v58143_v3 = vsub.f32 %v12096_v43, %v12593_v19  ;;  %v58173_v45 = vpack.c.bf16 %v12593_v19, %v12590_v51  ;;  %v13058_v43 = vpop.permute.xlu1 %13057  ;;  %24927 = vrot.lane.b32.xlu1 %v56334_v16, %s56188_s12 }
 0x26e   : > { %11517 = vmatmul.mubr.f32.vlgmr.msra.gmra.mrb[0].mxu0 %v57970_v40  ;;  %v53332_v17 = vpack.c.bf16 %v12200_v36, %v12188_v21 }
 0x26f   : > { %53307 = vmatpush1.bf16.msra.mxu0 %v58023_v24  ;;  %11591 = vmatprep.mubr.f32.mxu0 %v56174_v1  ;;  %v53330_v24 = vpack.c.bf16 %v12194_v13, %v12182_v12  ;;  %v12676_v26 = vand.u32 4294901760, %v58143_v3  ;;  %v53357_v41 = vpack.c.bf16 %v58143_v3, %v58145_v35 }
 0x270   : > { %53327 = vmatprep.subr.bf16.mxu0 %v58121_v30 }
 0x271   : > { %v12677_v27 = vsub.f32 %v58143_v3, %v12676_v26  ;;  %v13054_v13 = vpop.permute.xlu1 %13053  ;;  %24933 = vrot.lane.b32.xlu1 %v56449_v10, %s56188_s12 }
 0x273   : > { %51217 = vmatmul.mubr.f32.vlgmr.msra.gmra.mrb[0].mxu1 %v57970_v40  ;;  %v12678_v44 = vand.u32 4294901760, %v12677_v27 }
 0x274   : > { %53325 = vmatpush3.bf16.msra.mxu1 %v58045_v2  ;;  %51223 = vmatprep.mubr.msk.f32.mxu1 %vm56176_vm1, %v56174_v1  ;;  %v12669_v2 = vand.u32 4294901760, %v58145_v35 }
 0x275   : > { %53350 = vmatprep.subr.bf16.mxu1 %v56175_v4 }
 0x276   : > { %11593 = vmatmul.mubr.f32.vlgmr.msra.gmra.mrb[0].mxu0 %v57970_v40  ;;  %v12670_v9 = vsub.f32 %v58145_v35, %v12669_v2  ;;  %v53363_v27 = vpack.c.bf16 %v12676_v26, %v12669_v2 }
 0x277   : > { %53329 = vmatpush1.bf16.msra.mxu0 %v58157_v7  ;;  %12166 = vmatprep.mubr.f32.mxu0 %v56174_v1 }
 0x278   : > { %53331 = vmatprep.subr.bf16.mxu0 %v53330_v24  ;;  %v12671_v61 = vand.u32 4294901760, %v12670_v9  ;;  %v58254_v9 = vand.u32 4294901760, %v13079_v48 }
 0x27a   : > { %v53354_v34 = vpack.c.bf16 %v12678_v44, %v12671_v61  ;;  %v58280_v61 = vsub.f32 %v13079_v48, %v58254_v9 }
 0x27b   : > { %51224 = vmatmul.mubr.f32.vlgmr.msra.gmra.mrb[0].mxu1 %v57970_v40  ;;  %v13064_v40 = vpop.permute.xlu0 %13063  ;;  %24929 = vrot.lane.b32.xlu0 %v56279_v39, %s56188_s12 }
 0x27c   : > { %53352 = vmatpush3.bf16.msra.mxu1 %v58173_v45  ;;  %51230 = vmatprep.mubr.msk.f32.mxu1 %vm56176_vm1, %v56174_v1  ;;  %v13073_v18 = vsel %vm12079_vm8, %v13064_v40, %v13066_v62 }
 0x27d   : > { %53353 = vmatprep.subr.bf16.mxu1 %v56175_v4  ;;  %v13083_v14 = vsel %vm234_vm2, %v13073_v18, 0 }
 0x27e   : > { %12172 = vmatmul.mubr.f32.vlgmr.msra.gmra.mrb[0].mxu0 %v12171_v49  ;;  %v13091_v51 = vand.u32 4294901760, %v13083_v14 }
 0x27f   : > { %53333 = vmatpush1.bf16.msra.mxu0 %v53332_v17  ;;  %12262 = vmatprep.mubr.f32.mxu0 %v56174_v1  ;;  %v13056_v57 = vpop.permute.xlu0 %13055 }
 0x280   : > { %53335 = vmatprep.subr.bf16.mxu0 %v53334_v0  ;;  %v13070_v5 = vsel %vm12079_vm8, %v13056_v57, %v13058_v43  ;;  %v58220_v53 = vsub.f32 %v13083_v14, %v13091_v51  ;;  %v13069_v50 = vsel %vm12079_vm8, %v13054_v13, %v13056_v57  ;;  %24935 = vrot.lane.b32.xlu0 %v56326_v11, %s56188_s12 }
 0x281   : > { %v13087_v12 = vand.u32 4294901760, %v13070_v5  ;;  %v13089_v21 = vand.u32 4294901760, %v13069_v50 }
 0x282   : > { %v13181_v55 = vand.u32 4294901760, %v58220_v53 }
 0x283   : > { %51231 = vmatmul.mubr.f32.vlgmr.msra.gmra.mrb[0].mxu1 %v12171_v49  ;;  %v13062_v19 = vpop.permute.xlu0 %13061  ;;  %v58223_v46 = vsub.f32 %v13070_v5, %v13087_v12  ;;  %v58263_v17 = vpack.c.bf16 %v13091_v51, %v13087_v12  ;;  %v58273_v2 = vsub.f32 %v13069_v50, %v13089_v21 }
 0x284   : > { %53355 = vmatpush3.bf16.msra.mxu1 %v53354_v34  ;;  %51237 = vmatprep.mubr.msk.f32.mxu1 %vm56176_vm1, %v56174_v1  ;;  %v13072_v63 = vsel %vm12079_vm8, %v13062_v19, %v13064_v40  ;;  %v13182_v35 = vsub.f32 %v58220_v53, %v13181_v55 }
 0x285   : > { %53356 = vmatprep.subr.bf16.mxu1 %v56175_v4  ;;  %v13081_v37 = vsel %vm234_vm2, %v13072_v63, 0  ;;  %v53376_v50 = vpack.c.bf16 %v58220_v53, %v58223_v46  ;;  %v49783_v53 = vld [vmem:[%s63392_s1 + $0x38] sm:$0xff]  ;;  %24941 = vrot.lane.b32.xlu0 %v56444_v58, %s56188_s12  ;;  %s143_s12 = scalar_lea.vmem %s63393_s2, %s56118_s7 }
 0x286   : > { %12264 = vmatmul.mubr.f32.vlgmr.msra.gmra.mrb[0].mxu0 %v58114_v23  ;;  %v13093_v36 = vand.u32 4294901760, %v13081_v37  ;;  %v13183_v34 = vand.u32 4294901760, %v13182_v35 }
 0x287   : > { %53337 = vmatpush1.bf16.msra.mxu0 %v53336_v8  ;;  %12342 = vmatprep.mubr.f32.mxu0 %v56174_v1  ;;  %v13068_v24 = vpop.permute.xlu0 %13067  ;;  %v13175_v8 = vand.u32 4294901760, %v58273_v2 }
 0x288   : > { %53339 = vmatprep.subr.bf16.mxu0 %v58121_v30  ;;  %v13074_v20 = vsel %vm12079_vm8, %v13066_v62, %v13068_v24  ;;  %v58271_v26 = vsub.f32 %v13081_v37, %v13093_v36 }
 0x289   : > { %v13176_v14 = vsub.f32 %v58273_v2, %v13175_v8  ;;  %25926 = vrot.lane.b32.xlu0 %v56270_v31, %s56189_s17 }
 0x28a   : > { %v13187_v40 = vand.u32 4294901760, %v58271_v26 }
 0x28b   : > { %51238 = vmatmul.mubr.f32.vlgmr.msra.gmra.mrb[0].mxu1 %v58114_v23  ;;  %v13177_v51 = vand.u32 4294901760, %v13176_v14 }
 0x28c   : > { %53358 = vmatpush3.bf16.msra.mxu1 %v53357_v41  ;;  %51244 = vmatprep.mubr.msk.f32.mxu1 %vm56176_vm1, %v56174_v1  ;;  %v58296_v41 = vand.u32 4294901760, %v58280_v61  ;;  %v13188_v18 = vsub.f32 %v58271_v26, %v13187_v40 }
 0x28d   : > { %53359 = vmatprep.subr.bf16.mxu1 %v56175_v4 }
 0x28e   : > { %12345 = vmatmul.mubr.f32.vlgmr.msra.gmra.mrb[0].mxu0 %v58136_v54  ;;  %v13189_v19 = vand.u32 4294901760, %v13188_v18 }
 0x28f   : > { %53341 = vmatpush1.bf16.msra.mxu0 %v58157_v7  ;;  %12419 = vmatprep.mubr.f32.mxu0 %v56174_v1 }
 0x290   : > { %53343 = vmatprep.subr.bf16.mxu0 %v53342_v56  ;;  %v13159_v56 = vsub.f32 %v58280_v61, %v58296_v41 }
 0x292   : > { %v13160_v42 = vand.u32 4294901760, %v13159_v56  ;;  %v14069_v56 = vsel %vm230_vm0, %v49783_v53, 0 }
 0x293   : > { %51245 = vmatmul.mubr.f32.vlgmr.msra.gmra.mrb[0].mxu1 %v58136_v54  ;;  %v53344_v54 = vpack.c.bf16 %v12198_v25, %v12186_v29  ;;  %v13060_v25 = vpop.permute.xlu1 %13059  ;;  %v13169_v29 = vand.u32 4294901760, %v58223_v46  ;;  %25928 = vrot.lane.b32.xlu1 %v56293_v52, %s56189_s17 }
 0x294   : > { %53361 = vmatpush3.bf16.msra.mxu1 %v58173_v45  ;;  %51251 = vmatprep.mubr.msk.f32.mxu1 %vm56176_vm1, %v56174_v1  ;;  %v13071_v49 = vsel %vm12079_vm8, %v13058_v43, %v13060_v25  ;;  %v58307_v43 = vpack.c.bf16 %v13093_v36, %v13089_v21  ;;  %vm37806_vm8 = vcmask 424960  }
 0x295   : > { %53362 = vmatprep.subr.bf16.mxu1 %v56175_v4  ;;  %v13170_v3 = vsub.f32 %v58223_v46, %v13169_v29  ;;  %v13579_v44 = vand.u32 4294901760, %v13071_v49  ;;  %v53384_v35 = vpack.c.bf16 %v13181_v55, %v13169_v29  ;;  %v53386_v29 = vpack.c.bf16 %v13187_v40, %v13175_v8 }
 0x296   : > { %12423 = vmatmul.mubr.f32.vlgmr.msra.gmra.mrb[0].mxu0 %v58148_v47 }
 0x297   : > { %53345 = vmatpush1.bf16.msra.mxu0 %v53344_v54  ;;  %12505 = vmatprep.mubr.f32.mxu0 %v56174_v1  ;;  %v13171_v0 = vand.u32 4294901760, %v13170_v3  ;;  %v58293_v57 = vsub.f32 %v13071_v49, %v13579_v44  ;;  %v53374_v54 = vpack.c.bf16 %v13189_v19, %v13177_v51  ;;  %v14055_v25 = vpop.permute.xlu1 %14054 }
 0x298   : > { %53347 = vmatprep.subr.bf16.mxu0 %v58121_v30  ;;  %v13085_v30 = vsel %vm234_vm2, %v13074_v20, 0  ;;  %v53378_v20 = vpack.c.bf16 %v58271_v26, %v58273_v2  ;;  %25920 = vrot.lane.b32.xlu1 %v56304_v59, %s56189_s17 }
 0x299   : > { %v13658_v5 = vand.u32 4294901760, %v58293_v57 }
 0x29b   : > { %51252 = vmatmul.mubr.f32.vlgmr.msra.gmra.mrb[0].mxu1 %v58148_v47  ;;  %v13582_v47 = vand.u32 4294901760, %v13085_v30  ;;  %v13659_v63 = vsub.f32 %v58293_v57, %v13658_v5 }
 0x29c   : > { %53364 = vmatpush3.bf16.msra.mxu1 %v53363_v27  ;;  %51258 = vmatprep.mubr.msk.f32.mxu1 %vm56176_vm1, %v56174_v1 }
 0x29d   : > { %53365 = vmatprep.subr.bf16.mxu1 %v56175_v4  ;;  %v58291_v62 = vsub.f32 %v13085_v30, %v13582_v47  ;;  %v58329_v13 = vpack.c.bf16 %v13582_v47, %v13579_v44  ;;  %v13660_v37 = vand.u32 4294901760, %v13659_v63  ;;  %v14047_v30 = vpop.permute.xlu1 %14046  ;;  %v58398_v63 = vand.u32 4294901760, %v14069_v56  ;;  %25916 = vrot.lane.b32.xlu1 %v56332_v15, %s56189_s17 }
 0x29e   : > { %12507 = vmatmul.mubr.f32.vlgmr.msra.gmra.mrb[0].mxu0 %v58114_v23 }
 0x29f   : > { %53349 = vmatpush1.bf16.msra.mxu0 %v58157_v7  ;;  %12581 = vmatprep.mubr.f32.mxu0 %v56174_v1  ;;  %v53372_v7 = vpack.c.bf16 %v13183_v34, %v13171_v0  ;;  %v53399_v21 = vpack.c.bf16 %v58291_v62, %v58293_v57 }
 0x2a0   : > { %53369 = vmatprep.subr.bf16.mxu0 %v58263_v17 }
 0x2a1   : > { %v14043_v34 = vpop.permute.xlu1 %14042  ;;  %25922 = vrot.lane.b32.xlu1 %v56368_v33, %s56189_s17 }
 0x2a3   : > { %51259 = vmatmul.mubr.f32.vlgmr.msra.gmra.mrb[0].mxu1 %v58114_v23 }
 0x2a4   : > { %53367 = vmatpush3.bf16.msra.mxu1 %v58173_v45  ;;  %51265 = vmatprep.mubr.msk.f32.mxu1 %vm56176_vm1, %v56174_v1  ;;  %v13665_v45 = vand.u32 4294901760, %v58291_v62 }
 0x2a5   : > { %53392 = vmatprep.subr.bf16.mxu1 %v56175_v4  ;;  %v14049_v26 = vpop.permute.xlu1 %14048  ;;  %26918 = vrot.lane.b32.xlu1 %v56353_v28, %s56189_s17 }
 0x2a6   : > { %12583 = vmatmul.mubr.f32.vlgmr.msra.gmra.mrb[0].mxu0 %v58114_v23  ;;  %v13666_v12 = vsub.f32 %v58291_v62, %v13665_v45 }
 0x2a7   : > { %53371 = vmatpush1.bf16.msra.mxu0 %v58307_v43  ;;  %13155 = vmatprep.mubr.f32.mxu0 %v56174_v1 }
 0x2a8   : > { %53373 = vmatprep.subr.bf16.mxu0 %v53372_v7  ;;  %v13667_v24 = vand.u32 4294901760, %v13666_v12  ;;  %v53405_v12 = vpack.c.bf16 %v13665_v45, %v13658_v5 }
 0x2aa   : > { %v53396_v48 = vpack.c.bf16 %v13667_v24, %v13660_v37  ;;  %v58420_v37 = vsub.f32 %v14069_v56, %v58398_v63 }
 0x2ab   : > { %51266 = vmatmul.mubr.f32.vlgmr.msra.gmra.mrb[0].mxu1 %v58114_v23  ;;  %v14053_v23 = vpop.permute.xlu0 %14052  ;;  %25918 = vrot.lane.b32.xlu0 %v56277_v38, %s56189_s17 }
 0x2ac   : > { %53394 = vmatpush3.bf16.msra.mxu1 %v58329_v13  ;;  %51272 = vmatprep.mubr.msk.f32.mxu1 %vm56176_vm1, %v56174_v1  ;;  %v14063_v27 = vsel %vm14058_vm9, %v14053_v23, %v14055_v25 }
 0x2ad   : > { %53395 = vmatprep.subr.bf16.mxu1 %v56175_v4  ;;  %v14073_v49 = vsel %vm234_vm2, %v14063_v27, 0 }
 0x2ae   : > { %13161 = vmatmul.mubr.f32.vlgmr.msra.gmra.mrb[0].mxu0 %v13160_v42  ;;  %v14081_v44 = vand.u32 4294901760, %v14073_v49 }
 0x2af   : > { %53375 = vmatpush1.bf16.msra.mxu0 %v53374_v54  ;;  %13251 = vmatprep.mubr.f32.mxu0 %v56174_v1  ;;  %v14045_v36 = vpop.permute.xlu0 %14044 }
 0x2b0   : > { %53377 = vmatprep.subr.bf16.mxu0 %v53376_v50  ;;  %v14060_v3 = vsel %vm14058_vm9, %v14045_v36, %v14047_v30  ;;  %v58370_v18 = vsub.f32 %v14073_v49, %v14081_v44  ;;  %v14059_v14 = vsel %vm14058_vm9, %v14043_v34, %v14045_v36  ;;  %25924 = vrot.lane.b32.xlu0 %v56317_v6, %s56189_s17 }
 0x2b1   : > { %v14077_v0 = vand.u32 4294901760, %v14060_v3  ;;  %v14079_v51 = vand.u32 4294901760, %v14059_v14 }
 0x2b2   : > { %v14171_v8 = vand.u32 4294901760, %v58370_v18 }
 0x2b3   : > { %51273 = vmatmul.mubr.f32.vlgmr.msra.gmra.mrb[0].mxu1 %v13160_v42  ;;  %v14051_v47 = vpop.permute.xlu0 %14050  ;;  %v58373_v46 = vsub.f32 %v14060_v3, %v14077_v0  ;;  %v58405_v54 = vpack.c.bf16 %v14081_v44, %v14077_v0  ;;  %v58415_v5 = vsub.f32 %v14059_v14, %v14079_v51 }
 0x2b4   : > { %53397 = vmatpush3.bf16.msra.mxu1 %v53396_v48  ;;  %51279 = vmatprep.mubr.msk.f32.mxu1 %vm56176_vm1, %v56174_v1  ;;  %v14062_v7 = vsel %vm14058_vm9, %v14051_v47, %v14053_v23  ;;  %v14172_v62 = vsub.f32 %v58370_v18, %v14171_v8 }
 0x2b5   : > { %53398 = vmatprep.subr.bf16.mxu1 %v56175_v4  ;;  %v14159_v40 = vand.u32 4294901760, %v58373_v46  ;;  %v53418_v14 = vpack.c.bf16 %v58370_v18, %v58373_v46  ;;  %25930 = vrot.lane.b32.xlu0 %v56360_v22, %s56189_s17 }
 0x2b6   : > { %13253 = vmatmul.mubr.f32.vlgmr.msra.gmra.mrb[0].mxu0 %v58254_v9  ;;  %v14173_v48 = vand.u32 4294901760, %v14172_v62 }
 0x2b7   : > { %53379 = vmatpush1.bf16.msra.mxu0 %v53378_v20  ;;  %13331 = vmatprep.mubr.f32.mxu0 %v56174_v1  ;;  %v14057_v55 = vpop.permute.xlu0 %14056  ;;  %v14160_v57 = vsub.f32 %v58373_v46, %v14159_v40  ;;  %v14165_v20 = vand.u32 4294901760, %v58415_v5  ;;  %v53426_v62 = vpack.c.bf16 %v14171_v8, %v14159_v40  ;;  %v49784_v8 = vld [vmem:[%s63392_s1 + $0x100] sm:$0xff] }
 0x2b8   : > { %53381 = vmatprep.subr.bf16.mxu0 %v58263_v17  ;;  %v14064_v2 = vsel %vm14058_vm9, %v14055_v25, %v14057_v55 }
 0x2b9   : > { %v14075_v42 = vsel %vm234_vm2, %v14064_v2, 0  ;;  %v14161_v50 = vand.u32 4294901760, %v14160_v57  ;;  %v14166_v49 = vsub.f32 %v58415_v5, %v14165_v20  ;;  %26916 = vrot.lane.b32.xlu0 %v56272_v32, %s56189_s17 }
 0x2bb   : > { %51280 = vmatmul.mubr.f32.vlgmr.msra.gmra.mrb[0].mxu1 %v58254_v9  ;;  %v14167_v44 = vand.u32 4294901760, %v14166_v49 }
 0x2bc   : > { %53400 = vmatpush3.bf16.msra.mxu1 %v53399_v21  ;;  %51286 = vmatprep.mubr.msk.f32.mxu1 %vm56176_vm1, %v56174_v1  ;;  %v58432_v21 = vand.u32 4294901760, %v58420_v37 }
 0x2bd   : > { %53401 = vmatprep.subr.bf16.mxu1 %v56175_v4 }
 0x2be   : > { %13334 = vmatmul.mubr.f32.vlgmr.msra.gmra.mrb[0].mxu0 %v58280_v61 }
 0x2bf   : > { %53383 = vmatpush1.bf16.msra.mxu0 %v58307_v43  ;;  %13408 = vmatprep.mubr.f32.mxu0 %v56174_v1 }
 0x2c0   : > { %53385 = vmatprep.subr.bf16.mxu0 %v53384_v35  ;;  %v14149_v35 = vsub.f32 %v58420_v37, %v58432_v21 }
 0x2c2   : > { %v14150_v53 = vand.u32 4294901760, %v14149_v35 }
 0x2c3   : > { %51287 = vmatmul.mubr.f32.vlgmr.msra.gmra.mrb[0].mxu1 %v58280_v61  ;;  %v14071_v61 = vsel %vm234_vm2, %v14062_v7, 0 }
 0x2c4   : > { %53403 = vmatpush3.bf16.msra.mxu1 %v58329_v13  ;;  %51293 = vmatprep.mubr.msk.f32.mxu1 %vm56176_vm1, %v56174_v1  ;;  %v14083_v19 = vand.u32 4294901760, %v14071_v61 }
 0x2c5   : > { %53404 = vmatprep.subr.bf16.mxu1 %v56175_v4 }
 0x2c6   : > { %13412 = vmatmul.mubr.f32.vlgmr.msra.gmra.mrb[0].mxu0 %v58296_v41  ;;  %v58413_v45 = vsub.f32 %v14071_v61, %v14083_v19 }
 0x2c7   : > { %53387 = vmatpush1.bf16.msra.mxu0 %v53386_v29  ;;  %13494 = vmatprep.mubr.f32.mxu0 %v56174_v1 }
 0x2c8   : > { %53389 = vmatprep.subr.bf16.mxu0 %v58263_v17  ;;  %v14061_v17 = vsel %vm14058_vm9, %v14047_v30, %v14049_v26  ;;  %v14177_v23 = vand.u32 4294901760, %v58413_v45  ;;  %v58441_v30 = vpack.c.bf16 %v14083_v19, %v14079_v51  ;;  %v53420_v2 = vpack.c.bf16 %v58413_v45, %v58415_v5  ;;  %v15045_v26 = vpop.permute.xlu1 %15044  ;;  %26910 = vrot.lane.b32.xlu1 %v56306_v60, %s56189_s17 }
 0x2c9   : > { %v14569_v24 = vand.u32 4294901760, %v14061_v17 }
 0x2ca   : > { %v14178_v27 = vsub.f32 %v58413_v45, %v14177_v23  ;;  %v15058_v45 = vsel %vm230_vm0, %v49784_v8, 0 }
 0x2cb   : > { %51294 = vmatmul.mubr.f32.vlgmr.msra.gmra.mrb[0].mxu1 %v58296_v41  ;;  %v14572_v41 = vand.u32 4294901760, %v14075_v42  ;;  %v58429_v36 = vsub.f32 %v14061_v17, %v14569_v24 }
 0x2cc   : > { %53406 = vmatpush3.bf16.msra.mxu1 %v53405_v12  ;;  %51300 = vmatprep.mubr.msk.f32.mxu1 %vm56176_vm1, %v56174_v1  ;;  %v14179_v47 = vand.u32 4294901760, %v14178_v27 }
 0x2cd   : > { %53407 = vmatprep.subr.bf16.mxu1 %v56175_v4  ;;  %v58427_v25 = vsub.f32 %v14075_v42, %v14572_v41  ;;  %v58457_v34 = vpack.c.bf16 %v14572_v41, %v14569_v24  ;;  %v15037_v42 = vpop.permute.xlu1 %15036  ;;  %26906 = vrot.lane.b32.xlu1 %v56334_v16, %s56189_s17 }
 0x2ce   : > { %13496 = vmatmul.mubr.f32.vlgmr.msra.gmra.mrb[0].mxu0 %v58254_v9  ;;  %v53416_v29 = vpack.c.bf16 %v14179_v47, %v14167_v44 }
 0x2cf   : > { %53391 = vmatpush1.bf16.msra.mxu0 %v58307_v43  ;;  %13570 = vmatprep.mubr.f32.mxu0 %v56174_v1  ;;  %v53414_v43 = vpack.c.bf16 %v14173_v48, %v14161_v50  ;;  %v14655_v3 = vand.u32 4294901760, %v58427_v25  ;;  %v53441_v51 = vpack.c.bf16 %v58427_v25, %v58429_v36 }
 0x2d0   : > { %53411 = vmatprep.subr.bf16.mxu0 %v58405_v54 }
 0x2d1   : > { %v14656_v0 = vsub.f32 %v58427_v25, %v14655_v3  ;;  %v15033_v48 = vpop.permute.xlu1 %15032  ;;  %26912 = vrot.lane.b32.xlu1 %v56449_v10, %s56189_s17 }
 0x2d3   : > { %51301 = vmatmul.mubr.f32.vlgmr.msra.gmra.mrb[0].mxu1 %v58254_v9  ;;  %v14657_v55 = vand.u32 4294901760, %v14656_v0 }
 0x2d4   : > { %53409 = vmatpush3.bf16.msra.mxu1 %v58329_v13  ;;  %51307 = vmatprep.mubr.msk.f32.mxu1 %vm56176_vm1, %v56174_v1  ;;  %v14648_v13 = vand.u32 4294901760, %v58429_v36 }
 0x2d5   : > { %53434 = vmatprep.subr.bf16.mxu1 %v56175_v4 }
 0x2d6   : > { %13572 = vmatmul.mubr.f32.vlgmr.msra.gmra.mrb[0].mxu0 %v58254_v9  ;;  %v14649_v7 = vsub.f32 %v58429_v36, %v14648_v13  ;;  %v53447_v0 = vpack.c.bf16 %v14655_v3, %v14648_v13 }
 0x2d7   : > { %53413 = vmatpush1.bf16.msra.mxu0 %v58441_v30  ;;  %14145 = vmatprep.mubr.f32.mxu0 %v56174_v1 }
 0x2d8   : > { %53415 = vmatprep.subr.bf16.mxu0 %v53414_v43  ;;  %v14650_v61 = vand.u32 4294901760, %v14649_v7  ;;  %v58538_v7 = vand.u32 4294901760, %v15058_v45 }
 0x2da   : > { %v53438_v56 = vpack.c.bf16 %v14657_v55, %v14650_v61  ;;  %v58564_v61 = vsub.f32 %v15058_v45, %v58538_v7 }
 0x2db   : > { %51308 = vmatmul.mubr.f32.vlgmr.msra.gmra.mrb[0].mxu1 %v58254_v9  ;;  %v15043_v9 = vpop.permute.xlu0 %15042  ;;  %26908 = vrot.lane.b32.xlu0 %v56279_v39, %s56189_s17 }
 0x2dc   : > { %53436 = vmatpush3.bf16.msra.mxu1 %v58457_v34  ;;  %51314 = vmatprep.mubr.msk.f32.mxu1 %vm56176_vm1, %v56174_v1  ;;  %v15052_v12 = vsel %vm14058_vm9, %v15043_v9, %v15045_v26 }
 0x2dd   : > { %53437 = vmatprep.subr.bf16.mxu1 %v56175_v4  ;;  %v15062_v17 = vsel %vm234_vm2, %v15052_v12, 0 }
 0x2de   : > { %14151 = vmatmul.mubr.f32.vlgmr.msra.gmra.mrb[0].mxu0 %v14150_v53  ;;  %v15070_v24 = vand.u32 4294901760, %v15062_v17 }
 0x2df   : > { %53417 = vmatpush1.bf16.msra.mxu0 %v53416_v29  ;;  %14241 = vmatprep.mubr.f32.mxu0 %v56174_v1  ;;  %v15035_v19 = vpop.permute.xlu0 %15034 }
 0x2e0   : > { %53419 = vmatprep.subr.bf16.mxu0 %v53418_v14  ;;  %v15049_v57 = vsel %vm14058_vm9, %v15035_v19, %v15037_v42  ;;  %v58504_v46 = vsub.f32 %v15062_v17, %v15070_v24  ;;  %v15048_v49 = vsel %vm14058_vm9, %v15033_v48, %v15035_v19  ;;  %26914 = vrot.lane.b32.xlu0 %v56326_v11, %s56189_s17 }
 0x2e1   : > { %v15066_v50 = vand.u32 4294901760, %v15049_v57  ;;  %v15068_v44 = vand.u32 4294901760, %v15048_v49 }
 0x2e2   : > { %v15160_v35 = vand.u32 4294901760, %v58504_v46 }
 0x2e3   : > { %51315 = vmatmul.mubr.f32.vlgmr.msra.gmra.mrb[0].mxu1 %v14150_v53  ;;  %v15041_v41 = vpop.permute.xlu0 %15040  ;;  %v58507_v40 = vsub.f32 %v15049_v57, %v15066_v50  ;;  %v58547_v29 = vpack.c.bf16 %v15070_v24, %v15066_v50  ;;  %v58557_v13 = vsub.f32 %v15048_v49, %v15068_v44 }
 0x2e4   : > { %53439 = vmatpush3.bf16.msra.mxu1 %v53438_v56  ;;  %51321 = vmatprep.mubr.msk.f32.mxu1 %vm56176_vm1, %v56174_v1  ;;  %v15051_v18 = vsel %vm14058_vm9, %v15041_v41, %v15043_v9  ;;  %v15161_v36 = vsub.f32 %v58504_v46, %v15160_v35 }
 0x2e5   : > { %53440 = vmatprep.subr.bf16.mxu1 %v56175_v4  ;;  %v15060_v27 = vsel %vm234_vm2, %v15051_v18, 0  ;;  %v53460_v49 = vpack.c.bf16 %v58504_v46, %v58507_v40  ;;  %v49785_v46 = vld [vmem:[%s63392_s1 + $0x40] sm:$0xff]  ;;  %26920 = vrot.lane.b32.xlu0 %v56444_v58, %s56189_s17 }
 0x2e6   : > { %14243 = vmatmul.mubr.f32.vlgmr.msra.gmra.mrb[0].mxu0 %v58398_v63  ;;  %v15072_v47 = vand.u32 4294901760, %v15060_v27  ;;  %v15162_v56 = vand.u32 4294901760, %v15161_v36 }
 0x2e7   : > { %53421 = vmatpush1.bf16.msra.mxu0 %v53420_v2  ;;  %14321 = vmatprep.mubr.f32.mxu0 %v56174_v1  ;;  %v15047_v43 = vpop.permute.xlu0 %15046  ;;  %v15154_v2 = vand.u32 4294901760, %v58557_v13 }
 0x2e8   : > { %53423 = vmatprep.subr.bf16.mxu0 %v58405_v54  ;;  %v15053_v5 = vsel %vm14058_vm9, %v15045_v26, %v15047_v43  ;;  %v58555_v3 = vsub.f32 %v15060_v27, %v15072_v47 }
 0x2e9   : > { %v15155_v17 = vsub.f32 %v58557_v13, %v15154_v2  ;;  %27905 = vrot.lane.b32.xlu0 %v56270_v31, %s56190_s22 }
 0x2ea   : > { %v15166_v9 = vand.u32 4294901760, %v58555_v3 }
 0x2eb   : > { %51322 = vmatmul.mubr.f32.vlgmr.msra.gmra.mrb[0].mxu1 %v58398_v63  ;;  %v15156_v24 = vand.u32 4294901760, %v15155_v17 }
 0x2ec   : > { %53442 = vmatpush3.bf16.msra.mxu1 %v53441_v51  ;;  %51328 = vmatprep.mubr.msk.f32.mxu1 %vm56176_vm1, %v56174_v1  ;;  %v58580_v51 = vand.u32 4294901760, %v58564_v61  ;;  %v15167_v12 = vsub.f32 %v58555_v3, %v15166_v9 }
 0x2ed   : > { %53443 = vmatprep.subr.bf16.mxu1 %v56175_v4 }
 0x2ee   : > { %14324 = vmatmul.mubr.f32.vlgmr.msra.gmra.mrb[0].mxu0 %v58420_v37  ;;  %v15168_v41 = vand.u32 4294901760, %v15167_v12 }
 0x2ef   : > { %53425 = vmatpush1.bf16.msra.mxu0 %v58441_v30  ;;  %14398 = vmatprep.mubr.f32.mxu0 %v56174_v1 }
 0x2f0   : > { %53427 = vmatprep.subr.bf16.mxu0 %v53426_v62  ;;  %v15138_v62 = vsub.f32 %v58564_v61, %v58580_v51 }
 0x2f2   : > { %v15139_v8 = vand.u32 4294901760, %v15138_v62  ;;  %v16048_v62 = vsel %vm230_vm0, %v49785_v46, 0 }
 0x2f3   : > { %51329 = vmatmul.mubr.f32.vlgmr.msra.gmra.mrb[0].mxu1 %v58420_v37  ;;  %v53428_v37 = vpack.c.bf16 %v14177_v23, %v14165_v20  ;;  %v15039_v23 = vpop.permute.xlu1 %15038  ;;  %v15148_v20 = vand.u32 4294901760, %v58507_v40  ;;  %27907 = vrot.lane.b32.xlu1 %v56293_v52, %s56190_s22 }
 0x2f4   : > { %53445 = vmatpush3.bf16.msra.mxu1 %v58457_v34  ;;  %51335 = vmatprep.mubr.msk.f32.mxu1 %vm56176_vm1, %v56174_v1  ;;  %v15050_v53 = vsel %vm14058_vm9, %v15037_v42, %v15039_v23  ;;  %v58591_v42 = vpack.c.bf16 %v15072_v47, %v15068_v44  ;;  %vm39785_vm9 = vcmask 261120  }
 0x2f5   : > { %53446 = vmatprep.subr.bf16.mxu1 %v56175_v4  ;;  %v15149_v25 = vsub.f32 %v58507_v40, %v15148_v20  ;;  %v15558_v55 = vand.u32 4294901760, %v15050_v53  ;;  %v53468_v36 = vpack.c.bf16 %v15160_v35, %v15148_v20  ;;  %v53470_v20 = vpack.c.bf16 %v15166_v9, %v15154_v2 }
 0x2f6   : > { %14402 = vmatmul.mubr.f32.vlgmr.msra.gmra.mrb[0].mxu0 %v58432_v21 }
 0x2f7   : > { %53429 = vmatpush1.bf16.msra.mxu0 %v53428_v37  ;;  %14484 = vmatprep.mubr.f32.mxu0 %v56174_v1  ;;  %v15150_v14 = vand.u32 4294901760, %v15149_v25  ;;  %v58577_v19 = vsub.f32 %v15050_v53, %v15558_v55  ;;  %v53458_v37 = vpack.c.bf16 %v15168_v41, %v15156_v24  ;;  %v16034_v23 = vpop.permute.xlu1 %16033 }
 0x2f8   : > { %53431 = vmatprep.subr.bf16.mxu0 %v58405_v54  ;;  %v15064_v54 = vsel %vm234_vm2, %v15053_v5, 0  ;;  %v53462_v5 = vpack.c.bf16 %v58555_v3, %v58557_v13  ;;  %27899 = vrot.lane.b32.xlu1 %v56304_v59, %s56190_s22 }
 0x2f9   : > { %v15637_v57 = vand.u32 4294901760, %v58577_v19 }
 0x2fb   : > { %51336 = vmatmul.mubr.f32.vlgmr.msra.gmra.mrb[0].mxu1 %v58432_v21  ;;  %v15561_v21 = vand.u32 4294901760, %v15064_v54  ;;  %v15638_v18 = vsub.f32 %v58577_v19, %v15637_v57 }
 0x2fc   : > { %53448 = vmatpush3.bf16.msra.mxu1 %v53447_v0  ;;  %51342 = vmatprep.mubr.msk.f32.mxu1 %vm56176_vm1, %v56174_v1 }
 0x2fd   : > { %53449 = vmatprep.subr.bf16.mxu1 %v56175_v4  ;;  %v58575_v26 = vsub.f32 %v15064_v54, %v15561_v21  ;;  %v58613_v48 = vpack.c.bf16 %v15561_v21, %v15558_v55  ;;  %v15639_v27 = vand.u32 4294901760, %v15638_v18  ;;  %v16026_v54 = vpop.permute.xlu1 %16025  ;;  %v58682_v18 = vand.u32 4294901760, %v16048_v62  ;;  %27895 = vrot.lane.b32.xlu1 %v56332_v15, %s56190_s22 }
 0x2fe   : > { %14486 = vmatmul.mubr.f32.vlgmr.msra.gmra.mrb[0].mxu0 %v58398_v63 }
 0x2ff   : > { %53433 = vmatpush1.bf16.msra.mxu0 %v58441_v30  ;;  %14560 = vmatprep.mubr.f32.mxu0 %v56174_v1  ;;  %v53456_v30 = vpack.c.bf16 %v15162_v56, %v15150_v14  ;;  %v53483_v44 = vpack.c.bf16 %v58575_v26, %v58577_v19 }
 0x300   : > { %53453 = vmatprep.subr.bf16.mxu0 %v58547_v29 }
 0x301   : > { %v16022_v56 = vpop.permute.xlu1 %16021  ;;  %27901 = vrot.lane.b32.xlu1 %v56368_v33, %s56190_s22 }
 0x303   : > { %51343 = vmatmul.mubr.f32.vlgmr.msra.gmra.mrb[0].mxu1 %v58398_v63 }
 0x304   : > { %53451 = vmatpush3.bf16.msra.mxu1 %v58457_v34  ;;  %51349 = vmatprep.mubr.msk.f32.mxu1 %vm56176_vm1, %v56174_v1  ;;  %v15644_v34 = vand.u32 4294901760, %v58575_v26 }
 0x305   : > { %53476 = vmatprep.subr.bf16.mxu1 %v56175_v4  ;;  %v16028_v3 = vpop.permute.xlu1 %16027  ;;  %28897 = vrot.lane.b32.xlu1 %v56353_v28, %s56190_s22 }
 0x306   : > { %14562 = vmatmul.mubr.f32.vlgmr.msra.gmra.mrb[0].mxu0 %v58398_v63  ;;  %v15645_v50 = vsub.f32 %v58575_v26, %v15644_v34 }
 0x307   : > { %53455 = vmatpush1.bf16.msra.mxu0 %v58591_v42  ;;  %15134 = vmatprep.mubr.f32.mxu0 %v56174_v1 }
 0x308   : > { %53457 = vmatprep.subr.bf16.mxu0 %v53456_v30  ;;  %v15646_v43 = vand.u32 4294901760, %v15645_v50  ;;  %v53489_v50 = vpack.c.bf16 %v15644_v34, %v15637_v57 }
 0x30a   : > { %v53480_v45 = vpack.c.bf16 %v15646_v43, %v15639_v27  ;;  %v58704_v27 = vsub.f32 %v16048_v62, %v58682_v18 }
 0x30b   : > { %51350 = vmatmul.mubr.f32.vlgmr.msra.gmra.mrb[0].mxu1 %v58398_v63  ;;  %v16032_v63 = vpop.permute.xlu0 %16031  ;;  %27897 = vrot.lane.b32.xlu0 %v56277_v38, %s56190_s22 }
 0x30c   : > { %53478 = vmatpush3.bf16.msra.mxu1 %v58613_v48  ;;  %51356 = vmatprep.mubr.msk.f32.mxu1 %vm56176_vm1, %v56174_v1  ;;  %v16042_v0 = vsel %vm16037_vm10, %v16032_v63, %v16034_v23 }
 0x30d   : > { %53479 = vmatprep.subr.bf16.mxu1 %v56175_v4  ;;  %v16052_v53 = vsel %vm234_vm2, %v16042_v0, 0 }
 0x30e   : > { %15140 = vmatmul.mubr.f32.vlgmr.msra.gmra.mrb[0].mxu0 %v15139_v8  ;;  %v16060_v55 = vand.u32 4294901760, %v16052_v53 }
 0x30f   : > { %53459 = vmatpush1.bf16.msra.mxu0 %v53458_v37  ;;  %15230 = vmatprep.mubr.f32.mxu0 %v56174_v1  ;;  %v16024_v47 = vpop.permute.xlu0 %16023 }
 0x310   : > { %53461 = vmatprep.subr.bf16.mxu0 %v53460_v49  ;;  %v16039_v25 = vsel %vm16037_vm10, %v16024_v47, %v16026_v54  ;;  %v58654_v12 = vsub.f32 %v16052_v53, %v16060_v55  ;;  %v16038_v17 = vsel %vm16037_vm10, %v16022_v56, %v16024_v47  ;;  %27903 = vrot.lane.b32.xlu0 %v56317_v6, %s56190_s22 }
 0x311   : > { %v16056_v14 = vand.u32 4294901760, %v16039_v25  ;;  %v16058_v24 = vand.u32 4294901760, %v16038_v17 }
 0x312   : > { %v16150_v2 = vand.u32 4294901760, %v58654_v12 }
 0x313   : > { %51357 = vmatmul.mubr.f32.vlgmr.msra.gmra.mrb[0].mxu1 %v15139_v8  ;;  %v16030_v21 = vpop.permute.xlu0 %16029  ;;  %v58657_v40 = vsub.f32 %v16039_v25, %v16056_v14  ;;  %v58689_v37 = vpack.c.bf16 %v16060_v55, %v16056_v14  ;;  %v58699_v57 = vsub.f32 %v16038_v17, %v16058_v24 }
 0x314   : > { %53481 = vmatpush3.bf16.msra.mxu1 %v53480_v45  ;;  %51363 = vmatprep.mubr.msk.f32.mxu1 %vm56176_vm1, %v56174_v1  ;;  %v16041_v30 = vsel %vm16037_vm10, %v16030_v21, %v16032_v63  ;;  %v16151_v26 = vsub.f32 %v58654_v12, %v16150_v2 }
 0x315   : > { %53482 = vmatprep.subr.bf16.mxu1 %v56175_v4  ;;  %v16138_v9 = vand.u32 4294901760, %v58657_v40  ;;  %v53502_v17 = vpack.c.bf16 %v58654_v12, %v58657_v40  ;;  %27909 = vrot.lane.b32.xlu0 %v56360_v22, %s56190_s22 }
 0x316   : > { %15232 = vmatmul.mubr.f32.vlgmr.msra.gmra.mrb[0].mxu0 %v58538_v7  ;;  %v16152_v45 = vand.u32 4294901760, %v16151_v26 }
 0x317   : > { %53463 = vmatpush1.bf16.msra.mxu0 %v53462_v5  ;;  %15310 = vmatprep.mubr.f32.mxu0 %v56174_v1  ;;  %v16036_v35 = vpop.permute.xlu0 %16035  ;;  %v16139_v19 = vsub.f32 %v58657_v40, %v16138_v9  ;;  %v16144_v5 = vand.u32 4294901760, %v58699_v57  ;;  %v53510_v26 = vpack.c.bf16 %v16150_v2, %v16138_v9  ;;  %v49786_v2 = vld [vmem:[%s63392_s1 + $0x108] sm:$0xff] }
 0x318   : > { %53465 = vmatprep.subr.bf16.mxu0 %v58547_v29  ;;  %v16043_v13 = vsel %vm16037_vm10, %v16034_v23, %v16036_v35 }
 0x319   : > { %v16054_v8 = vsel %vm234_vm2, %v16043_v13, 0  ;;  %v16140_v49 = vand.u32 4294901760, %v16139_v19  ;;  %v16145_v53 = vsub.f32 %v58699_v57, %v16144_v5  ;;  %28895 = vrot.lane.b32.xlu0 %v56272_v32, %s56190_s22 }
 0x31b   : > { %51364 = vmatmul.mubr.f32.vlgmr.msra.gmra.mrb[0].mxu1 %v58538_v7  ;;  %v16146_v55 = vand.u32 4294901760, %v16145_v53 }
 0x31c   : > { %53484 = vmatpush3.bf16.msra.mxu1 %v53483_v44  ;;  %51370 = vmatprep.mubr.msk.f32.mxu1 %vm56176_vm1, %v56174_v1  ;;  %v58716_v44 = vand.u32 4294901760, %v58704_v27 }
 0x31d   : > { %53485 = vmatprep.subr.bf16.mxu1 %v56175_v4 }
 0x31e   : > { %15313 = vmatmul.mubr.f32.vlgmr.msra.gmra.mrb[0].mxu0 %v58564_v61 }
 0x31f   : > { %53467 = vmatpush1.bf16.msra.mxu0 %v58591_v42  ;;  %15387 = vmatprep.mubr.f32.mxu0 %v56174_v1 }
 0x320   : > { %53469 = vmatprep.subr.bf16.mxu0 %v53468_v36  ;;  %v16128_v36 = vsub.f32 %v58704_v27, %v58716_v44 }
 0x322   : > { %v16129_v46 = vand.u32 4294901760, %v16128_v36 }
 0x323   : > { %51371 = vmatmul.mubr.f32.vlgmr.msra.gmra.mrb[0].mxu1 %v58564_v61  ;;  %v16050_v61 = vsel %vm234_vm2, %v16041_v30, 0 }
 0x324   : > { %53487 = vmatpush3.bf16.msra.mxu1 %v58613_v48  ;;  %51377 = vmatprep.mubr.msk.f32.mxu1 %vm56176_vm1, %v56174_v1  ;;  %v16062_v41 = vand.u32 4294901760, %v16050_v61 }
 0x325   : > { %53488 = vmatprep.subr.bf16.mxu1 %v56175_v4 }
 0x326   : > { %15391 = vmatmul.mubr.f32.vlgmr.msra.gmra.mrb[0].mxu0 %v58580_v51  ;;  %v58697_v34 = vsub.f32 %v16050_v61, %v16062_v41 }
 0x327   : > { %53471 = vmatpush1.bf16.msra.mxu0 %v53470_v20  ;;  %15473 = vmatprep.mubr.f32.mxu0 %v56174_v1 }
 0x328   : > { %53473 = vmatprep.subr.bf16.mxu0 %v58547_v29  ;;  %v16040_v29 = vsel %vm16037_vm10, %v16026_v54, %v16028_v3  ;;  %v16156_v63 = vand.u32 4294901760, %v58697_v34  ;;  %v58725_v54 = vpack.c.bf16 %v16062_v41, %v16058_v24  ;;  %v53504_v13 = vpack.c.bf16 %v58697_v34, %v58699_v57  ;;  %v17024_v3 = vpop.permute.xlu1 %17023  ;;  %28889 = vrot.lane.b32.xlu1 %v56306_v60, %s56190_s22 }
 0x329   : > { %v16548_v43 = vand.u32 4294901760, %v16040_v29 }
 0x32a   : > { %v16157_v0 = vsub.f32 %v58697_v34, %v16156_v63  ;;  %v17037_v34 = vsel %vm230_vm0, %v49786_v2, 0 }
 0x32b   : > { %51378 = vmatmul.mubr.f32.vlgmr.msra.gmra.mrb[0].mxu1 %v58580_v51  ;;  %v16551_v51 = vand.u32 4294901760, %v16054_v8  ;;  %v58713_v47 = vsub.f32 %v16040_v29, %v16548_v43 }
 0x32c   : > { %53490 = vmatpush3.bf16.msra.mxu1 %v53489_v50  ;;  %51384 = vmatprep.mubr.msk.f32.mxu1 %vm56176_vm1, %v56174_v1  ;;  %v16158_v21 = vand.u32 4294901760, %v16157_v0 }
 0x32d   : > { %53491 = vmatprep.subr.bf16.mxu1 %v56175_v4  ;;  %v58711_v23 = vsub.f32 %v16054_v8, %v16551_v51  ;;  %v58741_v56 = vpack.c.bf16 %v16551_v51, %v16548_v43  ;;  %v17016_v8 = vpop.permute.xlu1 %17015  ;;  %28885 = vrot.lane.b32.xlu1 %v56334_v16, %s56190_s22 }
 0x32e   : > { %15475 = vmatmul.mubr.f32.vlgmr.msra.gmra.mrb[0].mxu0 %v58538_v7  ;;  %v53500_v20 = vpack.c.bf16 %v16158_v21, %v16146_v55 }
 0x32f   : > { %53475 = vmatpush1.bf16.msra.mxu0 %v58591_v42  ;;  %15549 = vmatprep.mubr.f32.mxu0 %v56174_v1  ;;  %v53498_v42 = vpack.c.bf16 %v16152_v45, %v16140_v49  ;;  %v16634_v25 = vand.u32 4294901760, %v58711_v23  ;;  %v53525_v24 = vpack.c.bf16 %v58711_v23, %v58713_v47 }
 0x330   : > { %53495 = vmatprep.subr.bf16.mxu0 %v58689_v37 }
 0x331   : > { %v16635_v14 = vsub.f32 %v58711_v23, %v16634_v25  ;;  %v17012_v45 = vpop.permute.xlu1 %17011  ;;  %28891 = vrot.lane.b32.xlu1 %v56449_v10, %s56190_s22 }
 0x333   : > { %51385 = vmatmul.mubr.f32.vlgmr.msra.gmra.mrb[0].mxu1 %v58538_v7  ;;  %v16636_v35 = vand.u32 4294901760, %v16635_v14 }
 0x334   : > { %53493 = vmatpush3.bf16.msra.mxu1 %v58613_v48  ;;  %51391 = vmatprep.mubr.msk.f32.mxu1 %vm56176_vm1, %v56174_v1  ;;  %v16627_v48 = vand.u32 4294901760, %v58713_v47 }
 0x335   : > { %53518 = vmatprep.subr.bf16.mxu1 %v56175_v4 }
 0x336   : > { %15551 = vmatmul.mubr.f32.vlgmr.msra.gmra.mrb[0].mxu0 %v58538_v7  ;;  %v16628_v30 = vsub.f32 %v58713_v47, %v16627_v48  ;;  %v53531_v14 = vpack.c.bf16 %v16634_v25, %v16627_v48 }
 0x337   : > { %53497 = vmatpush1.bf16.msra.mxu0 %v58725_v54  ;;  %16124 = vmatprep.mubr.f32.mxu0 %v56174_v1 }
 0x338   : > { %53499 = vmatprep.subr.bf16.mxu0 %v53498_v42  ;;  %v16629_v61 = vand.u32 4294901760, %v16628_v30  ;;  %v58822_v30 = vand.u32 4294901760, %v17037_v34 }
 0x33a   : > { %v53522_v62 = vpack.c.bf16 %v16636_v35, %v16629_v61  ;;  %v58848_v61 = vsub.f32 %v17037_v34, %v58822_v30 }
 0x33b   : > { %51392 = vmatmul.mubr.f32.vlgmr.msra.gmra.mrb[0].mxu1 %v58538_v7  ;;  %v17022_v7 = vpop.permute.xlu0 %17021  ;;  %28887 = vrot.lane.b32.xlu0 %v56279_v39, %s56190_s22 }
 0x33c   : > { %53520 = vmatpush3.bf16.msra.mxu1 %v58741_v56  ;;  %51398 = vmatprep.mubr.msk.f32.mxu1 %vm56176_vm1, %v56174_v1  ;;  %v17031_v50 = vsel %vm16037_vm10, %v17022_v7, %v17024_v3 }
 0x33d   : > { %53521 = vmatprep.subr.bf16.mxu1 %v56175_v4  ;;  %v17041_v29 = vsel %vm234_vm2, %v17031_v50, 0 }
 0x33e   : > { %16130 = vmatmul.mubr.f32.vlgmr.msra.gmra.mrb[0].mxu0 %v16129_v46  ;;  %v17049_v43 = vand.u32 4294901760, %v17041_v29 }
 0x33f   : > { %53501 = vmatpush1.bf16.msra.mxu0 %v53500_v20  ;;  %16220 = vmatprep.mubr.f32.mxu0 %v56174_v1  ;;  %v17014_v41 = vpop.permute.xlu0 %17013 }
 0x340   : > { %53503 = vmatprep.subr.bf16.mxu0 %v53502_v17  ;;  %v17028_v19 = vsel %vm16037_vm10, %v17014_v41, %v17016_v8  ;;  %v58788_v40 = vsub.f32 %v17041_v29, %v17049_v43  ;;  %v17027_v53 = vsel %vm16037_vm10, %v17012_v45, %v17014_v41  ;;  %28893 = vrot.lane.b32.xlu0 %v56326_v11, %s56190_s22 }
 0x341   : > { %v17045_v49 = vand.u32 4294901760, %v17028_v19  ;;  %v17047_v55 = vand.u32 4294901760, %v17027_v53 }
 0x342   : > { %v17139_v36 = vand.u32 4294901760, %v58788_v40 }
 0x343   : > { %51399 = vmatmul.mubr.f32.vlgmr.msra.gmra.mrb[0].mxu1 %v16129_v46  ;;  %v17020_v51 = vpop.permute.xlu0 %17019  ;;  %v58791_v9 = vsub.f32 %v17028_v19, %v17045_v49  ;;  %v58831_v20 = vpack.c.bf16 %v17049_v43, %v17045_v49  ;;  %v58841_v48 = vsub.f32 %v17027_v53, %v17047_v55 }
 0x344   : > { %53523 = vmatpush3.bf16.msra.mxu1 %v53522_v62  ;;  %51405 = vmatprep.mubr.msk.f32.mxu1 %vm56176_vm1, %v56174_v1  ;;  %v17030_v12 = vsel %vm16037_vm10, %v17020_v51, %v17022_v7  ;;  %v17140_v47 = vsub.f32 %v58788_v40, %v17139_v36 }
 0x345   : > { %53524 = vmatprep.subr.bf16.mxu1 %v56175_v4  ;;  %v17039_v0 = vsel %vm234_vm2, %v17030_v12, 0  ;;  %v53544_v53 = vpack.c.bf16 %v58788_v40, %v58791_v9  ;;  %v49787_v40 = vld [vmem:[%s63392_s1 + $0x48] sm:$0xff]  ;;  %28899 = vrot.lane.b32.xlu0 %v56444_v58, %s56190_s22 }
 0x346   : > { %16222 = vmatmul.mubr.f32.vlgmr.msra.gmra.mrb[0].mxu0 %v58682_v18  ;;  %v17051_v21 = vand.u32 4294901760, %v17039_v0  ;;  %v17141_v62 = vand.u32 4294901760, %v17140_v47 }
 0x347   : > { %53505 = vmatpush1.bf16.msra.mxu0 %v53504_v13  ;;  %16300 = vmatprep.mubr.f32.mxu0 %v56174_v1  ;;  %v17026_v42 = vpop.permute.xlu0 %17025  ;;  %v17133_v13 = vand.u32 4294901760, %v58841_v48 }
 0x348   : > { %53507 = vmatprep.subr.bf16.mxu0 %v58689_v37  ;;  %v17032_v57 = vsel %vm16037_vm10, %v17024_v3, %v17026_v42  ;;  %v58839_v25 = vsub.f32 %v17039_v0, %v17051_v21 }
 0x349   : > { %v17134_v29 = vsub.f32 %v58841_v48, %v17133_v13  ;;  %29884 = vrot.lane.b32.xlu0 %v56270_v31, %s56191_s27 }
 0x34a   : > { %v17145_v7 = vand.u32 4294901760, %v58839_v25 }
 0x34b   : > { %51406 = vmatmul.mubr.f32.vlgmr.msra.gmra.mrb[0].mxu1 %v58682_v18  ;;  %v17135_v43 = vand.u32 4294901760, %v17134_v29 }
 0x34c   : > { %53526 = vmatpush3.bf16.msra.mxu1 %v53525_v24  ;;  %51412 = vmatprep.mubr.msk.f32.mxu1 %vm56176_vm1, %v56174_v1  ;;  %v58864_v24 = vand.u32 4294901760, %v58848_v61  ;;  %v17146_v50 = vsub.f32 %v58839_v25, %v17145_v7 }
 0x34d   : > { %53527 = vmatprep.subr.bf16.mxu1 %v56175_v4 }
 0x34e   : > { %16303 = vmatmul.mubr.f32.vlgmr.msra.gmra.mrb[0].mxu0 %v58704_v27  ;;  %v17147_v51 = vand.u32 4294901760, %v17146_v50 }
 0x34f   : > { %53509 = vmatpush1.bf16.msra.mxu0 %v58725_v54  ;;  %16377 = vmatprep.mubr.f32.mxu0 %v56174_v1 }
 0x350   : > { %53511 = vmatprep.subr.bf16.mxu0 %v53510_v26  ;;  %v17117_v26 = vsub.f32 %v58848_v61, %v58864_v24 }
 0x352   : > { %v17118_v2 = vand.u32 4294901760, %v17117_v26  ;;  %v18027_v26 = vsel %vm230_vm0, %v49787_v40, 0 }
 0x353   : > { %51413 = vmatmul.mubr.f32.vlgmr.msra.gmra.mrb[0].mxu1 %v58704_v27  ;;  %v53512_v27 = vpack.c.bf16 %v16156_v63, %v16144_v5  ;;  %v17018_v63 = vpop.permute.xlu1 %17017  ;;  %v17127_v5 = vand.u32 4294901760, %v58791_v9  ;;  %29886 = vrot.lane.b32.xlu1 %v56293_v52, %s56191_s27 }
 0x354   : > { %53529 = vmatpush3.bf16.msra.mxu1 %v58741_v56  ;;  %51419 = vmatprep.mubr.msk.f32.mxu1 %vm56176_vm1, %v56174_v1  ;;  %v17029_v46 = vsel %vm16037_vm10, %v17016_v8, %v17018_v63  ;;  %v58875_v8 = vpack.c.bf16 %v17051_v21, %v17047_v55  ;;  %vm41764_vm10 = vcmask 252928  }
 0x355   : > { %53530 = vmatprep.subr.bf16.mxu1 %v56175_v4  ;;  %v17128_v23 = vsub.f32 %v58791_v9, %v17127_v5  ;;  %v17537_v35 = vand.u32 4294901760, %v17029_v46  ;;  %v53552_v47 = vpack.c.bf16 %v17139_v36, %v17127_v5  ;;  %v53554_v5 = vpack.c.bf16 %v17145_v7, %v17133_v13 }
 0x356   : > { %16381 = vmatmul.mubr.f32.vlgmr.msra.gmra.mrb[0].mxu0 %v58716_v44 }
 0x357   : > { %53513 = vmatpush1.bf16.msra.mxu0 %v53512_v27  ;;  %16463 = vmatprep.mubr.f32.mxu0 %v56174_v1  ;;  %v17129_v17 = vand.u32 4294901760, %v17128_v23  ;;  %v58861_v41 = vsub.f32 %v17029_v46, %v17537_v35  ;;  %v53542_v27 = vpack.c.bf16 %v17147_v51, %v17135_v43  ;;  %v18013_v63 = vpop.permute.xlu1 %18012 }
 0x358   : > { %53515 = vmatprep.subr.bf16.mxu0 %v58689_v37  ;;  %v17043_v37 = vsel %vm234_vm2, %v17032_v57, 0  ;;  %v53546_v57 = vpack.c.bf16 %v58839_v25, %v58841_v48  ;;  %29878 = vrot.lane.b32.xlu1 %v56304_v59, %s56191_s27 }
 0x359   : > { %v17616_v19 = vand.u32 4294901760, %v58861_v41 }
 0x35b   : > { %51420 = vmatmul.mubr.f32.vlgmr.msra.gmra.mrb[0].mxu1 %v58716_v44  ;;  %v17540_v44 = vand.u32 4294901760, %v17043_v37  ;;  %v17617_v12 = vsub.f32 %v58861_v41, %v17616_v19 }
 0x35c   : > { %53532 = vmatpush3.bf16.msra.mxu1 %v53531_v14  ;;  %51426 = vmatprep.mubr.msk.f32.mxu1 %vm56176_vm1, %v56174_v1 }
 0x35d   : > { %53533 = vmatprep.subr.bf16.mxu1 %v56175_v4  ;;  %v58859_v3 = vsub.f32 %v17043_v37, %v17540_v44  ;;  %v58897_v45 = vpack.c.bf16 %v17540_v44, %v17537_v35  ;;  %v17618_v0 = vand.u32 4294901760, %v17617_v12  ;;  %v18005_v37 = vpop.permute.xlu1 %18004  ;;  %v58966_v12 = vand.u32 4294901760, %v18027_v26  ;;  %29874 = vrot.lane.b32.xlu1 %v56332_v15, %s56191_s27 }
 0x35e   : > { %16465 = vmatmul.mubr.f32.vlgmr.msra.gmra.mrb[0].mxu0 %v58682_v18 }
 0x35f   : > { %53517 = vmatpush1.bf16.msra.mxu0 %v58725_v54  ;;  %16539 = vmatprep.mubr.f32.mxu0 %v56174_v1  ;;  %v53540_v54 = vpack.c.bf16 %v17141_v62, %v17129_v17  ;;  %v53567_v55 = vpack.c.bf16 %v58859_v3, %v58861_v41 }
 0x360   : > { %53537 = vmatprep.subr.bf16.mxu0 %v58831_v20 }
 0x361   : > { %v18001_v62 = vpop.permute.xlu1 %18000  ;;  %29880 = vrot.lane.b32.xlu1 %v56368_v33, %s56191_s27 }
 0x363   : > { %51427 = vmatmul.mubr.f32.vlgmr.msra.gmra.mrb[0].mxu1 %v58682_v18 }
 0x364   : > { %53535 = vmatpush3.bf16.msra.mxu1 %v58741_v56  ;;  %51433 = vmatprep.mubr.msk.f32.mxu1 %vm56176_vm1, %v56174_v1  ;;  %v17623_v56 = vand.u32 4294901760, %v58859_v3 }
 0x365   : > { %53560 = vmatprep.subr.bf16.mxu1 %v56175_v4  ;;  %v18007_v25 = vpop.permute.xlu1 %18006  ;;  %30876 = vrot.lane.b32.xlu1 %v56353_v28, %s56191_s27 }
 0x366   : > { %16541 = vmatmul.mubr.f32.vlgmr.msra.gmra.mrb[0].mxu0 %v58682_v18  ;;  %v17624_v49 = vsub.f32 %v58859_v3, %v17623_v56 }
 0x367   : > { %53539 = vmatpush1.bf16.msra.mxu0 %v58875_v8  ;;  %17113 = vmatprep.mubr.f32.mxu0 %v56174_v1 }
 0x368   : > { %53541 = vmatprep.subr.bf16.mxu0 %v53540_v54  ;;  %v17625_v42 = vand.u32 4294901760, %v17624_v49  ;;  %v53573_v49 = vpack.c.bf16 %v17623_v56, %v17616_v19 }
 0x36a   : > { %v53564_v34 = vpack.c.bf16 %v17625_v42, %v17618_v0  ;;  %v58988_v0 = vsub.f32 %v18027_v26, %v58966_v12 }
 0x36b   : > { %51434 = vmatmul.mubr.f32.vlgmr.msra.gmra.mrb[0].mxu1 %v58682_v18  ;;  %v18011_v18 = vpop.permute.xlu0 %18010  ;;  %29876 = vrot.lane.b32.xlu0 %v56277_v38, %s56191_s27 }
 0x36c   : > { %53562 = vmatpush3.bf16.msra.mxu1 %v58897_v45  ;;  %51440 = vmatprep.mubr.msk.f32.mxu1 %vm56176_vm1, %v56174_v1  ;;  %v18021_v14 = vsel %vm18016_vm11, %v18011_v18, %v18013_v63 }
 0x36d   : > { %53563 = vmatprep.subr.bf16.mxu1 %v56175_v4  ;;  %v18031_v46 = vsel %vm234_vm2, %v18021_v14, 0 }
 0x36e   : > { %17119 = vmatmul.mubr.f32.vlgmr.msra.gmra.mrb[0].mxu0 %v17118_v2  ;;  %v18039_v35 = vand.u32 4294901760, %v18031_v46 }
 0x36f   : > { %53543 = vmatpush1.bf16.msra.mxu0 %v53542_v27  ;;  %17209 = vmatprep.mubr.f32.mxu0 %v56174_v1  ;;  %v18003_v21 = vpop.permute.xlu0 %18002 }
 0x370   : > { %53545 = vmatprep.subr.bf16.mxu0 %v53544_v53  ;;  %v18018_v23 = vsel %vm18016_vm11, %v18003_v21, %v18005_v37  ;;  %v58938_v50 = vsub.f32 %v18031_v46, %v18039_v35  ;;  %v18017_v29 = vsel %vm18016_vm11, %v18001_v62, %v18003_v21  ;;  %29882 = vrot.lane.b32.xlu0 %v56317_v6, %s56191_s27 }
 0x371   : > { %v18035_v17 = vand.u32 4294901760, %v18018_v23  ;;  %v18037_v43 = vand.u32 4294901760, %v18017_v29 }
 0x372   : > { %v18129_v13 = vand.u32 4294901760, %v58938_v50 }
 0x373   : > { %51441 = vmatmul.mubr.f32.vlgmr.msra.gmra.mrb[0].mxu1 %v17118_v2  ;;  %v18009_v44 = vpop.permute.xlu0 %18008  ;;  %v58941_v9 = vsub.f32 %v18018_v23, %v18035_v17  ;;  %v58973_v27 = vpack.c.bf16 %v18039_v35, %v18035_v17  ;;  %v58983_v19 = vsub.f32 %v18017_v29, %v18037_v43 }
 0x374   : > { %53565 = vmatpush3.bf16.msra.mxu1 %v53564_v34  ;;  %51447 = vmatprep.mubr.msk.f32.mxu1 %vm56176_vm1, %v56174_v1  ;;  %v18020_v54 = vsel %vm18016_vm11, %v18009_v44, %v18011_v18  ;;  %v18130_v3 = vsub.f32 %v58938_v50, %v18129_v13 }
 0x375   : > { %53566 = vmatprep.subr.bf16.mxu1 %v56175_v4  ;;  %v18117_v7 = vand.u32 4294901760, %v58941_v9  ;;  %v53586_v29 = vpack.c.bf16 %v58938_v50, %v58941_v9  ;;  %29888 = vrot.lane.b32.xlu0 %v56360_v22, %s56191_s27 }
 0x376   : > { %17211 = vmatmul.mubr.f32.vlgmr.msra.gmra.mrb[0].mxu0 %v58822_v30  ;;  %v18131_v34 = vand.u32 4294901760, %v18130_v3 }
 0x377   : > { %53547 = vmatpush1.bf16.msra.mxu0 %v53546_v57  ;;  %17289 = vmatprep.mubr.f32.mxu0 %v56174_v1  ;;  %v18015_v36 = vpop.permute.xlu0 %18014  ;;  %v18118_v41 = vsub.f32 %v58941_v9, %v18117_v7  ;;  %v18123_v57 = vand.u32 4294901760, %v58983_v19  ;;  %v53594_v3 = vpack.c.bf16 %v18129_v13, %v18117_v7  ;;  %v49788_v13 = vld [vmem:[%s63392_s1 + $0x110] sm:$0xff] }
 0x378   : > { %53549 = vmatprep.subr.bf16.mxu0 %v58831_v20  ;;  %v18022_v48 = vsel %vm18016_vm11, %v18013_v63, %v18015_v36 }
 0x379   : > { %v18033_v2 = vsel %vm234_vm2, %v18022_v48, 0  ;;  %v18119_v53 = vand.u32 4294901760, %v18118_v41  ;;  %v18124_v46 = vsub.f32 %v58983_v19, %v18123_v57  ;;  %30874 = vrot.lane.b32.xlu0 %v56272_v32, %s56191_s27 }
 0x37b   : > { %51448 = vmatmul.mubr.f32.vlgmr.msra.gmra.mrb[0].mxu1 %v58822_v30  ;;  %v18125_v35 = vand.u32 4294901760, %v18124_v46 }
 0x37c   : > { %53568 = vmatpush3.bf16.msra.mxu1 %v53567_v55  ;;  %51454 = vmatprep.mubr.msk.f32.mxu1 %vm56176_vm1, %v56174_v1  ;;  %v59000_v55 = vand.u32 4294901760, %v58988_v0 }
 0x37d   : > { %53569 = vmatprep.subr.bf16.mxu1 %v56175_v4 }
 0x37e   : > { %17292 = vmatmul.mubr.f32.vlgmr.msra.gmra.mrb[0].mxu0 %v58848_v61 }
 0x37f   : > { %53551 = vmatpush1.bf16.msra.mxu0 %v58875_v8  ;;  %17366 = vmatprep.mubr.f32.mxu0 %v56174_v1 }
 0x380   : > { %53553 = vmatprep.subr.bf16.mxu0 %v53552_v47  ;;  %v18107_v47 = vsub.f32 %v58988_v0, %v59000_v55 }
 0x382   : > { %v18108_v40 = vand.u32 4294901760, %v18107_v47 }
 0x383   : > { %51455 = vmatmul.mubr.f32.vlgmr.msra.gmra.mrb[0].mxu1 %v58848_v61  ;;  %v18029_v61 = vsel %vm234_vm2, %v18020_v54, 0 }
 0x384   : > { %53571 = vmatpush3.bf16.msra.mxu1 %v58897_v45  ;;  %51461 = vmatprep.mubr.msk.f32.mxu1 %vm56176_vm1, %v56174_v1  ;;  %v18041_v51 = vand.u32 4294901760, %v18029_v61 }
 0x385   : > { %53572 = vmatprep.subr.bf16.mxu1 %v56175_v4 }
 0x386   : > { %17370 = vmatmul.mubr.f32.vlgmr.msra.gmra.mrb[0].mxu0 %v58864_v24  ;;  %v58981_v56 = vsub.f32 %v18029_v61, %v18041_v51 }
 0x387   : > { %53555 = vmatpush1.bf16.msra.mxu0 %v53554_v5  ;;  %17452 = vmatprep.mubr.f32.mxu0 %v56174_v1 }
 0x388   : > { %53557 = vmatprep.subr.bf16.mxu0 %v58831_v20  ;;  %v18019_v20 = vsel %vm18016_vm11, %v18005_v37, %v18007_v25  ;;  %v18135_v18 = vand.u32 4294901760, %v58981_v56  ;;  %v59009_v37 = vpack.c.bf16 %v18041_v51, %v18037_v43  ;;  %v53588_v48 = vpack.c.bf16 %v58981_v56, %v58983_v19  ;;  %v19003_v25 = vpop.permute.xlu1 %19002  ;;  %30868 = vrot.lane.b32.xlu1 %v56306_v60, %s56191_s27 }
 0x389   : > { %v18527_v42 = vand.u32 4294901760, %v18019_v20 }
 0x38a   : > { %v18136_v14 = vsub.f32 %v58981_v56, %v18135_v18  ;;  %v19016_v56 = vsel %vm230_vm0, %v49788_v13, 0 }
 0x38b   : > { %51462 = vmatmul.mubr.f32.vlgmr.msra.gmra.mrb[0].mxu1 %v58864_v24  ;;  %v18530_v24 = vand.u32 4294901760, %v18033_v2  ;;  %v58997_v21 = vsub.f32 %v18019_v20, %v18527_v42 }
 0x38c   : > { %53574 = vmatpush3.bf16.msra.mxu1 %v53573_v49  ;;  %51468 = vmatprep.mubr.msk.f32.mxu1 %vm56176_vm1, %v56174_v1  ;;  %v18137_v44 = vand.u32 4294901760, %v18136_v14 }
 0x38d   : > { %53575 = vmatprep.subr.bf16.mxu1 %v56175_v4  ;;  %v58995_v63 = vsub.f32 %v18033_v2, %v18530_v24  ;;  %v59025_v62 = vpack.c.bf16 %v18530_v24, %v18527_v42  ;;  %v18995_v2 = vpop.permute.xlu1 %18994  ;;  %30864 = vrot.lane.b32.xlu1 %v56334_v16, %s56191_s27 }
 0x38e   : > { %17454 = vmatmul.mubr.f32.vlgmr.msra.gmra.mrb[0].mxu0 %v58822_v30  ;;  %v53584_v5 = vpack.c.bf16 %v18137_v44, %v18125_v35 }
 0x38f   : > { %53559 = vmatpush1.bf16.msra.mxu0 %v58875_v8  ;;  %17528 = vmatprep.mubr.f32.mxu0 %v56174_v1  ;;  %v53582_v8 = vpack.c.bf16 %v18131_v34, %v18119_v53  ;;  %v18613_v23 = vand.u32 4294901760, %v58995_v63  ;;  %v53609_v43 = vpack.c.bf16 %v58995_v63, %v58997_v21 }
 0x390   : > { %53579 = vmatprep.subr.bf16.mxu0 %v58973_v27 }
 0x391   : > { %v18614_v17 = vsub.f32 %v58995_v63, %v18613_v23  ;;  %v18991_v34 = vpop.permute.xlu1 %18990  ;;  %30870 = vrot.lane.b32.xlu1 %v56449_v10, %s56191_s27 }
 0x393   : > { %51469 = vmatmul.mubr.f32.vlgmr.msra.gmra.mrb[0].mxu1 %v58822_v30  ;;  %v18615_v36 = vand.u32 4294901760, %v18614_v17 }
 0x394   : > { %53577 = vmatpush3.bf16.msra.mxu1 %v58897_v45  ;;  %51475 = vmatprep.mubr.msk.f32.mxu1 %vm56176_vm1, %v56174_v1  ;;  %v18606_v45 = vand.u32 4294901760, %v58997_v21 }
 0x395   : > { %53602 = vmatprep.subr.bf16.mxu1 %v56175_v4 }
 0x396   : > { %17530 = vmatmul.mubr.f32.vlgmr.msra.gmra.mrb[0].mxu0 %v58822_v30  ;;  %v18607_v54 = vsub.f32 %v58997_v21, %v18606_v45  ;;  %v53615_v17 = vpack.c.bf16 %v18613_v23, %v18606_v45 }
 0x397   : > { %53581 = vmatpush1.bf16.msra.mxu0 %v59009_v37  ;;  %18103 = vmatprep.mubr.f32.mxu0 %v56174_v1 }
 0x398   : > { %53583 = vmatprep.subr.bf16.mxu0 %v53582_v8  ;;  %v18608_v61 = vand.u32 4294901760, %v18607_v54  ;;  %v59106_v54 = vand.u32 4294901760, %v19016_v56 }
 0x39a   : > { %v53606_v26 = vpack.c.bf16 %v18615_v36, %v18608_v61  ;;  %v59132_v61 = vsub.f32 %v19016_v56, %v59106_v54 }
 0x39b   : > { %51476 = vmatmul.mubr.f32.vlgmr.msra.gmra.mrb[0].mxu1 %v58822_v30  ;;  %v19001_v30 = vpop.permute.xlu0 %19000  ;;  %30866 = vrot.lane.b32.xlu0 %v56279_v39, %s56191_s27 }
 0x39c   : > { %53604 = vmatpush3.bf16.msra.mxu1 %v59025_v62  ;;  %51482 = vmatprep.mubr.msk.f32.mxu1 %vm56176_vm1, %v56174_v1  ;;  %v19010_v49 = vsel %vm18016_vm11, %v19001_v30, %v19003_v25 }
 0x39d   : > { %53605 = vmatprep.subr.bf16.mxu1 %v56175_v4  ;;  %v19020_v20 = vsel %vm234_vm2, %v19010_v49, 0 }
 0x39e   : > { %18109 = vmatmul.mubr.f32.vlgmr.msra.gmra.mrb[0].mxu0 %v18108_v40  ;;  %v19028_v42 = vand.u32 4294901760, %v19020_v20 }
 0x39f   : > { %53585 = vmatpush1.bf16.msra.mxu0 %v53584_v5  ;;  %18199 = vmatprep.mubr.f32.mxu0 %v56174_v1  ;;  %v18993_v51 = vpop.permute.xlu0 %18992 }
 0x3a0   : > { %53587 = vmatprep.subr.bf16.mxu0 %v53586_v29  ;;  %v19007_v41 = vsel %vm18016_vm11, %v18993_v51, %v18995_v2  ;;  %v59072_v9 = vsub.f32 %v19020_v20, %v19028_v42  ;;  %v19006_v46 = vsel %vm18016_vm11, %v18991_v34, %v18993_v51  ;;  %30872 = vrot.lane.b32.xlu0 %v56326_v11, %s56191_s27 }
 0x3a1   : > { %v19024_v53 = vand.u32 4294901760, %v19007_v41  ;;  %v19026_v35 = vand.u32 4294901760, %v19006_v46 }
 0x3a2   : > { %v19118_v47 = vand.u32 4294901760, %v59072_v9 }
 0x3a3   : > { %51483 = vmatmul.mubr.f32.vlgmr.msra.gmra.mrb[0].mxu1 %v18108_v40  ;;  %v18999_v24 = vpop.permute.xlu0 %18998  ;;  %v59075_v7 = vsub.f32 %v19007_v41, %v19024_v53  ;;  %v59115_v5 = vpack.c.bf16 %v19028_v42, %v19024_v53  ;;  %v59125_v45 = vsub.f32 %v19006_v46, %v19026_v35 }
 0x3a4   : > { %53607 = vmatpush3.bf16.msra.mxu1 %v53606_v26  ;;  %51489 = vmatprep.mubr.msk.f32.mxu1 %vm56176_vm1, %v56174_v1  ;;  %v19009_v50 = vsel %vm18016_vm11, %v18999_v24, %v19001_v30  ;;  %v19119_v21 = vsub.f32 %v59072_v9, %v19118_v47 }
 0x3a5   : > { %53608 = vmatprep.subr.bf16.mxu1 %v56175_v4  ;;  %v19018_v14 = vsel %vm234_vm2, %v19009_v50, 0  ;;  %v53628_v46 = vpack.c.bf16 %v59072_v9, %v59075_v7  ;;  %v49789_v9 = vld [vmem:[%s63392_s1 + $0x50] sm:$0xff]  ;;  %30878 = vrot.lane.b32.xlu0 %v56444_v58, %s56191_s27 }
 0x3a6   : > { %18201 = vmatmul.mubr.f32.vlgmr.msra.gmra.mrb[0].mxu0 %v58966_v12  ;;  %v19030_v44 = vand.u32 4294901760, %v19018_v14  ;;  %v19120_v26 = vand.u32 4294901760, %v19119_v21 }
 0x3a7   : > { %53589 = vmatpush1.bf16.msra.mxu0 %v53588_v48  ;;  %18279 = vmatprep.mubr.f32.mxu0 %v56174_v1  ;;  %v19005_v8 = vpop.permute.xlu0 %19004  ;;  %v19112_v48 = vand.u32 4294901760, %v59125_v45 }
 0x3a8   : > { %53591 = vmatprep.subr.bf16.mxu0 %v58973_v27  ;;  %v19011_v19 = vsel %vm18016_vm11, %v19003_v25, %v19005_v8  ;;  %v59123_v23 = vsub.f32 %v19018_v14, %v19030_v44 }
 0x3a9   : > { %v19113_v20 = vsub.f32 %v59125_v45, %v19112_v48  ;;  %31863 = vrot.lane.b32.xlu0 %v56270_v31, %s56192_s4 }
 0x3aa   : > { %v19124_v30 = vand.u32 4294901760, %v59123_v23 }
 0x3ab   : > { %51490 = vmatmul.mubr.f32.vlgmr.msra.gmra.mrb[0].mxu1 %v58966_v12  ;;  %v19114_v42 = vand.u32 4294901760, %v19113_v20 }
 0x3ac   : > { %53610 = vmatpush3.bf16.msra.mxu1 %v53609_v43  ;;  %51496 = vmatprep.mubr.msk.f32.mxu1 %vm56176_vm1, %v56174_v1  ;;  %v59148_v43 = vand.u32 4294901760, %v59132_v61  ;;  %v19125_v49 = vsub.f32 %v59123_v23, %v19124_v30 }
 0x3ad   : > { %53611 = vmatprep.subr.bf16.mxu1 %v56175_v4 }
 0x3ae   : > { %18282 = vmatmul.mubr.f32.vlgmr.msra.gmra.mrb[0].mxu0 %v58988_v0  ;;  %v19126_v24 = vand.u32 4294901760, %v19125_v49 }
 0x3af   : > { %53593 = vmatpush1.bf16.msra.mxu0 %v59009_v37  ;;  %18356 = vmatprep.mubr.f32.mxu0 %v56174_v1 }
 0x3b0   : > { %53595 = vmatprep.subr.bf16.mxu0 %v53594_v3  ;;  %v19096_v3 = vsub.f32 %v59132_v61, %v59148_v43 }
 0x3b2   : > { %v19097_v13 = vand.u32 4294901760, %v19096_v3  ;;  %v20006_v3 = vsel %vm230_vm0, %v49789_v9, 0 }
 0x3b3   : > { %51497 = vmatmul.mubr.f32.vlgmr.msra.gmra.mrb[0].mxu1 %v58988_v0  ;;  %v53596_v0 = vpack.c.bf16 %v18135_v18, %v18123_v57  ;;  %v18997_v18 = vpop.permute.xlu1 %18996  ;;  %v19106_v57 = vand.u32 4294901760, %v59075_v7  ;;  %31865 = vrot.lane.b32.xlu1 %v56293_v52, %s56192_s4 }
 0x3b4   : > { %53613 = vmatpush3.bf16.msra.mxu1 %v59025_v62  ;;  %51503 = vmatprep.mubr.msk.f32.mxu1 %vm56176_vm1, %v56174_v1  ;;  %v19008_v40 = vsel %vm18016_vm11, %v18995_v2, %v18997_v18  ;;  %v59159_v2 = vpack.c.bf16 %v19030_v44, %v19026_v35  ;;  %vm43743_vm11 = vcmask 244736  }
 0x3b5   : > { %53614 = vmatprep.subr.bf16.mxu1 %v56175_v4  ;;  %v19107_v63 = vsub.f32 %v59075_v7, %v19106_v57  ;;  %v19516_v36 = vand.u32 4294901760, %v19008_v40  ;;  %v53636_v21 = vpack.c.bf16 %v19118_v47, %v19106_v57  ;;  %v53638_v57 = vpack.c.bf16 %v19124_v30, %v19112_v48 }
 0x3b6   : > { %18360 = vmatmul.mubr.f32.vlgmr.msra.gmra.mrb[0].mxu0 %v59000_v55 }
 0x3b7   : > { %53597 = vmatpush1.bf16.msra.mxu0 %v53596_v0  ;;  %18442 = vmatprep.mubr.f32.mxu0 %v56174_v1  ;;  %v19108_v29 = vand.u32 4294901760, %v19107_v63  ;;  %v59145_v51 = vsub.f32 %v19008_v40, %v19516_v36  ;;  %v53626_v0 = vpack.c.bf16 %v19126_v24, %v19114_v42  ;;  %v19992_v18 = vpop.permute.xlu1 %19991 }
 0x3b8   : > { %53599 = vmatprep.subr.bf16.mxu0 %v58973_v27  ;;  %v19022_v27 = vsel %vm234_vm2, %v19011_v19, 0  ;;  %v53630_v19 = vpack.c.bf16 %v59123_v23, %v59125_v45  ;;  %31857 = vrot.lane.b32.xlu1 %v56304_v59, %s56192_s4 }
 0x3b9   : > { %v19595_v41 = vand.u32 4294901760, %v59145_v51 }
 0x3bb   : > { %51504 = vmatmul.mubr.f32.vlgmr.msra.gmra.mrb[0].mxu1 %v59000_v55  ;;  %v19519_v55 = vand.u32 4294901760, %v19022_v27  ;;  %v19596_v50 = vsub.f32 %v59145_v51, %v19595_v41 }
 0x3bc   : > { %53616 = vmatpush3.bf16.msra.mxu1 %v53615_v17  ;;  %51510 = vmatprep.mubr.msk.f32.mxu1 %vm56176_vm1, %v56174_v1 }
 0x3bd   : > { %53617 = vmatprep.subr.bf16.mxu1 %v56175_v4  ;;  %v59143_v25 = vsub.f32 %v19022_v27, %v19519_v55  ;;  %v59181_v34 = vpack.c.bf16 %v19519_v55, %v19516_v36  ;;  %v19597_v14 = vand.u32 4294901760, %v19596_v50  ;;  %v19984_v27 = vpop.permute.xlu1 %19983  ;;  %v59250_v50 = vand.u32 4294901760, %v20006_v3  ;;  %31853 = vrot.lane.b32.xlu1 %v56332_v15, %s56192_s4 }
 0x3be   : > { %18444 = vmatmul.mubr.f32.vlgmr.msra.gmra.mrb[0].mxu0 %v58966_v12 }
 0x3bf   : > { %53601 = vmatpush1.bf16.msra.mxu0 %v59009_v37  ;;  %18518 = vmatprep.mubr.f32.mxu0 %v56174_v1  ;;  %v53624_v37 = vpack.c.bf16 %v19120_v26, %v19108_v29  ;;  %v53651_v35 = vpack.c.bf16 %v59143_v25, %v59145_v51 }
 0x3c0   : > { %53621 = vmatprep.subr.bf16.mxu0 %v59115_v5 }
 0x3c1   : > { %v19980_v26 = vpop.permute.xlu1 %19979  ;;  %31859 = vrot.lane.b32.xlu1 %v56368_v33, %s56192_s4 }
 0x3c3   : > { %51511 = vmatmul.mubr.f32.vlgmr.msra.gmra.mrb[0].mxu1 %v58966_v12 }
 0x3c4   : > { %53619 = vmatpush3.bf16.msra.mxu1 %v59025_v62  ;;  %51517 = vmatprep.mubr.msk.f32.mxu1 %vm56176_vm1, %v56174_v1  ;;  %v19602_v62 = vand.u32 4294901760, %v59143_v25 }
 0x3c5   : > { %53644 = vmatprep.subr.bf16.mxu1 %v56175_v4  ;;  %v19986_v23 = vpop.permute.xlu1 %19985  ;;  %32855 = vrot.lane.b32.xlu1 %v56353_v28, %s56192_s4 }
 0x3c6   : > { %18520 = vmatmul.mubr.f32.vlgmr.msra.gmra.mrb[0].mxu0 %v58966_v12  ;;  %v19603_v53 = vsub.f32 %v59143_v25, %v19602_v62 }
 0x3c7   : > { %53623 = vmatpush1.bf16.msra.mxu0 %v59159_v2  ;;  %19092 = vmatprep.mubr.f32.mxu0 %v56174_v1 }
 0x3c8   : > { %53625 = vmatprep.subr.bf16.mxu0 %v53624_v37  ;;  %v19604_v8 = vand.u32 4294901760, %v19603_v53  ;;  %v53657_v53 = vpack.c.bf16 %v19602_v62, %v19595_v41 }
 0x3ca   : > { %v53648_v56 = vpack.c.bf16 %v19604_v8, %v19597_v14  ;;  %v59272_v14 = vsub.f32 %v20006_v3, %v59250_v50 }
 0x3cb   : > { %51518 = vmatmul.mubr.f32.vlgmr.msra.gmra.mrb[0].mxu1 %v58966_v12  ;;  %v19990_v12 = vpop.permute.xlu0 %19989  ;;  %31855 = vrot.lane.b32.xlu0 %v56277_v38, %s56192_s4 }
 0x3cc   : > { %53646 = vmatpush3.bf16.msra.mxu1 %v59181_v34  ;;  %51524 = vmatprep.mubr.msk.f32.mxu1 %vm56176_vm1, %v56174_v1  ;;  %v20000_v17 = vsel %vm19995_vm12, %v19990_v12, %v19992_v18 }
 0x3cd   : > { %53647 = vmatprep.subr.bf16.mxu1 %v56175_v4  ;;  %v20010_v40 = vsel %vm234_vm2, %v20000_v17, 0 }
 0x3ce   : > { %19098 = vmatmul.mubr.f32.vlgmr.msra.gmra.mrb[0].mxu0 %v19097_v13  ;;  %v20018_v36 = vand.u32 4294901760, %v20010_v40 }
 0x3cf   : > { %53627 = vmatpush1.bf16.msra.mxu0 %v53626_v0  ;;  %19188 = vmatprep.mubr.f32.mxu0 %v56174_v1  ;;  %v19982_v44 = vpop.permute.xlu0 %19981 }
 0x3d0   : > { %53629 = vmatprep.subr.bf16.mxu0 %v53628_v46  ;;  %v19997_v63 = vsel %vm19995_vm12, %v19982_v44, %v19984_v27  ;;  %v59222_v49 = vsub.f32 %v20010_v40, %v20018_v36  ;;  %v19996_v20 = vsel %vm19995_vm12, %v19980_v26, %v19982_v44  ;;  %31861 = vrot.lane.b32.xlu0 %v56317_v6, %s56192_s4 }
 0x3d1   : > { %v20014_v29 = vand.u32 4294901760, %v19997_v63  ;;  %v20016_v42 = vand.u32 4294901760, %v19996_v20 }
 0x3d2   : > { %v20108_v48 = vand.u32 4294901760, %v59222_v49 }
 0x3d3   : > { %51525 = vmatmul.mubr.f32.vlgmr.msra.gmra.mrb[0].mxu1 %v19097_v13  ;;  %v19988_v55 = vpop.permute.xlu0 %19987  ;;  %v59225_v7 = vsub.f32 %v19997_v63, %v20014_v29  ;;  %v59257_v0 = vpack.c.bf16 %v20018_v36, %v20014_v29  ;;  %v59267_v41 = vsub.f32 %v19996_v20, %v20016_v42 }
 0x3d4   : > { %53649 = vmatpush3.bf16.msra.mxu1 %v53648_v56  ;;  %51531 = vmatprep.mubr.msk.f32.mxu1 %vm56176_vm1, %v56174_v1  ;;  %v19999_v37 = vsel %vm19995_vm12, %v19988_v55, %v19990_v12  ;;  %v20109_v25 = vsub.f32 %v59222_v49, %v20108_v48 }
 0x3d5   : > { %53650 = vmatprep.subr.bf16.mxu1 %v56175_v4  ;;  %v20096_v30 = vand.u32 4294901760, %v59225_v7  ;;  %v53670_v20 = vpack.c.bf16 %v59222_v49, %v59225_v7  ;;  %31867 = vrot.lane.b32.xlu0 %v56360_v22, %s56192_s4 }
 0x3d6   : > { %19190 = vmatmul.mubr.f32.vlgmr.msra.gmra.mrb[0].mxu0 %v59106_v54  ;;  %v20110_v56 = vand.u32 4294901760, %v20109_v25 }
 0x3d7   : > { %53631 = vmatpush1.bf16.msra.mxu0 %v53630_v19  ;;  %19268 = vmatprep.mubr.f32.mxu0 %v56174_v1  ;;  %v19994_v47 = vpop.permute.xlu0 %19993  ;;  %v20097_v51 = vsub.f32 %v59225_v7, %v20096_v30  ;;  %v20102_v19 = vand.u32 4294901760, %v59267_v41  ;;  %v53678_v25 = vpack.c.bf16 %v20108_v48, %v20096_v30  ;;  %v49790_v48 = vld [vmem:[%s63392_s1 + $0x118] sm:$0xff] }
 0x3d8   : > { %53633 = vmatprep.subr.bf16.mxu0 %v59115_v5  ;;  %v20001_v45 = vsel %vm19995_vm12, %v19992_v18, %v19994_v47 }
 0x3d9   : > { %v20012_v13 = vsel %vm234_vm2, %v20001_v45, 0  ;;  %v20098_v46 = vand.u32 4294901760, %v20097_v51  ;;  %v20103_v40 = vsub.f32 %v59267_v41, %v20102_v19  ;;  %32853 = vrot.lane.b32.xlu0 %v56272_v32, %s56192_s4 }
 0x3db   : > { %51532 = vmatmul.mubr.f32.vlgmr.msra.gmra.mrb[0].mxu1 %v59106_v54  ;;  %v20104_v36 = vand.u32 4294901760, %v20103_v40 }
 0x3dc   : > { %53652 = vmatpush3.bf16.msra.mxu1 %v53651_v35  ;;  %51538 = vmatprep.mubr.msk.f32.mxu1 %vm56176_vm1, %v56174_v1  ;;  %v59284_v35 = vand.u32 4294901760, %v59272_v14 }
 0x3dd   : > { %53653 = vmatprep.subr.bf16.mxu1 %v56175_v4 }
 0x3de   : > { %19271 = vmatmul.mubr.f32.vlgmr.msra.gmra.mrb[0].mxu0 %v59132_v61 }
 0x3df   : > { %53635 = vmatpush1.bf16.msra.mxu0 %v59159_v2  ;;  %19345 = vmatprep.mubr.f32.mxu0 %v56174_v1 }
 0x3e0   : > { %53637 = vmatprep.subr.bf16.mxu0 %v53636_v21  ;;  %v20086_v21 = vsub.f32 %v59272_v14, %v59284_v35 }
 0x3e2   : > { %v20087_v9 = vand.u32 4294901760, %v20086_v21 }
 0x3e3   : > { %51539 = vmatmul.mubr.f32.vlgmr.msra.gmra.mrb[0].mxu1 %v59132_v61  ;;  %v20008_v61 = vsel %vm234_vm2, %v19999_v37, 0 }
 0x3e4   : > { %53655 = vmatpush3.bf16.msra.mxu1 %v59181_v34  ;;  %51545 = vmatprep.mubr.msk.f32.mxu1 %vm56176_vm1, %v56174_v1  ;;  %v20020_v24 = vand.u32 4294901760, %v20008_v61 }
 0x3e5   : > { %53656 = vmatprep.subr.bf16.mxu1 %v56175_v4 }
 0x3e6   : > { %19349 = vmatmul.mubr.f32.vlgmr.msra.gmra.mrb[0].mxu0 %v59148_v43  ;;  %v59265_v62 = vsub.f32 %v20008_v61, %v20020_v24 }
 0x3e7   : > { %53639 = vmatpush1.bf16.msra.mxu0 %v53638_v57  ;;  %19431 = vmatprep.mubr.f32.mxu0 %v56174_v1 }
 0x3e8   : > { %53641 = vmatprep.subr.bf16.mxu0 %v59115_v5  ;;  %v19998_v5 = vsel %vm19995_vm12, %v19984_v27, %v19986_v23  ;;  %v20114_v12 = vand.u32 4294901760, %v59265_v62  ;;  %v59293_v27 = vpack.c.bf16 %v20020_v24, %v20016_v42  ;;  %v53672_v45 = vpack.c.bf16 %v59265_v62, %v59267_v41  ;;  %v20982_v23 = vpop.permute.xlu1 %20981  ;;  %32847 = vrot.lane.b32.xlu1 %v56306_v60, %s56192_s4 }
 0x3e9   : > { %v20506_v8 = vand.u32 4294901760, %v19998_v5 }
 0x3ea   : > { %v20115_v17 = vsub.f32 %v59265_v62, %v20114_v12  ;;  %v20995_v62 = vsel %vm230_vm0, %v49790_v48, 0 }
 0x3eb   : > { %51546 = vmatmul.mubr.f32.vlgmr.msra.gmra.mrb[0].mxu1 %v59148_v43  ;;  %v20509_v43 = vand.u32 4294901760, %v20012_v13  ;;  %v59281_v44 = vsub.f32 %v19998_v5, %v20506_v8 }
 0x3ec   : > { %53658 = vmatpush3.bf16.msra.mxu1 %v53657_v53  ;;  %51552 = vmatprep.mubr.msk.f32.mxu1 %vm56176_vm1, %v56174_v1  ;;  %v20116_v55 = vand.u32 4294901760, %v20115_v17 }
 0x3ed   : > { %53659 = vmatprep.subr.bf16.mxu1 %v56175_v4  ;;  %v59279_v18 = vsub.f32 %v20012_v13, %v20509_v43  ;;  %v59309_v26 = vpack.c.bf16 %v20509_v43, %v20506_v8  ;;  %v20974_v13 = vpop.permute.xlu1 %20973  ;;  %32843 = vrot.lane.b32.xlu1 %v56334_v16, %s56192_s4 }
 0x3ee   : > { %19433 = vmatmul.mubr.f32.vlgmr.msra.gmra.mrb[0].mxu0 %v59106_v54  ;;  %v53668_v57 = vpack.c.bf16 %v20116_v55, %v20104_v36 }
 0x3ef   : > { %53643 = vmatpush1.bf16.msra.mxu0 %v59159_v2  ;;  %19507 = vmatprep.mubr.f32.mxu0 %v56174_v1  ;;  %v53666_v2 = vpack.c.bf16 %v20110_v56, %v20098_v46  ;;  %v20592_v63 = vand.u32 4294901760, %v59279_v18  ;;  %v53693_v42 = vpack.c.bf16 %v59279_v18, %v59281_v44 }
 0x3f0   : > { %53663 = vmatprep.subr.bf16.mxu0 %v59257_v0 }
 0x3f1   : > { %v20593_v29 = vsub.f32 %v59279_v18, %v20592_v63  ;;  %v20970_v56 = vpop.permute.xlu1 %20969  ;;  %32849 = vrot.lane.b32.xlu1 %v56449_v10, %s56192_s4 }
 0x3f3   : > { %51553 = vmatmul.mubr.f32.vlgmr.msra.gmra.mrb[0].mxu1 %v59106_v54  ;;  %v20594_v47 = vand.u32 4294901760, %v20593_v29 }
 0x3f4   : > { %53661 = vmatpush3.bf16.msra.mxu1 %v59181_v34  ;;  %51559 = vmatprep.mubr.msk.f32.mxu1 %vm56176_vm1, %v56174_v1  ;;  %v20585_v34 = vand.u32 4294901760, %v59281_v44 }
 0x3f5   : > { %53686 = vmatprep.subr.bf16.mxu1 %v56175_v4 }
 0x3f6   : > { %19509 = vmatmul.mubr.f32.vlgmr.msra.gmra.mrb[0].mxu0 %v59106_v54  ;;  %v20586_v37 = vsub.f32 %v59281_v44, %v20585_v34  ;;  %v53699_v29 = vpack.c.bf16 %v20592_v63, %v20585_v34 }
 0x3f7   : > { %53665 = vmatpush1.bf16.msra.mxu0 %v59293_v27  ;;  %20082 = vmatprep.mubr.f32.mxu0 %v56174_v1 }
 0x3f8   : > { %53667 = vmatprep.subr.bf16.mxu0 %v53666_v2  ;;  %v20587_v61 = vand.u32 4294901760, %v20586_v37  ;;  %v59390_v37 = vand.u32 4294901760, %v20995_v62 }
 0x3fa   : > { %v53690_v3 = vpack.c.bf16 %v20594_v47, %v20587_v61  ;;  %v59416_v61 = vsub.f32 %v20995_v62, %v59390_v37 }
 0x3fb   : > { %51560 = vmatmul.mubr.f32.vlgmr.msra.gmra.mrb[0].mxu1 %v59106_v54  ;;  %v20980_v54 = vpop.permute.xlu0 %20979  ;;  %32845 = vrot.lane.b32.xlu0 %v56279_v39, %s56192_s4 }
 0x3fc   : > { %53688 = vmatpush3.bf16.msra.mxu1 %v59309_v26  ;;  %51566 = vmatprep.mubr.msk.f32.mxu1 %vm56176_vm1, %v56174_v1  ;;  %v20989_v53 = vsel %vm19995_vm12, %v20980_v54, %v20982_v23 }
 0x3fd   : > { %53689 = vmatprep.subr.bf16.mxu1 %v56175_v4  ;;  %v20999_v5 = vsel %vm234_vm2, %v20989_v53, 0 }
 0x3fe   : > { %20088 = vmatmul.mubr.f32.vlgmr.msra.gmra.mrb[0].mxu0 %v20087_v9  ;;  %v21007_v8 = vand.u32 4294901760, %v20999_v5 }
 0x3ff   : > { %53669 = vmatpush1.bf16.msra.mxu0 %v53668_v57  ;;  %20178 = vmatprep.mubr.f32.mxu0 %v56174_v1  ;;  %v20972_v24 = vpop.permute.xlu0 %20971 }
 0x400   : > { %53671 = vmatprep.subr.bf16.mxu0 %v53670_v20  ;;  %v20986_v51 = vsel %vm19995_vm12, %v20972_v24, %v20974_v13  ;;  %v59356_v7 = vsub.f32 %v20999_v5, %v21007_v8  ;;  %v20985_v40 = vsel %vm19995_vm12, %v20970_v56, %v20972_v24  ;;  %32851 = vrot.lane.b32.xlu0 %v56326_v11, %s56192_s4 }
 0x401   : > { %v21003_v46 = vand.u32 4294901760, %v20986_v51  ;;  %v21005_v36 = vand.u32 4294901760, %v20985_v40 }
 0x402   : > { %v21097_v21 = vand.u32 4294901760, %v59356_v7 }
 0x403   : > { %51567 = vmatmul.mubr.f32.vlgmr.msra.gmra.mrb[0].mxu1 %v20087_v9  ;;  %v20978_v43 = vpop.permute.xlu0 %20977  ;;  %v59359_v30 = vsub.f32 %v20986_v51, %v21003_v46  ;;  %v59399_v57 = vpack.c.bf16 %v21007_v8, %v21003_v46  ;;  %v59409_v34 = vsub.f32 %v20985_v40, %v21005_v36 }
 0x404   : > { %53691 = vmatpush3.bf16.msra.mxu1 %v53690_v3  ;;  %51573 = vmatprep.mubr.msk.f32.mxu1 %vm56176_vm1, %v56174_v1  ;;  %v20988_v49 = vsel %vm19995_vm12, %v20978_v43, %v20980_v54  ;;  %v21098_v44 = vsub.f32 %v59356_v7, %v21097_v21 }
 0x405   : > { %53692 = vmatprep.subr.bf16.mxu1 %v56175_v4  ;;  %v20997_v17 = vsel %vm234_vm2, %v20988_v49, 0  ;;  %v53712_v40 = vpack.c.bf16 %v59356_v7, %v59359_v30  ;;  %v49791_v7 = vld [vmem:[%s63392_s1 + $0x58] sm:$0xff]  ;;  %32857 = vrot.lane.b32.xlu0 %v56444_v58, %s56192_s4 }
 0x406   : > { %20180 = vmatmul.mubr.f32.vlgmr.msra.gmra.mrb[0].mxu0 %v59250_v50  ;;  %v21009_v55 = vand.u32 4294901760, %v20997_v17  ;;  %v21099_v3 = vand.u32 4294901760, %v21098_v44 }
 0x407   : > { %53673 = vmatpush1.bf16.msra.mxu0 %v53672_v45  ;;  %20258 = vmatprep.mubr.f32.mxu0 %v56174_v1  ;;  %v20984_v2 = vpop.permute.xlu0 %20983  ;;  %v21091_v45 = vand.u32 4294901760, %v59409_v34 }
 0x408   : > { %53675 = vmatprep.subr.bf16.mxu0 %v59257_v0  ;;  %v20990_v41 = vsel %vm19995_vm12, %v20982_v23, %v20984_v2  ;;  %v59407_v63 = vsub.f32 %v20997_v17, %v21009_v55 }
 0x409   : > { %v21092_v5 = vsub.f32 %v59409_v34, %v21091_v45  ;;  %33842 = vrot.lane.b32.xlu0 %v56270_v31, %s56193_s11 }
 0x40a   : > { %v21103_v54 = vand.u32 4294901760, %v59407_v63 }
 0x40b   : > { %51574 = vmatmul.mubr.f32.vlgmr.msra.gmra.mrb[0].mxu1 %v59250_v50  ;;  %v21093_v8 = vand.u32 4294901760, %v21092_v5 }
 0x40c   : > { %53694 = vmatpush3.bf16.msra.mxu1 %v53693_v42  ;;  %51580 = vmatprep.mubr.msk.f32.mxu1 %vm56176_vm1, %v56174_v1  ;;  %v59432_v42 = vand.u32 4294901760, %v59416_v61  ;;  %v21104_v53 = vsub.f32 %v59407_v63, %v21103_v54 }
 0x40d   : > { %53695 = vmatprep.subr.bf16.mxu1 %v56175_v4 }
 0x40e   : > { %20261 = vmatmul.mubr.f32.vlgmr.msra.gmra.mrb[0].mxu0 %v59272_v14  ;;  %v21105_v43 = vand.u32 4294901760, %v21104_v53 }
 0x40f   : > { %53677 = vmatpush1.bf16.msra.mxu0 %v59293_v27  ;;  %20335 = vmatprep.mubr.f32.mxu0 %v56174_v1 }
 0x410   : > { %53679 = vmatprep.subr.bf16.mxu0 %v53678_v25  ;;  %v21075_v25 = vsub.f32 %v59416_v61, %v59432_v42 }
 0x412   : > { %v21076_v48 = vand.u32 4294901760, %v21075_v25  ;;  %v21985_v25 = vsel %vm230_vm0, %v49791_v7, 0 }
 0x413   : > { %51581 = vmatmul.mubr.f32.vlgmr.msra.gmra.mrb[0].mxu1 %v59272_v14  ;;  %v53680_v14 = vpack.c.bf16 %v20114_v12, %v20102_v19  ;;  %v20976_v12 = vpop.permute.xlu1 %20975  ;;  %v21085_v19 = vand.u32 4294901760, %v59359_v30  ;;  %33844 = vrot.lane.b32.xlu1 %v56293_v52, %s56193_s11 }
 0x414   : > { %53697 = vmatpush3.bf16.msra.mxu1 %v59309_v26  ;;  %51587 = vmatprep.mubr.msk.f32.mxu1 %vm56176_vm1, %v56174_v1  ;;  %v20987_v9 = vsel %vm19995_vm12, %v20974_v13, %v20976_v12  ;;  %v59443_v13 = vpack.c.bf16 %v21009_v55, %v21005_v36  ;;  %vm45722_vm12 = vcmask 236544  }
 0x415   : > { %53698 = vmatprep.subr.bf16.mxu1 %v56175_v4  ;;  %v21086_v18 = vsub.f32 %v59359_v30, %v21085_v19  ;;  %v21495_v47 = vand.u32 4294901760, %v20987_v9  ;;  %v53720_v44 = vpack.c.bf16 %v21097_v21, %v21085_v19  ;;  %v53722_v19 = vpack.c.bf16 %v21103_v54, %v21091_v45 }
 0x416   : > { %20339 = vmatmul.mubr.f32.vlgmr.msra.gmra.mrb[0].mxu0 %v59284_v35 }
 0x417   : > { %53681 = vmatpush1.bf16.msra.mxu0 %v53680_v14  ;;  %20421 = vmatprep.mubr.f32.mxu0 %v56174_v1  ;;  %v21087_v20 = vand.u32 4294901760, %v21086_v18  ;;  %v59429_v24 = vsub.f32 %v20987_v9, %v21495_v47  ;;  %v53710_v14 = vpack.c.bf16 %v21105_v43, %v21093_v8  ;;  %v21971_v12 = vpop.permute.xlu1 %21970 }
 0x418   : > { %53683 = vmatprep.subr.bf16.mxu0 %v59257_v0  ;;  %v21001_v0 = vsel %vm234_vm2, %v20990_v41, 0  ;;  %v53714_v41 = vpack.c.bf16 %v59407_v63, %v59409_v34  ;;  %33836 = vrot.lane.b32.xlu1 %v56304_v59, %s56193_s11 }
 0x419   : > { %v21574_v51 = vand.u32 4294901760, %v59429_v24 }
 0x41b   : > { %51588 = vmatmul.mubr.f32.vlgmr.msra.gmra.mrb[0].mxu1 %v59284_v35  ;;  %v21498_v35 = vand.u32 4294901760, %v21001_v0  ;;  %v21575_v49 = vsub.f32 %v59429_v24, %v21574_v51 }
 0x41c   : > { %53700 = vmatpush3.bf16.msra.mxu1 %v53699_v29  ;;  %51594 = vmatprep.mubr.msk.f32.mxu1 %vm56176_vm1, %v56174_v1 }
 0x41d   : > { %53701 = vmatprep.subr.bf16.mxu1 %v56175_v4  ;;  %v59427_v23 = vsub.f32 %v21001_v0, %v21498_v35  ;;  %v59465_v56 = vpack.c.bf16 %v21498_v35, %v21495_v47  ;;  %v21576_v17 = vand.u32 4294901760, %v21575_v49  ;;  %v21963_v0 = vpop.permute.xlu1 %21962  ;;  %v59534_v49 = vand.u32 4294901760, %v21985_v25  ;;  %33832 = vrot.lane.b32.xlu1 %v56332_v15, %s56193_s11 }
 0x41e   : > { %20423 = vmatmul.mubr.f32.vlgmr.msra.gmra.mrb[0].mxu0 %v59250_v50 }
 0x41f   : > { %53685 = vmatpush1.bf16.msra.mxu0 %v59293_v27  ;;  %20497 = vmatprep.mubr.f32.mxu0 %v56174_v1  ;;  %v53708_v27 = vpack.c.bf16 %v21099_v3, %v21087_v20  ;;  %v53735_v36 = vpack.c.bf16 %v59427_v23, %v59429_v24 }
 0x420   : > { %53705 = vmatprep.subr.bf16.mxu0 %v59399_v57 }
 0x421   : > { %v21959_v3 = vpop.permute.xlu1 %21958  ;;  %33838 = vrot.lane.b32.xlu1 %v56368_v33, %s56193_s11 }
 0x423   : > { %51595 = vmatmul.mubr.f32.vlgmr.msra.gmra.mrb[0].mxu1 %v59250_v50 }
 0x424   : > { %53703 = vmatpush3.bf16.msra.mxu1 %v59309_v26  ;;  %51601 = vmatprep.mubr.msk.f32.mxu1 %vm56176_vm1, %v56174_v1  ;;  %v21581_v26 = vand.u32 4294901760, %v59427_v23 }
 0x425   : > { %53728 = vmatprep.subr.bf16.mxu1 %v56175_v4  ;;  %v21965_v63 = vpop.permute.xlu1 %21964  ;;  %34834 = vrot.lane.b32.xlu1 %v56353_v28, %s56193_s11 }
 0x426   : > { %20499 = vmatmul.mubr.f32.vlgmr.msra.gmra.mrb[0].mxu0 %v59250_v50  ;;  %v21582_v46 = vsub.f32 %v59427_v23, %v21581_v26 }
 0x427   : > { %53707 = vmatpush1.bf16.msra.mxu0 %v59443_v13  ;;  %21071 = vmatprep.mubr.f32.mxu0 %v56174_v1 }
 0x428   : > { %53709 = vmatprep.subr.bf16.mxu0 %v53708_v27  ;;  %v21583_v2 = vand.u32 4294901760, %v21582_v46  ;;  %v53741_v46 = vpack.c.bf16 %v21581_v26, %v21574_v51 }
 0x42a   : > { %v53732_v62 = vpack.c.bf16 %v21583_v2, %v21576_v17  ;;  %v59556_v17 = vsub.f32 %v21985_v25, %v59534_v49 }
 0x42b   : > { %51602 = vmatmul.mubr.f32.vlgmr.msra.gmra.mrb[0].mxu1 %v59250_v50  ;;  %v21969_v50 = vpop.permute.xlu0 %21968  ;;  %33834 = vrot.lane.b32.xlu0 %v56277_v38, %s56193_s11 }
 0x42c   : > { %53730 = vmatpush3.bf16.msra.mxu1 %v59465_v56  ;;  %51608 = vmatprep.mubr.msk.f32.mxu1 %vm56176_vm1, %v56174_v1  ;;  %v21979_v29 = vsel %vm21974_vm13, %v21969_v50, %v21971_v12 }
 0x42d   : > { %53731 = vmatprep.subr.bf16.mxu1 %v56175_v4  ;;  %v21989_v9 = vsel %vm234_vm2, %v21979_v29, 0 }
 0x42e   : > { %21077 = vmatmul.mubr.f32.vlgmr.msra.gmra.mrb[0].mxu0 %v21076_v48  ;;  %v21997_v47 = vand.u32 4294901760, %v21989_v9 }
 0x42f   : > { %53711 = vmatpush1.bf16.msra.mxu0 %v53710_v14  ;;  %21167 = vmatprep.mubr.f32.mxu0 %v56174_v1  ;;  %v21961_v55 = vpop.permute.xlu0 %21960 }
 0x430   : > { %53713 = vmatprep.subr.bf16.mxu0 %v53712_v40  ;;  %v21976_v18 = vsel %vm21974_vm13, %v21961_v55, %v21963_v0  ;;  %v59506_v53 = vsub.f32 %v21989_v9, %v21997_v47  ;;  %v21975_v5 = vsel %vm21974_vm13, %v21959_v3, %v21961_v55  ;;  %33840 = vrot.lane.b32.xlu0 %v56317_v6, %s56193_s11 }
 0x431   : > { %v21993_v20 = vand.u32 4294901760, %v21976_v18  ;;  %v21995_v8 = vand.u32 4294901760, %v21975_v5 }
 0x432   : > { %v22087_v45 = vand.u32 4294901760, %v59506_v53 }
 0x433   : > { %51609 = vmatmul.mubr.f32.vlgmr.msra.gmra.mrb[0].mxu1 %v21076_v48  ;;  %v21967_v35 = vpop.permute.xlu0 %21966  ;;  %v59509_v30 = vsub.f32 %v21976_v18, %v21993_v20  ;;  %v59541_v14 = vpack.c.bf16 %v21997_v47, %v21993_v20  ;;  %v59551_v51 = vsub.f32 %v21975_v5, %v21995_v8 }
 0x434   : > { %53733 = vmatpush3.bf16.msra.mxu1 %v53732_v62  ;;  %51615 = vmatprep.mubr.msk.f32.mxu1 %vm56176_vm1, %v56174_v1  ;;  %v21978_v27 = vsel %vm21974_vm13, %v21967_v35, %v21969_v50  ;;  %v22088_v23 = vsub.f32 %v59506_v53, %v22087_v45 }
 0x435   : > { %53734 = vmatprep.subr.bf16.mxu1 %v56175_v4  ;;  %v22075_v54 = vand.u32 4294901760, %v59509_v30  ;;  %v53754_v5 = vpack.c.bf16 %v59506_v53, %v59509_v30  ;;  %33846 = vrot.lane.b32.xlu0 %v56360_v22, %s56193_s11 }
 0x436   : > { %21169 = vmatmul.mubr.f32.vlgmr.msra.gmra.mrb[0].mxu0 %v59390_v37  ;;  %v22089_v62 = vand.u32 4294901760, %v22088_v23 }
 0x437   : > { %53715 = vmatpush1.bf16.msra.mxu0 %v53714_v41  ;;  %21247 = vmatprep.mubr.f32.mxu0 %v56174_v1  ;;  %v21973_v21 = vpop.permute.xlu0 %21972  ;;  %v22076_v24 = vsub.f32 %v59509_v30, %v22075_v54  ;;  %v22081_v41 = vand.u32 4294901760, %v59551_v51  ;;  %v53762_v23 = vpack.c.bf16 %v22087_v45, %v22075_v54  ;;  %v49792_v45 = vld [vmem:[%s63392_s1 + $0x120] sm:$0xff] }
 0x438   : > { %53717 = vmatprep.subr.bf16.mxu0 %v59399_v57  ;;  %v21980_v34 = vsel %vm21974_vm13, %v21971_v12, %v21973_v21 }
 0x439   : > { %v21991_v48 = vsel %vm234_vm2, %v21980_v34, 0  ;;  %v22077_v40 = vand.u32 4294901760, %v22076_v24  ;;  %v22082_v9 = vsub.f32 %v59551_v51, %v22081_v41  ;;  %34832 = vrot.lane.b32.xlu0 %v56272_v32, %s56193_s11 }
 0x43b   : > { %51616 = vmatmul.mubr.f32.vlgmr.msra.gmra.mrb[0].mxu1 %v59390_v37  ;;  %v22083_v47 = vand.u32 4294901760, %v22082_v9 }
 0x43c   : > { %53736 = vmatpush3.bf16.msra.mxu1 %v53735_v36  ;;  %51622 = vmatprep.mubr.msk.f32.mxu1 %vm56176_vm1, %v56174_v1  ;;  %v59568_v36 = vand.u32 4294901760, %v59556_v17 }
 0x43d   : > { %53737 = vmatprep.subr.bf16.mxu1 %v56175_v4 }
 0x43e   : > { %21250 = vmatmul.mubr.f32.vlgmr.msra.gmra.mrb[0].mxu0 %v59416_v61 }
 0x43f   : > { %53719 = vmatpush1.bf16.msra.mxu0 %v59443_v13  ;;  %21324 = vmatprep.mubr.f32.mxu0 %v56174_v1 }
 0x440   : > { %53721 = vmatprep.subr.bf16.mxu0 %v53720_v44  ;;  %v22065_v44 = vsub.f32 %v59556_v17, %v59568_v36 }
 0x442   : > { %v22066_v7 = vand.u32 4294901760, %v22065_v44 }
 0x443   : > { %51623 = vmatmul.mubr.f32.vlgmr.msra.gmra.mrb[0].mxu1 %v59416_v61  ;;  %v21987_v61 = vsel %vm234_vm2, %v21978_v27, 0 }
 0x444   : > { %53739 = vmatpush3.bf16.msra.mxu1 %v59465_v56  ;;  %51629 = vmatprep.mubr.msk.f32.mxu1 %vm56176_vm1, %v56174_v1  ;;  %v21999_v43 = vand.u32 4294901760, %v21987_v61 }
 0x445   : > { %53740 = vmatprep.subr.bf16.mxu1 %v56175_v4 }
 0x446   : > { %21328 = vmatmul.mubr.f32.vlgmr.msra.gmra.mrb[0].mxu0 %v59432_v42  ;;  %v59549_v26 = vsub.f32 %v21987_v61, %v21999_v43 }
 0x447   : > { %53723 = vmatpush1.bf16.msra.mxu0 %v53722_v19  ;;  %21410 = vmatprep.mubr.f32.mxu0 %v56174_v1 }
 0x448   : > { %53725 = vmatprep.subr.bf16.mxu0 %v59399_v57  ;;  %v21977_v57 = vsel %vm21974_vm13, %v21963_v0, %v21965_v63  ;;  %v22093_v50 = vand.u32 4294901760, %v59549_v26  ;;  %v59577_v0 = vpack.c.bf16 %v21999_v43, %v21995_v8  ;;  %v53756_v34 = vpack.c.bf16 %v59549_v26, %v59551_v51  ;;  %v22961_v63 = vpop.permute.xlu1 %22960  ;;  %34826 = vrot.lane.b32.xlu1 %v56306_v60, %s56193_s11 }
 0x449   : > { %v22485_v2 = vand.u32 4294901760, %v21977_v57 }
 0x44a   : > { %v22094_v29 = vsub.f32 %v59549_v26, %v22093_v50  ;;  %v22974_v26 = vsel %vm230_vm0, %v49792_v45, 0 }
 0x44b   : > { %51630 = vmatmul.mubr.f32.vlgmr.msra.gmra.mrb[0].mxu1 %v59432_v42  ;;  %v22488_v42 = vand.u32 4294901760, %v21991_v48  ;;  %v59565_v55 = vsub.f32 %v21977_v57, %v22485_v2 }
 0x44c   : > { %53742 = vmatpush3.bf16.msra.mxu1 %v53741_v46  ;;  %51636 = vmatprep.mubr.msk.f32.mxu1 %vm56176_vm1, %v56174_v1  ;;  %v22095_v35 = vand.u32 4294901760, %v22094_v29 }
 0x44d   : > { %53743 = vmatprep.subr.bf16.mxu1 %v56175_v4  ;;  %v59563_v12 = vsub.f32 %v21991_v48, %v22488_v42  ;;  %v59593_v3 = vpack.c.bf16 %v22488_v42, %v22485_v2  ;;  %v22953_v48 = vpop.permute.xlu1 %22952  ;;  %34822 = vrot.lane.b32.xlu1 %v56334_v16, %s56193_s11 }
 0x44e   : > { %21412 = vmatmul.mubr.f32.vlgmr.msra.gmra.mrb[0].mxu0 %v59390_v37  ;;  %v53752_v19 = vpack.c.bf16 %v22095_v35, %v22083_v47 }
 0x44f   : > { %53727 = vmatpush1.bf16.msra.mxu0 %v59443_v13  ;;  %21486 = vmatprep.mubr.f32.mxu0 %v56174_v1  ;;  %v53750_v13 = vpack.c.bf16 %v22089_v62, %v22077_v40  ;;  %v22571_v18 = vand.u32 4294901760, %v59563_v12  ;;  %v53777_v8 = vpack.c.bf16 %v59563_v12, %v59565_v55 }
 0x450   : > { %53747 = vmatprep.subr.bf16.mxu0 %v59541_v14 }
 0x451   : > { %v22572_v20 = vsub.f32 %v59563_v12, %v22571_v18  ;;  %v22949_v62 = vpop.permute.xlu1 %22948  ;;  %34828 = vrot.lane.b32.xlu1 %v56449_v10, %s56193_s11 }
 0x453   : > { %51637 = vmatmul.mubr.f32.vlgmr.msra.gmra.mrb[0].mxu1 %v59390_v37  ;;  %v22573_v21 = vand.u32 4294901760, %v22572_v20 }
 0x454   : > { %53745 = vmatpush3.bf16.msra.mxu1 %v59465_v56  ;;  %51643 = vmatprep.mubr.msk.f32.mxu1 %vm56176_vm1, %v56174_v1  ;;  %v22564_v56 = vand.u32 4294901760, %v59565_v55 }
 0x455   : > { %53770 = vmatprep.subr.bf16.mxu1 %v56175_v4 }
 0x456   : > { %21488 = vmatmul.mubr.f32.vlgmr.msra.gmra.mrb[0].mxu0 %v59390_v37  ;;  %v22565_v27 = vsub.f32 %v59565_v55, %v22564_v56  ;;  %v53783_v20 = vpack.c.bf16 %v22571_v18, %v22564_v56 }
 0x457   : > { %53749 = vmatpush1.bf16.msra.mxu0 %v59577_v0  ;;  %22061 = vmatprep.mubr.f32.mxu0 %v56174_v1 }
 0x458   : > { %53751 = vmatprep.subr.bf16.mxu0 %v53750_v13  ;;  %v22566_v61 = vand.u32 4294901760, %v22565_v27  ;;  %v59674_v27 = vand.u32 4294901760, %v22974_v26 }
 0x45a   : > { %v53774_v25 = vpack.c.bf16 %v22573_v21, %v22566_v61  ;;  %v59700_v61 = vsub.f32 %v22974_v26, %v59674_v27 }
 0x45b   : > { %51644 = vmatmul.mubr.f32.vlgmr.msra.gmra.mrb[0].mxu1 %v59390_v37  ;;  %v22959_v37 = vpop.permute.xlu0 %22958  ;;  %34824 = vrot.lane.b32.xlu0 %v56279_v39, %s56193_s11 }
 0x45c   : > { %53772 = vmatpush3.bf16.msra.mxu1 %v59593_v3  ;;  %51650 = vmatprep.mubr.msk.f32.mxu1 %vm56176_vm1, %v56174_v1  ;;  %v22968_v46 = vsel %vm21974_vm13, %v22959_v37, %v22961_v63 }
 0x45d   : > { %53773 = vmatprep.subr.bf16.mxu1 %v56175_v4  ;;  %v22978_v57 = vsel %vm234_vm2, %v22968_v46, 0 }
 0x45e   : > { %22067 = vmatmul.mubr.f32.vlgmr.msra.gmra.mrb[0].mxu0 %v22066_v7  ;;  %v22986_v2 = vand.u32 4294901760, %v22978_v57 }
 0x45f   : > { %53753 = vmatpush1.bf16.msra.mxu0 %v53752_v19  ;;  %22157 = vmatprep.mubr.f32.mxu0 %v56174_v1  ;;  %v22951_v43 = vpop.permute.xlu0 %22950 }
 0x460   : > { %53755 = vmatprep.subr.bf16.mxu0 %v53754_v5  ;;  %v22965_v24 = vsel %vm21974_vm13, %v22951_v43, %v22953_v48  ;;  %v59640_v30 = vsub.f32 %v22978_v57, %v22986_v2  ;;  %v22964_v9 = vsel %vm21974_vm13, %v22949_v62, %v22951_v43  ;;  %34830 = vrot.lane.b32.xlu0 %v56326_v11, %s56193_s11 }
 0x461   : > { %v22982_v40 = vand.u32 4294901760, %v22965_v24  ;;  %v22984_v47 = vand.u32 4294901760, %v22964_v9 }
 0x462   : > { %v23076_v44 = vand.u32 4294901760, %v59640_v30 }
 0x463   : > { %51651 = vmatmul.mubr.f32.vlgmr.msra.gmra.mrb[0].mxu1 %v22066_v7  ;;  %v22957_v42 = vpop.permute.xlu0 %22956  ;;  %v59643_v54 = vsub.f32 %v22965_v24, %v22982_v40  ;;  %v59683_v19 = vpack.c.bf16 %v22986_v2, %v22982_v40  ;;  %v59693_v56 = vsub.f32 %v22964_v9, %v22984_v47 }
 0x464   : > { %53775 = vmatpush3.bf16.msra.mxu1 %v53774_v25  ;;  %51657 = vmatprep.mubr.msk.f32.mxu1 %vm56176_vm1, %v56174_v1  ;;  %v22967_v53 = vsel %vm21974_vm13, %v22957_v42, %v22959_v37  ;;  %v23077_v55 = vsub.f32 %v59640_v30, %v23076_v44 }
 0x465   : > { %53776 = vmatprep.subr.bf16.mxu1 %v56175_v4  ;;  %v22976_v29 = vsel %vm234_vm2, %v22967_v53, 0  ;;  %v53796_v9 = vpack.c.bf16 %v59640_v30, %v59643_v54  ;;  %v49793_v30 = vld [vmem:[%s63392_s1 + $0x60] sm:$0xff]  ;;  %34836 = vrot.lane.b32.xlu0 %v56444_v58, %s56193_s11 }
 0x466   : > { %22159 = vmatmul.mubr.f32.vlgmr.msra.gmra.mrb[0].mxu0 %v59534_v49  ;;  %v22988_v35 = vand.u32 4294901760, %v22976_v29  ;;  %v23078_v25 = vand.u32 4294901760, %v23077_v55 }
 0x467   : > { %53757 = vmatpush1.bf16.msra.mxu0 %v53756_v34  ;;  %22237 = vmatprep.mubr.f32.mxu0 %v56174_v1  ;;  %v22963_v13 = vpop.permute.xlu0 %22962  ;;  %v23070_v34 = vand.u32 4294901760, %v59693_v56 }
 0x468   : > { %53759 = vmatprep.subr.bf16.mxu0 %v59541_v14  ;;  %v22969_v51 = vsel %vm21974_vm13, %v22961_v63, %v22963_v13  ;;  %v59691_v18 = vsub.f32 %v22976_v29, %v22988_v35 }
 0x469   : > { %v23071_v57 = vsub.f32 %v59693_v56, %v23070_v34  ;;  %35821 = vrot.lane.b32.xlu0 %v56270_v31, %s56194_s16 }
 0x46a   : > { %v23082_v37 = vand.u32 4294901760, %v59691_v18 }
 0x46b   : > { %51658 = vmatmul.mubr.f32.vlgmr.msra.gmra.mrb[0].mxu1 %v59534_v49  ;;  %v23072_v2 = vand.u32 4294901760, %v23071_v57 }
 0x46c   : > { %53778 = vmatpush3.bf16.msra.mxu1 %v53777_v8  ;;  %51664 = vmatprep.mubr.msk.f32.mxu1 %vm56176_vm1, %v56174_v1  ;;  %v59716_v8 = vand.u32 4294901760, %v59700_v61  ;;  %v23083_v46 = vsub.f32 %v59691_v18, %v23082_v37 }
 0x46d   : > { %53779 = vmatprep.subr.bf16.mxu1 %v56175_v4 }
 0x46e   : > { %22240 = vmatmul.mubr.f32.vlgmr.msra.gmra.mrb[0].mxu0 %v59556_v17  ;;  %v23084_v42 = vand.u32 4294901760, %v23083_v46 }
 0x46f   : > { %53761 = vmatpush1.bf16.msra.mxu0 %v59577_v0  ;;  %22314 = vmatprep.mubr.f32.mxu0 %v56174_v1 }
 0x470   : > { %53763 = vmatprep.subr.bf16.mxu0 %v53762_v23  ;;  %v23054_v23 = vsub.f32 %v59700_v61, %v59716_v8 }
 0x472   : > { %v23055_v45 = vand.u32 4294901760, %v23054_v23  ;;  %v23964_v23 = vsel %vm230_vm0, %v49793_v30, 0 }
 0x473   : > { %51665 = vmatmul.mubr.f32.vlgmr.msra.gmra.mrb[0].mxu1 %v59556_v17  ;;  %v53764_v17 = vpack.c.bf16 %v22093_v50, %v22081_v41  ;;  %v22955_v50 = vpop.permute.xlu1 %22954  ;;  %v23064_v41 = vand.u32 4294901760, %v59643_v54  ;;  %35823 = vrot.lane.b32.xlu1 %v56293_v52, %s56194_s16 }
 0x474   : > { %53781 = vmatpush3.bf16.msra.mxu1 %v59593_v3  ;;  %51671 = vmatprep.mubr.msk.f32.mxu1 %vm56176_vm1, %v56174_v1  ;;  %v22966_v7 = vsel %vm21974_vm13, %v22953_v48, %v22955_v50  ;;  %v59727_v48 = vpack.c.bf16 %v22988_v35, %v22984_v47  ;;  %vm47701_vm13 = vcmask 228352  }
 0x475   : > { %53782 = vmatprep.subr.bf16.mxu1 %v56175_v4  ;;  %v23065_v12 = vsub.f32 %v59643_v54, %v23064_v41  ;;  %v23474_v21 = vand.u32 4294901760, %v22966_v7  ;;  %v53804_v55 = vpack.c.bf16 %v23076_v44, %v23064_v41  ;;  %v53806_v41 = vpack.c.bf16 %v23082_v37, %v23070_v34 }
 0x476   : > { %22318 = vmatmul.mubr.f32.vlgmr.msra.gmra.mrb[0].mxu0 %v59568_v36 }
 0x477   : > { %53765 = vmatpush1.bf16.msra.mxu0 %v53764_v17  ;;  %22400 = vmatprep.mubr.f32.mxu0 %v56174_v1  ;;  %v23066_v5 = vand.u32 4294901760, %v23065_v12  ;;  %v59713_v43 = vsub.f32 %v22966_v7, %v23474_v21  ;;  %v53794_v17 = vpack.c.bf16 %v23084_v42, %v23072_v2  ;;  %v23950_v50 = vpop.permute.xlu1 %23949 }
 0x478   : > { %53767 = vmatprep.subr.bf16.mxu0 %v59541_v14  ;;  %v22980_v14 = vsel %vm234_vm2, %v22969_v51, 0  ;;  %v53798_v51 = vpack.c.bf16 %v59691_v18, %v59693_v56  ;;  %35815 = vrot.lane.b32.xlu1 %v56304_v59, %s56194_s16 }
 0x479   : > { %v23553_v24 = vand.u32 4294901760, %v59713_v43 }
 0x47b   : > { %51672 = vmatmul.mubr.f32.vlgmr.msra.gmra.mrb[0].mxu1 %v59568_v36  ;;  %v23477_v36 = vand.u32 4294901760, %v22980_v14  ;;  %v23554_v53 = vsub.f32 %v59713_v43, %v23553_v24 }
 0x47c   : > { %53784 = vmatpush3.bf16.msra.mxu1 %v53783_v20  ;;  %51678 = vmatprep.mubr.msk.f32.mxu1 %vm56176_vm1, %v56174_v1 }
 0x47d   : > { %53785 = vmatprep.subr.bf16.mxu1 %v56175_v4  ;;  %v59711_v63 = vsub.f32 %v22980_v14, %v23477_v36  ;;  %v59749_v62 = vpack.c.bf16 %v23477_v36, %v23474_v21  ;;  %v23555_v29 = vand.u32 4294901760, %v23554_v53  ;;  %v23942_v14 = vpop.permute.xlu1 %23941  ;;  %v59818_v53 = vand.u32 4294901760, %v23964_v23  ;;  %35811 = vrot.lane.b32.xlu1 %v56332_v15, %s56194_s16 }
 0x47e   : > { %22402 = vmatmul.mubr.f32.vlgmr.msra.gmra.mrb[0].mxu0 %v59534_v49 }
 0x47f   : > { %53769 = vmatpush1.bf16.msra.mxu0 %v59577_v0  ;;  %22476 = vmatprep.mubr.f32.mxu0 %v56174_v1  ;;  %v53792_v0 = vpack.c.bf16 %v23078_v25, %v23066_v5  ;;  %v53819_v47 = vpack.c.bf16 %v59711_v63, %v59713_v43 }
 0x480   : > { %53789 = vmatprep.subr.bf16.mxu0 %v59683_v19 }
 0x481   : > { %v23938_v25 = vpop.permute.xlu1 %23937  ;;  %35817 = vrot.lane.b32.xlu1 %v56368_v33, %s56194_s16 }
 0x483   : > { %51679 = vmatmul.mubr.f32.vlgmr.msra.gmra.mrb[0].mxu1 %v59534_v49 }
 0x484   : > { %53787 = vmatpush3.bf16.msra.mxu1 %v59593_v3  ;;  %51685 = vmatprep.mubr.msk.f32.mxu1 %vm56176_vm1, %v56174_v1  ;;  %v23560_v3 = vand.u32 4294901760, %v59711_v63 }
 0x485   : > { %53812 = vmatprep.subr.bf16.mxu1 %v56175_v4  ;;  %v23944_v18 = vpop.permute.xlu1 %23943  ;;  %36813 = vrot.lane.b32.xlu1 %v56353_v28, %s56194_s16 }
 0x486   : > { %22478 = vmatmul.mubr.f32.vlgmr.msra.gmra.mrb[0].mxu0 %v59534_v49  ;;  %v23561_v40 = vsub.f32 %v59711_v63, %v23560_v3 }
 0x487   : > { %53791 = vmatpush1.bf16.msra.mxu0 %v59727_v48  ;;  %23050 = vmatprep.mubr.f32.mxu0 %v56174_v1 }
 0x488   : > { %53793 = vmatprep.subr.bf16.mxu0 %v53792_v0  ;;  %v23562_v13 = vand.u32 4294901760, %v23561_v40  ;;  %v53825_v40 = vpack.c.bf16 %v23560_v3, %v23553_v24 }
 0x48a   : > { %v53816_v26 = vpack.c.bf16 %v23562_v13, %v23555_v29  ;;  %v59840_v29 = vsub.f32 %v23964_v23, %v59818_v53 }
 0x48b   : > { %51686 = vmatmul.mubr.f32.vlgmr.msra.gmra.mrb[0].mxu1 %v59534_v49  ;;  %v23948_v49 = vpop.permute.xlu0 %23947  ;;  %35813 = vrot.lane.b32.xlu0 %v56277_v38, %s56194_s16 }
 0x48c   : > { %53814 = vmatpush3.bf16.msra.mxu1 %v59749_v62  ;;  %51692 = vmatprep.mubr.msk.f32.mxu1 %vm56176_vm1, %v56174_v1  ;;  %v23958_v20 = vsel %vm23953_vm14, %v23948_v49, %v23950_v50 }
 0x48d   : > { %53815 = vmatprep.subr.bf16.mxu1 %v56175_v4  ;;  %v23968_v7 = vsel %vm234_vm2, %v23958_v20, 0 }
 0x48e   : > { %23056 = vmatmul.mubr.f32.vlgmr.msra.gmra.mrb[0].mxu0 %v23055_v45  ;;  %v23976_v21 = vand.u32 4294901760, %v23968_v7 }
 0x48f   : > { %53795 = vmatpush1.bf16.msra.mxu0 %v53794_v17  ;;  %23146 = vmatprep.mubr.f32.mxu0 %v56174_v1  ;;  %v23940_v35 = vpop.permute.xlu0 %23939 }
 0x490   : > { %53797 = vmatprep.subr.bf16.mxu0 %v53796_v9  ;;  %v23955_v12 = vsel %vm23953_vm14, %v23940_v35, %v23942_v14  ;;  %v59790_v46 = vsub.f32 %v23968_v7, %v23976_v21  ;;  %v23954_v57 = vsel %vm23953_vm14, %v23938_v25, %v23940_v35  ;;  %35819 = vrot.lane.b32.xlu0 %v56317_v6, %s56194_s16 }
 0x491   : > { %v23972_v5 = vand.u32 4294901760, %v23955_v12  ;;  %v23974_v2 = vand.u32 4294901760, %v23954_v57 }
 0x492   : > { %v24066_v34 = vand.u32 4294901760, %v59790_v46 }
 0x493   : > { %51693 = vmatmul.mubr.f32.vlgmr.msra.gmra.mrb[0].mxu1 %v23055_v45  ;;  %v23946_v36 = vpop.permute.xlu0 %23945  ;;  %v59793_v54 = vsub.f32 %v23955_v12, %v23972_v5  ;;  %v59825_v17 = vpack.c.bf16 %v23976_v21, %v23972_v5  ;;  %v59835_v24 = vsub.f32 %v23954_v57, %v23974_v2 }
 0x494   : > { %53817 = vmatpush3.bf16.msra.mxu1 %v53816_v26  ;;  %51699 = vmatprep.mubr.msk.f32.mxu1 %vm56176_vm1, %v56174_v1  ;;  %v23957_v0 = vsel %vm23953_vm14, %v23946_v36, %v23948_v49  ;;  %v24067_v63 = vsub.f32 %v59790_v46, %v24066_v34 }
 0x495   : > { %53818 = vmatprep.subr.bf16.mxu1 %v56175_v4  ;;  %v24054_v37 = vand.u32 4294901760, %v59793_v54  ;;  %v53838_v57 = vpack.c.bf16 %v59790_v46, %v59793_v54  ;;  %35825 = vrot.lane.b32.xlu0 %v56360_v22, %s56194_s16 }
 0x496   : > { %23148 = vmatmul.mubr.f32.vlgmr.msra.gmra.mrb[0].mxu0 %v59674_v27  ;;  %v24068_v26 = vand.u32 4294901760, %v24067_v63 }
 0x497   : > { %53799 = vmatpush1.bf16.msra.mxu0 %v53798_v51  ;;  %23226 = vmatprep.mubr.f32.mxu0 %v56174_v1  ;;  %v23952_v44 = vpop.permute.xlu0 %23951  ;;  %v24055_v43 = vsub.f32 %v59793_v54, %v24054_v37  ;;  %v24060_v51 = vand.u32 4294901760, %v59835_v24  ;;  %v53846_v63 = vpack.c.bf16 %v24066_v34, %v24054_v37  ;;  %v49794_v34 = vld [vmem:[%s63392_s1 + $0x128] sm:$0xff] }
 0x498   : > { %53801 = vmatprep.subr.bf16.mxu0 %v59683_v19  ;;  %v23959_v56 = vsel %vm23953_vm14, %v23950_v50, %v23952_v44 }
 0x499   : > { %v23970_v45 = vsel %vm234_vm2, %v23959_v56, 0  ;;  %v24056_v9 = vand.u32 4294901760, %v24055_v43  ;;  %v24061_v7 = vsub.f32 %v59835_v24, %v24060_v51  ;;  %36811 = vrot.lane.b32.xlu0 %v56272_v32, %s56194_s16 }
 0x49b   : > { %51700 = vmatmul.mubr.f32.vlgmr.msra.gmra.mrb[0].mxu1 %v59674_v27  ;;  %v24062_v21 = vand.u32 4294901760, %v24061_v7 }
 0x49c   : > { %53820 = vmatpush3.bf16.msra.mxu1 %v53819_v47  ;;  %51706 = vmatprep.mubr.msk.f32.mxu1 %vm56176_vm1, %v56174_v1  ;;  %v59852_v47 = vand.u32 4294901760, %v59840_v29 }
 0x49d   : > { %53821 = vmatprep.subr.bf16.mxu1 %v56175_v4 }
 0x49e   : > { %23229 = vmatmul.mubr.f32.vlgmr.msra.gmra.mrb[0].mxu0 %v59700_v61 }
 0x49f   : > { %53803 = vmatpush1.bf16.msra.mxu0 %v59727_v48  ;;  %23303 = vmatprep.mubr.f32.mxu0 %v56174_v1 }
 0x4a0   : > { %53805 = vmatprep.subr.bf16.mxu0 %v53804_v55  ;;  %v24044_v55 = vsub.f32 %v59840_v29, %v59852_v47 }
 0x4a2   : > { %v24045_v30 = vand.u32 4294901760, %v24044_v55 }
 0x4a3   : > { %51707 = vmatmul.mubr.f32.vlgmr.msra.gmra.mrb[0].mxu1 %v59700_v61  ;;  %v23966_v61 = vsel %vm234_vm2, %v23957_v0, 0 }
 0x4a4   : > { %53823 = vmatpush3.bf16.msra.mxu1 %v59749_v62  ;;  %51713 = vmatprep.mubr.msk.f32.mxu1 %vm56176_vm1, %v56174_v1  ;;  %v23978_v42 = vand.u32 4294901760, %v23966_v61 }
 0x4a5   : > { %53824 = vmatprep.subr.bf16.mxu1 %v56175_v4 }
 0x4a6   : > { %23307 = vmatmul.mubr.f32.vlgmr.msra.gmra.mrb[0].mxu0 %v59716_v8  ;;  %v59833_v3 = vsub.f32 %v23966_v61, %v23978_v42 }
 0x4a7   : > { %53807 = vmatpush1.bf16.msra.mxu0 %v53806_v41  ;;  %23389 = vmatprep.mubr.f32.mxu0 %v56174_v1 }
 0x4a8   : > { %53809 = vmatprep.subr.bf16.mxu0 %v59683_v19  ;;  %v23956_v19 = vsel %vm23953_vm14, %v23942_v14, %v23944_v18  ;;  %v24072_v49 = vand.u32 4294901760, %v59833_v3  ;;  %v59861_v14 = vpack.c.bf16 %v23978_v42, %v23974_v2  ;;  %v53840_v56 = vpack.c.bf16 %v59833_v3, %v59835_v24  ;;  %v24940_v18 = vpop.permute.xlu1 %24939  ;;  %36805 = vrot.lane.b32.xlu1 %v56306_v60, %s56194_s16 }
 0x4a9   : > { %v24464_v13 = vand.u32 4294901760, %v23956_v19 }
 0x4aa   : > { %v24073_v20 = vsub.f32 %v59833_v3, %v24072_v49  ;;  %v24953_v3 = vsel %vm230_vm0, %v49794_v34, 0 }
 0x4ab   : > { %51714 = vmatmul.mubr.f32.vlgmr.msra.gmra.mrb[0].mxu1 %v59716_v8  ;;  %v24467_v8 = vand.u32 4294901760, %v23970_v45  ;;  %v59849_v35 = vsub.f32 %v23956_v19, %v24464_v13 }
 0x4ac   : > { %53826 = vmatpush3.bf16.msra.mxu1 %v53825_v40  ;;  %51720 = vmatprep.mubr.msk.f32.mxu1 %vm56176_vm1, %v56174_v1  ;;  %v24074_v36 = vand.u32 4294901760, %v24073_v20 }
 0x4ad   : > { %53827 = vmatprep.subr.bf16.mxu1 %v56175_v4  ;;  %v59847_v50 = vsub.f32 %v23970_v45, %v24467_v8  ;;  %v59877_v25 = vpack.c.bf16 %v24467_v8, %v24464_v13  ;;  %v24932_v45 = vpop.permute.xlu1 %24931  ;;  %36801 = vrot.lane.b32.xlu1 %v56334_v16, %s56194_s16 }
 0x4ae   : > { %23391 = vmatmul.mubr.f32.vlgmr.msra.gmra.mrb[0].mxu0 %v59674_v27  ;;  %v53836_v41 = vpack.c.bf16 %v24074_v36, %v24062_v21 }
 0x4af   : > { %53811 = vmatpush1.bf16.msra.mxu0 %v59727_v48  ;;  %23465 = vmatprep.mubr.f32.mxu0 %v56174_v1  ;;  %v53834_v48 = vpack.c.bf16 %v24068_v26, %v24056_v9  ;;  %v24550_v12 = vand.u32 4294901760, %v59847_v50  ;;  %v53861_v2 = vpack.c.bf16 %v59847_v50, %v59849_v35 }
 0x4b0   : > { %53831 = vmatprep.subr.bf16.mxu0 %v59825_v17 }
 0x4b1   : > { %v24551_v5 = vsub.f32 %v59847_v50, %v24550_v12  ;;  %v24928_v26 = vpop.permute.xlu1 %24927  ;;  %36807 = vrot.lane.b32.xlu1 %v56449_v10, %s56194_s16 }
 0x4b3   : > { %51721 = vmatmul.mubr.f32.vlgmr.msra.gmra.mrb[0].mxu1 %v59674_v27  ;;  %v24552_v44 = vand.u32 4294901760, %v24551_v5 }
 0x4b4   : > { %53829 = vmatpush3.bf16.msra.mxu1 %v59749_v62  ;;  %51727 = vmatprep.mubr.msk.f32.mxu1 %vm56176_vm1, %v56174_v1  ;;  %v24543_v62 = vand.u32 4294901760, %v59849_v35 }
 0x4b5   : > { %53854 = vmatprep.subr.bf16.mxu1 %v56175_v4 }
 0x4b6   : > { %23467 = vmatmul.mubr.f32.vlgmr.msra.gmra.mrb[0].mxu0 %v59674_v27  ;;  %v24544_v0 = vsub.f32 %v59849_v35, %v24543_v62  ;;  %v53867_v5 = vpack.c.bf16 %v24550_v12, %v24543_v62 }
 0x4b7   : > { %53833 = vmatpush1.bf16.msra.mxu0 %v59861_v14  ;;  %24040 = vmatprep.mubr.f32.mxu0 %v56174_v1 }
 0x4b8   : > { %53835 = vmatprep.subr.bf16.mxu0 %v53834_v48  ;;  %v24545_v61 = vand.u32 4294901760, %v24544_v0  ;;  %v59958_v0 = vand.u32 4294901760, %v24953_v3 }
 0x4ba   : > { %v53858_v23 = vpack.c.bf16 %v24552_v44, %v24545_v61  ;;  %v59984_v61 = vsub.f32 %v24953_v3, %v59958_v0 }
 0x4bb   : > { %51728 = vmatmul.mubr.f32.vlgmr.msra.gmra.mrb[0].mxu1 %v59674_v27  ;;  %v24938_v27 = vpop.permute.xlu0 %24937  ;;  %36803 = vrot.lane.b32.xlu0 %v56279_v39, %s56194_s16 }
 0x4bc   : > { %53856 = vmatpush3.bf16.msra.mxu1 %v59877_v25  ;;  %51734 = vmatprep.mubr.msk.f32.mxu1 %vm56176_vm1, %v56174_v1  ;;  %v24947_v40 = vsel %vm23953_vm14, %v24938_v27, %v24940_v18 }
 0x4bd   : > { %53857 = vmatprep.subr.bf16.mxu1 %v56175_v4  ;;  %v24957_v19 = vsel %vm234_vm2, %v24947_v40, 0 }
 0x4be   : > { %24046 = vmatmul.mubr.f32.vlgmr.msra.gmra.mrb[0].mxu0 %v24045_v30  ;;  %v24965_v13 = vand.u32 4294901760, %v24957_v19 }
 0x4bf   : > { %53837 = vmatpush1.bf16.msra.mxu0 %v53836_v41  ;;  %24136 = vmatprep.mubr.f32.mxu0 %v56174_v1  ;;  %v24930_v42 = vpop.permute.xlu0 %24929 }
 0x4c0   : > { %53839 = vmatprep.subr.bf16.mxu0 %v53838_v57  ;;  %v24944_v43 = vsel %vm23953_vm14, %v24930_v42, %v24932_v45  ;;  %v59924_v54 = vsub.f32 %v24957_v19, %v24965_v13  ;;  %v24943_v7 = vsel %vm23953_vm14, %v24928_v26, %v24930_v42  ;;  %36809 = vrot.lane.b32.xlu0 %v56326_v11, %s56194_s16 }
 0x4c1   : > { %v24961_v9 = vand.u32 4294901760, %v24944_v43  ;;  %v24963_v21 = vand.u32 4294901760, %v24943_v7 }
 0x4c2   : > { %v25055_v55 = vand.u32 4294901760, %v59924_v54 }
 0x4c3   : > { %51735 = vmatmul.mubr.f32.vlgmr.msra.gmra.mrb[0].mxu1 %v24045_v30  ;;  %v24936_v8 = vpop.permute.xlu0 %24935  ;;  %v59927_v37 = vsub.f32 %v24944_v43, %v24961_v9  ;;  %v59967_v41 = vpack.c.bf16 %v24965_v13, %v24961_v9  ;;  %v59977_v62 = vsub.f32 %v24943_v7, %v24963_v21 }
 0x4c4   : > { %53859 = vmatpush3.bf16.msra.mxu1 %v53858_v23  ;;  %51741 = vmatprep.mubr.msk.f32.mxu1 %vm56176_vm1, %v56174_v1  ;;  %v24946_v46 = vsel %vm23953_vm14, %v24936_v8, %v24938_v27  ;;  %v25056_v35 = vsub.f32 %v59924_v54, %v25055_v55 }
 0x4c5   : > { %53860 = vmatprep.subr.bf16.mxu1 %v56175_v4  ;;  %v24955_v20 = vsel %vm234_vm2, %v24946_v46, 0  ;;  %v53880_v7 = vpack.c.bf16 %v59924_v54, %v59927_v37  ;;  %v49795_v54 = vld [vmem:[%s63392_s1 + $0x68] sm:$0xff]  ;;  %36815 = vrot.lane.b32.xlu0 %v56444_v58, %s56194_s16 }
 0x4c6   : > { %24138 = vmatmul.mubr.f32.vlgmr.msra.gmra.mrb[0].mxu0 %v59818_v53  ;;  %v24967_v36 = vand.u32 4294901760, %v24955_v20  ;;  %v25057_v23 = vand.u32 4294901760, %v25056_v35 }
 0x4c7   : > { %53841 = vmatpush1.bf16.msra.mxu0 %v53840_v56  ;;  %24216 = vmatprep.mubr.f32.mxu0 %v56174_v1  ;;  %v24942_v48 = vpop.permute.xlu0 %24941  ;;  %v25049_v56 = vand.u32 4294901760, %v59977_v62 }
 0x4c8   : > { %53843 = vmatprep.subr.bf16.mxu0 %v59825_v17  ;;  %v24948_v24 = vsel %vm23953_vm14, %v24940_v18, %v24942_v48  ;;  %v59975_v12 = vsub.f32 %v24955_v20, %v24967_v36 }
 0x4c9   : > { %v25050_v19 = vsub.f32 %v59977_v62, %v25049_v56  ;;  %37800 = vrot.lane.b32.xlu0 %v56270_v31, %s56195_s21 }
 0x4ca   : > { %v25061_v27 = vand.u32 4294901760, %v59975_v12 }
 0x4cb   : > { %51742 = vmatmul.mubr.f32.vlgmr.msra.gmra.mrb[0].mxu1 %v59818_v53  ;;  %v25051_v13 = vand.u32 4294901760, %v25050_v19 }
 0x4cc   : > { %53862 = vmatpush3.bf16.msra.mxu1 %v53861_v2  ;;  %51748 = vmatprep.mubr.msk.f32.mxu1 %vm56176_vm1, %v56174_v1  ;;  %v60000_v2 = vand.u32 4294901760, %v59984_v61  ;;  %v25062_v40 = vsub.f32 %v59975_v12, %v25061_v27 }
 0x4cd   : > { %53863 = vmatprep.subr.bf16.mxu1 %v56175_v4 }
 0x4ce   : > { %24219 = vmatmul.mubr.f32.vlgmr.msra.gmra.mrb[0].mxu0 %v59840_v29  ;;  %v25063_v8 = vand.u32 4294901760, %v25062_v40 }
 0x4cf   : > { %53845 = vmatpush1.bf16.msra.mxu0 %v59861_v14  ;;  %24293 = vmatprep.mubr.f32.mxu0 %v56174_v1 }
 0x4d0   : > { %53847 = vmatprep.subr.bf16.mxu0 %v53846_v63  ;;  %v25033_v63 = vsub.f32 %v59984_v61, %v60000_v2 }
 0x4d2   : > { %v25034_v34 = vand.u32 4294901760, %v25033_v63  ;;  %v25943_v63 = vsel %vm230_vm0, %v49795_v54, 0 }
 0x4d3   : > { %51749 = vmatmul.mubr.f32.vlgmr.msra.gmra.mrb[0].mxu1 %v59840_v29  ;;  %v53848_v29 = vpack.c.bf16 %v24072_v49, %v24060_v51  ;;  %v24934_v49 = vpop.permute.xlu1 %24933  ;;  %v25043_v51 = vand.u32 4294901760, %v59927_v37  ;;  %37802 = vrot.lane.b32.xlu1 %v56293_v52, %s56195_s21 }
 0x4d4   : > { %53865 = vmatpush3.bf16.msra.mxu1 %v59877_v25  ;;  %51755 = vmatprep.mubr.msk.f32.mxu1 %vm56176_vm1, %v56174_v1  ;;  %v24945_v30 = vsel %vm23953_vm14, %v24932_v45, %v24934_v49  ;;  %v60011_v45 = vpack.c.bf16 %v24967_v36, %v24963_v21 }
 0x4d5   : > { %53866 = vmatprep.subr.bf16.mxu1 %v56175_v4  ;;  %v25044_v50 = vsub.f32 %v59927_v37, %v25043_v51  ;;  %v25453_v44 = vand.u32 4294901760, %v24945_v30  ;;  %v53888_v35 = vpack.c.bf16 %v25055_v55, %v25043_v51  ;;  %v53890_v51 = vpack.c.bf16 %v25061_v27, %v25049_v56 }
 0x4d6   : > { %24297 = vmatmul.mubr.f32.vlgmr.msra.gmra.mrb[0].mxu0 %v59852_v47 }
 0x4d7   : > { %53849 = vmatpush1.bf16.msra.mxu0 %v53848_v29  ;;  %24379 = vmatprep.mubr.f32.mxu0 %v56174_v1  ;;  %v25045_v57 = vand.u32 4294901760, %v25044_v50  ;;  %v59997_v42 = vsub.f32 %v24945_v30, %v25453_v44  ;;  %v53878_v29 = vpack.c.bf16 %v25063_v8, %v25051_v13  ;;  %v25929_v49 = vpop.permute.xlu1 %25928 }
 0x4d8   : > { %53851 = vmatprep.subr.bf16.mxu0 %v59825_v17  ;;  %v24959_v17 = vsel %vm234_vm2, %v24948_v24, 0  ;;  %v53882_v24 = vpack.c.bf16 %v59975_v12, %v59977_v62  ;;  %37794 = vrot.lane.b32.xlu1 %v56304_v59, %s56195_s21 }
 0x4d9   : > { %v25532_v43 = vand.u32 4294901760, %v59997_v42 }
 0x4db   : > { %51756 = vmatmul.mubr.f32.vlgmr.msra.gmra.mrb[0].mxu1 %v59852_v47  ;;  %v25456_v47 = vand.u32 4294901760, %v24959_v17  ;;  %v25533_v46 = vsub.f32 %v59997_v42, %v25532_v43 }
 0x4dc   : > { %53868 = vmatpush3.bf16.msra.mxu1 %v53867_v5  ;;  %51762 = vmatprep.mubr.msk.f32.mxu1 %vm56176_vm1, %v56174_v1 }
 0x4dd   : > { %53869 = vmatprep.subr.bf16.mxu1 %v56175_v4  ;;  %v59995_v18 = vsub.f32 %v24959_v17, %v25456_v47  ;;  %v60033_v26 = vpack.c.bf16 %v25456_v47, %v25453_v44  ;;  %v25534_v20 = vand.u32 4294901760, %v25533_v46  ;;  %v25921_v17 = vpop.permute.xlu1 %25920  ;;  %v60102_v46 = vand.u32 4294901760, %v25943_v63  ;;  %37790 = vrot.lane.b32.xlu1 %v56332_v15, %s56195_s21 }
 0x4de   : > { %24381 = vmatmul.mubr.f32.vlgmr.msra.gmra.mrb[0].mxu0 %v59818_v53 }
 0x4df   : > { %53853 = vmatpush1.bf16.msra.mxu0 %v59861_v14  ;;  %24455 = vmatprep.mubr.f32.mxu0 %v56174_v1  ;;  %v53876_v14 = vpack.c.bf16 %v25057_v23, %v25045_v57  ;;  %v53903_v21 = vpack.c.bf16 %v59995_v18, %v59997_v42 }
 0x4e0   : > { %53873 = vmatprep.subr.bf16.mxu0 %v59967_v41 }
 0x4e1   : > { %v25917_v23 = vpop.permute.xlu1 %25916  ;;  %37796 = vrot.lane.b32.xlu1 %v56368_v33, %s56195_s21 }
 0x4e3   : > { %51763 = vmatmul.mubr.f32.vlgmr.msra.gmra.mrb[0].mxu1 %v59818_v53 }
 0x4e4   : > { %53871 = vmatpush3.bf16.msra.mxu1 %v59877_v25  ;;  %51769 = vmatprep.mubr.msk.f32.mxu1 %vm56176_vm1, %v56174_v1  ;;  %v25539_v25 = vand.u32 4294901760, %v59995_v18 }
 0x4e5   : > { %53896 = vmatprep.subr.bf16.mxu1 %v56175_v4  ;;  %v25923_v12 = vpop.permute.xlu1 %25922  ;;  %38792 = vrot.lane.b32.xlu1 %v56353_v28, %s56195_s21 }
 0x4e6   : > { %24457 = vmatmul.mubr.f32.vlgmr.msra.gmra.mrb[0].mxu0 %v59818_v53  ;;  %v25540_v9 = vsub.f32 %v59995_v18, %v25539_v25 }
 0x4e7   : > { %53875 = vmatpush1.bf16.msra.mxu0 %v60011_v45  ;;  %25029 = vmatprep.mubr.f32.mxu0 %v56174_v1 }
 0x4e8   : > { %53877 = vmatprep.subr.bf16.mxu0 %v53876_v14  ;;  %v25541_v48 = vand.u32 4294901760, %v25540_v9  ;;  %v53909_v9 = vpack.c.bf16 %v25539_v25, %v25532_v43 }
 0x4ea   : > { %v53900_v3 = vpack.c.bf16 %v25541_v48, %v25534_v20  ;;  %v60124_v20 = vsub.f32 %v25943_v63, %v60102_v46 }
 0x4eb   : > { %51770 = vmatmul.mubr.f32.vlgmr.msra.gmra.mrb[0].mxu1 %v59818_v53  ;;  %v25927_v53 = vpop.permute.xlu0 %25926  ;;  %37792 = vrot.lane.b32.xlu0 %v56277_v38, %s56195_s21 }
 0x4ec   : > { %53898 = vmatpush3.bf16.msra.mxu1 %v60033_v26  ;;  %51776 = vmatprep.mubr.msk.f32.mxu1 %vm56176_vm1, %v56174_v1  ;;  %v25937_v5 = vsel %vm25932_vm15, %v25927_v53, %v25929_v49 }
 0x4ed   : > { %53899 = vmatprep.subr.bf16.mxu1 %v56175_v4  ;;  %v25947_v30 = vsel %vm234_vm2, %v25937_v5, 0 }
 0x4ee   : > { %25035 = vmatmul.mubr.f32.vlgmr.msra.gmra.mrb[0].mxu0 %v25034_v34  ;;  %v25955_v44 = vand.u32 4294901760, %v25947_v30 }
 0x4ef   : > { %53879 = vmatpush1.bf16.msra.mxu0 %v53878_v29  ;;  %25125 = vmatprep.mubr.f32.mxu0 %v56174_v1  ;;  %v25919_v36 = vpop.permute.xlu0 %25918 }
 0x4f0   : > { %53881 = vmatprep.subr.bf16.mxu0 %v53880_v7  ;;  %v25934_v50 = vsel %vm25932_vm15, %v25919_v36, %v25921_v17  ;;  %v60074_v40 = vsub.f32 %v25947_v30, %v25955_v44  ;;  %v25933_v19 = vsel %vm25932_vm15, %v25917_v23, %v25919_v36  ;;  %37798 = vrot.lane.b32.xlu0 %v56317_v6, %s56195_s21 }
 0x4f1   : > { %v25951_v57 = vand.u32 4294901760, %v25934_v50  ;;  %v25953_v13 = vand.u32 4294901760, %v25933_v19 }
 0x4f2   : > { %v26045_v56 = vand.u32 4294901760, %v60074_v40 }
 0x4f3   : > { %51777 = vmatmul.mubr.f32.vlgmr.msra.gmra.mrb[0].mxu1 %v25034_v34  ;;  %v25925_v47 = vpop.permute.xlu0 %25924  ;;  %v60077_v37 = vsub.f32 %v25934_v50, %v25951_v57  ;;  %v60109_v29 = vpack.c.bf16 %v25955_v44, %v25951_v57  ;;  %v60119_v43 = vsub.f32 %v25933_v19, %v25953_v13 }
 0x4f4   : > { %53901 = vmatpush3.bf16.msra.mxu1 %v53900_v3  ;;  %51783 = vmatprep.mubr.msk.f32.mxu1 %vm56176_vm1, %v56174_v1  ;;  %v25936_v14 = vsel %vm25932_vm15, %v25925_v47, %v25927_v53  ;;  %v26046_v18 = vsub.f32 %v60074_v40, %v26045_v56 }
 0x4f5   : > { %53902 = vmatprep.subr.bf16.mxu1 %v56175_v4  ;;  %v26033_v27 = vand.u32 4294901760, %v60077_v37  ;;  %v53922_v19 = vpack.c.bf16 %v60074_v40, %v60077_v37  ;;  %37804 = vrot.lane.b32.xlu0 %v56360_v22, %s56195_s21 }
 0x4f6   : > { %25127 = vmatmul.mubr.f32.vlgmr.msra.gmra.mrb[0].mxu0 %v59958_v0  ;;  %v26047_v3 = vand.u32 4294901760, %v26046_v18 }
 0x4f7   : > { %53883 = vmatpush1.bf16.msra.mxu0 %v53882_v24  ;;  %25205 = vmatprep.mubr.f32.mxu0 %v56174_v1  ;;  %v25931_v55 = vpop.permute.xlu0 %25930  ;;  %v26034_v42 = vsub.f32 %v60077_v37, %v26033_v27  ;;  %v26039_v24 = vand.u32 4294901760, %v60119_v43  ;;  %v53930_v18 = vpack.c.bf16 %v26045_v56, %v26033_v27  ;;  %v49796_v56 = vld [vmem:[%s63392_s1 + $0x130] sm:$0xff] }
 0x4f8   : > { %53885 = vmatprep.subr.bf16.mxu0 %v59967_v41  ;;  %v25938_v62 = vsel %vm25932_vm15, %v25929_v49, %v25931_v55 }
 0x4f9   : > { %v25949_v34 = vsel %vm234_vm2, %v25938_v62, 0  ;;  %v26035_v7 = vand.u32 4294901760, %v26034_v42  ;;  %v26040_v30 = vsub.f32 %v60119_v43, %v26039_v24  ;;  %38790 = vrot.lane.b32.xlu0 %v56272_v32, %s56195_s21 }
 0x4fb   : > { %51784 = vmatmul.mubr.f32.vlgmr.msra.gmra.mrb[0].mxu1 %v59958_v0  ;;  %v26041_v44 = vand.u32 4294901760, %v26040_v30 }
 0x4fc   : > { %53904 = vmatpush3.bf16.msra.mxu1 %v53903_v21  ;;  %51790 = vmatprep.mubr.msk.f32.mxu1 %vm56176_vm1, %v56174_v1  ;;  %v60136_v21 = vand.u32 4294901760, %v60124_v20 }
 0x4fd   : > { %53905 = vmatprep.subr.bf16.mxu1 %v56175_v4 }
 0x4fe   : > { %25208 = vmatmul.mubr.f32.vlgmr.msra.gmra.mrb[0].mxu0 %v59984_v61 }
 0x4ff   : > { %53887 = vmatpush1.bf16.msra.mxu0 %v60011_v45  ;;  %25282 = vmatprep.mubr.f32.mxu0 %v56174_v1 }
 0x500   : > { %53889 = vmatprep.subr.bf16.mxu0 %v53888_v35  ;;  %v26023_v35 = vsub.f32 %v60124_v20, %v60136_v21 }
 0x502   : > { %v26024_v54 = vand.u32 4294901760, %v26023_v35 }
 0x503   : > { %51791 = vmatmul.mubr.f32.vlgmr.msra.gmra.mrb[0].mxu1 %v59984_v61  ;;  %v25945_v61 = vsel %vm234_vm2, %v25936_v14, 0 }
 0x504   : > { %53907 = vmatpush3.bf16.msra.mxu1 %v60033_v26  ;;  %51797 = vmatprep.mubr.msk.f32.mxu1 %vm56176_vm1, %v56174_v1  ;;  %v25957_v8 = vand.u32 4294901760, %v25945_v61 }
 0x505   : > { %53908 = vmatprep.subr.bf16.mxu1 %v56175_v4 }
 0x506   : > { %25286 = vmatmul.mubr.f32.vlgmr.msra.gmra.mrb[0].mxu0 %v60000_v2  ;;  %v60117_v25 = vsub.f32 %v25945_v61, %v25957_v8 }
 0x507   : > { %53891 = vmatpush1.bf16.msra.mxu0 %v53890_v51  ;;  %25368 = vmatprep.mubr.f32.mxu0 %v56174_v1 }
 0x508   : > { %53893 = vmatprep.subr.bf16.mxu0 %v59967_v41  ;;  %v25935_v41 = vsel %vm25932_vm15, %v25921_v17, %v25923_v12  ;;  %v26051_v53 = vand.u32 4294901760, %v60117_v25  ;;  %v60145_v17 = vpack.c.bf16 %v25957_v8, %v25953_v13  ;;  %v53924_v62 = vpack.c.bf16 %v60117_v25, %v60119_v43  ;;  %v26919_v12 = vpop.permute.xlu1 %26918  ;;  %38784 = vrot.lane.b32.xlu1 %v56306_v60, %s56195_s21 }
 0x509   : > { %v26443_v48 = vand.u32 4294901760, %v25935_v41 }
 0x50a   : > { %v26052_v5 = vsub.f32 %v60117_v25, %v26051_v53  ;;  %v26932_v25 = vsel %vm230_vm0, %v49796_v56, 0 }
 0x50b   : > { %51798 = vmatmul.mubr.f32.vlgmr.msra.gmra.mrb[0].mxu1 %v60000_v2  ;;  %v26446_v2 = vand.u32 4294901760, %v25949_v34  ;;  %v60133_v36 = vsub.f32 %v25935_v41, %v26443_v48 }
 0x50c   : > { %53910 = vmatpush3.bf16.msra.mxu1 %v53909_v9  ;;  %51804 = vmatprep.mubr.msk.f32.mxu1 %vm56176_vm1, %v56174_v1  ;;  %v26053_v47 = vand.u32 4294901760, %v26052_v5 }
 0x50d   : > { %53911 = vmatprep.subr.bf16.mxu1 %v56175_v4  ;;  %v60131_v49 = vsub.f32 %v25949_v34, %v26446_v2  ;;  %v60161_v23 = vpack.c.bf16 %v26446_v2, %v26443_v48  ;;  %v26911_v34 = vpop.permute.xlu1 %26910  ;;  %38780 = vrot.lane.b32.xlu1 %v56334_v16, %s56195_s21 }
 0x50e   : > { %25370 = vmatmul.mubr.f32.vlgmr.msra.gmra.mrb[0].mxu0 %v59958_v0  ;;  %v53920_v51 = vpack.c.bf16 %v26053_v47, %v26041_v44 }
 0x50f   : > { %53895 = vmatpush1.bf16.msra.mxu0 %v60011_v45  ;;  %25444 = vmatprep.mubr.f32.mxu0 %v56174_v1  ;;  %v53918_v45 = vpack.c.bf16 %v26047_v3, %v26035_v7  ;;  %v26529_v50 = vand.u32 4294901760, %v60131_v49  ;;  %v53945_v13 = vpack.c.bf16 %v60131_v49, %v60133_v36 }
 0x510   : > { %53915 = vmatprep.subr.bf16.mxu0 %v60109_v29 }
 0x511   : > { %v26530_v57 = vsub.f32 %v60131_v49, %v26529_v50  ;;  %v26907_v3 = vpop.permute.xlu1 %26906  ;;  %38786 = vrot.lane.b32.xlu1 %v56449_v10, %s56195_s21 }
 0x513   : > { %51805 = vmatmul.mubr.f32.vlgmr.msra.gmra.mrb[0].mxu1 %v59958_v0  ;;  %v26531_v55 = vand.u32 4294901760, %v26530_v57 }
 0x514   : > { %53913 = vmatpush3.bf16.msra.mxu1 %v60033_v26  ;;  %51811 = vmatprep.mubr.msk.f32.mxu1 %vm56176_vm1, %v56174_v1  ;;  %v26522_v26 = vand.u32 4294901760, %v60133_v36 }
 0x515   : > { %53938 = vmatprep.subr.bf16.mxu1 %v56175_v4 }
 0x516   : > { %25446 = vmatmul.mubr.f32.vlgmr.msra.gmra.mrb[0].mxu0 %v59958_v0  ;;  %v26523_v14 = vsub.f32 %v60133_v36, %v26522_v26  ;;  %v53951_v57 = vpack.c.bf16 %v26529_v50, %v26522_v26 }
 0x517   : > { %53917 = vmatpush1.bf16.msra.mxu0 %v60145_v17  ;;  %26019 = vmatprep.mubr.f32.mxu0 %v56174_v1 }
 0x518   : > { %53919 = vmatprep.subr.bf16.mxu0 %v53918_v45  ;;  %v26524_v61 = vand.u32 4294901760, %v26523_v14  ;;  %v60242_v14 = vand.u32 4294901760, %v26932_v25 }
 0x51a   : > { %v53942_v63 = vpack.c.bf16 %v26531_v55, %v26524_v61  ;;  %v60268_v61 = vsub.f32 %v26932_v25, %v60242_v14 }
 0x51b   : > { %51812 = vmatmul.mubr.f32.vlgmr.msra.gmra.mrb[0].mxu1 %v59958_v0  ;;  %v26917_v0 = vpop.permute.xlu0 %26916  ;;  %38782 = vrot.lane.b32.xlu0 %v56279_v39, %s56195_s21 }
 0x51c   : > { %53940 = vmatpush3.bf16.msra.mxu1 %v60161_v23  ;;  %51818 = vmatprep.mubr.msk.f32.mxu1 %vm56176_vm1, %v56174_v1  ;;  %v26926_v9 = vsel %vm25932_vm15, %v26917_v0, %v26919_v12 }
 0x51d   : > { %53941 = vmatprep.subr.bf16.mxu1 %v56175_v4  ;;  %v26936_v41 = vsel %vm234_vm2, %v26926_v9, 0 }
 0x51e   : > { %26025 = vmatmul.mubr.f32.vlgmr.msra.gmra.mrb[0].mxu0 %v26024_v54  ;;  %v26944_v48 = vand.u32 4294901760, %v26936_v41 }
 0x51f   : > { %53921 = vmatpush1.bf16.msra.mxu0 %v53920_v51  ;;  %26115 = vmatprep.mubr.f32.mxu0 %v56174_v1  ;;  %v26909_v8 = vpop.permute.xlu0 %26908 }
 0x520   : > { %53923 = vmatprep.subr.bf16.mxu0 %v53922_v19  ;;  %v26923_v42 = vsel %vm25932_vm15, %v26909_v8, %v26911_v34  ;;  %v60208_v37 = vsub.f32 %v26936_v41, %v26944_v48  ;;  %v26922_v30 = vsel %vm25932_vm15, %v26907_v3, %v26909_v8  ;;  %38788 = vrot.lane.b32.xlu0 %v56326_v11, %s56195_s21 }
 0x521   : > { %v26940_v7 = vand.u32 4294901760, %v26923_v42  ;;  %v26942_v44 = vand.u32 4294901760, %v26922_v30 }
 0x522   : > { %v27034_v35 = vand.u32 4294901760, %v60208_v37 }
 0x523   : > { %51819 = vmatmul.mubr.f32.vlgmr.msra.gmra.mrb[0].mxu1 %v26024_v54  ;;  %v26915_v2 = vpop.permute.xlu0 %26914  ;;  %v60211_v27 = vsub.f32 %v26923_v42, %v26940_v7  ;;  %v60251_v51 = vpack.c.bf16 %v26944_v48, %v26940_v7  ;;  %v60261_v26 = vsub.f32 %v26922_v30, %v26942_v44 }
 0x524   : > { %53943 = vmatpush3.bf16.msra.mxu1 %v53942_v63  ;;  %51825 = vmatprep.mubr.msk.f32.mxu1 %vm56176_vm1, %v56174_v1  ;;  %v26925_v40 = vsel %vm25932_vm15, %v26915_v2, %v26917_v0  ;;  %v27035_v36 = vsub.f32 %v60208_v37, %v27034_v35 }
 0x525   : > { %53944 = vmatprep.subr.bf16.mxu1 %v56175_v4  ;;  %v26934_v5 = vsel %vm234_vm2, %v26925_v40, 0  ;;  %v53964_v30 = vpack.c.bf16 %v60208_v37, %v60211_v27  ;;  %v49797_v37 = vld [vmem:[%s63392_s1 + $0x70] sm:$0xff]  ;;  %38794 = vrot.lane.b32.xlu0 %v56444_v58, %s56195_s21 }
 0x526   : > { %26117 = vmatmul.mubr.f32.vlgmr.msra.gmra.mrb[0].mxu0 %v60102_v46  ;;  %v26946_v47 = vand.u32 4294901760, %v26934_v5  ;;  %v27036_v63 = vand.u32 4294901760, %v27035_v36 }
 0x527   : > { %53925 = vmatpush1.bf16.msra.mxu0 %v53924_v62  ;;  %26195 = vmatprep.mubr.f32.mxu0 %v56174_v1  ;;  %v26921_v45 = vpop.permute.xlu0 %26920  ;;  %v27028_v62 = vand.u32 4294901760, %v60261_v26 }
 0x528   : > { %53927 = vmatprep.subr.bf16.mxu0 %v60109_v29  ;;  %v26927_v43 = vsel %vm25932_vm15, %v26919_v12, %v26921_v45  ;;  %v60259_v50 = vsub.f32 %v26934_v5, %v26946_v47 }
 0x529   : > { %v27029_v41 = vsub.f32 %v60261_v26, %v27028_v62  ;;  %39779 = vrot.lane.b32.xlu0 %v56270_v31, %s56196_s26 }
 0x52a   : > { %v27040_v0 = vand.u32 4294901760, %v60259_v50 }
 0x52b   : > { %51826 = vmatmul.mubr.f32.vlgmr.msra.gmra.mrb[0].mxu1 %v60102_v46  ;;  %v27030_v48 = vand.u32 4294901760, %v27029_v41 }
 0x52c   : > { %53946 = vmatpush3.bf16.msra.mxu1 %v53945_v13  ;;  %51832 = vmatprep.mubr.msk.f32.mxu1 %vm56176_vm1, %v56174_v1  ;;  %v60284_v13 = vand.u32 4294901760, %v60268_v61  ;;  %v27041_v9 = vsub.f32 %v60259_v50, %v27040_v0 }
 0x52d   : > { %53947 = vmatprep.subr.bf16.mxu1 %v56175_v4 }
 0x52e   : > { %26198 = vmatmul.mubr.f32.vlgmr.msra.gmra.mrb[0].mxu0 %v60124_v20  ;;  %v27042_v2 = vand.u32 4294901760, %v27041_v9 }
 0x52f   : > { %53929 = vmatpush1.bf16.msra.mxu0 %v60145_v17  ;;  %26272 = vmatprep.mubr.f32.mxu0 %v56174_v1 }
 0x530   : > { %53931 = vmatprep.subr.bf16.mxu0 %v53930_v18  ;;  %v27012_v18 = vsub.f32 %v60268_v61, %v60284_v13 }
 0x532   : > { %v27013_v56 = vand.u32 4294901760, %v27012_v18  ;;  %v27922_v18 = vsel %vm230_vm0, %v49797_v37, 0 }
 0x533   : > { %51833 = vmatmul.mubr.f32.vlgmr.msra.gmra.mrb[0].mxu1 %v60124_v20  ;;  %v53932_v20 = vpack.c.bf16 %v26051_v53, %v26039_v24  ;;  %v26913_v53 = vpop.permute.xlu1 %26912  ;;  %v27022_v24 = vand.u32 4294901760, %v60211_v27  ;;  %39781 = vrot.lane.b32.xlu1 %v56293_v52, %s56196_s26 }
 0x534   : > { %53949 = vmatpush3.bf16.msra.mxu1 %v60161_v23  ;;  %51839 = vmatprep.mubr.msk.f32.mxu1 %vm56176_vm1, %v56174_v1  ;;  %v26924_v54 = vsel %vm25932_vm15, %v26911_v34, %v26913_v53  ;;  %v60295_v34 = vpack.c.bf16 %v26946_v47, %v26942_v44 }
 0x535   : > { %53950 = vmatprep.subr.bf16.mxu1 %v56175_v4  ;;  %v27023_v49 = vsub.f32 %v60211_v27, %v27022_v24  ;;  %v27432_v55 = vand.u32 4294901760, %v26924_v54  ;;  %v53972_v36 = vpack.c.bf16 %v27034_v35, %v27022_v24  ;;  %v53974_v24 = vpack.c.bf16 %v27040_v0, %v27028_v62 }
 0x536   : > { %26276 = vmatmul.mubr.f32.vlgmr.msra.gmra.mrb[0].mxu0 %v60136_v21 }
 0x537   : > { %53933 = vmatpush1.bf16.msra.mxu0 %v53932_v20  ;;  %26358 = vmatprep.mubr.f32.mxu0 %v56174_v1  ;;  %v27024_v19 = vand.u32 4294901760, %v27023_v49  ;;  %v60281_v8 = vsub.f32 %v26924_v54, %v27432_v55  ;;  %v53962_v20 = vpack.c.bf16 %v27042_v2, %v27030_v48  ;;  %v27908_v53 = vpop.permute.xlu1 %27907 }
 0x538   : > { %53935 = vmatprep.subr.bf16.mxu0 %v60109_v29  ;;  %v26938_v29 = vsel %vm234_vm2, %v26927_v43, 0  ;;  %v53966_v43 = vpack.c.bf16 %v60259_v50, %v60261_v26  ;;  %39773 = vrot.lane.b32.xlu1 %v56304_v59, %s56196_s26 }
 0x539   : > { %v27511_v42 = vand.u32 4294901760, %v60281_v8 }
 0x53b   : > { %51840 = vmatmul.mubr.f32.vlgmr.msra.gmra.mrb[0].mxu1 %v60136_v21  ;;  %v27435_v21 = vand.u32 4294901760, %v26938_v29  ;;  %v27512_v40 = vsub.f32 %v60281_v8, %v27511_v42 }
 0x53c   : > { %53952 = vmatpush3.bf16.msra.mxu1 %v53951_v57  ;;  %51846 = vmatprep.mubr.msk.f32.mxu1 %vm56176_vm1, %v56174_v1 }
 0x53d   : > { %53953 = vmatprep.subr.bf16.mxu1 %v56175_v4  ;;  %v60279_v12 = vsub.f32 %v26938_v29, %v27435_v21  ;;  %v60317_v3 = vpack.c.bf16 %v27435_v21, %v27432_v55  ;;  %v27513_v5 = vand.u32 4294901760, %v27512_v40  ;;  %v27900_v29 = vpop.permute.xlu1 %27899  ;;  %v60386_v40 = vand.u32 4294901760, %v27922_v18  ;;  %39769 = vrot.lane.b32.xlu1 %v56332_v15, %s56196_s26 }
 0x53e   : > { %26360 = vmatmul.mubr.f32.vlgmr.msra.gmra.mrb[0].mxu0 %v60102_v46 }
 0x53f   : > { %53937 = vmatpush1.bf16.msra.mxu0 %v60145_v17  ;;  %26434 = vmatprep.mubr.f32.mxu0 %v56174_v1  ;;  %v53960_v17 = vpack.c.bf16 %v27036_v63, %v27024_v19  ;;  %v53987_v44 = vpack.c.bf16 %v60279_v12, %v60281_v8 }
 0x540   : > { %53957 = vmatprep.subr.bf16.mxu0 %v60251_v51 }
 0x541   : > { %v27896_v63 = vpop.permute.xlu1 %27895  ;;  %39775 = vrot.lane.b32.xlu1 %v56368_v33, %s56196_s26 }
 0x543   : > { %51847 = vmatmul.mubr.f32.vlgmr.msra.gmra.mrb[0].mxu1 %v60102_v46 }
 0x544   : > { %53955 = vmatpush3.bf16.msra.mxu1 %v60161_v23  ;;  %51853 = vmatprep.mubr.msk.f32.mxu1 %vm56176_vm1, %v56174_v1  ;;  %v27518_v23 = vand.u32 4294901760, %v60279_v12 }
 0x545   : > { %53980 = vmatprep.subr.bf16.mxu1 %v56175_v4  ;;  %v27902_v50 = vpop.permute.xlu1 %27901  ;;  %40771 = vrot.lane.b32.xlu1 %v56353_v28, %s56196_s26 }
 0x546   : > { %26436 = vmatmul.mubr.f32.vlgmr.msra.gmra.mrb[0].mxu0 %v60102_v46  ;;  %v27519_v7 = vsub.f32 %v60279_v12, %v27518_v23 }
 0x547   : > { %53959 = vmatpush1.bf16.msra.mxu0 %v60295_v34  ;;  %27008 = vmatprep.mubr.f32.mxu0 %v56174_v1 }
 0x548   : > { %53961 = vmatprep.subr.bf16.mxu0 %v53960_v17  ;;  %v27520_v45 = vand.u32 4294901760, %v27519_v7  ;;  %v53993_v7 = vpack.c.bf16 %v27518_v23, %v27511_v42 }
 0x54a   : > { %v53984_v25 = vpack.c.bf16 %v27520_v45, %v27513_v5  ;;  %v60408_v5 = vsub.f32 %v27922_v18, %v60386_v40 }
 0x54b   : > { %51854 = vmatmul.mubr.f32.vlgmr.msra.gmra.mrb[0].mxu1 %v60102_v46  ;;  %v27906_v46 = vpop.permute.xlu0 %27905  ;;  %39771 = vrot.lane.b32.xlu0 %v56277_v38, %s56196_s26 }
 0x54c   : > { %53982 = vmatpush3.bf16.msra.mxu1 %v60317_v3  ;;  %51860 = vmatprep.mubr.msk.f32.mxu1 %vm56176_vm1, %v56174_v1  ;;  %v27916_v57 = vsel %vm27911_vm3, %v27906_v46, %v27908_v53 }
 0x54d   : > { %53983 = vmatprep.subr.bf16.mxu1 %v56175_v4  ;;  %v27926_v54 = vsel %vm234_vm2, %v27916_v57, 0 }
 0x54e   : > { %27014 = vmatmul.mubr.f32.vlgmr.msra.gmra.mrb[0].mxu0 %v27013_v56  ;;  %v27934_v55 = vand.u32 4294901760, %v27926_v54 }
 0x54f   : > { %53963 = vmatpush1.bf16.msra.mxu0 %v53962_v20  ;;  %27104 = vmatprep.mubr.f32.mxu0 %v56174_v1  ;;  %v27898_v47 = vpop.permute.xlu0 %27897 }
 0x550   : > { %53965 = vmatprep.subr.bf16.mxu0 %v53964_v30  ;;  %v27913_v49 = vsel %vm27911_vm3, %v27898_v47, %v27900_v29  ;;  %v60358_v9 = vsub.f32 %v27926_v54, %v27934_v55  ;;  %v27912_v41 = vsel %vm27911_vm3, %v27896_v63, %v27898_v47  ;;  %39777 = vrot.lane.b32.xlu0 %v56317_v6, %s56196_s26 }
 0x551   : > { %v27930_v19 = vand.u32 4294901760, %v27913_v49  ;;  %v27932_v48 = vand.u32 4294901760, %v27912_v41 }
 0x552   : > { %v28024_v62 = vand.u32 4294901760, %v60358_v9 }
 0x553   : > { %51861 = vmatmul.mubr.f32.vlgmr.msra.gmra.mrb[0].mxu1 %v27013_v56  ;;  %v27904_v21 = vpop.permute.xlu0 %27903  ;;  %v60361_v27 = vsub.f32 %v27913_v49, %v27930_v19  ;;  %v60393_v20 = vpack.c.bf16 %v27934_v55, %v27930_v19  ;;  %v60403_v42 = vsub.f32 %v27912_v41, %v27932_v48 }
 0x554   : > { %53985 = vmatpush3.bf16.msra.mxu1 %v53984_v25  ;;  %51867 = vmatprep.mubr.msk.f32.mxu1 %vm56176_vm1, %v56174_v1  ;;  %v27915_v17 = vsel %vm27911_vm3, %v27904_v21, %v27906_v46  ;;  %v28025_v12 = vsub.f32 %v60358_v9, %v28024_v62 }
 0x555   : > { %53986 = vmatprep.subr.bf16.mxu1 %v56175_v4  ;;  %v28012_v0 = vand.u32 4294901760, %v60361_v27  ;;  %v54006_v41 = vpack.c.bf16 %v60358_v9, %v60361_v27  ;;  %39783 = vrot.lane.b32.xlu0 %v56360_v22, %s56196_s26 }
 0x556   : > { %27106 = vmatmul.mubr.f32.vlgmr.msra.gmra.mrb[0].mxu0 %v60242_v14  ;;  %v28026_v25 = vand.u32 4294901760, %v28025_v12 }
 0x557   : > { %53967 = vmatpush1.bf16.msra.mxu0 %v53966_v43  ;;  %27184 = vmatprep.mubr.f32.mxu0 %v56174_v1  ;;  %v27910_v35 = vpop.permute.xlu0 %27909  ;;  %v28013_v8 = vsub.f32 %v60361_v27, %v28012_v0  ;;  %v28018_v43 = vand.u32 4294901760, %v60403_v42  ;;  %v54014_v12 = vpack.c.bf16 %v28024_v62, %v28012_v0  ;;  %v49798_v62 = vld [vmem:[%s63392_s1 + $0x138] sm:$0xff] }
 0x558   : > { %53969 = vmatprep.subr.bf16.mxu0 %v60251_v51  ;;  %v27917_v26 = vsel %vm27911_vm3, %v27908_v53, %v27910_v35 }
 0x559   : > { %v27928_v56 = vsel %vm234_vm2, %v27917_v26, 0  ;;  %v28014_v30 = vand.u32 4294901760, %v28013_v8  ;;  %v28019_v54 = vsub.f32 %v60403_v42, %v28018_v43  ;;  %40769 = vrot.lane.b32.xlu0 %v56272_v32, %s56196_s26 }
 0x55b   : > { %51868 = vmatmul.mubr.f32.vlgmr.msra.gmra.mrb[0].mxu1 %v60242_v14  ;;  %v28020_v55 = vand.u32 4294901760, %v28019_v54 }
 0x55c   : > { %53988 = vmatpush3.bf16.msra.mxu1 %v53987_v44  ;;  %51874 = vmatprep.mubr.msk.f32.mxu1 %vm56176_vm1, %v56174_v1  ;;  %v60420_v44 = vand.u32 4294901760, %v60408_v5 }
 0x55d   : > { %53989 = vmatprep.subr.bf16.mxu1 %v56175_v4 }
 0x55e   : > { %27187 = vmatmul.mubr.f32.vlgmr.msra.gmra.mrb[0].mxu0 %v60268_v61 }
 0x55f   : > { %53971 = vmatpush1.bf16.msra.mxu0 %v60295_v34  ;;  %27261 = vmatprep.mubr.f32.mxu0 %v56174_v1 }
 0x560   : > { %53973 = vmatprep.subr.bf16.mxu0 %v53972_v36  ;;  %v28002_v36 = vsub.f32 %v60408_v5, %v60420_v44 }
 0x562   : > { %v28003_v37 = vand.u32 4294901760, %v28002_v36 }
 0x563   : > { %51875 = vmatmul.mubr.f32.vlgmr.msra.gmra.mrb[0].mxu1 %v60268_v61  ;;  %v27924_v61 = vsel %vm234_vm2, %v27915_v17, 0 }
 0x564   : > { %53991 = vmatpush3.bf16.msra.mxu1 %v60317_v3  ;;  %51881 = vmatprep.mubr.msk.f32.mxu1 %vm56176_vm1, %v56174_v1  ;;  %v27936_v2 = vand.u32 4294901760, %v27924_v61 }
 0x565   : > { %53992 = vmatprep.subr.bf16.mxu1 %v56175_v4 }
 0x566   : > { %27265 = vmatmul.mubr.f32.vlgmr.msra.gmra.mrb[0].mxu0 %v60284_v13  ;;  %v60401_v23 = vsub.f32 %v27924_v61, %v27936_v2 }
 0x567   : > { %53975 = vmatpush1.bf16.msra.mxu0 %v53974_v24  ;;  %27347 = vmatprep.mubr.f32.mxu0 %v56174_v1 }
 0x568   : > { %53977 = vmatprep.subr.bf16.mxu0 %v60251_v51  ;;  %v27914_v51 = vsel %vm27911_vm3, %v27900_v29, %v27902_v50  ;;  %v28030_v46 = vand.u32 4294901760, %v60401_v23  ;;  %v60429_v29 = vpack.c.bf16 %v27936_v2, %v27932_v48  ;;  %v54008_v26 = vpack.c.bf16 %v60401_v23, %v60403_v42  ;;  %v28898_v50 = vpop.permute.xlu1 %28897  ;;  %40763 = vrot.lane.b32.xlu1 %v56306_v60, %s56196_s26 }
 0x569   : > { %v28422_v45 = vand.u32 4294901760, %v27914_v51 }
 0x56a   : > { %v28031_v57 = vsub.f32 %v60401_v23, %v28030_v46  ;;  %v28911_v23 = vsel %vm230_vm0, %v49798_v62, 0 }
 0x56b   : > { %51882 = vmatmul.mubr.f32.vlgmr.msra.gmra.mrb[0].mxu1 %v60284_v13  ;;  %v28425_v13 = vand.u32 4294901760, %v27928_v56  ;;  %v60417_v47 = vsub.f32 %v27914_v51, %v28422_v45 }
 0x56c   : > { %53994 = vmatpush3.bf16.msra.mxu1 %v53993_v7  ;;  %51888 = vmatprep.mubr.msk.f32.mxu1 %vm56176_vm1, %v56174_v1  ;;  %v28032_v21 = vand.u32 4294901760, %v28031_v57 }
 0x56d   : > { %53995 = vmatprep.subr.bf16.mxu1 %v56175_v4  ;;  %v60415_v53 = vsub.f32 %v27928_v56, %v28425_v13  ;;  %v60445_v63 = vpack.c.bf16 %v28425_v13, %v28422_v45  ;;  %v28890_v56 = vpop.permute.xlu1 %28889  ;;  %40759 = vrot.lane.b32.xlu1 %v56334_v16, %s56196_s26 }
 0x56e   : > { %27349 = vmatmul.mubr.f32.vlgmr.msra.gmra.mrb[0].mxu0 %v60242_v14  ;;  %v54004_v24 = vpack.c.bf16 %v28032_v21, %v28020_v55 }
 0x56f   : > { %53979 = vmatpush1.bf16.msra.mxu0 %v60295_v34  ;;  %27423 = vmatprep.mubr.f32.mxu0 %v56174_v1  ;;  %v54002_v34 = vpack.c.bf16 %v28026_v25, %v28014_v30  ;;  %v28508_v49 = vand.u32 4294901760, %v60415_v53  ;;  %v54029_v48 = vpack.c.bf16 %v60415_v53, %v60417_v47 }
 0x570   : > { %53999 = vmatprep.subr.bf16.mxu0 %v60393_v20 }
 0x571   : > { %v28509_v19 = vsub.f32 %v60415_v53, %v28508_v49  ;;  %v28886_v25 = vpop.permute.xlu1 %28885  ;;  %40765 = vrot.lane.b32.xlu1 %v56449_v10, %s56196_s26 }
 0x573   : > { %51889 = vmatmul.mubr.f32.vlgmr.msra.gmra.mrb[0].mxu1 %v60242_v14  ;;  %v28510_v35 = vand.u32 4294901760, %v28509_v19 }
 0x574   : > { %53997 = vmatpush3.bf16.msra.mxu1 %v60317_v3  ;;  %51895 = vmatprep.mubr.msk.f32.mxu1 %vm56176_vm1, %v56174_v1  ;;  %v28501_v3 = vand.u32 4294901760, %v60417_v47 }
 0x575   : > { %54022 = vmatprep.subr.bf16.mxu1 %v56175_v4 }
 0x576   : > { %27425 = vmatmul.mubr.f32.vlgmr.msra.gmra.mrb[0].mxu0 %v60242_v14  ;;  %v28502_v17 = vsub.f32 %v60417_v47, %v28501_v3  ;;  %v54035_v19 = vpack.c.bf16 %v28508_v49, %v28501_v3 }
 0x577   : > { %54001 = vmatpush1.bf16.msra.mxu0 %v60429_v29  ;;  %27998 = vmatprep.mubr.f32.mxu0 %v56174_v1 }
 0x578   : > { %54003 = vmatprep.subr.bf16.mxu0 %v54002_v34  ;;  %v28503_v61 = vand.u32 4294901760, %v28502_v17  ;;  %v60526_v17 = vand.u32 4294901760, %v28911_v23 }
 0x57a   : > { %v54026_v18 = vpack.c.bf16 %v28510_v35, %v28503_v61  ;;  %v60552_v61 = vsub.f32 %v28911_v23, %v60526_v17 }
 0x57b   : > { %51896 = vmatmul.mubr.f32.vlgmr.msra.gmra.mrb[0].mxu1 %v60242_v14  ;;  %v28896_v14 = vpop.permute.xlu0 %28895  ;;  %40761 = vrot.lane.b32.xlu0 %v56279_v39, %s56196_s26 }
 0x57c   : > { %54024 = vmatpush3.bf16.msra.mxu1 %v60445_v63  ;;  %51902 = vmatprep.mubr.msk.f32.mxu1 %vm56176_vm1, %v56174_v1  ;;  %v28905_v7 = vsel %vm27911_vm3, %v28896_v14, %v28898_v50 }
 0x57d   : > { %54025 = vmatprep.subr.bf16.mxu1 %v56175_v4  ;;  %v28915_v51 = vsel %vm234_vm2, %v28905_v7, 0 }
 0x57e   : > { %28004 = vmatmul.mubr.f32.vlgmr.msra.gmra.mrb[0].mxu0 %v28003_v37  ;;  %v28923_v45 = vand.u32 4294901760, %v28915_v51 }
 0x57f   : > { %54005 = vmatpush1.bf16.msra.mxu0 %v54004_v24  ;;  %28094 = vmatprep.mubr.f32.mxu0 %v56174_v1  ;;  %v28888_v2 = vpop.permute.xlu0 %28887 }
 0x580   : > { %54007 = vmatprep.subr.bf16.mxu0 %v54006_v41  ;;  %v28902_v8 = vsel %vm27911_vm3, %v28888_v2, %v28890_v56  ;;  %v60492_v27 = vsub.f32 %v28915_v51, %v28923_v45  ;;  %v28901_v54 = vsel %vm27911_vm3, %v28886_v25, %v28888_v2  ;;  %40767 = vrot.lane.b32.xlu0 %v56326_v11, %s56196_s26 }
 0x581   : > { %v28919_v30 = vand.u32 4294901760, %v28902_v8  ;;  %v28921_v55 = vand.u32 4294901760, %v28901_v54 }
 0x582   : > { %v29013_v36 = vand.u32 4294901760, %v60492_v27 }
 0x583   : > { %51903 = vmatmul.mubr.f32.vlgmr.msra.gmra.mrb[0].mxu1 %v28003_v37  ;;  %v28894_v13 = vpop.permute.xlu0 %28893  ;;  %v60495_v0 = vsub.f32 %v28902_v8, %v28919_v30  ;;  %v60535_v24 = vpack.c.bf16 %v28923_v45, %v28919_v30  ;;  %v60545_v3 = vsub.f32 %v28901_v54, %v28921_v55 }
 0x584   : > { %54027 = vmatpush3.bf16.msra.mxu1 %v54026_v18  ;;  %51909 = vmatprep.mubr.msk.f32.mxu1 %vm56176_vm1, %v56174_v1  ;;  %v28904_v9 = vsel %vm27911_vm3, %v28894_v13, %v28896_v14  ;;  %v29014_v47 = vsub.f32 %v60492_v27, %v29013_v36 }
 0x585   : > { %54028 = vmatprep.subr.bf16.mxu1 %v56175_v4  ;;  %v28913_v57 = vsel %vm234_vm2, %v28904_v9, 0  ;;  %v54048_v54 = vpack.c.bf16 %v60492_v27, %v60495_v0  ;;  %v49799_v27 = vld [vmem:[%s63392_s1 + $0x78] sm:$0xff]  ;;  %40773 = vrot.lane.b32.xlu0 %v56444_v58, %s56196_s26 }
 0x586   : > { %28096 = vmatmul.mubr.f32.vlgmr.msra.gmra.mrb[0].mxu0 %v60386_v40  ;;  %v28925_v21 = vand.u32 4294901760, %v28913_v57  ;;  %v29015_v18 = vand.u32 4294901760, %v29014_v47 }
 0x587   : > { %54009 = vmatpush1.bf16.msra.mxu0 %v54008_v26  ;;  %28174 = vmatprep.mubr.f32.mxu0 %v56174_v1  ;;  %v28900_v34 = vpop.permute.xlu0 %28899  ;;  %v29007_v26 = vand.u32 4294901760, %v60545_v3 }
 0x588   : > { %54011 = vmatprep.subr.bf16.mxu0 %v60393_v20  ;;  %v28906_v42 = vsel %vm27911_vm3, %v28898_v50, %v28900_v34  ;;  %v60543_v49 = vsub.f32 %v28913_v57, %v28925_v21 }
 0x589   : > { %v29008_v51 = vsub.f32 %v60545_v3, %v29007_v26  ;;  %41758 = vrot.lane.b32.xlu0 %v56270_v31, %s56197_s3 }
 0x58a   : > { %v29019_v14 = vand.u32 4294901760, %v60543_v49 }
 0x58b   : > { %51910 = vmatmul.mubr.f32.vlgmr.msra.gmra.mrb[0].mxu1 %v60386_v40  ;;  %v29009_v45 = vand.u32 4294901760, %v29008_v51 }
 0x58c   : > { %54030 = vmatpush3.bf16.msra.mxu1 %v54029_v48  ;;  %51916 = vmatprep.mubr.msk.f32.mxu1 %vm56176_vm1, %v56174_v1  ;;  %v60568_v48 = vand.u32 4294901760, %v60552_v61  ;;  %v29020_v7 = vsub.f32 %v60543_v49, %v29019_v14 }
 0x58d   : > { %54031 = vmatprep.subr.bf16.mxu1 %v56175_v4 }
 0x58e   : > { %28177 = vmatmul.mubr.f32.vlgmr.msra.gmra.mrb[0].mxu0 %v60408_v5  ;;  %v29021_v13 = vand.u32 4294901760, %v29020_v7 }
 0x58f   : > { %54013 = vmatpush1.bf16.msra.mxu0 %v60429_v29  ;;  %28251 = vmatprep.mubr.f32.mxu0 %v56174_v1 }
 0x590   : > { %54015 = vmatprep.subr.bf16.mxu0 %v54014_v12  ;;  %v28991_v12 = vsub.f32 %v60552_v61, %v60568_v48 }
 0x592   : > { %v28992_v62 = vand.u32 4294901760, %v28991_v12  ;;  %v29901_v12 = vsel %vm230_vm0, %v49799_v27, 0 }
 0x593   : > { %51917 = vmatmul.mubr.f32.vlgmr.msra.gmra.mrb[0].mxu1 %v60408_v5  ;;  %v54016_v5 = vpack.c.bf16 %v28030_v46, %v28018_v43  ;;  %v28892_v46 = vpop.permute.xlu1 %28891  ;;  %v29001_v43 = vand.u32 4294901760, %v60495_v0  ;;  %41760 = vrot.lane.b32.xlu1 %v56293_v52, %s56197_s3 }
 0x594   : > { %54033 = vmatpush3.bf16.msra.mxu1 %v60445_v63  ;;  %51923 = vmatprep.mubr.msk.f32.mxu1 %vm56176_vm1, %v56174_v1  ;;  %v28903_v37 = vsel %vm27911_vm3, %v28890_v56, %v28892_v46  ;;  %v60579_v56 = vpack.c.bf16 %v28925_v21, %v28921_v55 }
 0x595   : > { %54034 = vmatprep.subr.bf16.mxu1 %v56175_v4  ;;  %v29002_v53 = vsub.f32 %v60495_v0, %v29001_v43  ;;  %v29411_v35 = vand.u32 4294901760, %v28903_v37  ;;  %v54056_v47 = vpack.c.bf16 %v29013_v36, %v29001_v43  ;;  %v54058_v43 = vpack.c.bf16 %v29019_v14, %v29007_v26 }
 0x596   : > { %28255 = vmatmul.mubr.f32.vlgmr.msra.gmra.mrb[0].mxu0 %v60420_v44 }
 0x597   : > { %54017 = vmatpush1.bf16.msra.mxu0 %v54016_v5  ;;  %28337 = vmatprep.mubr.f32.mxu0 %v56174_v1  ;;  %v29003_v41 = vand.u32 4294901760, %v29002_v53  ;;  %v60565_v2 = vsub.f32 %v28903_v37, %v29411_v35  ;;  %v54046_v5 = vpack.c.bf16 %v29021_v13, %v29009_v45  ;;  %v29887_v46 = vpop.permute.xlu1 %29886 }
 0x598   : > { %54019 = vmatprep.subr.bf16.mxu0 %v60393_v20  ;;  %v28917_v20 = vsel %vm234_vm2, %v28906_v42, 0  ;;  %v54050_v42 = vpack.c.bf16 %v60543_v49, %v60545_v3  ;;  %41752 = vrot.lane.b32.xlu1 %v56304_v59, %s56197_s3 }
 0x599   : > { %v29490_v8 = vand.u32 4294901760, %v60565_v2 }
 0x59b   : > { %51924 = vmatmul.mubr.f32.vlgmr.msra.gmra.mrb[0].mxu1 %v60420_v44  ;;  %v29414_v44 = vand.u32 4294901760, %v28917_v20  ;;  %v29491_v9 = vsub.f32 %v60565_v2, %v29490_v8 }
 0x59c   : > { %54036 = vmatpush3.bf16.msra.mxu1 %v54035_v19  ;;  %51930 = vmatprep.mubr.msk.f32.mxu1 %vm56176_vm1, %v56174_v1 }
 0x59d   : > { %54037 = vmatprep.subr.bf16.mxu1 %v56175_v4  ;;  %v60563_v50 = vsub.f32 %v28917_v20, %v29414_v44  ;;  %v60601_v25 = vpack.c.bf16 %v29414_v44, %v29411_v35  ;;  %v29492_v57 = vand.u32 4294901760, %v29491_v9  ;;  %v29879_v20 = vpop.permute.xlu1 %29878  ;;  %v60670_v9 = vand.u32 4294901760, %v29901_v12  ;;  %41748 = vrot.lane.b32.xlu1 %v56332_v15, %s56197_s3 }
 0x59e   : > { %28339 = vmatmul.mubr.f32.vlgmr.msra.gmra.mrb[0].mxu0 %v60386_v40 }
 0x59f   : > { %54021 = vmatpush1.bf16.msra.mxu0 %v60429_v29  ;;  %28413 = vmatprep.mubr.f32.mxu0 %v56174_v1  ;;  %v54044_v29 = vpack.c.bf16 %v29015_v18, %v29003_v41  ;;  %v54071_v55 = vpack.c.bf16 %v60563_v50, %v60565_v2 }
 0x5a0   : > { %54041 = vmatprep.subr.bf16.mxu0 %v60535_v24 }
 0x5a1   : > { %v29875_v18 = vpop.permute.xlu1 %29874  ;;  %41754 = vrot.lane.b32.xlu1 %v56368_v33, %s56197_s3 }
 0x5a3   : > { %51931 = vmatmul.mubr.f32.vlgmr.msra.gmra.mrb[0].mxu1 %v60386_v40 }
 0x5a4   : > { %54039 = vmatpush3.bf16.msra.mxu1 %v60445_v63  ;;  %51937 = vmatprep.mubr.msk.f32.mxu1 %vm56176_vm1, %v56174_v1  ;;  %v29497_v63 = vand.u32 4294901760, %v60563_v50 }
 0x5a5   : > { %54064 = vmatprep.subr.bf16.mxu1 %v56175_v4  ;;  %v29881_v49 = vpop.permute.xlu1 %29880  ;;  %42750 = vrot.lane.b32.xlu1 %v56353_v28, %s56197_s3 }
 0x5a6   : > { %28415 = vmatmul.mubr.f32.vlgmr.msra.gmra.mrb[0].mxu0 %v60386_v40  ;;  %v29498_v30 = vsub.f32 %v60563_v50, %v29497_v63 }
 0x5a7   : > { %54043 = vmatpush1.bf16.msra.mxu0 %v60579_v56  ;;  %28987 = vmatprep.mubr.f32.mxu0 %v56174_v1 }
 0x5a8   : > { %54045 = vmatprep.subr.bf16.mxu0 %v54044_v29  ;;  %v29499_v34 = vand.u32 4294901760, %v29498_v30  ;;  %v54077_v30 = vpack.c.bf16 %v29497_v63, %v29490_v8 }
 0x5aa   : > { %v54068_v23 = vpack.c.bf16 %v29499_v34, %v29492_v57  ;;  %v60692_v57 = vsub.f32 %v29901_v12, %v60670_v9 }
 0x5ab   : > { %51938 = vmatmul.mubr.f32.vlgmr.msra.gmra.mrb[0].mxu1 %v60386_v40  ;;  %v29885_v40 = vpop.permute.xlu0 %29884  ;;  %41750 = vrot.lane.b32.xlu0 %v56277_v38, %s56197_s3 }
 0x5ac   : > { %54066 = vmatpush3.bf16.msra.mxu1 %v60601_v25  ;;  %51944 = vmatprep.mubr.msk.f32.mxu1 %vm56176_vm1, %v56174_v1  ;;  %v29895_v19 = vsel %vm29890_vm4, %v29885_v40, %v29887_v46 }
 0x5ad   : > { %54067 = vmatprep.subr.bf16.mxu1 %v56175_v4  ;;  %v29905_v37 = vsel %vm234_vm2, %v29895_v19, 0 }
 0x5ae   : > { %28993 = vmatmul.mubr.f32.vlgmr.msra.gmra.mrb[0].mxu0 %v28992_v62  ;;  %v29913_v35 = vand.u32 4294901760, %v29905_v37 }
 0x5af   : > { %54047 = vmatpush1.bf16.msra.mxu0 %v54046_v5  ;;  %29083 = vmatprep.mubr.f32.mxu0 %v56174_v1  ;;  %v29877_v21 = vpop.permute.xlu0 %29876 }
 0x5b0   : > { %54049 = vmatprep.subr.bf16.mxu0 %v54048_v54  ;;  %v29892_v53 = vsel %vm29890_vm4, %v29877_v21, %v29879_v20  ;;  %v60642_v7 = vsub.f32 %v29905_v37, %v29913_v35  ;;  %v29891_v51 = vsel %vm29890_vm4, %v29875_v18, %v29877_v21  ;;  %41756 = vrot.lane.b32.xlu0 %v56317_v6, %s56197_s3 }
 0x5b1   : > { %v29909_v41 = vand.u32 4294901760, %v29892_v53  ;;  %v29911_v45 = vand.u32 4294901760, %v29891_v51 }
 0x5b2   : > { %v30003_v26 = vand.u32 4294901760, %v60642_v7 }
 0x5b3   : > { %51945 = vmatmul.mubr.f32.vlgmr.msra.gmra.mrb[0].mxu1 %v28992_v62  ;;  %v29883_v44 = vpop.permute.xlu0 %29882  ;;  %v60645_v0 = vsub.f32 %v29892_v53, %v29909_v41  ;;  %v60677_v5 = vpack.c.bf16 %v29913_v35, %v29909_v41  ;;  %v60687_v8 = vsub.f32 %v29891_v51, %v29911_v45 }
 0x5b4   : > { %54069 = vmatpush3.bf16.msra.mxu1 %v54068_v23  ;;  %51951 = vmatprep.mubr.msk.f32.mxu1 %vm56176_vm1, %v56174_v1  ;;  %v29894_v29 = vsel %vm29890_vm4, %v29883_v44, %v29885_v40  ;;  %v30004_v50 = vsub.f32 %v60642_v7, %v30003_v26 }
 0x5b5   : > { %54070 = vmatprep.subr.bf16.mxu1 %v56175_v4  ;;  %v29991_v14 = vand.u32 4294901760, %v60645_v0  ;;  %v54090_v51 = vpack.c.bf16 %v60642_v7, %v60645_v0  ;;  %41762 = vrot.lane.b32.xlu0 %v56360_v22, %s56197_s3 }
 0x5b6   : > { %29085 = vmatmul.mubr.f32.vlgmr.msra.gmra.mrb[0].mxu0 %v60526_v17  ;;  %v30005_v23 = vand.u32 4294901760, %v30004_v50 }
 0x5b7   : > { %54051 = vmatpush1.bf16.msra.mxu0 %v54050_v42  ;;  %29163 = vmatprep.mubr.f32.mxu0 %v56174_v1  ;;  %v29889_v36 = vpop.permute.xlu0 %29888  ;;  %v29992_v2 = vsub.f32 %v60645_v0, %v29991_v14  ;;  %v29997_v42 = vand.u32 4294901760, %v60687_v8  ;;  %v54098_v50 = vpack.c.bf16 %v30003_v26, %v29991_v14  ;;  %v49800_v26 = vld [vmem:[%s63392_s1 + $0x140] sm:$0xff] }
 0x5b8   : > { %54053 = vmatprep.subr.bf16.mxu0 %v60535_v24  ;;  %v29896_v3 = vsel %vm29890_vm4, %v29887_v46, %v29889_v36 }
 0x5b9   : > { %v29907_v62 = vsel %vm234_vm2, %v29896_v3, 0  ;;  %v29993_v54 = vand.u32 4294901760, %v29992_v2  ;;  %v29998_v37 = vsub.f32 %v60687_v8, %v29997_v42  ;;  %42748 = vrot.lane.b32.xlu0 %v56272_v32, %s56197_s3 }
 0x5bb   : > { %51952 = vmatmul.mubr.f32.vlgmr.msra.gmra.mrb[0].mxu1 %v60526_v17  ;;  %v29999_v35 = vand.u32 4294901760, %v29998_v37 }
 0x5bc   : > { %54072 = vmatpush3.bf16.msra.mxu1 %v54071_v55  ;;  %51958 = vmatprep.mubr.msk.f32.mxu1 %vm56176_vm1, %v56174_v1  ;;  %v60704_v55 = vand.u32 4294901760, %v60692_v57 }
 0x5bd   : > { %54073 = vmatprep.subr.bf16.mxu1 %v56175_v4 }
 0x5be   : > { %29166 = vmatmul.mubr.f32.vlgmr.msra.gmra.mrb[0].mxu0 %v60552_v61 }
 0x5bf   : > { %54055 = vmatpush1.bf16.msra.mxu0 %v60579_v56  ;;  %29240 = vmatprep.mubr.f32.mxu0 %v56174_v1 }
 0x5c0   : > { %54057 = vmatprep.subr.bf16.mxu0 %v54056_v47  ;;  %v29981_v47 = vsub.f32 %v60692_v57, %v60704_v55 }
 0x5c2   : > { %v29982_v27 = vand.u32 4294901760, %v29981_v47 }
 0x5c3   : > { %51959 = vmatmul.mubr.f32.vlgmr.msra.gmra.mrb[0].mxu1 %v60552_v61  ;;  %v29903_v61 = vsel %vm234_vm2, %v29894_v29, 0 }
 0x5c4   : > { %54075 = vmatpush3.bf16.msra.mxu1 %v60601_v25  ;;  %51965 = vmatprep.mubr.msk.f32.mxu1 %vm56176_vm1, %v56174_v1  ;;  %v29915_v13 = vand.u32 4294901760, %v29903_v61 }
 0x5c5   : > { %54076 = vmatprep.subr.bf16.mxu1 %v56175_v4 }
 0x5c6   : > { %29244 = vmatmul.mubr.f32.vlgmr.msra.gmra.mrb[0].mxu0 %v60568_v48  ;;  %v60685_v63 = vsub.f32 %v29903_v61, %v29915_v13 }
 0x5c7   : > { %54059 = vmatpush1.bf16.msra.mxu0 %v54058_v43  ;;  %29326 = vmatprep.mubr.f32.mxu0 %v56174_v1 }
 0x5c8   : > { %54061 = vmatprep.subr.bf16.mxu0 %v60535_v24  ;;  %v29893_v24 = vsel %vm29890_vm4, %v29879_v20, %v29881_v49  ;;  %v30009_v40 = vand.u32 4294901760, %v60685_v63  ;;  %v60713_v20 = vpack.c.bf16 %v29915_v13, %v29911_v45  ;;  %v54092_v3 = vpack.c.bf16 %v60685_v63, %v60687_v8  ;;  %v30877_v49 = vpop.permute.xlu1 %30876  ;;  %42742 = vrot.lane.b32.xlu1 %v56306_v60, %s56197_s3 }
 0x5c9   : > { %v30401_v34 = vand.u32 4294901760, %v29893_v24 }
 0x5ca   : > { %v30010_v19 = vsub.f32 %v60685_v63, %v30009_v40  ;;  %v30890_v63 = vsel %vm230_vm0, %v49800_v26, 0 }
 0x5cb   : > { %51966 = vmatmul.mubr.f32.vlgmr.msra.gmra.mrb[0].mxu1 %v60568_v48  ;;  %v30404_v48 = vand.u32 4294901760, %v29907_v62  ;;  %v60701_v21 = vsub.f32 %v29893_v24, %v30401_v34 }
 0x5cc   : > { %54078 = vmatpush3.bf16.msra.mxu1 %v54077_v30  ;;  %51972 = vmatprep.mubr.msk.f32.mxu1 %vm56176_vm1, %v56174_v1  ;;  %v30011_v44 = vand.u32 4294901760, %v30010_v19 }
 0x5cd   : > { %54079 = vmatprep.subr.bf16.mxu1 %v56175_v4  ;;  %v60699_v46 = vsub.f32 %v29907_v62, %v30404_v48  ;;  %v60729_v18 = vpack.c.bf16 %v30404_v48, %v30401_v34  ;;  %v30869_v62 = vpop.permute.xlu1 %30868  ;;  %42738 = vrot.lane.b32.xlu1 %v56334_v16, %s56197_s3 }
 0x5ce   : > { %29328 = vmatmul.mubr.f32.vlgmr.msra.gmra.mrb[0].mxu0 %v60526_v17  ;;  %v54088_v43 = vpack.c.bf16 %v30011_v44, %v29999_v35 }
 0x5cf   : > { %54063 = vmatpush1.bf16.msra.mxu0 %v60579_v56  ;;  %29402 = vmatprep.mubr.f32.mxu0 %v56174_v1  ;;  %v54086_v56 = vpack.c.bf16 %v30005_v23, %v29993_v54  ;;  %v30487_v53 = vand.u32 4294901760, %v60699_v46  ;;  %v54113_v45 = vpack.c.bf16 %v60699_v46, %v60701_v21 }
 0x5d0   : > { %54083 = vmatprep.subr.bf16.mxu0 %v60677_v5 }
 0x5d1   : > { %v30488_v41 = vsub.f32 %v60699_v46, %v30487_v53  ;;  %v30865_v23 = vpop.permute.xlu1 %30864  ;;  %42744 = vrot.lane.b32.xlu1 %v56449_v10, %s56197_s3 }
 0x5d3   : > { %51973 = vmatmul.mubr.f32.vlgmr.msra.gmra.mrb[0].mxu1 %v60526_v17  ;;  %v30489_v36 = vand.u32 4294901760, %v30488_v41 }
 0x5d4   : > { %54081 = vmatpush3.bf16.msra.mxu1 %v60601_v25  ;;  %51979 = vmatprep.mubr.msk.f32.mxu1 %vm56176_vm1, %v56174_v1  ;;  %v30480_v25 = vand.u32 4294901760, %v60701_v21 }
 0x5d5   : > { %54106 = vmatprep.subr.bf16.mxu1 %v56175_v4 }
 0x5d6   : > { %29404 = vmatmul.mubr.f32.vlgmr.msra.gmra.mrb[0].mxu0 %v60526_v17  ;;  %v30481_v29 = vsub.f32 %v60701_v21, %v30480_v25  ;;  %v54119_v41 = vpack.c.bf16 %v30487_v53, %v30480_v25 }
 0x5d7   : > { %54085 = vmatpush1.bf16.msra.mxu0 %v60713_v20  ;;  %29977 = vmatprep.mubr.f32.mxu0 %v56174_v1 }
 0x5d8   : > { %54087 = vmatprep.subr.bf16.mxu0 %v54086_v56  ;;  %v30482_v61 = vand.u32 4294901760, %v30481_v29  ;;  %v60810_v29 = vand.u32 4294901760, %v30890_v63 }
 0x5da   : > { %v54110_v12 = vpack.c.bf16 %v30489_v36, %v30482_v61  ;;  %v60836_v61 = vsub.f32 %v30890_v63, %v60810_v29 }
 0x5db   : > { %51980 = vmatmul.mubr.f32.vlgmr.msra.gmra.mrb[0].mxu1 %v60526_v17  ;;  %v30875_v17 = vpop.permute.xlu0 %30874  ;;  %42740 = vrot.lane.b32.xlu0 %v56279_v39, %s56197_s3 }
 0x5dc   : > { %54108 = vmatpush3.bf16.msra.mxu1 %v60729_v18  ;;  %51986 = vmatprep.mubr.msk.f32.mxu1 %vm56176_vm1, %v56174_v1  ;;  %v30884_v30 = vsel %vm29890_vm4, %v30875_v17, %v30877_v49 }
 0x5dd   : > { %54109 = vmatprep.subr.bf16.mxu1 %v56175_v4  ;;  %v30894_v24 = vsel %vm234_vm2, %v30884_v30, 0 }
 0x5de   : > { %29983 = vmatmul.mubr.f32.vlgmr.msra.gmra.mrb[0].mxu0 %v29982_v27  ;;  %v30902_v34 = vand.u32 4294901760, %v30894_v24 }
 0x5df   : > { %54089 = vmatpush1.bf16.msra.mxu0 %v54088_v43  ;;  %30073 = vmatprep.mubr.f32.mxu0 %v56174_v1  ;;  %v30867_v13 = vpop.permute.xlu0 %30866 }
 0x5e0   : > { %54091 = vmatprep.subr.bf16.mxu0 %v54090_v51  ;;  %v30881_v2 = vsel %vm29890_vm4, %v30867_v13, %v30869_v62  ;;  %v60776_v0 = vsub.f32 %v30894_v24, %v30902_v34  ;;  %v30880_v37 = vsel %vm29890_vm4, %v30865_v23, %v30867_v13  ;;  %42746 = vrot.lane.b32.xlu0 %v56326_v11, %s56197_s3 }
 0x5e1   : > { %v30898_v54 = vand.u32 4294901760, %v30881_v2  ;;  %v30900_v35 = vand.u32 4294901760, %v30880_v37 }
 0x5e2   : > { %v30992_v47 = vand.u32 4294901760, %v60776_v0 }
 0x5e3   : > { %51987 = vmatmul.mubr.f32.vlgmr.msra.gmra.mrb[0].mxu1 %v29982_v27  ;;  %v30873_v48 = vpop.permute.xlu0 %30872  ;;  %v60779_v14 = vsub.f32 %v30881_v2, %v30898_v54  ;;  %v60819_v43 = vpack.c.bf16 %v30902_v34, %v30898_v54  ;;  %v60829_v25 = vsub.f32 %v30880_v37, %v30900_v35 }
 0x5e4   : > { %54111 = vmatpush3.bf16.msra.mxu1 %v54110_v12  ;;  %51993 = vmatprep.mubr.msk.f32.mxu1 %vm56176_vm1, %v56174_v1  ;;  %v30883_v7 = vsel %vm29890_vm4, %v30873_v48, %v30875_v17  ;;  %v30993_v21 = vsub.f32 %v60776_v0, %v30992_v47 }
 0x5e5   : > { %54112 = vmatprep.subr.bf16.mxu1 %v56175_v4  ;;  %v30892_v19 = vsel %vm234_vm2, %v30883_v7, 0  ;;  %v54132_v37 = vpack.c.bf16 %v60776_v0, %v60779_v14  ;;  %v49801_v0 = vld [vmem:[%s63392_s1 + $0x80] sm:$0xff]  ;;  %42752 = vrot.lane.b32.xlu0 %v56444_v58, %s56197_s3 }
 0x5e6   : > { %30075 = vmatmul.mubr.f32.vlgmr.msra.gmra.mrb[0].mxu0 %v60670_v9  ;;  %v30904_v44 = vand.u32 4294901760, %v30892_v19  ;;  %v30994_v12 = vand.u32 4294901760, %v30993_v21 }
 0x5e7   : > { %54093 = vmatpush1.bf16.msra.mxu0 %v54092_v3  ;;  %30153 = vmatprep.mubr.f32.mxu0 %v56174_v1  ;;  %v30879_v56 = vpop.permute.xlu0 %30878  ;;  %v30986_v3 = vand.u32 4294901760, %v60829_v25 }
 0x5e8   : > { %54095 = vmatprep.subr.bf16.mxu0 %v60677_v5  ;;  %v30885_v8 = vsel %vm29890_vm4, %v30877_v49, %v30879_v56  ;;  %v60827_v53 = vsub.f32 %v30892_v19, %v30904_v44 }
 0x5e9   : > { %v30987_v24 = vsub.f32 %v60829_v25, %v30986_v3  ;;  %43737 = vrot.lane.b32.xlu0 %v56270_v31, %s56198_s8 }
 0x5ea   : > { %v30998_v17 = vand.u32 4294901760, %v60827_v53 }
 0x5eb   : > { %51994 = vmatmul.mubr.f32.vlgmr.msra.gmra.mrb[0].mxu1 %v60670_v9  ;;  %v30988_v34 = vand.u32 4294901760, %v30987_v24 }
 0x5ec   : > { %54114 = vmatpush3.bf16.msra.mxu1 %v54113_v45  ;;  %52000 = vmatprep.mubr.msk.f32.mxu1 %vm56176_vm1, %v56174_v1  ;;  %v60852_v45 = vand.u32 4294901760, %v60836_v61  ;;  %v30999_v30 = vsub.f32 %v60827_v53, %v30998_v17 }
 0x5ed   : > { %54115 = vmatprep.subr.bf16.mxu1 %v56175_v4 }
 0x5ee   : > { %30156 = vmatmul.mubr.f32.vlgmr.msra.gmra.mrb[0].mxu0 %v60692_v57  ;;  %v31000_v48 = vand.u32 4294901760, %v30999_v30 }
 0x5ef   : > { %54097 = vmatpush1.bf16.msra.mxu0 %v60713_v20  ;;  %30230 = vmatprep.mubr.f32.mxu0 %v56174_v1 }
 0x5f0   : > { %54099 = vmatprep.subr.bf16.mxu0 %v54098_v50  ;;  %v30970_v50 = vsub.f32 %v60836_v61, %v60852_v45 }
 0x5f2   : > { %v30971_v26 = vand.u32 4294901760, %v30970_v50  ;;  %v31880_v50 = vsel %vm230_vm0, %v49801_v0, 0 }
 0x5f3   : > { %52001 = vmatmul.mubr.f32.vlgmr.msra.gmra.mrb[0].mxu1 %v60692_v57  ;;  %v54100_v57 = vpack.c.bf16 %v30009_v40, %v29997_v42  ;;  %v30871_v40 = vpop.permute.xlu1 %30870  ;;  %v30980_v42 = vand.u32 4294901760, %v60779_v14  ;;  %43739 = vrot.lane.b32.xlu1 %v56293_v52, %s56198_s8 }
 0x5f4   : > { %54117 = vmatpush3.bf16.msra.mxu1 %v60729_v18  ;;  %52007 = vmatprep.mubr.msk.f32.mxu1 %vm56176_vm1, %v56174_v1  ;;  %v30882_v27 = vsel %vm29890_vm4, %v30869_v62, %v30871_v40  ;;  %v60863_v62 = vpack.c.bf16 %v30904_v44, %v30900_v35 }
 0x5f5   : > { %54118 = vmatprep.subr.bf16.mxu1 %v56175_v4  ;;  %v30981_v46 = vsub.f32 %v60779_v14, %v30980_v42  ;;  %v31390_v36 = vand.u32 4294901760, %v30882_v27  ;;  %v54140_v21 = vpack.c.bf16 %v30992_v47, %v30980_v42  ;;  %v54142_v42 = vpack.c.bf16 %v30998_v17, %v30986_v3 }
 0x5f6   : > { %30234 = vmatmul.mubr.f32.vlgmr.msra.gmra.mrb[0].mxu0 %v60704_v55 }
 0x5f7   : > { %54101 = vmatpush1.bf16.msra.mxu0 %v54100_v57  ;;  %30316 = vmatprep.mubr.f32.mxu0 %v56174_v1  ;;  %v30982_v51 = vand.u32 4294901760, %v30981_v46  ;;  %v60849_v13 = vsub.f32 %v30882_v27, %v31390_v36  ;;  %v54130_v57 = vpack.c.bf16 %v31000_v48, %v30988_v34  ;;  %v31866_v40 = vpop.permute.xlu1 %31865 }
 0x5f8   : > { %54103 = vmatprep.subr.bf16.mxu0 %v60677_v5  ;;  %v30896_v5 = vsel %vm234_vm2, %v30885_v8, 0  ;;  %v54134_v8 = vpack.c.bf16 %v60827_v53, %v60829_v25  ;;  %43731 = vrot.lane.b32.xlu1 %v56304_v59, %s56198_s8 }
 0x5f9   : > { %v31469_v2 = vand.u32 4294901760, %v60849_v13 }
 0x5fb   : > { %52008 = vmatmul.mubr.f32.vlgmr.msra.gmra.mrb[0].mxu1 %v60704_v55  ;;  %v31393_v55 = vand.u32 4294901760, %v30896_v5  ;;  %v31470_v7 = vsub.f32 %v60849_v13, %v31469_v2 }
 0x5fc   : > { %54120 = vmatpush3.bf16.msra.mxu1 %v54119_v41  ;;  %52014 = vmatprep.mubr.msk.f32.mxu1 %vm56176_vm1, %v56174_v1 }
 0x5fd   : > { %54121 = vmatprep.subr.bf16.mxu1 %v56175_v4  ;;  %v60847_v49 = vsub.f32 %v30896_v5, %v31393_v55  ;;  %v60885_v23 = vpack.c.bf16 %v31393_v55, %v31390_v36  ;;  %v31471_v19 = vand.u32 4294901760, %v31470_v7  ;;  %v31858_v5 = vpop.permute.xlu1 %31857  ;;  %v60954_v7 = vand.u32 4294901760, %v31880_v50  ;;  %43727 = vrot.lane.b32.xlu1 %v56332_v15, %s56198_s8 }
 0x5fe   : > { %30318 = vmatmul.mubr.f32.vlgmr.msra.gmra.mrb[0].mxu0 %v60670_v9 }
 0x5ff   : > { %54105 = vmatpush1.bf16.msra.mxu0 %v60713_v20  ;;  %30392 = vmatprep.mubr.f32.mxu0 %v56174_v1  ;;  %v54128_v20 = vpack.c.bf16 %v30994_v12, %v30982_v51  ;;  %v54155_v35 = vpack.c.bf16 %v60847_v49, %v60849_v13 }
 0x600   : > { %54125 = vmatprep.subr.bf16.mxu0 %v60819_v43 }
 0x601   : > { %v31854_v12 = vpop.permute.xlu1 %31853  ;;  %43733 = vrot.lane.b32.xlu1 %v56368_v33, %s56198_s8 }
 0x603   : > { %52015 = vmatmul.mubr.f32.vlgmr.msra.gmra.mrb[0].mxu1 %v60670_v9 }
 0x604   : > { %54123 = vmatpush3.bf16.msra.mxu1 %v60729_v18  ;;  %52021 = vmatprep.mubr.msk.f32.mxu1 %vm56176_vm1, %v56174_v1  ;;  %v31476_v18 = vand.u32 4294901760, %v60847_v49 }
 0x605   : > { %54148 = vmatprep.subr.bf16.mxu1 %v56175_v4  ;;  %v31860_v53 = vpop.permute.xlu1 %31859  ;;  %44729 = vrot.lane.b32.xlu1 %v56353_v28, %s56198_s8 }
 0x606   : > { %30394 = vmatmul.mubr.f32.vlgmr.msra.gmra.mrb[0].mxu0 %v60670_v9  ;;  %v31477_v54 = vsub.f32 %v60847_v49, %v31476_v18 }
 0x607   : > { %54127 = vmatpush1.bf16.msra.mxu0 %v60863_v62  ;;  %30966 = vmatprep.mubr.f32.mxu0 %v56174_v1 }
 0x608   : > { %54129 = vmatprep.subr.bf16.mxu0 %v54128_v20  ;;  %v31478_v56 = vand.u32 4294901760, %v31477_v54  ;;  %v54161_v54 = vpack.c.bf16 %v31476_v18, %v31469_v2 }
 0x60a   : > { %v54152_v63 = vpack.c.bf16 %v31478_v56, %v31471_v19  ;;  %v60976_v19 = vsub.f32 %v31880_v50, %v60954_v7 }
 0x60b   : > { %52022 = vmatmul.mubr.f32.vlgmr.msra.gmra.mrb[0].mxu1 %v60670_v9  ;;  %v31864_v9 = vpop.permute.xlu0 %31863  ;;  %43729 = vrot.lane.b32.xlu0 %v56277_v38, %s56198_s8 }
 0x60c   : > { %54150 = vmatpush3.bf16.msra.mxu1 %v60885_v23  ;;  %52028 = vmatprep.mubr.msk.f32.mxu1 %vm56176_vm1, %v56174_v1  ;;  %v31874_v41 = vsel %vm31869_vm5, %v31864_v9, %v31866_v40 }
 0x60d   : > { %54151 = vmatprep.subr.bf16.mxu1 %v56175_v4  ;;  %v31884_v27 = vsel %vm234_vm2, %v31874_v41, 0 }
 0x60e   : > { %30972 = vmatmul.mubr.f32.vlgmr.msra.gmra.mrb[0].mxu0 %v30971_v26  ;;  %v31892_v36 = vand.u32 4294901760, %v31884_v27 }
 0x60f   : > { %54131 = vmatpush1.bf16.msra.mxu0 %v54130_v57  ;;  %31062 = vmatprep.mubr.f32.mxu0 %v56174_v1  ;;  %v31856_v44 = vpop.permute.xlu0 %31855 }
 0x610   : > { %54133 = vmatprep.subr.bf16.mxu0 %v54132_v37  ;;  %v31871_v46 = vsel %vm31869_vm5, %v31856_v44, %v31858_v5  ;;  %v60926_v30 = vsub.f32 %v31884_v27, %v31892_v36  ;;  %v31870_v24 = vsel %vm31869_vm5, %v31854_v12, %v31856_v44  ;;  %43735 = vrot.lane.b32.xlu0 %v56317_v6, %s56198_s8 }
 0x611   : > { %v31888_v51 = vand.u32 4294901760, %v31871_v46  ;;  %v31890_v34 = vand.u32 4294901760, %v31870_v24 }
 0x612   : > { %v31982_v3 = vand.u32 4294901760, %v60926_v30 }
 0x613   : > { %52029 = vmatmul.mubr.f32.vlgmr.msra.gmra.mrb[0].mxu1 %v30971_v26  ;;  %v31862_v55 = vpop.permute.xlu0 %31861  ;;  %v60929_v14 = vsub.f32 %v31871_v46, %v31888_v51  ;;  %v60961_v57 = vpack.c.bf16 %v31892_v36, %v31888_v51  ;;  %v60971_v2 = vsub.f32 %v31870_v24, %v31890_v34 }
 0x614   : > { %54153 = vmatpush3.bf16.msra.mxu1 %v54152_v63  ;;  %52035 = vmatprep.mubr.msk.f32.mxu1 %vm56176_vm1, %v56174_v1  ;;  %v31873_v20 = vsel %vm31869_vm5, %v31862_v55, %v31864_v9  ;;  %v31983_v49 = vsub.f32 %v60926_v30, %v31982_v3 }
 0x615   : > { %54154 = vmatprep.subr.bf16.mxu1 %v56175_v4  ;;  %v31970_v17 = vand.u32 4294901760, %v60929_v14  ;;  %v54174_v24 = vpack.c.bf16 %v60926_v30, %v60929_v14  ;;  %43741 = vrot.lane.b32.xlu0 %v56360_v22, %s56198_s8 }
 0x616   : > { %31064 = vmatmul.mubr.f32.vlgmr.msra.gmra.mrb[0].mxu0 %v60810_v29  ;;  %v31984_v63 = vand.u32 4294901760, %v31983_v49 }
 0x617   : > { %54135 = vmatpush1.bf16.msra.mxu0 %v54134_v8  ;;  %31142 = vmatprep.mubr.f32.mxu0 %v56174_v1  ;;  %v31868_v47 = vpop.permute.xlu0 %31867  ;;  %v31971_v13 = vsub.f32 %v60929_v14, %v31970_v17  ;;  %v31976_v8 = vand.u32 4294901760, %v60971_v2  ;;  %v54182_v49 = vpack.c.bf16 %v31982_v3, %v31970_v17  ;;  %v49802_v3 = vld [vmem:[%s63392_s1 + $0x148] sm:$0xff] }
 0x618   : > { %54137 = vmatprep.subr.bf16.mxu0 %v60819_v43  ;;  %v31875_v25 = vsel %vm31869_vm5, %v31866_v40, %v31868_v47 }
 0x619   : > { %v31886_v26 = vsel %vm234_vm2, %v31875_v25, 0  ;;  %v31972_v37 = vand.u32 4294901760, %v31971_v13  ;;  %v31977_v27 = vsub.f32 %v60971_v2, %v31976_v8  ;;  %44727 = vrot.lane.b32.xlu0 %v56272_v32, %s56198_s8 }
 0x61b   : > { %52036 = vmatmul.mubr.f32.vlgmr.msra.gmra.mrb[0].mxu1 %v60810_v29  ;;  %v31978_v36 = vand.u32 4294901760, %v31977_v27 }
 0x61c   : > { %54156 = vmatpush3.bf16.msra.mxu1 %v54155_v35  ;;  %52042 = vmatprep.mubr.msk.f32.mxu1 %vm56176_vm1, %v56174_v1  ;;  %v60988_v35 = vand.u32 4294901760, %v60976_v19 }
 0x61d   : > { %54157 = vmatprep.subr.bf16.mxu1 %v56175_v4 }
 0x61e   : > { %31145 = vmatmul.mubr.f32.vlgmr.msra.gmra.mrb[0].mxu0 %v60836_v61 }
 0x61f   : > { %54139 = vmatpush1.bf16.msra.mxu0 %v60863_v62  ;;  %31219 = vmatprep.mubr.f32.mxu0 %v56174_v1 }
 0x620   : > { %54141 = vmatprep.subr.bf16.mxu0 %v54140_v21  ;;  %v31960_v21 = vsub.f32 %v60976_v19, %v60988_v35 }
 0x622   : > { %v31961_v0 = vand.u32 4294901760, %v31960_v21 }
 0x623   : > { %52043 = vmatmul.mubr.f32.vlgmr.msra.gmra.mrb[0].mxu1 %v60836_v61  ;;  %v31882_v61 = vsel %vm234_vm2, %v31873_v20, 0 }
 0x624   : > { %54159 = vmatpush3.bf16.msra.mxu1 %v60885_v23  ;;  %52049 = vmatprep.mubr.msk.f32.mxu1 %vm56176_vm1, %v56174_v1  ;;  %v31894_v48 = vand.u32 4294901760, %v31882_v61 }
 0x625   : > { %54160 = vmatprep.subr.bf16.mxu1 %v56175_v4 }
 0x626   : > { %31223 = vmatmul.mubr.f32.vlgmr.msra.gmra.mrb[0].mxu0 %v60852_v45  ;;  %v60969_v18 = vsub.f32 %v31882_v61, %v31894_v48 }
 0x627   : > { %54143 = vmatpush1.bf16.msra.mxu0 %v54142_v42  ;;  %31305 = vmatprep.mubr.f32.mxu0 %v56174_v1 }
 0x628   : > { %54145 = vmatprep.subr.bf16.mxu0 %v60819_v43  ;;  %v31872_v43 = vsel %vm31869_vm5, %v31858_v5, %v31860_v53  ;;  %v31988_v9 = vand.u32 4294901760, %v60969_v18  ;;  %v60997_v5 = vpack.c.bf16 %v31894_v48, %v31890_v34  ;;  %v54176_v25 = vpack.c.bf16 %v60969_v18, %v60971_v2  ;;  %v32856_v53 = vpop.permute.xlu1 %32855  ;;  %44721 = vrot.lane.b32.xlu1 %v56306_v60, %s56198_s8 }
 0x629   : > { %v32380_v56 = vand.u32 4294901760, %v31872_v43 }
 0x62a   : > { %v31989_v41 = vsub.f32 %v60969_v18, %v31988_v9  ;;  %v32869_v18 = vsel %vm230_vm0, %v49802_v3, 0 }
 0x62b   : > { %52050 = vmatmul.mubr.f32.vlgmr.msra.gmra.mrb[0].mxu1 %v60852_v45  ;;  %v32383_v45 = vand.u32 4294901760, %v31886_v26  ;;  %v60985_v44 = vsub.f32 %v31872_v43, %v32380_v56 }
 0x62c   : > { %54162 = vmatpush3.bf16.msra.mxu1 %v54161_v54  ;;  %52056 = vmatprep.mubr.msk.f32.mxu1 %vm56176_vm1, %v56174_v1  ;;  %v31990_v55 = vand.u32 4294901760, %v31989_v41 }
 0x62d   : > { %54163 = vmatprep.subr.bf16.mxu1 %v56175_v4  ;;  %v60983_v40 = vsub.f32 %v31886_v26, %v32383_v45  ;;  %v61013_v12 = vpack.c.bf16 %v32383_v45, %v32380_v56  ;;  %v32848_v26 = vpop.permute.xlu1 %32847  ;;  %44717 = vrot.lane.b32.xlu1 %v56334_v16, %s56198_s8 }
 0x62e   : > { %31307 = vmatmul.mubr.f32.vlgmr.msra.gmra.mrb[0].mxu0 %v60810_v29  ;;  %v54172_v42 = vpack.c.bf16 %v31990_v55, %v31978_v36 }
 0x62f   : > { %54147 = vmatpush1.bf16.msra.mxu0 %v60863_v62  ;;  %31381 = vmatprep.mubr.f32.mxu0 %v56174_v1  ;;  %v54170_v62 = vpack.c.bf16 %v31984_v63, %v31972_v37  ;;  %v32466_v46 = vand.u32 4294901760, %v60983_v40  ;;  %v54197_v34 = vpack.c.bf16 %v60983_v40, %v60985_v44 }
 0x630   : > { %54167 = vmatprep.subr.bf16.mxu0 %v60961_v57 }
 0x631   : > { %v32467_v51 = vsub.f32 %v60983_v40, %v32466_v46  ;;  %v32844_v63 = vpop.permute.xlu1 %32843  ;;  %44723 = vrot.lane.b32.xlu1 %v56449_v10, %s56198_s8 }
 0x633   : > { %52057 = vmatmul.mubr.f32.vlgmr.msra.gmra.mrb[0].mxu1 %v60810_v29  ;;  %v32468_v47 = vand.u32 4294901760, %v32467_v51 }
 0x634   : > { %54165 = vmatpush3.bf16.msra.mxu1 %v60885_v23  ;;  %52063 = vmatprep.mubr.msk.f32.mxu1 %vm56176_vm1, %v56174_v1  ;;  %v32459_v23 = vand.u32 4294901760, %v60985_v44 }
 0x635   : > { %54190 = vmatprep.subr.bf16.mxu1 %v56175_v4 }
 0x636   : > { %31383 = vmatmul.mubr.f32.vlgmr.msra.gmra.mrb[0].mxu0 %v60810_v29  ;;  %v32460_v20 = vsub.f32 %v60985_v44, %v32459_v23  ;;  %v54203_v51 = vpack.c.bf16 %v32466_v46, %v32459_v23 }
 0x637   : > { %54169 = vmatpush1.bf16.msra.mxu0 %v60997_v5  ;;  %31956 = vmatprep.mubr.f32.mxu0 %v56174_v1 }
 0x638   : > { %54171 = vmatprep.subr.bf16.mxu0 %v54170_v62  ;;  %v32461_v61 = vand.u32 4294901760, %v32460_v20  ;;  %v61094_v20 = vand.u32 4294901760, %v32869_v18 }
 0x63a   : > { %v54194_v50 = vpack.c.bf16 %v32468_v47, %v32461_v61  ;;  %v61120_v61 = vsub.f32 %v32869_v18, %v61094_v20 }
 0x63b   : > { %52064 = vmatmul.mubr.f32.vlgmr.msra.gmra.mrb[0].mxu1 %v60810_v29  ;;  %v32854_v29 = vpop.permute.xlu0 %32853  ;;  %44719 = vrot.lane.b32.xlu0 %v56279_v39, %s56198_s8 }
 0x63c   : > { %54192 = vmatpush3.bf16.msra.mxu1 %v61013_v12  ;;  %52070 = vmatprep.mubr.msk.f32.mxu1 %vm56176_vm1, %v56174_v1  ;;  %v32863_v54 = vsel %vm31869_vm5, %v32854_v29, %v32856_v53 }
 0x63d   : > { %54193 = vmatprep.subr.bf16.mxu1 %v56175_v4  ;;  %v32873_v43 = vsel %vm234_vm2, %v32863_v54, 0 }
 0x63e   : > { %31962 = vmatmul.mubr.f32.vlgmr.msra.gmra.mrb[0].mxu0 %v31961_v0  ;;  %v32881_v56 = vand.u32 4294901760, %v32873_v43 }
 0x63f   : > { %54173 = vmatpush1.bf16.msra.mxu0 %v54172_v42  ;;  %32052 = vmatprep.mubr.f32.mxu0 %v56174_v1  ;;  %v32846_v48 = vpop.permute.xlu0 %32845 }
 0x640   : > { %54175 = vmatprep.subr.bf16.mxu0 %v54174_v24  ;;  %v32860_v13 = vsel %vm31869_vm5, %v32846_v48, %v32848_v26  ;;  %v61060_v14 = vsub.f32 %v32873_v43, %v32881_v56  ;;  %v32859_v27 = vsel %vm31869_vm5, %v32844_v63, %v32846_v48  ;;  %44725 = vrot.lane.b32.xlu0 %v56326_v11, %s56198_s8 }
 0x641   : > { %v32877_v37 = vand.u32 4294901760, %v32860_v13  ;;  %v32879_v36 = vand.u32 4294901760, %v32859_v27 }
 0x642   : > { %v32971_v21 = vand.u32 4294901760, %v61060_v14 }
 0x643   : > { %52071 = vmatmul.mubr.f32.vlgmr.msra.gmra.mrb[0].mxu1 %v31961_v0  ;;  %v32852_v45 = vpop.permute.xlu0 %32851  ;;  %v61063_v17 = vsub.f32 %v32860_v13, %v32877_v37  ;;  %v61103_v42 = vpack.c.bf16 %v32881_v56, %v32877_v37  ;;  %v61113_v23 = vsub.f32 %v32859_v27, %v32879_v36 }
 0x644   : > { %54195 = vmatpush3.bf16.msra.mxu1 %v54194_v50  ;;  %52077 = vmatprep.mubr.msk.f32.mxu1 %vm56176_vm1, %v56174_v1  ;;  %v32862_v30 = vsel %vm31869_vm5, %v32852_v45, %v32854_v29  ;;  %v32972_v44 = vsub.f32 %v61060_v14, %v32971_v21 }
 0x645   : > { %54196 = vmatprep.subr.bf16.mxu1 %v56175_v4  ;;  %v32871_v41 = vsel %vm234_vm2, %v32862_v30, 0  ;;  %v54216_v27 = vpack.c.bf16 %v61060_v14, %v61063_v17  ;;  %v49803_v14 = vld [vmem:[%s63392_s1 + $0x88] sm:$0xff]  ;;  %44731 = vrot.lane.b32.xlu0 %v56444_v58, %s56198_s8 }
 0x646   : > { %32054 = vmatmul.mubr.f32.vlgmr.msra.gmra.mrb[0].mxu0 %v60954_v7  ;;  %v32883_v55 = vand.u32 4294901760, %v32871_v41  ;;  %v32973_v50 = vand.u32 4294901760, %v32972_v44 }
 0x647   : > { %54177 = vmatpush1.bf16.msra.mxu0 %v54176_v25  ;;  %32132 = vmatprep.mubr.f32.mxu0 %v56174_v1  ;;  %v32858_v62 = vpop.permute.xlu0 %32857  ;;  %v32965_v25 = vand.u32 4294901760, %v61113_v23 }
 0x648   : > { %54179 = vmatprep.subr.bf16.mxu0 %v60961_v57  ;;  %v32864_v2 = vsel %vm31869_vm5, %v32856_v53, %v32858_v62  ;;  %v61111_v46 = vsub.f32 %v32871_v41, %v32883_v55 }
 0x649   : > { %v32966_v43 = vsub.f32 %v61113_v23, %v32965_v25  ;;  %45716 = vrot.lane.b32.xlu0 %v56270_v31, %s56199_s15 }
 0x64a   : > { %v32977_v29 = vand.u32 4294901760, %v61111_v46 }
 0x64b   : > { %52078 = vmatmul.mubr.f32.vlgmr.msra.gmra.mrb[0].mxu1 %v60954_v7  ;;  %v32967_v56 = vand.u32 4294901760, %v32966_v43 }
 0x64c   : > { %54198 = vmatpush3.bf16.msra.mxu1 %v54197_v34  ;;  %52084 = vmatprep.mubr.msk.f32.mxu1 %vm56176_vm1, %v56174_v1  ;;  %v61136_v34 = vand.u32 4294901760, %v61120_v61  ;;  %v32978_v54 = vsub.f32 %v61111_v46, %v32977_v29 }
 0x64d   : > { %54199 = vmatprep.subr.bf16.mxu1 %v56175_v4 }
 0x64e   : > { %32135 = vmatmul.mubr.f32.vlgmr.msra.gmra.mrb[0].mxu0 %v60976_v19  ;;  %v32979_v45 = vand.u32 4294901760, %v32978_v54 }
 0x64f   : > { %54181 = vmatpush1.bf16.msra.mxu0 %v60997_v5  ;;  %32209 = vmatprep.mubr.f32.mxu0 %v56174_v1 }
 0x650   : > { %54183 = vmatprep.subr.bf16.mxu0 %v54182_v49  ;;  %v32949_v49 = vsub.f32 %v61120_v61, %v61136_v34 }
 0x652   : > { %v32950_v3 = vand.u32 4294901760, %v32949_v49  ;;  %v33859_v49 = vsel %vm230_vm0, %v49803_v14, 0 }
 0x653   : > { %52085 = vmatmul.mubr.f32.vlgmr.msra.gmra.mrb[0].mxu1 %v60976_v19  ;;  %v54184_v19 = vpack.c.bf16 %v31988_v9, %v31976_v8  ;;  %v32850_v9 = vpop.permute.xlu1 %32849  ;;  %v32959_v8 = vand.u32 4294901760, %v61063_v17  ;;  %45718 = vrot.lane.b32.xlu1 %v56293_v52, %s56199_s15 }
 0x654   : > { %54201 = vmatpush3.bf16.msra.mxu1 %v61013_v12  ;;  %52091 = vmatprep.mubr.msk.f32.mxu1 %vm56176_vm1, %v56174_v1  ;;  %v32861_v0 = vsel %vm31869_vm5, %v32848_v26, %v32850_v9  ;;  %v61147_v26 = vpack.c.bf16 %v32883_v55, %v32879_v36 }
 0x655   : > { %54202 = vmatprep.subr.bf16.mxu1 %v56175_v4  ;;  %v32960_v40 = vsub.f32 %v61063_v17, %v32959_v8  ;;  %v33369_v47 = vand.u32 4294901760, %v32861_v0  ;;  %v54224_v44 = vpack.c.bf16 %v32971_v21, %v32959_v8  ;;  %v54226_v8 = vpack.c.bf16 %v32977_v29, %v32965_v25 }
 0x656   : > { %32213 = vmatmul.mubr.f32.vlgmr.msra.gmra.mrb[0].mxu0 %v60988_v35 }
 0x657   : > { %54185 = vmatpush1.bf16.msra.mxu0 %v54184_v19  ;;  %32295 = vmatprep.mubr.f32.mxu0 %v56174_v1  ;;  %v32961_v24 = vand.u32 4294901760, %v32960_v40  ;;  %v61133_v48 = vsub.f32 %v32861_v0, %v33369_v47  ;;  %v54214_v19 = vpack.c.bf16 %v32979_v45, %v32967_v56  ;;  %v33845_v9 = vpop.permute.xlu1 %33844 }
 0x658   : > { %54187 = vmatprep.subr.bf16.mxu0 %v60961_v57  ;;  %v32875_v57 = vsel %vm234_vm2, %v32864_v2, 0  ;;  %v54218_v2 = vpack.c.bf16 %v61111_v46, %v61113_v23  ;;  %45710 = vrot.lane.b32.xlu1 %v56304_v59, %s56199_s15 }
 0x659   : > { %v33448_v13 = vand.u32 4294901760, %v61133_v48 }
 0x65b   : > { %52092 = vmatmul.mubr.f32.vlgmr.msra.gmra.mrb[0].mxu1 %v60988_v35  ;;  %v33372_v35 = vand.u32 4294901760, %v32875_v57  ;;  %v33449_v30 = vsub.f32 %v61133_v48, %v33448_v13 }
 0x65c   : > { %54204 = vmatpush3.bf16.msra.mxu1 %v54203_v51  ;;  %52098 = vmatprep.mubr.msk.f32.mxu1 %vm56176_vm1, %v56174_v1 }
 0x65d   : > { %54205 = vmatprep.subr.bf16.mxu1 %v56175_v4  ;;  %v61131_v53 = vsub.f32 %v32875_v57, %v33372_v35  ;;  %v61169_v63 = vpack.c.bf16 %v33372_v35, %v33369_v47  ;;  %v33450_v41 = vand.u32 4294901760, %v33449_v30  ;;  %v33837_v57 = vpop.permute.xlu1 %33836  ;;  %v61238_v30 = vand.u32 4294901760, %v33859_v49  ;;  %45706 = vrot.lane.b32.xlu1 %v56332_v15, %s56199_s15 }
 0x65e   : > { %32297 = vmatmul.mubr.f32.vlgmr.msra.gmra.mrb[0].mxu0 %v60954_v7 }
 0x65f   : > { %54189 = vmatpush1.bf16.msra.mxu0 %v60997_v5  ;;  %32371 = vmatprep.mubr.f32.mxu0 %v56174_v1  ;;  %v54212_v5 = vpack.c.bf16 %v32973_v50, %v32961_v24  ;;  %v54239_v36 = vpack.c.bf16 %v61131_v53, %v61133_v48 }
 0x660   : > { %54209 = vmatprep.subr.bf16.mxu0 %v61103_v42 }
 0x661   : > { %v33833_v50 = vpop.permute.xlu1 %33832  ;;  %45712 = vrot.lane.b32.xlu1 %v56368_v33, %s56199_s15 }
 0x663   : > { %52099 = vmatmul.mubr.f32.vlgmr.msra.gmra.mrb[0].mxu1 %v60954_v7 }
 0x664   : > { %54207 = vmatpush3.bf16.msra.mxu1 %v61013_v12  ;;  %52105 = vmatprep.mubr.msk.f32.mxu1 %vm56176_vm1, %v56174_v1  ;;  %v33455_v12 = vand.u32 4294901760, %v61131_v53 }
 0x665   : > { %54232 = vmatprep.subr.bf16.mxu1 %v56175_v4  ;;  %v33839_v46 = vpop.permute.xlu1 %33838  ;;  %46708 = vrot.lane.b32.xlu1 %v56353_v28, %s56199_s15 }
 0x666   : > { %32373 = vmatmul.mubr.f32.vlgmr.msra.gmra.mrb[0].mxu0 %v60954_v7  ;;  %v33456_v37 = vsub.f32 %v61131_v53, %v33455_v12 }
 0x667   : > { %54211 = vmatpush1.bf16.msra.mxu0 %v61147_v26  ;;  %32945 = vmatprep.mubr.f32.mxu0 %v56174_v1 }
 0x668   : > { %54213 = vmatprep.subr.bf16.mxu0 %v54212_v5  ;;  %v33457_v62 = vand.u32 4294901760, %v33456_v37  ;;  %v54245_v37 = vpack.c.bf16 %v33455_v12, %v33448_v13 }
 0x66a   : > { %v54236_v18 = vpack.c.bf16 %v33457_v62, %v33450_v41  ;;  %v61260_v41 = vsub.f32 %v33859_v49, %v61238_v30 }
 0x66b   : > { %52106 = vmatmul.mubr.f32.vlgmr.msra.gmra.mrb[0].mxu1 %v60954_v7  ;;  %v33843_v7 = vpop.permute.xlu0 %33842  ;;  %45708 = vrot.lane.b32.xlu0 %v56277_v38, %s56199_s15 }
 0x66c   : > { %54234 = vmatpush3.bf16.msra.mxu1 %v61169_v63  ;;  %52112 = vmatprep.mubr.msk.f32.mxu1 %vm56176_vm1, %v56174_v1  ;;  %v33853_v51 = vsel %vm33848_vm6, %v33843_v7, %v33845_v9 }
 0x66d   : > { %54235 = vmatprep.subr.bf16.mxu1 %v56175_v4  ;;  %v33863_v0 = vsel %vm234_vm2, %v33853_v51, 0 }
 0x66e   : > { %32951 = vmatmul.mubr.f32.vlgmr.msra.gmra.mrb[0].mxu0 %v32950_v3  ;;  %v33871_v47 = vand.u32 4294901760, %v33863_v0 }
 0x66f   : > { %54215 = vmatpush1.bf16.msra.mxu0 %v54214_v19  ;;  %33041 = vmatprep.mubr.f32.mxu0 %v56174_v1  ;;  %v33835_v55 = vpop.permute.xlu0 %33834 }
 0x670   : > { %54217 = vmatprep.subr.bf16.mxu0 %v54216_v27  ;;  %v33850_v40 = vsel %vm33848_vm6, %v33835_v55, %v33837_v57  ;;  %v61210_v54 = vsub.f32 %v33863_v0, %v33871_v47  ;;  %v33849_v43 = vsel %vm33848_vm6, %v33833_v50, %v33835_v55  ;;  %45714 = vrot.lane.b32.xlu0 %v56317_v6, %s56199_s15 }
 0x671   : > { %v33867_v24 = vand.u32 4294901760, %v33850_v40  ;;  %v33869_v56 = vand.u32 4294901760, %v33849_v43 }
 0x672   : > { %v33961_v25 = vand.u32 4294901760, %v61210_v54 }
 0x673   : > { %52113 = vmatmul.mubr.f32.vlgmr.msra.gmra.mrb[0].mxu1 %v32950_v3  ;;  %v33841_v35 = vpop.permute.xlu0 %33840  ;;  %v61213_v17 = vsub.f32 %v33850_v40, %v33867_v24  ;;  %v61245_v19 = vpack.c.bf16 %v33871_v47, %v33867_v24  ;;  %v61255_v13 = vsub.f32 %v33849_v43, %v33869_v56 }
 0x674   : > { %54237 = vmatpush3.bf16.msra.mxu1 %v54236_v18  ;;  %52119 = vmatprep.mubr.msk.f32.mxu1 %vm56176_vm1, %v56174_v1  ;;  %v33852_v5 = vsel %vm33848_vm6, %v33841_v35, %v33843_v7  ;;  %v33962_v53 = vsub.f32 %v61210_v54, %v33961_v25 }
 0x675   : > { %54238 = vmatprep.subr.bf16.mxu1 %v56175_v4  ;;  %v33949_v29 = vand.u32 4294901760, %v61213_v17  ;;  %v54258_v43 = vpack.c.bf16 %v61210_v54, %v61213_v17  ;;  %45720 = vrot.lane.b32.xlu0 %v56360_v22, %s56199_s15 }
 0x676   : > { %33043 = vmatmul.mubr.f32.vlgmr.msra.gmra.mrb[0].mxu0 %v61094_v20  ;;  %v33963_v18 = vand.u32 4294901760, %v33962_v53 }
 0x677   : > { %54219 = vmatpush1.bf16.msra.mxu0 %v54218_v2  ;;  %33121 = vmatprep.mubr.f32.mxu0 %v56174_v1  ;;  %v33847_v21 = vpop.permute.xlu0 %33846  ;;  %v33950_v48 = vsub.f32 %v61213_v17, %v33949_v29  ;;  %v33955_v2 = vand.u32 4294901760, %v61255_v13  ;;  %v54266_v53 = vpack.c.bf16 %v33961_v25, %v33949_v29  ;;  %v49804_v25 = vld [vmem:[%s63392_s1 + $0x150] sm:$0xff] }
 0x678   : > { %54221 = vmatprep.subr.bf16.mxu0 %v61103_v42  ;;  %v33854_v23 = vsel %vm33848_vm6, %v33845_v9, %v33847_v21 }
 0x679   : > { %v33865_v3 = vsel %vm234_vm2, %v33854_v23, 0  ;;  %v33951_v27 = vand.u32 4294901760, %v33950_v48  ;;  %v33956_v0 = vsub.f32 %v61255_v13, %v33955_v2  ;;  %46706 = vrot.lane.b32.xlu0 %v56272_v32, %s56199_s15 }
 0x67b   : > { %52120 = vmatmul.mubr.f32.vlgmr.msra.gmra.mrb[0].mxu1 %v61094_v20  ;;  %v33957_v47 = vand.u32 4294901760, %v33956_v0 }
 0x67c   : > { %54240 = vmatpush3.bf16.msra.mxu1 %v54239_v36  ;;  %52126 = vmatprep.mubr.msk.f32.mxu1 %vm56176_vm1, %v56174_v1  ;;  %v61272_v36 = vand.u32 4294901760, %v61260_v41 }
 0x67d   : > { %54241 = vmatprep.subr.bf16.mxu1 %v56175_v4 }
 0x67e   : > { %33124 = vmatmul.mubr.f32.vlgmr.msra.gmra.mrb[0].mxu0 %v61120_v61 }
 0x67f   : > { %54223 = vmatpush1.bf16.msra.mxu0 %v61147_v26  ;;  %33198 = vmatprep.mubr.f32.mxu0 %v56174_v1 }
 0x680   : > { %54225 = vmatprep.subr.bf16.mxu0 %v54224_v44  ;;  %v33939_v44 = vsub.f32 %v61260_v41, %v61272_v36 }
 0x682   : > { %v33940_v14 = vand.u32 4294901760, %v33939_v44 }
 0x683   : > { %52127 = vmatmul.mubr.f32.vlgmr.msra.gmra.mrb[0].mxu1 %v61120_v61  ;;  %v33861_v61 = vsel %vm234_vm2, %v33852_v5, 0 }
 0x684   : > { %54243 = vmatpush3.bf16.msra.mxu1 %v61169_v63  ;;  %52133 = vmatprep.mubr.msk.f32.mxu1 %vm56176_vm1, %v56174_v1  ;;  %v33873_v45 = vand.u32 4294901760, %v33861_v61 }
 0x685   : > { %54244 = vmatprep.subr.bf16.mxu1 %v56175_v4 }
 0x686   : > { %33202 = vmatmul.mubr.f32.vlgmr.msra.gmra.mrb[0].mxu0 %v61136_v34  ;;  %v61253_v12 = vsub.f32 %v33861_v61, %v33873_v45 }
 0x687   : > { %54227 = vmatpush1.bf16.msra.mxu0 %v54226_v8  ;;  %33284 = vmatprep.mubr.f32.mxu0 %v56174_v1 }
 0x688   : > { %54229 = vmatprep.subr.bf16.mxu0 %v61103_v42  ;;  %v33851_v42 = vsel %vm33848_vm6, %v33837_v57, %v33839_v46  ;;  %v33967_v7 = vand.u32 4294901760, %v61253_v12  ;;  %v61281_v57 = vpack.c.bf16 %v33873_v45, %v33869_v56  ;;  %v54260_v23 = vpack.c.bf16 %v61253_v12, %v61255_v13  ;;  %v34835_v46 = vpop.permute.xlu1 %34834  ;;  %46700 = vrot.lane.b32.xlu1 %v56306_v60, %s56199_s15 }
 0x689   : > { %v34359_v62 = vand.u32 4294901760, %v33851_v42 }
 0x68a   : > { %v33968_v51 = vsub.f32 %v61253_v12, %v33967_v7  ;;  %v34848_v12 = vsel %vm230_vm0, %v49804_v25, 0 }
 0x68b   : > { %52134 = vmatmul.mubr.f32.vlgmr.msra.gmra.mrb[0].mxu1 %v61136_v34  ;;  %v34362_v34 = vand.u32 4294901760, %v33865_v3  ;;  %v61269_v55 = vsub.f32 %v33851_v42, %v34359_v62 }
 0x68c   : > { %54246 = vmatpush3.bf16.msra.mxu1 %v54245_v37  ;;  %52140 = vmatprep.mubr.msk.f32.mxu1 %vm56176_vm1, %v56174_v1  ;;  %v33969_v35 = vand.u32 4294901760, %v33968_v51 }
 0x68d   : > { %54247 = vmatprep.subr.bf16.mxu1 %v56175_v4  ;;  %v61267_v9 = vsub.f32 %v33865_v3, %v34362_v34  ;;  %v61297_v50 = vpack.c.bf16 %v34362_v34, %v34359_v62  ;;  %v34827_v3 = vpop.permute.xlu1 %34826  ;;  %46696 = vrot.lane.b32.xlu1 %v56334_v16, %s56199_s15 }
 0x68e   : > { %33286 = vmatmul.mubr.f32.vlgmr.msra.gmra.mrb[0].mxu0 %v61094_v20  ;;  %v54256_v8 = vpack.c.bf16 %v33969_v35, %v33957_v47 }
 0x68f   : > { %54231 = vmatpush1.bf16.msra.mxu0 %v61147_v26  ;;  %33360 = vmatprep.mubr.f32.mxu0 %v56174_v1  ;;  %v54254_v26 = vpack.c.bf16 %v33963_v18, %v33951_v27  ;;  %v34445_v40 = vand.u32 4294901760, %v61267_v9  ;;  %v54281_v56 = vpack.c.bf16 %v61267_v9, %v61269_v55 }
 0x690   : > { %54251 = vmatprep.subr.bf16.mxu0 %v61245_v19 }
 0x691   : > { %v34446_v24 = vsub.f32 %v61267_v9, %v34445_v40  ;;  %v34823_v18 = vpop.permute.xlu1 %34822  ;;  %46702 = vrot.lane.b32.xlu1 %v56449_v10, %s56199_s15 }
 0x693   : > { %52141 = vmatmul.mubr.f32.vlgmr.msra.gmra.mrb[0].mxu1 %v61094_v20  ;;  %v34447_v21 = vand.u32 4294901760, %v34446_v24 }
 0x694   : > { %54249 = vmatpush3.bf16.msra.mxu1 %v61169_v63  ;;  %52147 = vmatprep.mubr.msk.f32.mxu1 %vm56176_vm1, %v56174_v1  ;;  %v34438_v63 = vand.u32 4294901760, %v61269_v55 }
 0x695   : > { %54274 = vmatprep.subr.bf16.mxu1 %v56175_v4 }
 0x696   : > { %33362 = vmatmul.mubr.f32.vlgmr.msra.gmra.mrb[0].mxu0 %v61094_v20  ;;  %v34439_v5 = vsub.f32 %v61269_v55, %v34438_v63  ;;  %v54287_v24 = vpack.c.bf16 %v34445_v40, %v34438_v63 }
 0x697   : > { %54253 = vmatpush1.bf16.msra.mxu0 %v61281_v57  ;;  %33935 = vmatprep.mubr.f32.mxu0 %v56174_v1 }
 0x698   : > { %54255 = vmatprep.subr.bf16.mxu0 %v54254_v26  ;;  %v34440_v61 = vand.u32 4294901760, %v34439_v5  ;;  %v61378_v5 = vand.u32 4294901760, %v34848_v12 }
 0x69a   : > { %v54278_v49 = vpack.c.bf16 %v34447_v21, %v34440_v61  ;;  %v61404_v61 = vsub.f32 %v34848_v12, %v61378_v5 }
 0x69b   : > { %52148 = vmatmul.mubr.f32.vlgmr.msra.gmra.mrb[0].mxu1 %v61094_v20  ;;  %v34833_v20 = vpop.permute.xlu0 %34832  ;;  %46698 = vrot.lane.b32.xlu0 %v56279_v39, %s56199_s15 }
 0x69c   : > { %54276 = vmatpush3.bf16.msra.mxu1 %v61297_v50  ;;  %52154 = vmatprep.mubr.msk.f32.mxu1 %vm56176_vm1, %v56174_v1  ;;  %v34842_v37 = vsel %vm33848_vm6, %v34833_v20, %v34835_v46 }
 0x69d   : > { %54277 = vmatprep.subr.bf16.mxu1 %v56175_v4  ;;  %v34852_v42 = vsel %vm234_vm2, %v34842_v37, 0 }
 0x69e   : > { %33941 = vmatmul.mubr.f32.vlgmr.msra.gmra.mrb[0].mxu0 %v33940_v14  ;;  %v34860_v62 = vand.u32 4294901760, %v34852_v42 }
 0x69f   : > { %54257 = vmatpush1.bf16.msra.mxu0 %v54256_v8  ;;  %34031 = vmatprep.mubr.f32.mxu0 %v56174_v1  ;;  %v34825_v45 = vpop.permute.xlu0 %34824 }
 0x6a0   : > { %54259 = vmatprep.subr.bf16.mxu0 %v54258_v43  ;;  %v34839_v48 = vsel %vm33848_vm6, %v34825_v45, %v34827_v3  ;;  %v61344_v17 = vsub.f32 %v34852_v42, %v34860_v62  ;;  %v34838_v0 = vsel %vm33848_vm6, %v34823_v18, %v34825_v45  ;;  %46704 = vrot.lane.b32.xlu0 %v56326_v11, %s56199_s15 }
 0x6a1   : > { %v34856_v27 = vand.u32 4294901760, %v34839_v48  ;;  %v34858_v47 = vand.u32 4294901760, %v34838_v0 }
 0x6a2   : > { %v34950_v44 = vand.u32 4294901760, %v61344_v17 }
 0x6a3   : > { %52155 = vmatmul.mubr.f32.vlgmr.msra.gmra.mrb[0].mxu1 %v33940_v14  ;;  %v34831_v34 = vpop.permute.xlu0 %34830  ;;  %v61347_v29 = vsub.f32 %v34839_v48, %v34856_v27  ;;  %v61387_v8 = vpack.c.bf16 %v34860_v62, %v34856_v27  ;;  %v61397_v63 = vsub.f32 %v34838_v0, %v34858_v47 }
 0x6a4   : > { %54279 = vmatpush3.bf16.msra.mxu1 %v54278_v49  ;;  %52161 = vmatprep.mubr.msk.f32.mxu1 %vm56176_vm1, %v56174_v1  ;;  %v34841_v54 = vsel %vm33848_vm6, %v34831_v34, %v34833_v20  ;;  %v34951_v55 = vsub.f32 %v61344_v17, %v34950_v44 }
 0x6a5   : > { %54280 = vmatprep.subr.bf16.mxu1 %v56175_v4  ;;  %v34850_v51 = vsel %vm234_vm2, %v34841_v54, 0  ;;  %v54300_v0 = vpack.c.bf16 %v61344_v17, %v61347_v29  ;;  %v49805_v17 = vld [vmem:[%s63392_s1 + $0x90] sm:$0xff]  ;;  %46710 = vrot.lane.b32.xlu0 %v56444_v58, %s56199_s15 }
 0x6a6   : > { %34033 = vmatmul.mubr.f32.vlgmr.msra.gmra.mrb[0].mxu0 %v61238_v30  ;;  %v34862_v35 = vand.u32 4294901760, %v34850_v51  ;;  %v34952_v49 = vand.u32 4294901760, %v34951_v55 }
 0x6a7   : > { %54261 = vmatpush1.bf16.msra.mxu0 %v54260_v23  ;;  %34111 = vmatprep.mubr.f32.mxu0 %v56174_v1  ;;  %v34837_v26 = vpop.permute.xlu0 %34836  ;;  %v34944_v23 = vand.u32 4294901760, %v61397_v63 }
 0x6a8   : > { %54263 = vmatprep.subr.bf16.mxu0 %v61245_v19  ;;  %v34843_v13 = vsel %vm33848_vm6, %v34835_v46, %v34837_v26  ;;  %v61395_v40 = vsub.f32 %v34850_v51, %v34862_v35 }
 0x6a9   : > { %v34945_v42 = vsub.f32 %v61397_v63, %v34944_v23  ;;  %47695 = vrot.lane.b32.xlu0 %v56270_v31, %s56200_s20 }
 0x6aa   : > { %v34956_v20 = vand.u32 4294901760, %v61395_v40 }
 0x6ab   : > { %52162 = vmatmul.mubr.f32.vlgmr.msra.gmra.mrb[0].mxu1 %v61238_v30  ;;  %v34946_v62 = vand.u32 4294901760, %v34945_v42 }
 0x6ac   : > { %54282 = vmatpush3.bf16.msra.mxu1 %v54281_v56  ;;  %52168 = vmatprep.mubr.msk.f32.mxu1 %vm56176_vm1, %v56174_v1  ;;  %v61420_v56 = vand.u32 4294901760, %v61404_v61  ;;  %v34957_v37 = vsub.f32 %v61395_v40, %v34956_v20 }
 0x6ad   : > { %54283 = vmatprep.subr.bf16.mxu1 %v56175_v4 }
 0x6ae   : > { %34114 = vmatmul.mubr.f32.vlgmr.msra.gmra.mrb[0].mxu0 %v61260_v41  ;;  %v34958_v34 = vand.u32 4294901760, %v34957_v37 }
 0x6af   : > { %54265 = vmatpush1.bf16.msra.mxu0 %v61281_v57  ;;  %34188 = vmatprep.mubr.f32.mxu0 %v56174_v1 }
 0x6b0   : > { %54267 = vmatprep.subr.bf16.mxu0 %v54266_v53  ;;  %v34928_v53 = vsub.f32 %v61404_v61, %v61420_v56 }
 0x6b2   : > { %v34929_v25 = vand.u32 4294901760, %v34928_v53  ;;  %v35838_v53 = vsel %vm230_vm0, %v49805_v17, 0 }
 0x6b3   : > { %52169 = vmatmul.mubr.f32.vlgmr.msra.gmra.mrb[0].mxu1 %v61260_v41  ;;  %v54268_v41 = vpack.c.bf16 %v33967_v7, %v33955_v2  ;;  %v34829_v7 = vpop.permute.xlu1 %34828  ;;  %v34938_v2 = vand.u32 4294901760, %v61347_v29  ;;  %47697 = vrot.lane.b32.xlu1 %v56293_v52, %s56200_s20 }
 0x6b4   : > { %54285 = vmatpush3.bf16.msra.mxu1 %v61297_v50  ;;  %52175 = vmatprep.mubr.msk.f32.mxu1 %vm56176_vm1, %v56174_v1  ;;  %v34840_v14 = vsel %vm33848_vm6, %v34827_v3, %v34829_v7  ;;  %v61431_v3 = vpack.c.bf16 %v34862_v35, %v34858_v47 }
 0x6b5   : > { %54286 = vmatprep.subr.bf16.mxu1 %v56175_v4  ;;  %v34939_v9 = vsub.f32 %v61347_v29, %v34938_v2  ;;  %v35348_v21 = vand.u32 4294901760, %v34840_v14  ;;  %v54308_v55 = vpack.c.bf16 %v34950_v44, %v34938_v2  ;;  %v54310_v2 = vpack.c.bf16 %v34956_v20, %v34944_v23 }
 0x6b6   : > { %34192 = vmatmul.mubr.f32.vlgmr.msra.gmra.mrb[0].mxu0 %v61272_v36 }
 0x6b7   : > { %54269 = vmatpush1.bf16.msra.mxu0 %v54268_v41  ;;  %34274 = vmatprep.mubr.f32.mxu0 %v56174_v1  ;;  %v34940_v43 = vand.u32 4294901760, %v34939_v9  ;;  %v61417_v45 = vsub.f32 %v34840_v14, %v35348_v21  ;;  %v54298_v41 = vpack.c.bf16 %v34958_v34, %v34946_v62  ;;  %v35824_v7 = vpop.permute.xlu1 %35823 }
 0x6b8   : > { %54271 = vmatprep.subr.bf16.mxu0 %v61245_v19  ;;  %v34854_v19 = vsel %vm234_vm2, %v34843_v13, 0  ;;  %v54302_v13 = vpack.c.bf16 %v61395_v40, %v61397_v63  ;;  %47689 = vrot.lane.b32.xlu1 %v56304_v59, %s56200_s20 }
 0x6b9   : > { %v35427_v48 = vand.u32 4294901760, %v61417_v45 }
 0x6bb   : > { %52176 = vmatmul.mubr.f32.vlgmr.msra.gmra.mrb[0].mxu1 %v61272_v36  ;;  %v35351_v36 = vand.u32 4294901760, %v34854_v19  ;;  %v35428_v54 = vsub.f32 %v61417_v45, %v35427_v48 }
 0x6bc   : > { %54288 = vmatpush3.bf16.msra.mxu1 %v54287_v24  ;;  %52182 = vmatprep.mubr.msk.f32.mxu1 %vm56176_vm1, %v56174_v1 }
 0x6bd   : > { %54289 = vmatprep.subr.bf16.mxu1 %v56175_v4  ;;  %v61415_v46 = vsub.f32 %v34854_v19, %v35351_v36  ;;  %v61453_v18 = vpack.c.bf16 %v35351_v36, %v35348_v21  ;;  %v35429_v51 = vand.u32 4294901760, %v35428_v54  ;;  %v35816_v19 = vpop.permute.xlu1 %35815  ;;  %v61522_v54 = vand.u32 4294901760, %v35838_v53  ;;  %47685 = vrot.lane.b32.xlu1 %v56332_v15, %s56200_s20 }
 0x6be   : > { %34276 = vmatmul.mubr.f32.vlgmr.msra.gmra.mrb[0].mxu0 %v61238_v30 }
 0x6bf   : > { %54273 = vmatpush1.bf16.msra.mxu0 %v61281_v57  ;;  %34350 = vmatprep.mubr.f32.mxu0 %v56174_v1  ;;  %v54296_v57 = vpack.c.bf16 %v34952_v49, %v34940_v43  ;;  %v54323_v47 = vpack.c.bf16 %v61415_v46, %v61417_v45 }
 0x6c0   : > { %54293 = vmatprep.subr.bf16.mxu0 %v61387_v8 }
 0x6c1   : > { %v35812_v49 = vpop.permute.xlu1 %35811  ;;  %47691 = vrot.lane.b32.xlu1 %v56368_v33, %s56200_s20 }
 0x6c3   : > { %52183 = vmatmul.mubr.f32.vlgmr.msra.gmra.mrb[0].mxu1 %v61238_v30 }
 0x6c4   : > { %54291 = vmatpush3.bf16.msra.mxu1 %v61297_v50  ;;  %52189 = vmatprep.mubr.msk.f32.mxu1 %vm56176_vm1, %v56174_v1  ;;  %v35434_v50 = vand.u32 4294901760, %v61415_v46 }
 0x6c5   : > { %54316 = vmatprep.subr.bf16.mxu1 %v56175_v4  ;;  %v35818_v40 = vpop.permute.xlu1 %35817  ;;  %48687 = vrot.lane.b32.xlu1 %v56353_v28, %s56200_s20 }
 0x6c6   : > { %34352 = vmatmul.mubr.f32.vlgmr.msra.gmra.mrb[0].mxu0 %v61238_v30  ;;  %v35435_v27 = vsub.f32 %v61415_v46, %v35434_v50 }
 0x6c7   : > { %54295 = vmatpush1.bf16.msra.mxu0 %v61431_v3  ;;  %34924 = vmatprep.mubr.f32.mxu0 %v56174_v1 }
 0x6c8   : > { %54297 = vmatprep.subr.bf16.mxu0 %v54296_v57  ;;  %v35436_v26 = vand.u32 4294901760, %v35435_v27  ;;  %v54329_v27 = vpack.c.bf16 %v35434_v50, %v35427_v48 }
 0x6ca   : > { %v54320_v12 = vpack.c.bf16 %v35436_v26, %v35429_v51  ;;  %v61544_v51 = vsub.f32 %v35838_v53, %v61522_v54 }
 0x6cb   : > { %52190 = vmatmul.mubr.f32.vlgmr.msra.gmra.mrb[0].mxu1 %v61238_v30  ;;  %v35822_v30 = vpop.permute.xlu0 %35821  ;;  %47687 = vrot.lane.b32.xlu0 %v56277_v38, %s56200_s20  ;;  %v49812_v38 = vld [vmem:[%s63392_s1 + $0x170] sm:$0xff] }
 0x6cc   : > { %54318 = vmatpush3.bf16.msra.mxu1 %v61453_v18  ;;  %52196 = vmatprep.mubr.msk.f32.mxu1 %vm56176_vm1, %v56174_v1  ;;  %v35832_v24 = vsel %vm35827_vm7, %v35822_v30, %v35824_v7 }
 0x6cd   : > { %54319 = vmatprep.subr.bf16.mxu1 %v56175_v4  ;;  %v35842_v14 = vsel %vm234_vm2, %v35832_v24, 0 }
 0x6ce   : > { %34930 = vmatmul.mubr.f32.vlgmr.msra.gmra.mrb[0].mxu0 %v34929_v25  ;;  %v35850_v21 = vand.u32 4294901760, %v35842_v14 }
 0x6cf   : > { %54299 = vmatpush1.bf16.msra.mxu0 %v54298_v41  ;;  %35020 = vmatprep.mubr.f32.mxu0 %v56174_v1  ;;  %v35814_v35 = vpop.permute.xlu0 %35813 }
 0x6d0   : > { %54301 = vmatprep.subr.bf16.mxu0 %v54300_v0  ;;  %v35829_v9 = vsel %vm35827_vm7, %v35814_v35, %v35816_v19  ;;  %v61494_v37 = vsub.f32 %v35842_v14, %v35850_v21  ;;  %v35828_v42 = vsel %vm35827_vm7, %v35812_v49, %v35814_v35  ;;  %47693 = vrot.lane.b32.xlu0 %v56317_v6, %s56200_s20 }
 0x6d1   : > { %v35846_v43 = vand.u32 4294901760, %v35829_v9  ;;  %v35848_v62 = vand.u32 4294901760, %v35828_v42 }
 0x6d2   : > { %v35940_v23 = vand.u32 4294901760, %v61494_v37 }
 0x6d3   : > { %52197 = vmatmul.mubr.f32.vlgmr.msra.gmra.mrb[0].mxu1 %v34929_v25  ;;  %v35820_v36 = vpop.permute.xlu0 %35819  ;;  %v61497_v29 = vsub.f32 %v35829_v9, %v35846_v43  ;;  %v61529_v41 = vpack.c.bf16 %v35850_v21, %v35846_v43  ;;  %v61539_v48 = vsub.f32 %v35828_v42, %v35848_v62 }
 0x6d4   : > { %54321 = vmatpush3.bf16.msra.mxu1 %v54320_v12  ;;  %52203 = vmatprep.mubr.msk.f32.mxu1 %vm56176_vm1, %v56174_v1  ;;  %v35831_v57 = vsel %vm35827_vm7, %v35820_v36, %v35822_v30  ;;  %v35941_v46 = vsub.f32 %v61494_v37, %v35940_v23 }
 0x6d5   : > { %54322 = vmatprep.subr.bf16.mxu1 %v56175_v4  ;;  %v35928_v20 = vand.u32 4294901760, %v61497_v29  ;;  %v54342_v42 = vpack.c.bf16 %v61494_v37, %v61497_v29  ;;  %47699 = vrot.lane.b32.xlu0 %v56360_v22, %s56200_s20 }
 0x6d6   : > { %35022 = vmatmul.mubr.f32.vlgmr.msra.gmra.mrb[0].mxu0 %v61378_v5  ;;  %v35942_v12 = vand.u32 4294901760, %v35941_v46 }
 0x6d7   : > { %54303 = vmatpush1.bf16.msra.mxu0 %v54302_v13  ;;  %35100 = vmatprep.mubr.f32.mxu0 %v56174_v1  ;;  %v35826_v44 = vpop.permute.xlu0 %35825  ;;  %v35929_v45 = vsub.f32 %v61497_v29, %v35928_v20  ;;  %v35934_v13 = vand.u32 4294901760, %v61539_v48  ;;  %v54350_v46 = vpack.c.bf16 %v35940_v23, %v35928_v20  ;;  %v49806_v23 = vld [vmem:[%s63392_s1 + $0x158] sm:$0xff] }
 0x6d8   : > { %54305 = vmatprep.subr.bf16.mxu0 %v61387_v8  ;;  %v35833_v63 = vsel %vm35827_vm7, %v35824_v7, %v35826_v44 }
 0x6d9   : > { %v35844_v25 = vsel %vm234_vm2, %v35833_v63, 0  ;;  %v35930_v0 = vand.u32 4294901760, %v35929_v45  ;;  %v35935_v14 = vsub.f32 %v61539_v48, %v35934_v13  ;;  %48685 = vrot.lane.b32.xlu0 %v56272_v32, %s56200_s20 }
 0x6db   : > { %52204 = vmatmul.mubr.f32.vlgmr.msra.gmra.mrb[0].mxu1 %v61378_v5  ;;  %v35936_v21 = vand.u32 4294901760, %v35935_v14 }
 0x6dc   : > { %54324 = vmatpush3.bf16.msra.mxu1 %v54323_v47  ;;  %52210 = vmatprep.mubr.msk.f32.mxu1 %vm56176_vm1, %v56174_v1  ;;  %v61556_v47 = vand.u32 4294901760, %v61544_v51 }
 0x6dd   : > { %54325 = vmatprep.subr.bf16.mxu1 %v56175_v4 }
 0x6de   : > { %35103 = vmatmul.mubr.f32.vlgmr.msra.gmra.mrb[0].mxu0 %v61404_v61 }
 0x6df   : > { %54307 = vmatpush1.bf16.msra.mxu0 %v61431_v3  ;;  %35177 = vmatprep.mubr.f32.mxu0 %v56174_v1 }
 0x6e0   : > { %54309 = vmatprep.subr.bf16.mxu0 %v54308_v55  ;;  %v35918_v55 = vsub.f32 %v61544_v51, %v61556_v47 }
 0x6e2   : > { %v35919_v17 = vand.u32 4294901760, %v35918_v55 }
 0x6e3   : > { %52211 = vmatmul.mubr.f32.vlgmr.msra.gmra.mrb[0].mxu1 %v61404_v61  ;;  %v35840_v61 = vsel %vm234_vm2, %v35831_v57, 0 }
 0x6e4   : > { %54327 = vmatpush3.bf16.msra.mxu1 %v61453_v18  ;;  %52217 = vmatprep.mubr.msk.f32.mxu1 %vm56176_vm1, %v56174_v1  ;;  %v35852_v34 = vand.u32 4294901760, %v35840_v61 }
 0x6e5   : > { %54328 = vmatprep.subr.bf16.mxu1 %v56175_v4 }
 0x6e6   : > { %35181 = vmatmul.mubr.f32.vlgmr.msra.gmra.mrb[0].mxu0 %v61420_v56  ;;  %v61537_v50 = vsub.f32 %v35840_v61, %v35852_v34 }
 0x6e7   : > { %54311 = vmatpush1.bf16.msra.mxu0 %v54310_v2  ;;  %35263 = vmatprep.mubr.f32.mxu0 %v56174_v1 }
 0x6e8   : > { %54313 = vmatprep.subr.bf16.mxu0 %v61387_v8  ;;  %v35830_v8 = vsel %vm35827_vm7, %v35816_v19, %v35818_v40  ;;  %v35946_v30 = vand.u32 4294901760, %v61537_v50  ;;  %v61565_v19 = vpack.c.bf16 %v35852_v34, %v35848_v62  ;;  %v54344_v63 = vpack.c.bf16 %v61537_v50, %v61539_v48  ;;  %v36814_v40 = vpop.permute.xlu1 %36813  ;;  %48679 = vrot.lane.b32.xlu1 %v56306_v60, %s56200_s20 }
 0x6e9   : > { %v36338_v26 = vand.u32 4294901760, %v35830_v8 }
 0x6ea   : > { %v35947_v24 = vsub.f32 %v61537_v50, %v35946_v30  ;;  %v36827_v50 = vsel %vm230_vm0, %v49806_v23, 0 }
 0x6eb   : > { %52218 = vmatmul.mubr.f32.vlgmr.msra.gmra.mrb[0].mxu1 %v61420_v56  ;;  %v36341_v56 = vand.u32 4294901760, %v35844_v25  ;;  %v61553_v35 = vsub.f32 %v35830_v8, %v36338_v26 }
 0x6ec   : > { %54330 = vmatpush3.bf16.msra.mxu1 %v54329_v27  ;;  %52224 = vmatprep.mubr.msk.f32.mxu1 %vm56176_vm1, %v56174_v1  ;;  %v35948_v36 = vand.u32 4294901760, %v35947_v24 }
 0x6ed   : > { %54331 = vmatprep.subr.bf16.mxu1 %v56175_v4  ;;  %v61551_v7 = vsub.f32 %v35844_v25, %v36341_v56  ;;  %v61581_v49 = vpack.c.bf16 %v36341_v56, %v36338_v26  ;;  %v36806_v25 = vpop.permute.xlu1 %36805  ;;  %48675 = vrot.lane.b32.xlu1 %v56334_v16, %s56200_s20 }
 0x6ee   : > { %35265 = vmatmul.mubr.f32.vlgmr.msra.gmra.mrb[0].mxu0 %v61378_v5  ;;  %v54340_v2 = vpack.c.bf16 %v35948_v36, %v35936_v21 }
 0x6ef   : > { %54315 = vmatpush1.bf16.msra.mxu0 %v61431_v3  ;;  %35339 = vmatprep.mubr.f32.mxu0 %v56174_v1  ;;  %v54338_v3 = vpack.c.bf16 %v35942_v12, %v35930_v0  ;;  %v36424_v9 = vand.u32 4294901760, %v61551_v7  ;;  %v54365_v62 = vpack.c.bf16 %v61551_v7, %v61553_v35 }
 0x6f0   : > { %54335 = vmatprep.subr.bf16.mxu0 %v61529_v41 }
 0x6f1   : > { %v36425_v43 = vsub.f32 %v61551_v7, %v36424_v9  ;;  %v36802_v12 = vpop.permute.xlu1 %36801  ;;  %48681 = vrot.lane.b32.xlu1 %v56449_v10, %s56200_s20 }
 0x6f3   : > { %52225 = vmatmul.mubr.f32.vlgmr.msra.gmra.mrb[0].mxu1 %v61378_v5  ;;  %v36426_v44 = vand.u32 4294901760, %v36425_v43 }
 0x6f4   : > { %54333 = vmatpush3.bf16.msra.mxu1 %v61453_v18  ;;  %52231 = vmatprep.mubr.msk.f32.mxu1 %vm56176_vm1, %v56174_v1  ;;  %v36417_v18 = vand.u32 4294901760, %v61553_v35 }
 0x6f5   : > { %54358 = vmatprep.subr.bf16.mxu1 %v56175_v4 }
 0x6f6   : > { %35341 = vmatmul.mubr.f32.vlgmr.msra.gmra.mrb[0].mxu0 %v61378_v5  ;;  %v36418_v57 = vsub.f32 %v61553_v35, %v36417_v18  ;;  %v54371_v43 = vpack.c.bf16 %v36424_v9, %v36417_v18 }
 0x6f7   : > { %54337 = vmatpush1.bf16.msra.mxu0 %v61565_v19  ;;  %35914 = vmatprep.mubr.f32.mxu0 %v56174_v1 }
 0x6f8   : > { %54339 = vmatprep.subr.bf16.mxu0 %v54338_v3  ;;  %v36419_v61 = vand.u32 4294901760, %v36418_v57  ;;  %v61662_v57 = vand.u32 4294901760, %v36827_v50 }
 0x6fa   : > { %v54362_v53 = vpack.c.bf16 %v36426_v44, %v36419_v61  ;;  %v61688_v61 = vsub.f32 %v36827_v50, %v61662_v57 }
 0x6fb   : > { %52232 = vmatmul.mubr.f32.vlgmr.msra.gmra.mrb[0].mxu1 %v61378_v5  ;;  %v36812_v5 = vpop.permute.xlu0 %36811  ;;  %48677 = vrot.lane.b32.xlu0 %v56279_v39, %s56200_s20 }
 0x6fc   : > { %54360 = vmatpush3.bf16.msra.mxu1 %v61581_v49  ;;  %52238 = vmatprep.mubr.msk.f32.mxu1 %vm56176_vm1, %v56174_v1  ;;  %v36821_v27 = vsel %vm35827_vm7, %v36812_v5, %v36814_v40 }
 0x6fd   : > { %54361 = vmatprep.subr.bf16.mxu1 %v56175_v4  ;;  %v36831_v8 = vsel %vm234_vm2, %v36821_v27, 0 }
 0x6fe   : > { %35920 = vmatmul.mubr.f32.vlgmr.msra.gmra.mrb[0].mxu0 %v35919_v17  ;;  %v36839_v26 = vand.u32 4294901760, %v36831_v8 }
 0x6ff   : > { %54341 = vmatpush1.bf16.msra.mxu0 %v54340_v2  ;;  %36010 = vmatprep.mubr.f32.mxu0 %v56174_v1  ;;  %v36804_v34 = vpop.permute.xlu0 %36803 }
 0x700   : > { %54343 = vmatprep.subr.bf16.mxu0 %v54342_v42  ;;  %v36818_v45 = vsel %vm35827_vm7, %v36804_v34, %v36806_v25  ;;  %v61628_v29 = vsub.f32 %v36831_v8, %v36839_v26  ;;  %v36817_v14 = vsel %vm35827_vm7, %v36802_v12, %v36804_v34  ;;  %48683 = vrot.lane.b32.xlu0 %v56326_v11, %s56200_s20 }
 0x701   : > { %v36835_v0 = vand.u32 4294901760, %v36818_v45  ;;  %v36837_v21 = vand.u32 4294901760, %v36817_v14 }
 0x702   : > { %v36929_v55 = vand.u32 4294901760, %v61628_v29 }
 0x703   : > { %52239 = vmatmul.mubr.f32.vlgmr.msra.gmra.mrb[0].mxu1 %v35919_v17  ;;  %v36810_v56 = vpop.permute.xlu0 %36809  ;;  %v61631_v20 = vsub.f32 %v36818_v45, %v36835_v0  ;;  %v61671_v2 = vpack.c.bf16 %v36839_v26, %v36835_v0  ;;  %v61681_v18 = vsub.f32 %v36817_v14, %v36837_v21 }
 0x704   : > { %54363 = vmatpush3.bf16.msra.mxu1 %v54362_v53  ;;  %52245 = vmatprep.mubr.msk.f32.mxu1 %vm56176_vm1, %v56174_v1  ;;  %v36820_v37 = vsel %vm35827_vm7, %v36810_v56, %v36812_v5  ;;  %v36930_v35 = vsub.f32 %v61628_v29, %v36929_v55 }
 0x705   : > { %54364 = vmatprep.subr.bf16.mxu1 %v56175_v4  ;;  %v36829_v24 = vsel %vm234_vm2, %v36820_v37, 0  ;;  %v54384_v14 = vpack.c.bf16 %v61628_v29, %v61631_v20  ;;  %v49807_v29 = vld [vmem:[%s63392_s1 + $0x98] sm:$0xff]  ;;  %48689 = vrot.lane.b32.xlu0 %v56444_v58, %s56200_s20 }
 0x706   : > { %36012 = vmatmul.mubr.f32.vlgmr.msra.gmra.mrb[0].mxu0 %v61522_v54  ;;  %v36841_v36 = vand.u32 4294901760, %v36829_v24  ;;  %v36931_v53 = vand.u32 4294901760, %v36930_v35 }
 0x707   : > { %54345 = vmatpush1.bf16.msra.mxu0 %v54344_v63  ;;  %36090 = vmatprep.mubr.f32.mxu0 %v56174_v1  ;;  %v36816_v3 = vpop.permute.xlu0 %36815  ;;  %v36923_v63 = vand.u32 4294901760, %v61681_v18 }
 0x708   : > { %54347 = vmatprep.subr.bf16.mxu0 %v61529_v41  ;;  %v36822_v48 = vsel %vm35827_vm7, %v36814_v40, %v36816_v3  ;;  %v61679_v9 = vsub.f32 %v36829_v24, %v36841_v36 }
 0x709   : > { %v36924_v8 = vsub.f32 %v61681_v18, %v36923_v63 }
 0x70a   : > { %v36935_v5 = vand.u32 4294901760, %v61679_v9 }
 0x70b   : > { %52246 = vmatmul.mubr.f32.vlgmr.msra.gmra.mrb[0].mxu1 %v61522_v54  ;;  %v36925_v26 = vand.u32 4294901760, %v36924_v8 }
 0x70c   : > { %54366 = vmatpush3.bf16.msra.mxu1 %v54365_v62  ;;  %52252 = vmatprep.mubr.msk.f32.mxu1 %vm56176_vm1, %v56174_v1  ;;  %v61704_v62 = vand.u32 4294901760, %v61688_v61  ;;  %v36936_v27 = vsub.f32 %v61679_v9, %v36935_v5 }
 0x70d   : > { %54367 = vmatprep.subr.bf16.mxu1 %v56175_v4 }
 0x70e   : > { %36093 = vmatmul.mubr.f32.vlgmr.msra.gmra.mrb[0].mxu0 %v61544_v51  ;;  %v36937_v56 = vand.u32 4294901760, %v36936_v27 }
 0x70f   : > { %54349 = vmatpush1.bf16.msra.mxu0 %v61565_v19  ;;  %36167 = vmatprep.mubr.f32.mxu0 %v56174_v1 }
 0x710   : > { %54351 = vmatprep.subr.bf16.mxu0 %v54350_v46  ;;  %v36907_v46 = vsub.f32 %v61688_v61, %v61704_v62 }
 0x712   : > { %v36908_v23 = vand.u32 4294901760, %v36907_v46  ;;  %v37817_v46 = vsel %vm230_vm0, %v49807_v29, 0 }
 0x713   : > { %52253 = vmatmul.mubr.f32.vlgmr.msra.gmra.mrb[0].mxu1 %v61544_v51  ;;  %v54352_v51 = vpack.c.bf16 %v35946_v30, %v35934_v13  ;;  %v36808_v30 = vpop.permute.xlu1 %36807  ;;  %v36917_v13 = vand.u32 4294901760, %v61631_v20 }
 0x714   : > { %54369 = vmatpush3.bf16.msra.mxu1 %v61581_v49  ;;  %52259 = vmatprep.mubr.msk.f32.mxu1 %vm56176_vm1, %v56174_v1  ;;  %v36819_v17 = vsel %vm35827_vm7, %v36806_v25, %v36808_v30  ;;  %v61715_v25 = vpack.c.bf16 %v36841_v36, %v36837_v21 }
 0x715   : > { %54370 = vmatprep.subr.bf16.mxu1 %v56175_v4  ;;  %v36918_v7 = vsub.f32 %v61631_v20, %v36917_v13  ;;  %v37327_v44 = vand.u32 4294901760, %v36819_v17  ;;  %v54392_v35 = vpack.c.bf16 %v36929_v55, %v36917_v13  ;;  %v54394_v13 = vpack.c.bf16 %v36935_v5, %v36923_v63 }
 0x716   : > { %36171 = vmatmul.mubr.f32.vlgmr.msra.gmra.mrb[0].mxu0 %v61556_v47 }
 0x717   : > { %54353 = vmatpush1.bf16.msra.mxu0 %v54352_v51  ;;  %36253 = vmatprep.mubr.f32.mxu0 %v56174_v1  ;;  %v36919_v42 = vand.u32 4294901760, %v36918_v7  ;;  %v61701_v34 = vsub.f32 %v36819_v17, %v37327_v44  ;;  %v54382_v51 = vpack.c.bf16 %v36937_v56, %v36925_v26  ;;  %v37803_v30 = vpop.permute.xlu1 %37802 }
 0x718   : > { %54355 = vmatprep.subr.bf16.mxu0 %v61529_v41  ;;  %v36833_v41 = vsel %vm234_vm2, %v36822_v48, 0  ;;  %v54386_v48 = vpack.c.bf16 %v61679_v9, %v61681_v18 }
 0x719   : > { %v37406_v45 = vand.u32 4294901760, %v61701_v34 }
 0x71b   : > { %52260 = vmatmul.mubr.f32.vlgmr.msra.gmra.mrb[0].mxu1 %v61556_v47  ;;  %v37330_v47 = vand.u32 4294901760, %v36833_v41  ;;  %v37407_v37 = vsub.f32 %v61701_v34, %v37406_v45 }
 0x71c   : > { %54372 = vmatpush3.bf16.msra.mxu1 %v54371_v43  ;;  %52266 = vmatprep.mubr.msk.f32.mxu1 %vm56176_vm1, %v56174_v1 }
 0x71d   : > { %54373 = vmatprep.subr.bf16.mxu1 %v56175_v4  ;;  %v61699_v40 = vsub.f32 %v36833_v41, %v37330_v47  ;;  %v61737_v12 = vpack.c.bf16 %v37330_v47, %v37327_v44  ;;  %v37408_v24 = vand.u32 4294901760, %v37407_v37  ;;  %v37795_v41 = vpop.permute.xlu1 %37794  ;;  %v61806_v37 = vand.u32 4294901760, %v37817_v46 }
 0x71e   : > { %36255 = vmatmul.mubr.f32.vlgmr.msra.gmra.mrb[0].mxu0 %v61522_v54 }
 0x71f   : > { %54357 = vmatpush1.bf16.msra.mxu0 %v61565_v19  ;;  %36329 = vmatprep.mubr.f32.mxu0 %v56174_v1  ;;  %v54380_v19 = vpack.c.bf16 %v36931_v53, %v36919_v42  ;;  %v54407_v21 = vpack.c.bf16 %v61699_v40, %v61701_v34 }
 0x720   : > { %54377 = vmatprep.subr.bf16.mxu0 %v61671_v2 }
 0x721   : > { %v37791_v53 = vpop.permute.xlu1 %37790 }
 0x723   : > { %52267 = vmatmul.mubr.f32.vlgmr.msra.gmra.mrb[0].mxu1 %v61522_v54 }
 0x724   : > { %54375 = vmatpush3.bf16.msra.mxu1 %v61581_v49  ;;  %52273 = vmatprep.mubr.msk.f32.mxu1 %vm56176_vm1, %v56174_v1  ;;  %v37413_v49 = vand.u32 4294901760, %v61699_v40 }
 0x725   : > { %54400 = vmatprep.subr.bf16.mxu1 %v56175_v4  ;;  %v37797_v5 = vpop.permute.xlu1 %37796 }
 0x726   : > { %36331 = vmatmul.mubr.f32.vlgmr.msra.gmra.mrb[0].mxu0 %v61522_v54  ;;  %v37414_v0 = vsub.f32 %v61699_v40, %v37413_v49 }
 0x727   : > { %54379 = vmatpush1.bf16.msra.mxu0 %v61715_v25  ;;  %36903 = vmatprep.mubr.f32.mxu0 %v56174_v1 }
 0x728   : > { %54381 = vmatprep.subr.bf16.mxu0 %v54380_v19  ;;  %v37415_v3 = vand.u32 4294901760, %v37414_v0  ;;  %v54413_v0 = vpack.c.bf16 %v37413_v49, %v37406_v45 }
 0x72a   : > { %v54404_v50 = vpack.c.bf16 %v37415_v3, %v37408_v24  ;;  %v61828_v24 = vsub.f32 %v37817_v46, %v61806_v37 }
 0x72b   : > { %52274 = vmatmul.mubr.f32.vlgmr.msra.gmra.mrb[0].mxu1 %v61522_v54  ;;  %v37801_v54 = vpop.permute.xlu0 %37800 }
 0x72c   : > { %54402 = vmatpush3.bf16.msra.mxu1 %v61737_v12  ;;  %52280 = vmatprep.mubr.msk.f32.mxu1 %vm56176_vm1, %v56174_v1  ;;  %v37811_v43 = vsel %vm37806_vm8, %v37801_v54, %v37803_v30 }
 0x72d   : > { %54403 = vmatprep.subr.bf16.mxu1 %v56175_v4  ;;  %v37821_v17 = vsel %vm234_vm2, %v37811_v43, 0 }
 0x72e   : > { %36909 = vmatmul.mubr.f32.vlgmr.msra.gmra.mrb[0].mxu0 %v36908_v23  ;;  %v37829_v44 = vand.u32 4294901760, %v37821_v17 }
 0x72f   : > { %54383 = vmatpush1.bf16.msra.mxu0 %v54382_v51  ;;  %36999 = vmatprep.mubr.f32.mxu0 %v56174_v1  ;;  %v37793_v36 = vpop.permute.xlu0 %37792  ;;  %v37809_v51 = vsel %vm37806_vm8, %v37795_v41, %v37797_v5  ;;  %v38793_v5 = vpop.permute.xlu1 %38792 }
 0x730   : > { %54385 = vmatprep.subr.bf16.mxu0 %v54384_v14  ;;  %v37808_v7 = vsel %vm37806_vm8, %v37793_v36, %v37795_v41  ;;  %v61778_v27 = vsub.f32 %v37821_v17, %v37829_v44  ;;  %v37807_v8 = vsel %vm37806_vm8, %v37791_v53, %v37793_v36  ;;  %v38317_v3 = vand.u32 4294901760, %v37809_v51 }
 0x731   : > { %v37825_v42 = vand.u32 4294901760, %v37808_v7  ;;  %v37827_v26 = vand.u32 4294901760, %v37807_v8 }
 0x732   : > { %v37919_v56 = vand.u32 4294901760, %v61778_v27  ;;  %v61837_v36 = vsub.f32 %v37809_v51, %v38317_v3 }
 0x733   : > { %52281 = vmatmul.mubr.f32.vlgmr.msra.gmra.mrb[0].mxu1 %v36908_v23  ;;  %v37799_v47 = vpop.permute.xlu0 %37798  ;;  %v61781_v20 = vsub.f32 %v37808_v7, %v37825_v42  ;;  %v61823_v45 = vsub.f32 %v37807_v8, %v37827_v26 }
 0x734   : > { %54405 = vmatpush3.bf16.msra.mxu1 %v54404_v50  ;;  %52287 = vmatprep.mubr.msk.f32.mxu1 %vm56176_vm1, %v56174_v1  ;;  %v37810_v19 = vsel %vm37806_vm8, %v37799_v47, %v37801_v54  ;;  %v37920_v40 = vsub.f32 %v61778_v27, %v37919_v56 }
 0x735   : > { %54406 = vmatprep.subr.bf16.mxu1 %v56175_v4  ;;  %v37907_v18 = vand.u32 4294901760, %v61781_v20  ;;  %v54426_v8 = vpack.c.bf16 %v61778_v27, %v61781_v20 }
 0x736   : > { %37001 = vmatmul.mubr.f32.vlgmr.msra.gmra.mrb[0].mxu0 %v61662_v57  ;;  %v37921_v50 = vand.u32 4294901760, %v37920_v40 }
 0x737   : > { %54387 = vmatpush1.bf16.msra.mxu0 %v54386_v48  ;;  %37079 = vmatprep.mubr.f32.mxu0 %v56174_v1  ;;  %v37805_v55 = vpop.permute.xlu0 %37804  ;;  %v37908_v34 = vsub.f32 %v61781_v20, %v37907_v18  ;;  %v37913_v48 = vand.u32 4294901760, %v61823_v45  ;;  %v54434_v40 = vpack.c.bf16 %v37919_v56, %v37907_v18  ;;  %v49808_v18 = vld [vmem:[%s63392_s1 + $0x160] sm:$0xff] }
 0x738   : > { %54389 = vmatprep.subr.bf16.mxu0 %v61671_v2  ;;  %v37812_v9 = vsel %vm37806_vm8, %v37803_v30, %v37805_v55 }
 0x739   : > { %v37823_v23 = vsel %vm234_vm2, %v37812_v9, 0  ;;  %v37909_v14 = vand.u32 4294901760, %v37908_v34  ;;  %v37914_v17 = vsub.f32 %v61823_v45, %v37913_v48 }
 0x73b   : > { %52288 = vmatmul.mubr.f32.vlgmr.msra.gmra.mrb[0].mxu1 %v61662_v57 }
 0x73c   : > { %54408 = vmatpush3.bf16.msra.mxu1 %v54407_v21  ;;  %52294 = vmatprep.mubr.msk.f32.mxu1 %vm56176_vm1, %v56174_v1  ;;  %v61840_v21 = vand.u32 4294901760, %v61828_v24 }
 0x73d   : > { %54409 = vmatprep.subr.bf16.mxu1 %v56175_v4 }
 0x73e   : > { %37082 = vmatmul.mubr.f32.vlgmr.msra.gmra.mrb[0].mxu0 %v61688_v61 }
 0x73f   : > { %54391 = vmatpush1.bf16.msra.mxu0 %v61715_v25  ;;  %37156 = vmatprep.mubr.f32.mxu0 %v56174_v1 }
 0x740   : > { %54393 = vmatprep.subr.bf16.mxu0 %v54392_v35  ;;  %v37897_v35 = vsub.f32 %v61828_v24, %v61840_v21 }
 0x742   : > { %v37898_v29 = vand.u32 4294901760, %v37897_v35 }
 0x743   : > { %52295 = vmatmul.mubr.f32.vlgmr.msra.gmra.mrb[0].mxu1 %v61688_v61  ;;  %v37819_v61 = vsel %vm234_vm2, %v37810_v19, 0 }
 0x744   : > { %54411 = vmatpush3.bf16.msra.mxu1 %v61737_v12  ;;  %52301 = vmatprep.mubr.msk.f32.mxu1 %vm56176_vm1, %v56174_v1  ;;  %v37831_v63 = vand.u32 4294901760, %v37819_v61 }
 0x745   : > { %54412 = vmatprep.subr.bf16.mxu1 %v56175_v4 }
 0x746   : > { %37160 = vmatmul.mubr.f32.vlgmr.msra.gmra.mrb[0].mxu0 %v61704_v62  ;;  %v61821_v49 = vsub.f32 %v37819_v61, %v37831_v63  ;;  %v61849_v41 = vpack.c.bf16 %v37831_v63, %v37827_v26 }
 0x747   : > { %54395 = vmatpush1.bf16.msra.mxu0 %v54394_v13  ;;  %37242 = vmatprep.mubr.f32.mxu0 %v56174_v1 }
 0x748   : > { %54397 = vmatprep.subr.bf16.mxu0 %v61671_v2  ;;  %v61813_v2 = vpack.c.bf16 %v37829_v44, %v37825_v42  ;;  %v37925_v54 = vand.u32 4294901760, %v61821_v49  ;;  %v37915_v44 = vand.u32 4294901760, %v37914_v17  ;;  %v54428_v9 = vpack.c.bf16 %v61821_v49, %v61823_v45 }
 0x74a   : > { %v37926_v43 = vsub.f32 %v61821_v49, %v37925_v54  ;;  %v38806_v49 = vsel %vm230_vm0, %v49808_v18, 0 }
 0x74b   : > { %52302 = vmatmul.mubr.f32.vlgmr.msra.gmra.mrb[0].mxu1 %v61704_v62  ;;  %v38320_v62 = vand.u32 4294901760, %v37823_v23 }
 0x74c   : > { %54414 = vmatpush3.bf16.msra.mxu1 %v54413_v0  ;;  %52308 = vmatprep.mubr.msk.f32.mxu1 %vm56176_vm1, %v56174_v1  ;;  %v37927_v47 = vand.u32 4294901760, %v37926_v43 }
 0x74d   : > { %54415 = vmatprep.subr.bf16.mxu1 %v56175_v4  ;;  %v61835_v30 = vsub.f32 %v37823_v23, %v38320_v62  ;;  %v61865_v53 = vpack.c.bf16 %v38320_v62, %v38317_v3  ;;  %v38785_v23 = vpop.permute.xlu1 %38784 }
 0x74e   : > { %37244 = vmatmul.mubr.f32.vlgmr.msra.gmra.mrb[0].mxu0 %v61662_v57  ;;  %v54424_v13 = vpack.c.bf16 %v37927_v47, %v37915_v44 }
 0x74f   : > { %54399 = vmatpush1.bf16.msra.mxu0 %v61715_v25  ;;  %37318 = vmatprep.mubr.f32.mxu0 %v56174_v1  ;;  %v54422_v25 = vpack.c.bf16 %v37921_v50, %v37909_v14  ;;  %v38403_v7 = vand.u32 4294901760, %v61835_v30  ;;  %v54449_v26 = vpack.c.bf16 %v61835_v30, %v61837_v36 }
 0x750   : > { %54419 = vmatprep.subr.bf16.mxu0 %v61813_v2 }
 0x751   : > { %v38404_v42 = vsub.f32 %v61835_v30, %v38403_v7  ;;  %v38781_v50 = vpop.permute.xlu1 %38780 }
 0x753   : > { %52309 = vmatmul.mubr.f32.vlgmr.msra.gmra.mrb[0].mxu1 %v61662_v57  ;;  %v38405_v55 = vand.u32 4294901760, %v38404_v42 }
 0x754   : > { %54417 = vmatpush3.bf16.msra.mxu1 %v61737_v12  ;;  %52315 = vmatprep.mubr.msk.f32.mxu1 %vm56176_vm1, %v56174_v1  ;;  %v38396_v12 = vand.u32 4294901760, %v61837_v36 }
 0x755   : > { %54442 = vmatprep.subr.bf16.mxu1 %v56175_v4  ;;  %v38787_v35 = vpop.permute.xlu1 %38786 }
 0x756   : > { %37320 = vmatmul.mubr.f32.vlgmr.msra.gmra.mrb[0].mxu0 %v61662_v57  ;;  %v38397_v19 = vsub.f32 %v61837_v36, %v38396_v12  ;;  %v54455_v42 = vpack.c.bf16 %v38403_v7, %v38396_v12 }
 0x757   : > { %54421 = vmatpush1.bf16.msra.mxu0 %v61849_v41  ;;  %37893 = vmatprep.mubr.f32.mxu0 %v56174_v1 }
 0x758   : > { %54423 = vmatprep.subr.bf16.mxu0 %v54422_v25  ;;  %v38398_v61 = vand.u32 4294901760, %v38397_v19  ;;  %v61946_v19 = vand.u32 4294901760, %v38806_v49 }
 0x75a   : > { %v54446_v46 = vpack.c.bf16 %v38405_v55, %v38398_v61  ;;  %v61972_v61 = vsub.f32 %v38806_v49, %v61946_v19 }
 0x75b   : > { %52316 = vmatmul.mubr.f32.vlgmr.msra.gmra.mrb[0].mxu1 %v61662_v57  ;;  %v38791_v57 = vpop.permute.xlu0 %38790 }
 0x75c   : > { %54444 = vmatpush3.bf16.msra.mxu1 %v61865_v53  ;;  %52322 = vmatprep.mubr.msk.f32.mxu1 %vm56176_vm1, %v56174_v1  ;;  %v38800_v0 = vsel %vm37806_vm8, %v38791_v57, %v38793_v5 }
 0x75d   : > { %54445 = vmatprep.subr.bf16.mxu1 %v56175_v4  ;;  %v38810_v51 = vsel %vm234_vm2, %v38800_v0, 0 }
 0x75e   : > { %37899 = vmatmul.mubr.f32.vlgmr.msra.gmra.mrb[0].mxu0 %v37898_v29  ;;  %v38818_v3 = vand.u32 4294901760, %v38810_v51 }
 0x75f   : > { %54425 = vmatpush1.bf16.msra.mxu0 %v54424_v13  ;;  %37989 = vmatprep.mubr.f32.mxu0 %v56174_v1  ;;  %v38783_v63 = vpop.permute.xlu0 %38782 }
 0x760   : > { %54427 = vmatprep.subr.bf16.mxu0 %v54426_v8  ;;  %v38797_v34 = vsel %vm37806_vm8, %v38783_v63, %v38785_v23  ;;  %v61912_v20 = vsub.f32 %v38810_v51, %v38818_v3  ;;  %v38796_v17 = vsel %vm37806_vm8, %v38781_v50, %v38783_v63 }
 0x761   : > { %v38814_v14 = vand.u32 4294901760, %v38797_v34  ;;  %v38816_v44 = vand.u32 4294901760, %v38796_v17 }
 0x762   : > { %v38908_v45 = vand.u32 4294901760, %v61912_v20 }
 0x763   : > { %52323 = vmatmul.mubr.f32.vlgmr.msra.gmra.mrb[0].mxu1 %v37898_v29  ;;  %v38789_v62 = vpop.permute.xlu0 %38788  ;;  %v61915_v56 = vsub.f32 %v38797_v34, %v38814_v14  ;;  %v38798_v29 = vsel %vm37806_vm8, %v38785_v23, %v38787_v35  ;;  %v61955_v13 = vpack.c.bf16 %v38818_v3, %v38814_v14  ;;  %v61965_v12 = vsub.f32 %v38796_v17, %v38816_v44  ;;  %v39782_v35 = vpop.permute.xlu1 %39781 }
 0x764   : > { %54447 = vmatpush3.bf16.msra.mxu1 %v54446_v46  ;;  %52329 = vmatprep.mubr.msk.f32.mxu1 %vm56176_vm1, %v56174_v1  ;;  %v38799_v27 = vsel %vm37806_vm8, %v38789_v62, %v38791_v57  ;;  %v38909_v36 = vsub.f32 %v61912_v20, %v38908_v45  ;;  %v39306_v55 = vand.u32 4294901760, %v38798_v29 }
 0x765   : > { %54448 = vmatprep.subr.bf16.mxu1 %v56175_v4  ;;  %v38808_v43 = vsel %vm234_vm2, %v38799_v27, 0  ;;  %v54468_v17 = vpack.c.bf16 %v61912_v20, %v61915_v56  ;;  %v49809_v20 = vld [vmem:[%s63392_s1 + $0xa0] sm:$0xff] }
 0x766   : > { %37991 = vmatmul.mubr.f32.vlgmr.msra.gmra.mrb[0].mxu0 %v61806_v37  ;;  %v38820_v47 = vand.u32 4294901760, %v38808_v43  ;;  %v38910_v46 = vand.u32 4294901760, %v38909_v36  ;;  %v61985_v63 = vsub.f32 %v38798_v29, %v39306_v55 }
 0x767   : > { %54429 = vmatpush1.bf16.msra.mxu0 %v54428_v9  ;;  %38069 = vmatprep.mubr.f32.mxu0 %v56174_v1  ;;  %v38795_v25 = vpop.permute.xlu0 %38794  ;;  %v38902_v9 = vand.u32 4294901760, %v61965_v12 }
 0x768   : > { %54431 = vmatprep.subr.bf16.mxu0 %v61813_v2  ;;  %v61963_v7 = vsub.f32 %v38808_v43, %v38820_v47  ;;  %v61999_v23 = vpack.c.bf16 %v38820_v47, %v38816_v44  ;;  %v39385_v34 = vand.u32 4294901760, %v61985_v63 }
 0x769   : > { %v38903_v51 = vsub.f32 %v61965_v12, %v38902_v9 }
 0x76a   : > { %v38914_v57 = vand.u32 4294901760, %v61963_v7  ;;  %v39386_v27 = vsub.f32 %v61985_v63, %v39385_v34 }
 0x76b   : > { %52330 = vmatmul.mubr.f32.vlgmr.msra.gmra.mrb[0].mxu1 %v61806_v37  ;;  %v38904_v3 = vand.u32 4294901760, %v38903_v51 }
 0x76c   : > { %54450 = vmatpush3.bf16.msra.mxu1 %v54449_v26  ;;  %52336 = vmatprep.mubr.msk.f32.mxu1 %vm56176_vm1, %v56174_v1  ;;  %v61988_v26 = vand.u32 4294901760, %v61972_v61  ;;  %v38915_v0 = vsub.f32 %v61963_v7, %v38914_v57  ;;  %v39387_v43 = vand.u32 4294901760, %v39386_v27 }
 0x76d   : > { %54451 = vmatprep.subr.bf16.mxu1 %v56175_v4 }
 0x76e   : > { %38072 = vmatmul.mubr.f32.vlgmr.msra.gmra.mrb[0].mxu0 %v61828_v24  ;;  %v38916_v62 = vand.u32 4294901760, %v38915_v0 }
 0x76f   : > { %54433 = vmatpush1.bf16.msra.mxu0 %v61849_v41  ;;  %38146 = vmatprep.mubr.f32.mxu0 %v56174_v1 }
 0x770   : > { %54435 = vmatprep.subr.bf16.mxu0 %v54434_v40  ;;  %v38886_v40 = vsub.f32 %v61972_v61, %v61988_v26 }
 0x772   : > { %v38887_v18 = vand.u32 4294901760, %v38886_v40  ;;  %v39796_v40 = vsel %vm230_vm0, %v49809_v20, 0 }
 0x773   : > { %52337 = vmatmul.mubr.f32.vlgmr.msra.gmra.mrb[0].mxu1 %v61828_v24  ;;  %v54436_v24 = vpack.c.bf16 %v37925_v54, %v37913_v48  ;;  %v38896_v54 = vand.u32 4294901760, %v61915_v56  ;;  %v38801_v48 = vsel %vm37806_vm8, %v38793_v5, %v38795_v25  ;;  %v62090_v27 = vand.u32 4294901760, %v39796_v40 }
 0x774   : > { %54453 = vmatpush3.bf16.msra.mxu1 %v61865_v53  ;;  %52343 = vmatprep.mubr.msk.f32.mxu1 %vm56176_vm1, %v56174_v1 }
 0x775   : > { %54454 = vmatprep.subr.bf16.mxu1 %v56175_v4  ;;  %v38897_v30 = vsub.f32 %v61915_v56, %v38896_v54  ;;  %v54476_v36 = vpack.c.bf16 %v38908_v45, %v38896_v54  ;;  %v54478_v45 = vpack.c.bf16 %v38914_v57, %v38902_v9 }
 0x776   : > { %38150 = vmatmul.mubr.f32.vlgmr.msra.gmra.mrb[0].mxu0 %v61840_v21 }
 0x777   : > { %54437 = vmatpush1.bf16.msra.mxu0 %v54436_v24  ;;  %38232 = vmatprep.mubr.f32.mxu0 %v56174_v1  ;;  %v38898_v8 = vand.u32 4294901760, %v38897_v30  ;;  %v54466_v24 = vpack.c.bf16 %v38916_v62, %v38904_v3 }
 0x778   : > { %54439 = vmatprep.subr.bf16.mxu0 %v61813_v2  ;;  %v38812_v2 = vsel %vm234_vm2, %v38801_v48, 0  ;;  %v54470_v48 = vpack.c.bf16 %v61963_v7, %v61965_v12 }
 0x77b   : > { %52344 = vmatmul.mubr.f32.vlgmr.msra.gmra.mrb[0].mxu1 %v61840_v21  ;;  %v39309_v21 = vand.u32 4294901760, %v38812_v2 }
 0x77c   : > { %54456 = vmatpush3.bf16.msra.mxu1 %v54455_v42  ;;  %52350 = vmatprep.mubr.msk.f32.mxu1 %vm56176_vm1, %v56174_v1 }
 0x77d   : > { %54457 = vmatprep.subr.bf16.mxu1 %v56175_v4  ;;  %v61983_v5 = vsub.f32 %v38812_v2, %v39309_v21  ;;  %v62021_v50 = vpack.c.bf16 %v39309_v21, %v39306_v55  ;;  %v39774_v2 = vpop.permute.xlu1 %39773 }
 0x77e   : > { %38234 = vmatmul.mubr.f32.vlgmr.msra.gmra.mrb[0].mxu0 %v61806_v37 }
 0x77f   : > { %54441 = vmatpush1.bf16.msra.mxu0 %v61849_v41  ;;  %38308 = vmatprep.mubr.f32.mxu0 %v56174_v1  ;;  %v54464_v41 = vpack.c.bf16 %v38910_v46, %v38898_v8  ;;  %v54491_v44 = vpack.c.bf16 %v61983_v5, %v61985_v63 }
 0x780   : > { %54461 = vmatprep.subr.bf16.mxu0 %v61955_v13 }
 0x781   : > { %v39770_v46 = vpop.permute.xlu1 %39769 }
 0x783   : > { %52351 = vmatmul.mubr.f32.vlgmr.msra.gmra.mrb[0].mxu1 %v61806_v37 }
 0x784   : > { %54459 = vmatpush3.bf16.msra.mxu1 %v61865_v53  ;;  %52357 = vmatprep.mubr.msk.f32.mxu1 %vm56176_vm1, %v56174_v1  ;;  %v39392_v53 = vand.u32 4294901760, %v61983_v5 }
 0x785   : > { %54484 = vmatprep.subr.bf16.mxu1 %v56175_v4  ;;  %v39776_v57 = vpop.permute.xlu1 %39775 }
 0x786   : > { %38310 = vmatmul.mubr.f32.vlgmr.msra.gmra.mrb[0].mxu0 %v61806_v37  ;;  %v39393_v14 = vsub.f32 %v61983_v5, %v39392_v53 }
 0x787   : > { %54463 = vmatpush1.bf16.msra.mxu0 %v61999_v23  ;;  %38882 = vmatprep.mubr.f32.mxu0 %v56174_v1 }
 0x788   : > { %54465 = vmatprep.subr.bf16.mxu0 %v54464_v41  ;;  %v39394_v25 = vand.u32 4294901760, %v39393_v14  ;;  %v54497_v14 = vpack.c.bf16 %v39392_v53, %v39385_v34 }
 0x78a   : > { %v54488_v49 = vpack.c.bf16 %v39394_v25, %v39387_v43  ;;  %v62112_v43 = vsub.f32 %v39796_v40, %v62090_v27 }
 0x78b   : > { %52358 = vmatmul.mubr.f32.vlgmr.msra.gmra.mrb[0].mxu1 %v61806_v37  ;;  %v39780_v37 = vpop.permute.xlu0 %39779 }
 0x78c   : > { %54486 = vmatpush3.bf16.msra.mxu1 %v62021_v50  ;;  %52364 = vmatprep.mubr.msk.f32.mxu1 %vm56176_vm1, %v56174_v1  ;;  %v39790_v42 = vsel %vm39785_vm9, %v39780_v37, %v39782_v35 }
 0x78d   : > { %54487 = vmatprep.subr.bf16.mxu1 %v56175_v4  ;;  %v39800_v29 = vsel %vm234_vm2, %v39790_v42, 0 }
 0x78e   : > { %38888 = vmatmul.mubr.f32.vlgmr.msra.gmra.mrb[0].mxu0 %v38887_v18  ;;  %v39808_v55 = vand.u32 4294901760, %v39800_v29 }
 0x78f   : > { %54467 = vmatpush1.bf16.msra.mxu0 %v54466_v24  ;;  %38978 = vmatprep.mubr.f32.mxu0 %v56174_v1  ;;  %v39772_v47 = vpop.permute.xlu0 %39771  ;;  %v39788_v24 = vsel %vm39785_vm9, %v39774_v2, %v39776_v57  ;;  %v40772_v57 = vpop.permute.xlu1 %40771 }
 0x790   : > { %54469 = vmatprep.subr.bf16.mxu0 %v54468_v17  ;;  %v39787_v30 = vsel %vm39785_vm9, %v39772_v47, %v39774_v2  ;;  %v62062_v0 = vsub.f32 %v39800_v29, %v39808_v55  ;;  %v39786_v51 = vsel %vm39785_vm9, %v39770_v46, %v39772_v47  ;;  %v40296_v25 = vand.u32 4294901760, %v39788_v24 }
 0x791   : > { %v39804_v8 = vand.u32 4294901760, %v39787_v30  ;;  %v39806_v3 = vand.u32 4294901760, %v39786_v51 }
 0x792   : > { %v39898_v62 = vand.u32 4294901760, %v62062_v0  ;;  %v62121_v47 = vsub.f32 %v39788_v24, %v40296_v25 }
 0x793   : > { %52365 = vmatmul.mubr.f32.vlgmr.msra.gmra.mrb[0].mxu1 %v38887_v18  ;;  %v39778_v21 = vpop.permute.xlu0 %39777  ;;  %v62065_v56 = vsub.f32 %v39787_v30, %v39804_v8  ;;  %v62107_v34 = vsub.f32 %v39786_v51, %v39806_v3 }
 0x794   : > { %54489 = vmatpush3.bf16.msra.mxu1 %v54488_v49  ;;  %52371 = vmatprep.mubr.msk.f32.mxu1 %vm56176_vm1, %v56174_v1  ;;  %v39789_v41 = vsel %vm39785_vm9, %v39778_v21, %v39780_v37  ;;  %v39899_v5 = vsub.f32 %v62062_v0, %v39898_v62 }
 0x795   : > { %54490 = vmatprep.subr.bf16.mxu1 %v56175_v4  ;;  %v39886_v12 = vand.u32 4294901760, %v62065_v56  ;;  %v54510_v51 = vpack.c.bf16 %v62062_v0, %v62065_v56 }
 0x796   : > { %38980 = vmatmul.mubr.f32.vlgmr.msra.gmra.mrb[0].mxu0 %v61946_v19  ;;  %v39900_v49 = vand.u32 4294901760, %v39899_v5 }
 0x797   : > { %54471 = vmatpush1.bf16.msra.mxu0 %v54470_v48  ;;  %39058 = vmatprep.mubr.f32.mxu0 %v56174_v1  ;;  %v39784_v54 = vpop.permute.xlu0 %39783  ;;  %v39887_v63 = vsub.f32 %v62065_v56, %v39886_v12  ;;  %v39892_v48 = vand.u32 4294901760, %v62107_v34  ;;  %v54518_v5 = vpack.c.bf16 %v39898_v62, %v39886_v12  ;;  %v49810_v12 = vld [vmem:[%s63392_s1 + $0x168] sm:$0xff] }
 0x798   : > { %54473 = vmatprep.subr.bf16.mxu0 %v61955_v13  ;;  %v39791_v7 = vsel %vm39785_vm9, %v39782_v35, %v39784_v54 }
 0x799   : > { %v39802_v18 = vsel %vm234_vm2, %v39791_v7, 0  ;;  %v39888_v17 = vand.u32 4294901760, %v39887_v63  ;;  %v39893_v29 = vsub.f32 %v62107_v34, %v39892_v48 }
 0x79b   : > { %52372 = vmatmul.mubr.f32.vlgmr.msra.gmra.mrb[0].mxu1 %v61946_v19 }
 0x79c   : > { %54492 = vmatpush3.bf16.msra.mxu1 %v54491_v44  ;;  %52378 = vmatprep.mubr.msk.f32.mxu1 %vm56176_vm1, %v56174_v1  ;;  %v62124_v44 = vand.u32 4294901760, %v62112_v43 }
 0x79d   : > { %54493 = vmatprep.subr.bf16.mxu1 %v56175_v4 }
 0x79e   : > { %39061 = vmatmul.mubr.f32.vlgmr.msra.gmra.mrb[0].mxu0 %v61972_v61 }
 0x79f   : > { %54475 = vmatpush1.bf16.msra.mxu0 %v61999_v23  ;;  %39135 = vmatprep.mubr.f32.mxu0 %v56174_v1 }
 0x7a0   : > { %54477 = vmatprep.subr.bf16.mxu0 %v54476_v36  ;;  %v39876_v36 = vsub.f32 %v62112_v43, %v62124_v44 }
 0x7a2   : > { %v39877_v20 = vand.u32 4294901760, %v39876_v36 }
 0x7a3   : > { %52379 = vmatmul.mubr.f32.vlgmr.msra.gmra.mrb[0].mxu1 %v61972_v61  ;;  %v39798_v61 = vsel %vm234_vm2, %v39789_v41, 0 }
 0x7a4   : > { %54495 = vmatpush3.bf16.msra.mxu1 %v62021_v50  ;;  %52385 = vmatprep.mubr.msk.f32.mxu1 %vm56176_vm1, %v56174_v1  ;;  %v39810_v9 = vand.u32 4294901760, %v39798_v61 }
 0x7a5   : > { %54496 = vmatprep.subr.bf16.mxu1 %v56175_v4 }
 0x7a6   : > { %39139 = vmatmul.mubr.f32.vlgmr.msra.gmra.mrb[0].mxu0 %v61988_v26  ;;  %v62105_v53 = vsub.f32 %v39798_v61, %v39810_v9  ;;  %v62133_v2 = vpack.c.bf16 %v39810_v9, %v39806_v3 }
 0x7a7   : > { %54479 = vmatpush1.bf16.msra.mxu0 %v54478_v45  ;;  %39221 = vmatprep.mubr.f32.mxu0 %v56174_v1 }
 0x7a8   : > { %54481 = vmatprep.subr.bf16.mxu0 %v61955_v13  ;;  %v62097_v13 = vpack.c.bf16 %v39808_v55, %v39804_v8  ;;  %v39904_v37 = vand.u32 4294901760, %v62105_v53  ;;  %v39894_v55 = vand.u32 4294901760, %v39893_v29  ;;  %v54512_v7 = vpack.c.bf16 %v62105_v53, %v62107_v34 }
 0x7aa   : > { %v39905_v42 = vsub.f32 %v62105_v53, %v39904_v37  ;;  %v40785_v53 = vsel %vm230_vm0, %v49810_v12, 0 }
 0x7ab   : > { %52386 = vmatmul.mubr.f32.vlgmr.msra.gmra.mrb[0].mxu1 %v61988_v26  ;;  %v40299_v26 = vand.u32 4294901760, %v39802_v18 }
 0x7ac   : > { %54498 = vmatpush3.bf16.msra.mxu1 %v54497_v14  ;;  %52392 = vmatprep.mubr.msk.f32.mxu1 %vm56176_vm1, %v56174_v1  ;;  %v39906_v21 = vand.u32 4294901760, %v39905_v42 }
 0x7ad   : > { %54499 = vmatprep.subr.bf16.mxu1 %v56175_v4  ;;  %v62119_v35 = vsub.f32 %v39802_v18, %v40299_v26  ;;  %v62149_v46 = vpack.c.bf16 %v40299_v26, %v40296_v25  ;;  %v40764_v18 = vpop.permute.xlu1 %40763 }
 0x7ae   : > { %39223 = vmatmul.mubr.f32.vlgmr.msra.gmra.mrb[0].mxu0 %v61946_v19  ;;  %v54508_v45 = vpack.c.bf16 %v39906_v21, %v39894_v55 }
 0x7af   : > { %54483 = vmatpush1.bf16.msra.mxu0 %v61999_v23  ;;  %39297 = vmatprep.mubr.f32.mxu0 %v56174_v1  ;;  %v54506_v23 = vpack.c.bf16 %v39900_v49, %v39888_v17  ;;  %v40382_v30 = vand.u32 4294901760, %v62119_v35  ;;  %v54533_v3 = vpack.c.bf16 %v62119_v35, %v62121_v47 }
 0x7b0   : > { %54503 = vmatprep.subr.bf16.mxu0 %v62097_v13 }
 0x7b1   : > { %v40383_v8 = vsub.f32 %v62119_v35, %v40382_v30  ;;  %v40760_v49 = vpop.permute.xlu1 %40759 }
 0x7b3   : > { %52393 = vmatmul.mubr.f32.vlgmr.msra.gmra.mrb[0].mxu1 %v61946_v19  ;;  %v40384_v54 = vand.u32 4294901760, %v40383_v8 }
 0x7b4   : > { %54501 = vmatpush3.bf16.msra.mxu1 %v62021_v50  ;;  %52399 = vmatprep.mubr.msk.f32.mxu1 %vm56176_vm1, %v56174_v1  ;;  %v40375_v50 = vand.u32 4294901760, %v62121_v47 }
 0x7b5   : > { %54526 = vmatprep.subr.bf16.mxu1 %v56175_v4  ;;  %v40766_v36 = vpop.permute.xlu1 %40765 }
 0x7b6   : > { %39299 = vmatmul.mubr.f32.vlgmr.msra.gmra.mrb[0].mxu0 %v61946_v19  ;;  %v40376_v41 = vsub.f32 %v62121_v47, %v40375_v50  ;;  %v54539_v8 = vpack.c.bf16 %v40382_v30, %v40375_v50 }
 0x7b7   : > { %54505 = vmatpush1.bf16.msra.mxu0 %v62133_v2  ;;  %39872 = vmatprep.mubr.f32.mxu0 %v56174_v1 }
 0x7b8   : > { %54507 = vmatprep.subr.bf16.mxu0 %v54506_v23  ;;  %v40377_v61 = vand.u32 4294901760, %v40376_v41  ;;  %v62230_v41 = vand.u32 4294901760, %v40785_v53 }
 0x7ba   : > { %v54530_v40 = vpack.c.bf16 %v40384_v54, %v40377_v61  ;;  %v62256_v61 = vsub.f32 %v40785_v53, %v62230_v41 }
 0x7bb   : > { %52400 = vmatmul.mubr.f32.vlgmr.msra.gmra.mrb[0].mxu1 %v61946_v19  ;;  %v40770_v19 = vpop.permute.xlu0 %40769 }
 0x7bc   : > { %54528 = vmatpush3.bf16.msra.mxu1 %v62149_v46  ;;  %52406 = vmatprep.mubr.msk.f32.mxu1 %vm56176_vm1, %v56174_v1  ;;  %v40779_v14 = vsel %vm39785_vm9, %v40770_v19, %v40772_v57 }
 0x7bd   : > { %54529 = vmatprep.subr.bf16.mxu1 %v56175_v4  ;;  %v40789_v24 = vsel %vm234_vm2, %v40779_v14, 0 }
 0x7be   : > { %39878 = vmatmul.mubr.f32.vlgmr.msra.gmra.mrb[0].mxu0 %v39877_v20  ;;  %v40797_v25 = vand.u32 4294901760, %v40789_v24 }
 0x7bf   : > { %54509 = vmatpush1.bf16.msra.mxu0 %v54508_v45  ;;  %39968 = vmatprep.mubr.f32.mxu0 %v56174_v1  ;;  %v40762_v9 = vpop.permute.xlu0 %40761 }
 0x7c0   : > { %54511 = vmatprep.subr.bf16.mxu0 %v54510_v51  ;;  %v40776_v63 = vsel %vm39785_vm9, %v40762_v9, %v40764_v18  ;;  %v62196_v56 = vsub.f32 %v40789_v24, %v40797_v25  ;;  %v40775_v29 = vsel %vm39785_vm9, %v40760_v49, %v40762_v9 }
 0x7c1   : > { %v40793_v17 = vand.u32 4294901760, %v40776_v63  ;;  %v40795_v55 = vand.u32 4294901760, %v40775_v29 }
 0x7c2   : > { %v40887_v34 = vand.u32 4294901760, %v62196_v56 }
 0x7c3   : > { %52407 = vmatmul.mubr.f32.vlgmr.msra.gmra.mrb[0].mxu1 %v39877_v20  ;;  %v40768_v26 = vpop.permute.xlu0 %40767  ;;  %v62199_v62 = vsub.f32 %v40776_v63, %v40793_v17  ;;  %v40777_v20 = vsel %vm39785_vm9, %v40764_v18, %v40766_v36  ;;  %v62239_v45 = vpack.c.bf16 %v40797_v25, %v40793_v17  ;;  %v62249_v50 = vsub.f32 %v40775_v29, %v40795_v55  ;;  %v41761_v36 = vpop.permute.xlu1 %41760 }
 0x7c4   : > { %54531 = vmatpush3.bf16.msra.mxu1 %v54530_v40  ;;  %52413 = vmatprep.mubr.msk.f32.mxu1 %vm56176_vm1, %v56174_v1  ;;  %v40778_v0 = vsel %vm39785_vm9, %v40768_v26, %v40770_v19  ;;  %v40888_v47 = vsub.f32 %v62196_v56, %v40887_v34  ;;  %v41285_v54 = vand.u32 4294901760, %v40777_v20 }
 0x7c5   : > { %54532 = vmatprep.subr.bf16.mxu1 %v56175_v4  ;;  %v40787_v42 = vsel %vm234_vm2, %v40778_v0, 0  ;;  %v54552_v29 = vpack.c.bf16 %v62196_v56, %v62199_v62  ;;  %v49811_v56 = vld [vmem:[%s63392_s1 + $0xa8] sm:$0xff] }
 0x7c6   : > { %39970 = vmatmul.mubr.f32.vlgmr.msra.gmra.mrb[0].mxu0 %v62090_v27  ;;  %v40799_v21 = vand.u32 4294901760, %v40787_v42  ;;  %v40889_v40 = vand.u32 4294901760, %v40888_v47  ;;  %v62269_v9 = vsub.f32 %v40777_v20, %v41285_v54 }
 0x7c7   : > { %54513 = vmatpush1.bf16.msra.mxu0 %v54512_v7  ;;  %40048 = vmatprep.mubr.f32.mxu0 %v56174_v1  ;;  %v40774_v23 = vpop.permute.xlu0 %40773  ;;  %v40881_v7 = vand.u32 4294901760, %v62249_v50 }
 0x7c8   : > { %54515 = vmatprep.subr.bf16.mxu0 %v62097_v13  ;;  %v62247_v30 = vsub.f32 %v40787_v42, %v40799_v21  ;;  %v62283_v18 = vpack.c.bf16 %v40799_v21, %v40795_v55  ;;  %v41364_v63 = vand.u32 4294901760, %v62269_v9 }
 0x7c9   : > { %v40882_v24 = vsub.f32 %v62249_v50, %v40881_v7 }
 0x7ca   : > { %v40893_v19 = vand.u32 4294901760, %v62247_v30  ;;  %v41365_v0 = vsub.f32 %v62269_v9, %v41364_v63 }
 0x7cb   : > { %52414 = vmatmul.mubr.f32.vlgmr.msra.gmra.mrb[0].mxu1 %v62090_v27  ;;  %v40883_v25 = vand.u32 4294901760, %v40882_v24 }
 0x7cc   : > { %54534 = vmatpush3.bf16.msra.mxu1 %v54533_v3  ;;  %52420 = vmatprep.mubr.msk.f32.mxu1 %vm56176_vm1, %v56174_v1  ;;  %v62272_v3 = vand.u32 4294901760, %v62256_v61  ;;  %v40894_v14 = vsub.f32 %v62247_v30, %v40893_v19  ;;  %v41366_v42 = vand.u32 4294901760, %v41365_v0 }
 0x7cd   : > { %54535 = vmatprep.subr.bf16.mxu1 %v56175_v4 }
 0x7ce   : > { %40051 = vmatmul.mubr.f32.vlgmr.msra.gmra.mrb[0].mxu0 %v62112_v43  ;;  %v40895_v26 = vand.u32 4294901760, %v40894_v14 }
 0x7cf   : > { %54517 = vmatpush1.bf16.msra.mxu0 %v62133_v2  ;;  %40125 = vmatprep.mubr.f32.mxu0 %v56174_v1 }
 0x7d0   : > { %54519 = vmatprep.subr.bf16.mxu0 %v54518_v5  ;;  %v40865_v5 = vsub.f32 %v62256_v61, %v62272_v3 }
 0x7d2   : > { %v40866_v12 = vand.u32 4294901760, %v40865_v5  ;;  %v41775_v5 = vsel %vm230_vm0, %v49811_v56, 0 }
 0x7d3   : > { %52421 = vmatmul.mubr.f32.vlgmr.msra.gmra.mrb[0].mxu1 %v62112_v43  ;;  %v54520_v43 = vpack.c.bf16 %v39904_v37, %v39892_v48  ;;  %v40875_v37 = vand.u32 4294901760, %v62199_v62  ;;  %v40780_v48 = vsel %vm39785_vm9, %v40772_v57, %v40774_v23  ;;  %v62374_v0 = vand.u32 4294901760, %v41775_v5 }
 0x7d4   : > { %54537 = vmatpush3.bf16.msra.mxu1 %v62149_v46  ;;  %52427 = vmatprep.mubr.msk.f32.mxu1 %vm56176_vm1, %v56174_v1 }
 0x7d5   : > { %54538 = vmatprep.subr.bf16.mxu1 %v56175_v4  ;;  %v40876_v35 = vsub.f32 %v62199_v62, %v40875_v37  ;;  %v54560_v47 = vpack.c.bf16 %v40887_v34, %v40875_v37  ;;  %v54562_v34 = vpack.c.bf16 %v40893_v19, %v40881_v7 }
 0x7d6   : > { %40129 = vmatmul.mubr.f32.vlgmr.msra.gmra.mrb[0].mxu0 %v62124_v44 }
 0x7d7   : > { %54521 = vmatpush1.bf16.msra.mxu0 %v54520_v43  ;;  %40211 = vmatprep.mubr.f32.mxu0 %v56174_v1  ;;  %v40877_v51 = vand.u32 4294901760, %v40876_v35  ;;  %v54550_v43 = vpack.c.bf16 %v40895_v26, %v40883_v25 }
 0x7d8   : > { %54523 = vmatprep.subr.bf16.mxu0 %v62097_v13  ;;  %v40791_v13 = vsel %vm234_vm2, %v40780_v48, 0  ;;  %v54554_v48 = vpack.c.bf16 %v62247_v30, %v62249_v50 }
 0x7db   : > { %52428 = vmatmul.mubr.f32.vlgmr.msra.gmra.mrb[0].mxu1 %v62124_v44  ;;  %v41288_v44 = vand.u32 4294901760, %v40791_v13 }
 0x7dc   : > { %54540 = vmatpush3.bf16.msra.mxu1 %v54539_v8  ;;  %52434 = vmatprep.mubr.msk.f32.mxu1 %vm56176_vm1, %v56174_v1 }
 0x7dd   : > { %54541 = vmatprep.subr.bf16.mxu1 %v56175_v4  ;;  %v62267_v57 = vsub.f32 %v40791_v13, %v41288_v44  ;;  %v62305_v49 = vpack.c.bf16 %v41288_v44, %v41285_v54  ;;  %v41753_v13 = vpop.permute.xlu1 %41752 }
 0x7de   : > { %40213 = vmatmul.mubr.f32.vlgmr.msra.gmra.mrb[0].mxu0 %v62090_v27 }
 0x7df   : > { %54525 = vmatpush1.bf16.msra.mxu0 %v62133_v2  ;;  %40287 = vmatprep.mubr.f32.mxu0 %v56174_v1  ;;  %v54548_v2 = vpack.c.bf16 %v40889_v40, %v40877_v51  ;;  %v54575_v55 = vpack.c.bf16 %v62267_v57, %v62269_v9 }
 0x7e0   : > { %54545 = vmatprep.subr.bf16.mxu0 %v62239_v45 }
 0x7e1   : > { %v41749_v40 = vpop.permute.xlu1 %41748 }
 0x7e3   : > { %52435 = vmatmul.mubr.f32.vlgmr.msra.gmra.mrb[0].mxu1 %v62090_v27 }
 0x7e4   : > { %54543 = vmatpush3.bf16.msra.mxu1 %v62149_v46  ;;  %52441 = vmatprep.mubr.msk.f32.mxu1 %vm56176_vm1, %v56174_v1  ;;  %v41371_v46 = vand.u32 4294901760, %v62267_v57 }
 0x7e5   : > { %54568 = vmatprep.subr.bf16.mxu1 %v56175_v4  ;;  %v41755_v19 = vpop.permute.xlu1 %41754 }
 0x7e6   : > { %40289 = vmatmul.mubr.f32.vlgmr.msra.gmra.mrb[0].mxu0 %v62090_v27  ;;  %v41372_v17 = vsub.f32 %v62267_v57, %v41371_v46 }
 0x7e7   : > { %54547 = vmatpush1.bf16.msra.mxu0 %v62283_v18  ;;  %40861 = vmatprep.mubr.f32.mxu0 %v56174_v1 }
 0x7e8   : > { %54549 = vmatprep.subr.bf16.mxu0 %v54548_v2  ;;  %v41373_v23 = vand.u32 4294901760, %v41372_v17  ;;  %v54581_v17 = vpack.c.bf16 %v41371_v46, %v41364_v63 }
 0x7ea   : > { %v54572_v53 = vpack.c.bf16 %v41373_v23, %v41366_v42  ;;  %v62396_v42 = vsub.f32 %v41775_v5, %v62374_v0 }
 0x7eb   : > { %52442 = vmatmul.mubr.f32.vlgmr.msra.gmra.mrb[0].mxu1 %v62090_v27  ;;  %v41759_v27 = vpop.permute.xlu0 %41758 }
 0x7ec   : > { %54570 = vmatpush3.bf16.msra.mxu1 %v62305_v49  ;;  %52448 = vmatprep.mubr.msk.f32.mxu1 %vm56176_vm1, %v56174_v1  ;;  %v41769_v8 = vsel %vm41764_vm10, %v41759_v27, %v41761_v36 }
 0x7ed   : > { %54571 = vmatprep.subr.bf16.mxu1 %v56175_v4  ;;  %v41779_v20 = vsel %vm234_vm2, %v41769_v8, 0 }
 0x7ee   : > { %40867 = vmatmul.mubr.f32.vlgmr.msra.gmra.mrb[0].mxu0 %v40866_v12  ;;  %v41787_v54 = vand.u32 4294901760, %v41779_v20 }
 0x7ef   : > { %54551 = vmatpush1.bf16.msra.mxu0 %v54550_v43  ;;  %40957 = vmatprep.mubr.f32.mxu0 %v56174_v1  ;;  %v41751_v21 = vpop.permute.xlu0 %41750  ;;  %v41767_v43 = vsel %vm41764_vm10, %v41753_v13, %v41755_v19  ;;  %v42751_v19 = vpop.permute.xlu1 %42750 }
 0x7f0   : > { %54553 = vmatprep.subr.bf16.mxu0 %v54552_v29  ;;  %v41766_v35 = vsel %vm41764_vm10, %v41751_v21, %v41753_v13  ;;  %v62346_v14 = vsub.f32 %v41779_v20, %v41787_v54  ;;  %v41765_v24 = vsel %vm41764_vm10, %v41749_v40, %v41751_v21  ;;  %v42275_v23 = vand.u32 4294901760, %v41767_v43 }
 0x7f1   : > { %v41783_v51 = vand.u32 4294901760, %v41766_v35  ;;  %v41785_v25 = vand.u32 4294901760, %v41765_v24 }
 0x7f2   : > { %v41877_v26 = vand.u32 4294901760, %v62346_v14  ;;  %v62405_v21 = vsub.f32 %v41767_v43, %v42275_v23 }
 0x7f3   : > { %52449 = vmatmul.mubr.f32.vlgmr.msra.gmra.mrb[0].mxu1 %v40866_v12  ;;  %v41757_v44 = vpop.permute.xlu0 %41756  ;;  %v62349_v62 = vsub.f32 %v41766_v35, %v41783_v51  ;;  %v62391_v63 = vsub.f32 %v41765_v24, %v41785_v25 }
 0x7f4   : > { %54573 = vmatpush3.bf16.msra.mxu1 %v54572_v53  ;;  %52455 = vmatprep.mubr.msk.f32.mxu1 %vm56176_vm1, %v56174_v1  ;;  %v41768_v2 = vsel %vm41764_vm10, %v41757_v44, %v41759_v27  ;;  %v41878_v57 = vsub.f32 %v62346_v14, %v41877_v26 }
 0x7f5   : > { %54574 = vmatprep.subr.bf16.mxu1 %v56175_v4  ;;  %v41865_v50 = vand.u32 4294901760, %v62349_v62  ;;  %v54594_v24 = vpack.c.bf16 %v62346_v14, %v62349_v62 }
 0x7f6   : > { %40959 = vmatmul.mubr.f32.vlgmr.msra.gmra.mrb[0].mxu0 %v62230_v41  ;;  %v41879_v53 = vand.u32 4294901760, %v41878_v57 }
 0x7f7   : > { %54555 = vmatpush1.bf16.msra.mxu0 %v54554_v48  ;;  %41037 = vmatprep.mubr.f32.mxu0 %v56174_v1  ;;  %v41763_v37 = vpop.permute.xlu0 %41762  ;;  %v41866_v9 = vsub.f32 %v62349_v62, %v41865_v50  ;;  %v41871_v48 = vand.u32 4294901760, %v62391_v63  ;;  %v54602_v57 = vpack.c.bf16 %v41877_v26, %v41865_v50 }
 0x7f8   : > { %54557 = vmatprep.subr.bf16.mxu0 %v62239_v45  ;;  %v41770_v30 = vsel %vm41764_vm10, %v41761_v36, %v41763_v37 }
 0x7f9   : > { %v41781_v12 = vsel %vm234_vm2, %v41770_v30, 0  ;;  %v41867_v29 = vand.u32 4294901760, %v41866_v9  ;;  %v41872_v20 = vsub.f32 %v62391_v63, %v41871_v48 }
 0x7fb   : > { %52456 = vmatmul.mubr.f32.vlgmr.msra.gmra.mrb[0].mxu1 %v62230_v41 }
 0x7fc   : > { %54576 = vmatpush3.bf16.msra.mxu1 %v54575_v55  ;;  %52462 = vmatprep.mubr.msk.f32.mxu1 %vm56176_vm1, %v56174_v1  ;;  %v62408_v55 = vand.u32 4294901760, %v62396_v42 }
 0x7fd   : > { %54577 = vmatprep.subr.bf16.mxu1 %v56175_v4 }
 0x7fe   : > { %41040 = vmatmul.mubr.f32.vlgmr.msra.gmra.mrb[0].mxu0 %v62256_v61 }
 0x7ff   : > { %54559 = vmatpush1.bf16.msra.mxu0 %v62283_v18  ;;  %41114 = vmatprep.mubr.f32.mxu0 %v56174_v1 }
 0x800   : > { %54561 = vmatprep.subr.bf16.mxu0 %v54560_v47  ;;  %v41855_v47 = vsub.f32 %v62396_v42, %v62408_v55 }
 0x802   : > { %v41856_v56 = vand.u32 4294901760, %v41855_v47 }
 0x803   : > { %52463 = vmatmul.mubr.f32.vlgmr.msra.gmra.mrb[0].mxu1 %v62256_v61  ;;  %v41777_v61 = vsel %vm234_vm2, %v41768_v2, 0 }
 0x804   : > { %54579 = vmatpush3.bf16.msra.mxu1 %v62305_v49  ;;  %52469 = vmatprep.mubr.msk.f32.mxu1 %vm56176_vm1, %v56174_v1  ;;  %v41789_v7 = vand.u32 4294901760, %v41777_v61 }
 0x805   : > { %54580 = vmatprep.subr.bf16.mxu1 %v56175_v4 }
 0x806   : > { %41118 = vmatmul.mubr.f32.vlgmr.msra.gmra.mrb[0].mxu0 %v62272_v3  ;;  %v62389_v46 = vsub.f32 %v41777_v61, %v41789_v7  ;;  %v62417_v13 = vpack.c.bf16 %v41789_v7, %v41785_v25 }
 0x807   : > { %54563 = vmatpush1.bf16.msra.mxu0 %v54562_v34  ;;  %41200 = vmatprep.mubr.f32.mxu0 %v56174_v1 }
 0x808   : > { %54565 = vmatprep.subr.bf16.mxu0 %v62239_v45  ;;  %v62381_v45 = vpack.c.bf16 %v41787_v54, %v41783_v51  ;;  %v41883_v27 = vand.u32 4294901760, %v62389_v46  ;;  %v41873_v54 = vand.u32 4294901760, %v41872_v20  ;;  %v54596_v30 = vpack.c.bf16 %v62389_v46, %v62391_v63 }
 0x80a   : > { %v41884_v8 = vsub.f32 %v62389_v46, %v41883_v27  ;;  %v54604_v59 = vpack.c.bf16 %v41883_v27, %v41871_v48  ;;  %v42764_v46 = vsel %vm230_vm0, %v49812_v38, 0 }
 0x80b   : > { %52470 = vmatmul.mubr.f32.vlgmr.msra.gmra.mrb[0].mxu1 %v62272_v3  ;;  %v42278_v3 = vand.u32 4294901760, %v41781_v12 }
 0x80c   : > { %54582 = vmatpush3.bf16.msra.mxu1 %v54581_v17  ;;  %52476 = vmatprep.mubr.msk.f32.mxu1 %vm56176_vm1, %v56174_v1  ;;  %v41885_v44 = vand.u32 4294901760, %v41884_v8  ;;  %v62514_v8 = vand.u32 4294901760, %v42764_v46 }
 0x80d   : > { %54583 = vmatprep.subr.bf16.mxu1 %v56175_v4  ;;  %v62403_v36 = vsub.f32 %v41781_v12, %v42278_v3  ;;  %v62433_v40 = vpack.c.bf16 %v42278_v3, %v42275_v23  ;;  %v42743_v12 = vpop.permute.xlu1 %42742 }
 0x80e   : > { %41202 = vmatmul.mubr.f32.vlgmr.msra.gmra.mrb[0].mxu0 %v62230_v41  ;;  %v54592_v34 = vpack.c.bf16 %v41885_v44, %v41873_v54  ;;  %v62540_v47 = vsub.f32 %v42764_v46, %v62514_v8 }
 0x80f   : > { %54567 = vmatpush1.bf16.msra.mxu0 %v62283_v18  ;;  %41276 = vmatprep.mubr.f32.mxu0 %v56174_v1  ;;  %v54590_v18 = vpack.c.bf16 %v41879_v53, %v41867_v29  ;;  %v42361_v35 = vand.u32 4294901760, %v62403_v36  ;;  %v54617_v25 = vpack.c.bf16 %v62403_v36, %v62405_v21 }
 0x810   : > { %54587 = vmatprep.subr.bf16.mxu0 %v62381_v45  ;;  %v62556_v28 = vand.u32 4294901760, %v62540_v47 }
 0x811   : > { %v42362_v51 = vsub.f32 %v62403_v36, %v42361_v35  ;;  %v42739_v31 = vpop.permute.xlu1 %42738 }
 0x813   : > { %52477 = vmatmul.mubr.f32.vlgmr.msra.gmra.mrb[0].mxu1 %v62230_v41  ;;  %v42363_v37 = vand.u32 4294901760, %v42362_v51 }
 0x814   : > { %54585 = vmatpush3.bf16.msra.mxu1 %v62305_v49  ;;  %52483 = vmatprep.mubr.msk.f32.mxu1 %vm56176_vm1, %v56174_v1  ;;  %v42354_v49 = vand.u32 4294901760, %v62405_v21 }
 0x815   : > { %54610 = vmatprep.subr.bf16.mxu1 %v56175_v4  ;;  %v42745_v27 = vpop.permute.xlu1 %42744 }
 0x816   : > { %41278 = vmatmul.mubr.f32.vlgmr.msra.gmra.mrb[0].mxu0 %v62230_v41  ;;  %v42355_v2 = vsub.f32 %v62405_v21, %v42354_v49  ;;  %v54623_v15 = vpack.c.bf16 %v42361_v35, %v42354_v49  ;;  %v42756_v20 = vsel %vm41764_vm10, %v42743_v12, %v42745_v27 }
 0x817   : > { %54589 = vmatpush1.bf16.msra.mxu0 %v62417_v13  ;;  %41851 = vmatprep.mubr.f32.mxu0 %v56174_v1  ;;  %v43264_v49 = vand.u32 4294901760, %v42756_v20 }
 0x818   : > { %54591 = vmatprep.subr.bf16.mxu0 %v54590_v18  ;;  %v42356_v61 = vand.u32 4294901760, %v42355_v2 }
 0x81a   : > { %v54614_v5 = vpack.c.bf16 %v42363_v37, %v42356_v61  ;;  %v42844_v61 = vsub.f32 %v62540_v47, %v62556_v28 }
 0x81b   : > { %52484 = vmatmul.mubr.f32.vlgmr.msra.gmra.mrb[0].mxu1 %v62230_v41  ;;  %v42749_v41 = vpop.permute.xlu0 %42748 }
 0x81c   : > { %54612 = vmatpush3.bf16.msra.mxu1 %v62433_v40  ;;  %52490 = vmatprep.mubr.msk.f32.mxu1 %vm56176_vm1, %v56174_v1  ;;  %v42758_v17 = vsel %vm41764_vm10, %v42749_v41, %v42751_v19 }
 0x81d   : > { %54613 = vmatprep.subr.bf16.mxu1 %v56175_v4  ;;  %v42768_v43 = vsel %vm234_vm2, %v42758_v17, 0 }
 0x81e   : > { %41857 = vmatmul.mubr.f32.vlgmr.msra.gmra.mrb[0].mxu0 %v41856_v56  ;;  %v42776_v23 = vand.u32 4294901760, %v42768_v43 }
 0x81f   : > { %54593 = vmatpush1.bf16.msra.mxu0 %v54592_v34  ;;  %41947 = vmatprep.mubr.f32.mxu0 %v56174_v1  ;;  %v42741_v7 = vpop.permute.xlu0 %42740 }
 0x820   : > { %54595 = vmatprep.subr.bf16.mxu0 %v54594_v24  ;;  %v42755_v9 = vsel %vm41764_vm10, %v42741_v7, %v42743_v12  ;;  %v62480_v52 = vsub.f32 %v42768_v43, %v42776_v23  ;;  %v43740_v12 = vpop.permute.xlu1 %43739 }
 0x821   : > { %v42772_v29 = vand.u32 4294901760, %v42755_v9 }
 0x822   : > { %v42866_v63 = vand.u32 4294901760, %v62480_v52 }
 0x823   : > { %52491 = vmatmul.mubr.f32.vlgmr.msra.gmra.mrb[0].mxu1 %v41856_v56  ;;  %v42747_v3 = vpop.permute.xlu0 %42746  ;;  %v62483_v62 = vsub.f32 %v42755_v9, %v42772_v29  ;;  %v62523_v22 = vpack.c.bf16 %v42776_v23, %v42772_v29  ;;  %v62553_v56 = vsub.f32 %v42756_v20, %v43264_v49 }
 0x824   : > { %54615 = vmatpush3.bf16.msra.mxu1 %v54614_v5  ;;  %52497 = vmatprep.mubr.msk.f32.mxu1 %vm56176_vm1, %v56174_v1  ;;  %v42757_v14 = vsel %vm41764_vm10, %v42747_v3, %v42749_v41  ;;  %v42867_v33 = vsub.f32 %v62480_v52, %v42866_v63  ;;  %v43732_v3 = vpop.permute.xlu1 %43731 }
 0x825   : > { %54616 = vmatprep.subr.bf16.mxu1 %v56175_v4  ;;  %v42766_v50 = vsel %vm234_vm2, %v42757_v14, 0  ;;  %v42854_v53 = vand.u32 4294901760, %v62483_v62 }
 0x826   : > { %41949 = vmatmul.mubr.f32.vlgmr.msra.gmra.mrb[0].mxu0 %v62374_v0  ;;  %v42778_v48 = vand.u32 4294901760, %v42766_v50  ;;  %v42868_v54 = vand.u32 4294901760, %v42867_v33 }
 0x827   : > { %54597 = vmatpush1.bf16.msra.mxu0 %v54596_v30  ;;  %42027 = vmatprep.mubr.f32.mxu0 %v56174_v1  ;;  %v42753_v26 = vpop.permute.xlu0 %42752  ;;  %v42855_v36 = vsub.f32 %v62483_v62, %v42854_v53  ;;  %v42845_v30 = vand.u32 4294901760, %v42844_v61 }
 0x828   : > { %54599 = vmatprep.subr.bf16.mxu0 %v62381_v45  ;;  %v42759_v6 = vsel %vm41764_vm10, %v42751_v19, %v42753_v26  ;;  %v62531_v21 = vsub.f32 %v42766_v50, %v42778_v48  ;;  %v43728_v26 = vpop.permute.xlu1 %43727 }
 0x829   : > { %v42856_v44 = vand.u32 4294901760, %v42855_v36 }
 0x82a   : > { %v42872_v32 = vand.u32 4294901760, %v62531_v21 }
 0x82b   : > { %52498 = vmatmul.mubr.f32.vlgmr.msra.gmra.mrb[0].mxu1 %v62374_v0 }
 0x82c   : > { %54618 = vmatpush3.bf16.msra.mxu1 %v54617_v25  ;;  %52504 = vmatprep.mubr.msk.f32.mxu1 %vm56176_vm1, %v56174_v1  ;;  %v42873_v39 = vsub.f32 %v62531_v21, %v42872_v32  ;;  %v54636_v25 = vpack.c.bf16 %v62480_v52, %v62483_v62  ;;  %v49813_v52 = vld [vmem:[%s63392_s1 + $0xb0] sm:$0xff] }
 0x82d   : > { %54619 = vmatprep.subr.bf16.mxu1 %v56175_v4  ;;  %v43754_v27 = vsel %vm230_vm0, %v49813_v52, 0 }
 0x82e   : > { %42030 = vmatmul.mubr.f32.vlgmr.msra.gmra.mrb[0].mxu0 %v62396_v42  ;;  %v42874_v24 = vand.u32 4294901760, %v42873_v39 }
 0x82f   : > { %54601 = vmatpush1.bf16.msra.mxu0 %v62417_v13  ;;  %42104 = vmatprep.mubr.f32.mxu0 %v56174_v1 }
 0x830   : > { %54603 = vmatprep.subr.bf16.mxu0 %v54602_v57 }
 0x833   : > { %52505 = vmatmul.mubr.f32.vlgmr.msra.gmra.mrb[0].mxu1 %v62396_v42  ;;  %v42754_v42 = vsel %vm41764_vm10, %v42739_v31, %v42741_v7  ;;  %v54644_v31 = vpack.c.bf16 %v42866_v63, %v42854_v53 }
 0x834   : > { %54621 = vmatpush3.bf16.msra.mxu1 %v62433_v40  ;;  %52511 = vmatprep.mubr.msk.f32.mxu1 %vm56176_vm1, %v56174_v1  ;;  %v42774_v18 = vand.u32 4294901760, %v42754_v42 }
 0x835   : > { %54622 = vmatprep.subr.bf16.mxu1 %v56175_v4 }
 0x836   : > { %42108 = vmatmul.mubr.f32.vlgmr.msra.gmra.mrb[0].mxu0 %v62408_v55  ;;  %v62533_v35 = vsub.f32 %v42754_v42, %v42774_v18  ;;  %v62567_v34 = vpack.c.bf16 %v42778_v48, %v42774_v18 }
 0x837   : > { %54605 = vmatpush1.bf16.msra.mxu0 %v54604_v59  ;;  %42190 = vmatprep.mubr.f32.mxu0 %v56174_v1 }
 0x838   : > { %54607 = vmatprep.subr.bf16.mxu0 %v62381_v45  ;;  %v42770_v45 = vsel %vm234_vm2, %v42759_v6, 0  ;;  %v42860_v51 = vand.u32 4294901760, %v62533_v35  ;;  %v54638_v17 = vpack.c.bf16 %v62531_v21, %v62533_v35  ;;  %v62658_v21 = vand.u32 4294901760, %v43754_v27 }
 0x83a   : > { %v42861_v37 = vsub.f32 %v62533_v35, %v42860_v51  ;;  %v54646_v46 = vpack.c.bf16 %v42872_v32, %v42860_v51 }
 0x83b   : > { %52512 = vmatmul.mubr.f32.vlgmr.msra.gmra.mrb[0].mxu1 %v62408_v55  ;;  %v43267_v55 = vand.u32 4294901760, %v42770_v45 }
 0x83c   : > { %54624 = vmatpush3.bf16.msra.mxu1 %v54623_v15  ;;  %52518 = vmatprep.mubr.msk.f32.mxu1 %vm56176_vm1, %v56174_v1  ;;  %v42862_v5 = vand.u32 4294901760, %v42861_v37 }
 0x83d   : > { %54625 = vmatprep.subr.bf16.mxu1 %v56175_v4  ;;  %v62551_v2 = vsub.f32 %v42770_v45, %v43267_v55  ;;  %v62589_v41 = vpack.c.bf16 %v43267_v55, %v43264_v49  ;;  %v43734_v45 = vpop.permute.xlu1 %43733 }
 0x83e   : > { %42192 = vmatmul.mubr.f32.vlgmr.msra.gmra.mrb[0].mxu0 %v62374_v0  ;;  %v54634_v58 = vpack.c.bf16 %v42874_v24, %v42862_v5  ;;  %v43746_v55 = vsel %vm43743_vm11, %v43732_v3, %v43734_v45 }
 0x83f   : > { %54609 = vmatpush1.bf16.msra.mxu0 %v62417_v13  ;;  %42266 = vmatprep.mubr.f32.mxu0 %v56174_v1  ;;  %v54632_v13 = vpack.c.bf16 %v42868_v54, %v42856_v44  ;;  %v43350_v60 = vand.u32 4294901760, %v62551_v2  ;;  %v54659_v9 = vpack.c.bf16 %v62551_v2, %v62553_v56  ;;  %v44254_v51 = vand.u32 4294901760, %v43746_v55 }
 0x840   : > { %54629 = vmatprep.subr.bf16.mxu0 %v62523_v22 }
 0x841   : > { %v43351_v11 = vsub.f32 %v62551_v2, %v43350_v60  ;;  %v62680_v2 = vsub.f32 %v43754_v27, %v62658_v21 }
 0x843   : > { %52519 = vmatmul.mubr.f32.vlgmr.msra.gmra.mrb[0].mxu1 %v62374_v0  ;;  %v43352_v19 = vand.u32 4294901760, %v43351_v11 }
 0x844   : > { %54627 = vmatpush3.bf16.msra.mxu1 %v62433_v40  ;;  %52525 = vmatprep.mubr.msk.f32.mxu1 %vm56176_vm1, %v56174_v1  ;;  %v43343_v40 = vand.u32 4294901760, %v62553_v56 }
 0x845   : > { %54652 = vmatprep.subr.bf16.mxu1 %v56175_v4 }
 0x846   : > { %42268 = vmatmul.mubr.f32.vlgmr.msra.gmra.mrb[0].mxu0 %v62374_v0  ;;  %v43344_v16 = vsub.f32 %v62553_v56, %v43343_v40  ;;  %v54665_v33 = vpack.c.bf16 %v43350_v60, %v43343_v40  ;;  %v62689_v60 = vsub.f32 %v43746_v55, %v44254_v51  ;;  %v62692_v40 = vand.u32 4294901760, %v62680_v2 }
 0x847   : > { %54631 = vmatpush1.bf16.msra.mxu0 %v62567_v34  ;;  %42840 = vmatprep.mubr.f32.mxu0 %v56174_v1 }
 0x848   : > { %54633 = vmatprep.subr.bf16.mxu0 %v54632_v13  ;;  %v43345_v7 = vand.u32 4294901760, %v43344_v16  ;;  %v43834_v16 = vsub.f32 %v62680_v2, %v62692_v40 }
 0x84a   : > { %v54656_v10 = vpack.c.bf16 %v43352_v19, %v43345_v7 }
 0x84b   : > { %52526 = vmatmul.mubr.f32.vlgmr.msra.gmra.mrb[0].mxu1 %v62374_v0  ;;  %v43738_v0 = vpop.permute.xlu0 %43737 }
 0x84c   : > { %54654 = vmatpush3.bf16.msra.mxu1 %v62589_v41  ;;  %52532 = vmatprep.mubr.msk.f32.mxu1 %vm56176_vm1, %v56174_v1  ;;  %v43748_v57 = vsel %vm43743_vm11, %v43738_v0, %v43740_v12 }
 0x84d   : > { %54655 = vmatprep.subr.bf16.mxu1 %v56175_v4  ;;  %v43758_v23 = vsel %vm234_vm2, %v43748_v57, 0 }
 0x84e   : > { %42846 = vmatmul.mubr.f32.vlgmr.msra.gmra.mrb[0].mxu0 %v42845_v30  ;;  %v43766_v38 = vand.u32 4294901760, %v43758_v23 }
 0x84f   : > { %54635 = vmatpush1.bf16.msra.mxu0 %v54634_v58  ;;  %42936 = vmatprep.mubr.f32.mxu0 %v56174_v1  ;;  %v43730_v43 = vpop.permute.xlu0 %43729 }
 0x850   : > { %54637 = vmatprep.subr.bf16.mxu0 %v54636_v25  ;;  %v43745_v29 = vsel %vm43743_vm11, %v43730_v43, %v43732_v3  ;;  %v62630_v42 = vsub.f32 %v43758_v23, %v43766_v38  ;;  %v43744_v6 = vsel %vm43743_vm11, %v43728_v26, %v43730_v43  ;;  %v44730_v3 = vpop.permute.xlu1 %44729 }
 0x851   : > { %v43762_v59 = vand.u32 4294901760, %v43745_v29  ;;  %v43764_v36 = vand.u32 4294901760, %v43744_v6 }
 0x852   : > { %v43856_v48 = vand.u32 4294901760, %v62630_v42 }
 0x853   : > { %52533 = vmatmul.mubr.f32.vlgmr.msra.gmra.mrb[0].mxu1 %v42845_v30  ;;  %v43736_v14 = vpop.permute.xlu0 %43735  ;;  %v62633_v62 = vsub.f32 %v43745_v29, %v43762_v59  ;;  %v62675_v54 = vsub.f32 %v43744_v6, %v43764_v36 }
 0x854   : > { %54657 = vmatpush3.bf16.msra.mxu1 %v54656_v10  ;;  %52539 = vmatprep.mubr.msk.f32.mxu1 %vm56176_vm1, %v56174_v1  ;;  %v43747_v50 = vsel %vm43743_vm11, %v43736_v14, %v43738_v0  ;;  %v43835_v10 = vand.u32 4294901760, %v43834_v16  ;;  %v44722_v14 = vpop.permute.xlu1 %44721 }
 0x855   : > { %54658 = vmatprep.subr.bf16.mxu1 %v56175_v4  ;;  %v43756_v53 = vsel %vm234_vm2, %v43747_v50, 0  ;;  %v43844_v18 = vand.u32 4294901760, %v62633_v62  ;;  %v43850_v39 = vand.u32 4294901760, %v62675_v54  ;;  %v54678_v43 = vpack.c.bf16 %v62630_v42, %v62633_v62 }
 0x856   : > { %42938 = vmatmul.mubr.f32.vlgmr.msra.gmra.mrb[0].mxu0 %v62514_v8  ;;  %v43768_v20 = vand.u32 4294901760, %v43756_v53 }
 0x857   : > { %54639 = vmatpush1.bf16.msra.mxu0 %v54638_v17  ;;  %43016 = vmatprep.mubr.f32.mxu0 %v56174_v1  ;;  %v43742_v63 = vpop.permute.xlu0 %43741  ;;  %v43845_v49 = vsub.f32 %v62633_v62, %v43844_v18  ;;  %v43851_v5 = vsub.f32 %v62675_v54, %v43850_v39  ;;  %v54686_v26 = vpack.c.bf16 %v43856_v48, %v43844_v18 }
 0x858   : > { %54641 = vmatprep.subr.bf16.mxu0 %v62523_v22  ;;  %v43749_v15 = vsel %vm43743_vm11, %v43740_v12, %v43742_v63  ;;  %v62673_v44 = vsub.f32 %v43756_v53, %v43768_v20  ;;  %v62701_v24 = vpack.c.bf16 %v43768_v20, %v43764_v36  ;;  %v44718_v63 = vpop.permute.xlu1 %44717 }
 0x859   : > { %v43760_v35 = vsel %vm234_vm2, %v43749_v15, 0  ;;  %v43846_v56 = vand.u32 4294901760, %v43845_v49  ;;  %v43852_v58 = vand.u32 4294901760, %v43851_v5 }
 0x85a   : > { %v44257_v32 = vand.u32 4294901760, %v43760_v35  ;;  %v43862_v13 = vand.u32 4294901760, %v62673_v44  ;;  %v54680_v57 = vpack.c.bf16 %v62673_v44, %v62675_v54 }
 0x85b   : > { %52540 = vmatmul.mubr.f32.vlgmr.msra.gmra.mrb[0].mxu1 %v62514_v8 }
 0x85c   : > { %54660 = vmatpush3.bf16.msra.mxu1 %v54659_v9  ;;  %52546 = vmatprep.mubr.msk.f32.mxu1 %vm56176_vm1, %v56174_v1  ;;  %v62687_v37 = vsub.f32 %v43760_v35, %v44257_v32  ;;  %v43863_v61 = vsub.f32 %v62673_v44, %v43862_v13  ;;  %v62717_v7 = vpack.c.bf16 %v44257_v32, %v44254_v51  ;;  %v44724_v35 = vpop.permute.xlu1 %44723 }
 0x85d   : > { %54661 = vmatprep.subr.bf16.mxu1 %v56175_v4  ;;  %v54688_v27 = vpack.c.bf16 %v43862_v13, %v43850_v39  ;;  %v44735_v32 = vsel %vm43743_vm11, %v44722_v14, %v44724_v35 }
 0x85e   : > { %43019 = vmatmul.mubr.f32.vlgmr.msra.gmra.mrb[0].mxu0 %v62540_v47  ;;  %v44340_v11 = vand.u32 4294901760, %v62687_v37  ;;  %v43864_v30 = vand.u32 4294901760, %v43863_v61  ;;  %v54701_v29 = vpack.c.bf16 %v62687_v37, %v62689_v60  ;;  %v45243_v39 = vand.u32 4294901760, %v44735_v32 }
 0x85f   : > { %54643 = vmatpush1.bf16.msra.mxu0 %v62567_v34  ;;  %43093 = vmatprep.mubr.f32.mxu0 %v56174_v1 }
 0x860   : > { %54645 = vmatprep.subr.bf16.mxu0 %v54644_v31  ;;  %v44341_v19 = vsub.f32 %v62687_v37, %v44340_v11  ;;  %v54676_v0 = vpack.c.bf16 %v43864_v30, %v43852_v58 }
 0x862   : > { %v44342_v17 = vand.u32 4294901760, %v44341_v19 }
 0x863   : > { %52547 = vmatmul.mubr.f32.vlgmr.msra.gmra.mrb[0].mxu1 %v62540_v47  ;;  %v43857_v47 = vsub.f32 %v62630_v42, %v43856_v48  ;;  %v49814_v42 = vld [vmem:[%s63392_s1 + $0x178] sm:$0xff] }
 0x864   : > { %54663 = vmatpush3.bf16.msra.mxu1 %v62589_v41  ;;  %52553 = vmatprep.mubr.msk.f32.mxu1 %vm56176_vm1, %v56174_v1  ;;  %v44743_v45 = vsel %vm230_vm0, %v49814_v42, 0 }
 0x865   : > { %54664 = vmatprep.subr.bf16.mxu1 %v56175_v4  ;;  %v62784_v44 = vand.u32 4294901760, %v44743_v45 }
 0x866   : > { %43097 = vmatmul.mubr.f32.vlgmr.msra.gmra.mrb[0].mxu0 %v62556_v28 }
 0x867   : > { %54647 = vmatpush1.bf16.msra.mxu0 %v54646_v46  ;;  %43179 = vmatprep.mubr.f32.mxu0 %v56174_v1  ;;  %v62806_v37 = vsub.f32 %v44743_v45, %v62784_v44 }
 0x868   : > { %54649 = vmatprep.subr.bf16.mxu0 %v62523_v22  ;;  %v62665_v22 = vpack.c.bf16 %v43766_v38, %v43762_v59 }
 0x86b   : > { %52554 = vmatmul.mubr.f32.vlgmr.msra.gmra.mrb[0].mxu1 %v62556_v28  ;;  %v43858_v28 = vand.u32 4294901760, %v43857_v47 }
 0x86c   : > { %54666 = vmatpush3.bf16.msra.mxu1 %v54665_v33  ;;  %52560 = vmatprep.mubr.msk.f32.mxu1 %vm56176_vm1, %v56174_v1 }
 0x86d   : > { %54667 = vmatprep.subr.bf16.mxu1 %v56175_v4 }
 0x86e   : > { %43181 = vmatmul.mubr.f32.vlgmr.msra.gmra.mrb[0].mxu0 %v62514_v8 }
 0x86f   : > { %54651 = vmatpush1.bf16.msra.mxu0 %v62567_v34  ;;  %43255 = vmatprep.mubr.f32.mxu0 %v56174_v1  ;;  %v54674_v34 = vpack.c.bf16 %v43858_v28, %v43846_v56 }
 0x870   : > { %54671 = vmatprep.subr.bf16.mxu0 %v62665_v22 }
 0x873   : > { %52561 = vmatmul.mubr.f32.vlgmr.msra.gmra.mrb[0].mxu1 %v62514_v8 }
 0x874   : > { %54669 = vmatpush3.bf16.msra.mxu1 %v62589_v41  ;;  %52567 = vmatprep.mubr.msk.f32.mxu1 %vm56176_vm1, %v56174_v1  ;;  %v44333_v41 = vand.u32 4294901760, %v62689_v60 }
 0x875   : > { %54694 = vmatprep.subr.bf16.mxu1 %v56175_v4 }
 0x876   : > { %43257 = vmatmul.mubr.f32.vlgmr.msra.gmra.mrb[0].mxu0 %v62514_v8  ;;  %v44334_v25 = vsub.f32 %v62689_v60, %v44333_v41  ;;  %v54707_v47 = vpack.c.bf16 %v44340_v11, %v44333_v41  ;;  %v62815_v11 = vsub.f32 %v44735_v32, %v45243_v39  ;;  %v62818_v41 = vand.u32 4294901760, %v62806_v37 }
 0x877   : > { %54673 = vmatpush1.bf16.msra.mxu0 %v62701_v24  ;;  %43830 = vmatprep.mubr.f32.mxu0 %v56174_v1 }
 0x878   : > { %54675 = vmatprep.subr.bf16.mxu0 %v54674_v34  ;;  %v44335_v12 = vand.u32 4294901760, %v44334_v25  ;;  %v44823_v25 = vsub.f32 %v62806_v37, %v62818_v41 }
 0x87a   : > { %v54698_v9 = vpack.c.bf16 %v44342_v17, %v44335_v12 }
 0x87b   : > { %52568 = vmatmul.mubr.f32.vlgmr.msra.gmra.mrb[0].mxu1 %v62514_v8  ;;  %v44728_v8 = vpop.permute.xlu0 %44727 }
 0x87c   : > { %54696 = vmatpush3.bf16.msra.mxu1 %v62717_v7  ;;  %52574 = vmatprep.mubr.msk.f32.mxu1 %vm56176_vm1, %v56174_v1  ;;  %v44737_v31 = vsel %vm43743_vm11, %v44728_v8, %v44730_v3 }
 0x87d   : > { %54697 = vmatprep.subr.bf16.mxu1 %v56175_v4  ;;  %v44747_v38 = vsel %vm234_vm2, %v44737_v31, 0 }
 0x87e   : > { %43836 = vmatmul.mubr.f32.vlgmr.msra.gmra.mrb[0].mxu0 %v43835_v10  ;;  %v44755_v52 = vand.u32 4294901760, %v44747_v38 }
 0x87f   : > { %54677 = vmatpush1.bf16.msra.mxu0 %v54676_v0  ;;  %43926 = vmatprep.mubr.f32.mxu0 %v56174_v1  ;;  %v44720_v23 = vpop.permute.xlu0 %44719 }
 0x880   : > { %54679 = vmatprep.subr.bf16.mxu0 %v54678_v43  ;;  %v44734_v59 = vsel %vm43743_vm11, %v44720_v23, %v44722_v14  ;;  %v62756_v6 = vsub.f32 %v44747_v38, %v44755_v52  ;;  %v44733_v15 = vsel %vm43743_vm11, %v44718_v63, %v44720_v23  ;;  %v45719_v14 = vpop.permute.xlu1 %45718 }
 0x881   : > { %v44751_v46 = vand.u32 4294901760, %v44734_v59  ;;  %v44753_v49 = vand.u32 4294901760, %v44733_v15 }
 0x882   : > { %v44845_v20 = vand.u32 4294901760, %v62756_v6 }
 0x883   : > { %52575 = vmatmul.mubr.f32.vlgmr.msra.gmra.mrb[0].mxu1 %v43835_v10  ;;  %v44726_v50 = vpop.permute.xlu0 %44725  ;;  %v62759_v62 = vsub.f32 %v44734_v59, %v44751_v46  ;;  %v62801_v28 = vsub.f32 %v44733_v15, %v44753_v49 }
 0x884   : > { %54699 = vmatpush3.bf16.msra.mxu1 %v54698_v9  ;;  %52581 = vmatprep.mubr.msk.f32.mxu1 %vm56176_vm1, %v56174_v1  ;;  %v44736_v53 = vsel %vm43743_vm11, %v44726_v50, %v44728_v8  ;;  %v44824_v9 = vand.u32 4294901760, %v44823_v25  ;;  %v45711_v50 = vpop.permute.xlu1 %45710 }
 0x885   : > { %54700 = vmatprep.subr.bf16.mxu1 %v56175_v4  ;;  %v44745_v18 = vsel %vm234_vm2, %v44736_v53, 0  ;;  %v44833_v36 = vand.u32 4294901760, %v62759_v62  ;;  %v44839_v61 = vand.u32 4294901760, %v62801_v28  ;;  %v54720_v23 = vpack.c.bf16 %v62756_v6, %v62759_v62 }
 0x886   : > { %43928 = vmatmul.mubr.f32.vlgmr.msra.gmra.mrb[0].mxu0 %v62658_v21  ;;  %v44757_v55 = vand.u32 4294901760, %v44745_v18 }
 0x887   : > { %54681 = vmatpush1.bf16.msra.mxu0 %v54680_v57  ;;  %44006 = vmatprep.mubr.f32.mxu0 %v56174_v1  ;;  %v44732_v48 = vpop.permute.xlu0 %44731  ;;  %v44834_v51 = vsub.f32 %v62759_v62, %v44833_v36  ;;  %v44840_v58 = vsub.f32 %v62801_v28, %v44839_v61  ;;  %v54728_v63 = vpack.c.bf16 %v44845_v20, %v44833_v36 }
 0x888   : > { %54683 = vmatprep.subr.bf16.mxu0 %v62665_v22  ;;  %v44738_v33 = vsel %vm43743_vm11, %v44730_v3, %v44732_v48  ;;  %v62799_v56 = vsub.f32 %v44745_v18, %v44757_v55  ;;  %v62827_v30 = vpack.c.bf16 %v44757_v55, %v44753_v49  ;;  %v45707_v48 = vpop.permute.xlu1 %45706 }
 0x889   : > { %v44749_v54 = vsel %vm234_vm2, %v44738_v33, 0  ;;  %v44835_v60 = vand.u32 4294901760, %v44834_v51  ;;  %v44841_v0 = vand.u32 4294901760, %v44840_v58 }
 0x88a   : > { %v45246_v13 = vand.u32 4294901760, %v44749_v54  ;;  %v44851_v34 = vand.u32 4294901760, %v62799_v56  ;;  %v54722_v31 = vpack.c.bf16 %v62799_v56, %v62801_v28 }
 0x88b   : > { %52582 = vmatmul.mubr.f32.vlgmr.msra.gmra.mrb[0].mxu1 %v62658_v21 }
 0x88c   : > { %54702 = vmatpush3.bf16.msra.mxu1 %v54701_v29  ;;  %52588 = vmatprep.mubr.msk.f32.mxu1 %vm56176_vm1, %v56174_v1  ;;  %v62813_v5 = vsub.f32 %v44749_v54, %v45246_v13  ;;  %v44852_v16 = vsub.f32 %v62799_v56, %v44851_v34  ;;  %v62843_v12 = vpack.c.bf16 %v45246_v13, %v45243_v39  ;;  %v45713_v54 = vpop.permute.xlu1 %45712 }
 0x88d   : > { %54703 = vmatprep.subr.bf16.mxu1 %v56175_v4  ;;  %v54730_v45 = vpack.c.bf16 %v44851_v34, %v44839_v61  ;;  %v45725_v13 = vsel %vm45722_vm12, %v45711_v50, %v45713_v54 }
 0x88e   : > { %44009 = vmatmul.mubr.f32.vlgmr.msra.gmra.mrb[0].mxu0 %v62680_v2  ;;  %v45329_v19 = vand.u32 4294901760, %v62813_v5  ;;  %v44853_v10 = vand.u32 4294901760, %v44852_v16  ;;  %v54743_v59 = vpack.c.bf16 %v62813_v5, %v62815_v11  ;;  %v46233_v61 = vand.u32 4294901760, %v45725_v13 }
 0x88f   : > { %54685 = vmatpush1.bf16.msra.mxu0 %v62701_v24  ;;  %44083 = vmatprep.mubr.f32.mxu0 %v56174_v1 }
 0x890   : > { %54687 = vmatprep.subr.bf16.mxu0 %v54686_v26  ;;  %v45330_v17 = vsub.f32 %v62813_v5, %v45329_v19  ;;  %v54718_v8 = vpack.c.bf16 %v44853_v10, %v44841_v0 }
 0x892   : > { %v45331_v57 = vand.u32 4294901760, %v45330_v17 }
 0x893   : > { %52589 = vmatmul.mubr.f32.vlgmr.msra.gmra.mrb[0].mxu1 %v62680_v2  ;;  %v44846_v2 = vsub.f32 %v62756_v6, %v44845_v20  ;;  %v49815_v6 = vld [vmem:[%s63392_s1 + $0xb8] sm:$0xff] }
 0x894   : > { %54705 = vmatpush3.bf16.msra.mxu1 %v62717_v7  ;;  %52595 = vmatprep.mubr.msk.f32.mxu1 %vm56176_vm1, %v56174_v1  ;;  %v45733_v35 = vsel %vm230_vm0, %v49815_v6, 0 }
 0x895   : > { %54706 = vmatprep.subr.bf16.mxu1 %v56175_v4  ;;  %v62910_v56 = vand.u32 4294901760, %v45733_v35 }
 0x896   : > { %44087 = vmatmul.mubr.f32.vlgmr.msra.gmra.mrb[0].mxu0 %v62692_v40 }
 0x897   : > { %54689 = vmatpush1.bf16.msra.mxu0 %v54688_v27  ;;  %44169 = vmatprep.mubr.f32.mxu0 %v56174_v1  ;;  %v62932_v5 = vsub.f32 %v45733_v35, %v62910_v56 }
 0x898   : > { %54691 = vmatprep.subr.bf16.mxu0 %v62665_v22  ;;  %v62791_v22 = vpack.c.bf16 %v44755_v52, %v44751_v46 }
 0x89b   : > { %52596 = vmatmul.mubr.f32.vlgmr.msra.gmra.mrb[0].mxu1 %v62692_v40  ;;  %v44847_v40 = vand.u32 4294901760, %v44846_v2 }
 0x89c   : > { %54708 = vmatpush3.bf16.msra.mxu1 %v54707_v47  ;;  %52602 = vmatprep.mubr.msk.f32.mxu1 %vm56176_vm1, %v56174_v1 }
 0x89d   : > { %54709 = vmatprep.subr.bf16.mxu1 %v56175_v4 }
 0x89e   : > { %44171 = vmatmul.mubr.f32.vlgmr.msra.gmra.mrb[0].mxu0 %v62658_v21 }
 0x89f   : > { %54693 = vmatpush1.bf16.msra.mxu0 %v62701_v24  ;;  %44245 = vmatprep.mubr.f32.mxu0 %v56174_v1  ;;  %v54716_v24 = vpack.c.bf16 %v44847_v40, %v44835_v60 }
 0x8a0   : > { %54713 = vmatprep.subr.bf16.mxu0 %v62791_v22 }
 0x8a3   : > { %52603 = vmatmul.mubr.f32.vlgmr.msra.gmra.mrb[0].mxu1 %v62658_v21 }
 0x8a4   : > { %54711 = vmatpush3.bf16.msra.mxu1 %v62717_v7  ;;  %52609 = vmatprep.mubr.msk.f32.mxu1 %vm56176_vm1, %v56174_v1  ;;  %v45322_v7 = vand.u32 4294901760, %v62815_v11 }
 0x8a5   : > { %54736 = vmatprep.subr.bf16.mxu1 %v56175_v4 }
 0x8a6   : > { %44247 = vmatmul.mubr.f32.vlgmr.msra.gmra.mrb[0].mxu0 %v62658_v21  ;;  %v45323_v43 = vsub.f32 %v62815_v11, %v45322_v7  ;;  %v54749_v2 = vpack.c.bf16 %v45329_v19, %v45322_v7  ;;  %v62941_v19 = vsub.f32 %v45725_v13, %v46233_v61  ;;  %v62944_v7 = vand.u32 4294901760, %v62932_v5 }
 0x8a7   : > { %54715 = vmatpush1.bf16.msra.mxu0 %v62827_v30  ;;  %44819 = vmatprep.mubr.f32.mxu0 %v56174_v1 }
 0x8a8   : > { %54717 = vmatprep.subr.bf16.mxu0 %v54716_v24  ;;  %v45324_v3 = vand.u32 4294901760, %v45323_v43  ;;  %v45813_v43 = vsub.f32 %v62932_v5, %v62944_v7 }
 0x8aa   : > { %v54740_v29 = vpack.c.bf16 %v45331_v57, %v45324_v3 }
 0x8ab   : > { %52610 = vmatmul.mubr.f32.vlgmr.msra.gmra.mrb[0].mxu1 %v62658_v21  ;;  %v45717_v21 = vpop.permute.xlu0 %45716 }
 0x8ac   : > { %54738 = vmatpush3.bf16.msra.mxu1 %v62843_v12  ;;  %52616 = vmatprep.mubr.msk.f32.mxu1 %vm56176_vm1, %v56174_v1  ;;  %v45727_v26 = vsel %vm45722_vm12, %v45717_v21, %v45719_v14 }
 0x8ad   : > { %54739 = vmatprep.subr.bf16.mxu1 %v56175_v4  ;;  %v45737_v52 = vsel %vm234_vm2, %v45727_v26, 0 }
 0x8ae   : > { %44825 = vmatmul.mubr.f32.vlgmr.msra.gmra.mrb[0].mxu0 %v44824_v9  ;;  %v45745_v42 = vand.u32 4294901760, %v45737_v52 }
 0x8af   : > { %54719 = vmatpush1.bf16.msra.mxu0 %v54718_v8  ;;  %44915 = vmatprep.mubr.f32.mxu0 %v56174_v1  ;;  %v45709_v38 = vpop.permute.xlu0 %45708 }
 0x8b0   : > { %54721 = vmatprep.subr.bf16.mxu0 %v54720_v23  ;;  %v45724_v46 = vsel %vm45722_vm12, %v45709_v38, %v45711_v50  ;;  %v62882_v15 = vsub.f32 %v45737_v52, %v45745_v42  ;;  %v45723_v33 = vsel %vm45722_vm12, %v45707_v48, %v45709_v38  ;;  %v46709_v50 = vpop.permute.xlu1 %46708 }
 0x8b1   : > { %v45741_v27 = vand.u32 4294901760, %v45724_v46  ;;  %v45743_v51 = vand.u32 4294901760, %v45723_v33 }
 0x8b2   : > { %v45835_v55 = vand.u32 4294901760, %v62882_v15 }
 0x8b3   : > { %52617 = vmatmul.mubr.f32.vlgmr.msra.gmra.mrb[0].mxu1 %v44824_v9  ;;  %v45715_v53 = vpop.permute.xlu0 %45714  ;;  %v62885_v62 = vsub.f32 %v45724_v46, %v45741_v27  ;;  %v62927_v40 = vsub.f32 %v45723_v33, %v45743_v51 }
 0x8b4   : > { %54741 = vmatpush3.bf16.msra.mxu1 %v54740_v29  ;;  %52623 = vmatprep.mubr.msk.f32.mxu1 %vm56176_vm1, %v56174_v1  ;;  %v45726_v18 = vsel %vm45722_vm12, %v45715_v53, %v45717_v21  ;;  %v45814_v29 = vand.u32 4294901760, %v45813_v43  ;;  %v46701_v53 = vpop.permute.xlu1 %46700 }
 0x8b5   : > { %54742 = vmatprep.subr.bf16.mxu1 %v56175_v4  ;;  %v45735_v36 = vsel %vm234_vm2, %v45726_v18, 0  ;;  %v45823_v49 = vand.u32 4294901760, %v62885_v62  ;;  %v45829_v16 = vand.u32 4294901760, %v62927_v40  ;;  %v54762_v38 = vpack.c.bf16 %v62882_v15, %v62885_v62 }
 0x8b6   : > { %44917 = vmatmul.mubr.f32.vlgmr.msra.gmra.mrb[0].mxu0 %v62784_v44  ;;  %v45747_v32 = vand.u32 4294901760, %v45735_v36 }
 0x8b7   : > { %54723 = vmatpush1.bf16.msra.mxu0 %v54722_v31  ;;  %44995 = vmatprep.mubr.f32.mxu0 %v56174_v1  ;;  %v45721_v20 = vpop.permute.xlu0 %45720  ;;  %v45824_v39 = vsub.f32 %v62885_v62, %v45823_v49  ;;  %v45830_v0 = vsub.f32 %v62927_v40, %v45829_v16  ;;  %v54770_v48 = vpack.c.bf16 %v45835_v55, %v45823_v49 }
 0x8b8   : > { %54725 = vmatprep.subr.bf16.mxu0 %v62791_v22  ;;  %v45728_v47 = vsel %vm45722_vm12, %v45719_v14, %v45721_v20  ;;  %v62925_v60 = vsub.f32 %v45735_v36, %v45747_v32  ;;  %v62953_v10 = vpack.c.bf16 %v45747_v32, %v45743_v51  ;;  %v46697_v20 = vpop.permute.xlu1 %46696 }
 0x8b9   : > { %v45739_v28 = vsel %vm234_vm2, %v45728_v47, 0  ;;  %v45825_v11 = vand.u32 4294901760, %v45824_v39  ;;  %v45831_v8 = vand.u32 4294901760, %v45830_v0 }
 0x8ba   : > { %v46236_v34 = vand.u32 4294901760, %v45739_v28  ;;  %v45841_v24 = vand.u32 4294901760, %v62925_v60  ;;  %v54764_v26 = vpack.c.bf16 %v62925_v60, %v62927_v40 }
 0x8bb   : > { %52624 = vmatmul.mubr.f32.vlgmr.msra.gmra.mrb[0].mxu1 %v62784_v44 }
 0x8bc   : > { %54744 = vmatpush3.bf16.msra.mxu1 %v54743_v59  ;;  %52630 = vmatprep.mubr.msk.f32.mxu1 %vm56176_vm1, %v56174_v1  ;;  %v62939_v58 = vsub.f32 %v45739_v28, %v46236_v34  ;;  %v45842_v25 = vsub.f32 %v62925_v60, %v45841_v24  ;;  %v62969_v3 = vpack.c.bf16 %v46236_v34, %v46233_v61  ;;  %v46703_v28 = vpop.permute.xlu1 %46702 }
 0x8bd   : > { %54745 = vmatprep.subr.bf16.mxu1 %v56175_v4  ;;  %v54772_v35 = vpack.c.bf16 %v45841_v24, %v45829_v16  ;;  %v46714_v34 = vsel %vm45722_vm12, %v46701_v53, %v46703_v28 }
 0x8be   : > { %44998 = vmatmul.mubr.f32.vlgmr.msra.gmra.mrb[0].mxu0 %v62806_v37  ;;  %v46319_v17 = vand.u32 4294901760, %v62939_v58  ;;  %v45843_v9 = vand.u32 4294901760, %v45842_v25  ;;  %v54785_v46 = vpack.c.bf16 %v62939_v58, %v62941_v19  ;;  %v47222_v16 = vand.u32 4294901760, %v46714_v34 }
 0x8bf   : > { %54727 = vmatpush1.bf16.msra.mxu0 %v62827_v30  ;;  %45072 = vmatprep.mubr.f32.mxu0 %v56174_v1 }
 0x8c0   : > { %54729 = vmatprep.subr.bf16.mxu0 %v54728_v63  ;;  %v46320_v57 = vsub.f32 %v62939_v58, %v46319_v17  ;;  %v54760_v21 = vpack.c.bf16 %v45843_v9, %v45831_v8 }
 0x8c2   : > { %v46321_v31 = vand.u32 4294901760, %v46320_v57 }
 0x8c3   : > { %52631 = vmatmul.mubr.f32.vlgmr.msra.gmra.mrb[0].mxu1 %v62806_v37  ;;  %v45836_v37 = vsub.f32 %v62882_v15, %v45835_v55  ;;  %v49816_v15 = vld [vmem:[%s63392_s1 + $0x180] sm:$0xff] }
 0x8c4   : > { %54747 = vmatpush3.bf16.msra.mxu1 %v62843_v12  ;;  %52637 = vmatprep.mubr.msk.f32.mxu1 %vm56176_vm1, %v56174_v1  ;;  %v46722_v54 = vsel %vm230_vm0, %v49816_v15, 0 }
 0x8c5   : > { %54748 = vmatprep.subr.bf16.mxu1 %v56175_v4  ;;  %v63036_v60 = vand.u32 4294901760, %v46722_v54 }
 0x8c6   : > { %45076 = vmatmul.mubr.f32.vlgmr.msra.gmra.mrb[0].mxu0 %v62818_v41 }
 0x8c7   : > { %54731 = vmatpush1.bf16.msra.mxu0 %v54730_v45  ;;  %45158 = vmatprep.mubr.f32.mxu0 %v56174_v1  ;;  %v63058_v58 = vsub.f32 %v46722_v54, %v63036_v60 }
 0x8c8   : > { %54733 = vmatprep.subr.bf16.mxu0 %v62791_v22  ;;  %v62917_v22 = vpack.c.bf16 %v45745_v42, %v45741_v27 }
 0x8cb   : > { %52638 = vmatmul.mubr.f32.vlgmr.msra.gmra.mrb[0].mxu1 %v62818_v41  ;;  %v45837_v41 = vand.u32 4294901760, %v45836_v37 }
 0x8cc   : > { %54750 = vmatpush3.bf16.msra.mxu1 %v54749_v2  ;;  %52644 = vmatprep.mubr.msk.f32.mxu1 %vm56176_vm1, %v56174_v1 }
 0x8cd   : > { %54751 = vmatprep.subr.bf16.mxu1 %v56175_v4 }
 0x8ce   : > { %45160 = vmatmul.mubr.f32.vlgmr.msra.gmra.mrb[0].mxu0 %v62784_v44 }
 0x8cf   : > { %54735 = vmatpush1.bf16.msra.mxu0 %v62827_v30  ;;  %45234 = vmatprep.mubr.f32.mxu0 %v56174_v1  ;;  %v54758_v30 = vpack.c.bf16 %v45837_v41, %v45825_v11 }
 0x8d0   : > { %54755 = vmatprep.subr.bf16.mxu0 %v62917_v22 }
 0x8d3   : > { %52645 = vmatmul.mubr.f32.vlgmr.msra.gmra.mrb[0].mxu1 %v62784_v44 }
 0x8d4   : > { %54753 = vmatpush3.bf16.msra.mxu1 %v62843_v12  ;;  %52651 = vmatprep.mubr.msk.f32.mxu1 %vm56176_vm1, %v56174_v1  ;;  %v46312_v12 = vand.u32 4294901760, %v62941_v19 }
 0x8d5   : > { %54778 = vmatprep.subr.bf16.mxu1 %v56175_v4 }
 0x8d6   : > { %45236 = vmatmul.mubr.f32.vlgmr.msra.gmra.mrb[0].mxu0 %v62784_v44  ;;  %v46313_v23 = vsub.f32 %v62941_v19, %v46312_v12  ;;  %v54791_v37 = vpack.c.bf16 %v46319_v17, %v46312_v12  ;;  %v63067_v17 = vsub.f32 %v46714_v34, %v47222_v16  ;;  %v63070_v12 = vand.u32 4294901760, %v63058_v58 }
 0x8d7   : > { %54757 = vmatpush1.bf16.msra.mxu0 %v62953_v10  ;;  %45809 = vmatprep.mubr.f32.mxu0 %v56174_v1 }
 0x8d8   : > { %54759 = vmatprep.subr.bf16.mxu0 %v54758_v30  ;;  %v46314_v14 = vand.u32 4294901760, %v46313_v23  ;;  %v46802_v23 = vsub.f32 %v63058_v58, %v63070_v12 }
 0x8da   : > { %v54782_v59 = vpack.c.bf16 %v46321_v31, %v46314_v14 }
 0x8db   : > { %52652 = vmatmul.mubr.f32.vlgmr.msra.gmra.mrb[0].mxu1 %v62784_v44  ;;  %v46707_v44 = vpop.permute.xlu0 %46706 }
 0x8dc   : > { %54780 = vmatpush3.bf16.msra.mxu1 %v62969_v3  ;;  %52658 = vmatprep.mubr.msk.f32.mxu1 %vm56176_vm1, %v56174_v1  ;;  %v46716_v63 = vsel %vm45722_vm12, %v46707_v44, %v46709_v50 }
 0x8dd   : > { %54781 = vmatprep.subr.bf16.mxu1 %v56175_v4  ;;  %v46726_v42 = vsel %vm234_vm2, %v46716_v63, 0 }
 0x8de   : > { %45815 = vmatmul.mubr.f32.vlgmr.msra.gmra.mrb[0].mxu0 %v45814_v29  ;;  %v46734_v6 = vand.u32 4294901760, %v46726_v42 }
 0x8df   : > { %54761 = vmatpush1.bf16.msra.mxu0 %v54760_v21  ;;  %45905 = vmatprep.mubr.f32.mxu0 %v56174_v1  ;;  %v46699_v52 = vpop.permute.xlu0 %46698 }
 0x8e0   : > { %54763 = vmatprep.subr.bf16.mxu0 %v54762_v38  ;;  %v46713_v27 = vsel %vm45722_vm12, %v46699_v52, %v46701_v53  ;;  %v63008_v33 = vsub.f32 %v46726_v42, %v46734_v6  ;;  %v46712_v47 = vsel %vm45722_vm12, %v46697_v20, %v46699_v52  ;;  %v47698_v53 = vpop.permute.xlu1 %47697 }
 0x8e1   : > { %v46730_v45 = vand.u32 4294901760, %v46713_v27  ;;  %v46732_v39 = vand.u32 4294901760, %v46712_v47 }
 0x8e2   : > { %v46824_v32 = vand.u32 4294901760, %v63008_v33 }
 0x8e3   : > { %52659 = vmatmul.mubr.f32.vlgmr.msra.gmra.mrb[0].mxu1 %v45814_v29  ;;  %v46705_v18 = vpop.permute.xlu0 %46704  ;;  %v63011_v62 = vsub.f32 %v46713_v27, %v46730_v45  ;;  %v63053_v41 = vsub.f32 %v46712_v47, %v46732_v39 }
 0x8e4   : > { %54783 = vmatpush3.bf16.msra.mxu1 %v54782_v59  ;;  %52665 = vmatprep.mubr.msk.f32.mxu1 %vm56176_vm1, %v56174_v1  ;;  %v46715_v36 = vsel %vm45722_vm12, %v46705_v18, %v46707_v44  ;;  %v46803_v59 = vand.u32 4294901760, %v46802_v23  ;;  %v47690_v18 = vpop.permute.xlu1 %47689 }
 0x8e5   : > { %54784 = vmatprep.subr.bf16.mxu1 %v56175_v4  ;;  %v46724_v49 = vsel %vm234_vm2, %v46715_v36, 0  ;;  %v46812_v51 = vand.u32 4294901760, %v63011_v62  ;;  %v46818_v25 = vand.u32 4294901760, %v63053_v41  ;;  %v54804_v52 = vpack.c.bf16 %v63008_v33, %v63011_v62 }
 0x8e6   : > { %45907 = vmatmul.mubr.f32.vlgmr.msra.gmra.mrb[0].mxu0 %v62910_v56  ;;  %v46736_v13 = vand.u32 4294901760, %v46724_v49 }
 0x8e7   : > { %54765 = vmatpush1.bf16.msra.mxu0 %v54764_v26  ;;  %45985 = vmatprep.mubr.f32.mxu0 %v56174_v1  ;;  %v46711_v55 = vpop.permute.xlu0 %46710  ;;  %v46813_v61 = vsub.f32 %v63011_v62, %v46812_v51  ;;  %v46819_v8 = vsub.f32 %v63053_v41, %v46818_v25  ;;  %v54812_v20 = vpack.c.bf16 %v46824_v32, %v46812_v51 }
 0x8e8   : > { %54767 = vmatprep.subr.bf16.mxu0 %v62917_v22  ;;  %v46717_v2 = vsel %vm45722_vm12, %v46709_v50, %v46711_v55  ;;  %v63051_v11 = vsub.f32 %v46724_v49, %v46736_v13  ;;  %v63079_v9 = vpack.c.bf16 %v46736_v13, %v46732_v39  ;;  %v47686_v55 = vpop.permute.xlu1 %47685 }
 0x8e9   : > { %v46728_v40 = vsel %vm234_vm2, %v46717_v2, 0  ;;  %v46814_v19 = vand.u32 4294901760, %v46813_v61  ;;  %v46820_v21 = vand.u32 4294901760, %v46819_v8 }
 0x8ea   : > { %v47225_v24 = vand.u32 4294901760, %v46728_v40  ;;  %v46830_v30 = vand.u32 4294901760, %v63051_v11  ;;  %v54806_v63 = vpack.c.bf16 %v63051_v11, %v63053_v41 }
 0x8eb   : > { %52666 = vmatmul.mubr.f32.vlgmr.msra.gmra.mrb[0].mxu1 %v62910_v56 }
 0x8ec   : > { %54786 = vmatpush3.bf16.msra.mxu1 %v54785_v46  ;;  %52672 = vmatprep.mubr.msk.f32.mxu1 %vm56176_vm1, %v56174_v1  ;;  %v63065_v0 = vsub.f32 %v46728_v40, %v47225_v24  ;;  %v46831_v43 = vsub.f32 %v63051_v11, %v46830_v30  ;;  %v63095_v14 = vpack.c.bf16 %v47225_v24, %v47222_v16  ;;  %v47692_v40 = vpop.permute.xlu1 %47691 }
 0x8ed   : > { %54787 = vmatprep.subr.bf16.mxu1 %v56175_v4  ;;  %v54814_v54 = vpack.c.bf16 %v46830_v30, %v46818_v25  ;;  %v47704_v24 = vsel %vm47701_vm13, %v47690_v18, %v47692_v40 }
 0x8ee   : > { %45988 = vmatmul.mubr.f32.vlgmr.msra.gmra.mrb[0].mxu0 %v62932_v5  ;;  %v47308_v57 = vand.u32 4294901760, %v63065_v0  ;;  %v46832_v29 = vand.u32 4294901760, %v46831_v43  ;;  %v54827_v27 = vpack.c.bf16 %v63065_v0, %v63067_v17  ;;  %v48212_v25 = vand.u32 4294901760, %v47704_v24 }
 0x8ef   : > { %54769 = vmatpush1.bf16.msra.mxu0 %v62953_v10  ;;  %46062 = vmatprep.mubr.f32.mxu0 %v56174_v1 }
 0x8f0   : > { %54771 = vmatprep.subr.bf16.mxu0 %v54770_v48  ;;  %v47309_v31 = vsub.f32 %v63065_v0, %v47308_v57  ;;  %v54802_v44 = vpack.c.bf16 %v46832_v29, %v46820_v21 }
 0x8f2   : > { %v47310_v26 = vand.u32 4294901760, %v47309_v31 }
 0x8f3   : > { %52673 = vmatmul.mubr.f32.vlgmr.msra.gmra.mrb[0].mxu1 %v62932_v5  ;;  %v46825_v5 = vsub.f32 %v63008_v33, %v46824_v32  ;;  %v49817_v33 = vld [vmem:[%s63392_s1 + $0xc0] sm:$0xff] }
 0x8f4   : > { %54789 = vmatpush3.bf16.msra.mxu1 %v62969_v3  ;;  %52679 = vmatprep.mubr.msk.f32.mxu1 %vm56176_vm1, %v56174_v1  ;;  %v47712_v28 = vsel %vm230_vm0, %v49817_v33, 0 }
 0x8f5   : > { %54790 = vmatprep.subr.bf16.mxu1 %v56175_v4  ;;  %v63162_v11 = vand.u32 4294901760, %v47712_v28 }
 0x8f6   : > { %46066 = vmatmul.mubr.f32.vlgmr.msra.gmra.mrb[0].mxu0 %v62944_v7 }
 0x8f7   : > { %54773 = vmatpush1.bf16.msra.mxu0 %v54772_v35  ;;  %46148 = vmatprep.mubr.f32.mxu0 %v56174_v1  ;;  %v63184_v0 = vsub.f32 %v47712_v28, %v63162_v11 }
 0x8f8   : > { %54775 = vmatprep.subr.bf16.mxu0 %v62917_v22  ;;  %v63043_v22 = vpack.c.bf16 %v46734_v6, %v46730_v45 }
 0x8fb   : > { %52680 = vmatmul.mubr.f32.vlgmr.msra.gmra.mrb[0].mxu1 %v62944_v7  ;;  %v46826_v7 = vand.u32 4294901760, %v46825_v5 }
 0x8fc   : > { %54792 = vmatpush3.bf16.msra.mxu1 %v54791_v37  ;;  %52686 = vmatprep.mubr.msk.f32.mxu1 %vm56176_vm1, %v56174_v1 }
 0x8fd   : > { %54793 = vmatprep.subr.bf16.mxu1 %v56175_v4 }
 0x8fe   : > { %46150 = vmatmul.mubr.f32.vlgmr.msra.gmra.mrb[0].mxu0 %v62910_v56 }
 0x8ff   : > { %54777 = vmatpush1.bf16.msra.mxu0 %v62953_v10  ;;  %46224 = vmatprep.mubr.f32.mxu0 %v56174_v1  ;;  %v54800_v10 = vpack.c.bf16 %v46826_v7, %v46814_v19 }
 0x900   : > { %54797 = vmatprep.subr.bf16.mxu0 %v63043_v22 }
 0x903   : > { %52687 = vmatmul.mubr.f32.vlgmr.msra.gmra.mrb[0].mxu1 %v62910_v56 }
 0x904   : > { %54795 = vmatpush3.bf16.msra.mxu1 %v62969_v3  ;;  %52693 = vmatprep.mubr.msk.f32.mxu1 %vm56176_vm1, %v56174_v1  ;;  %v47301_v3 = vand.u32 4294901760, %v63067_v17 }
 0x905   : > { %54820 = vmatprep.subr.bf16.mxu1 %v56175_v4 }
 0x906   : > { %46226 = vmatmul.mubr.f32.vlgmr.msra.gmra.mrb[0].mxu0 %v62910_v56  ;;  %v47302_v38 = vsub.f32 %v63067_v17, %v47301_v3  ;;  %v54833_v5 = vpack.c.bf16 %v47308_v57, %v47301_v3  ;;  %v63193_v57 = vsub.f32 %v47704_v24, %v48212_v25  ;;  %v63196_v3 = vand.u32 4294901760, %v63184_v0 }
 0x907   : > { %54799 = vmatpush1.bf16.msra.mxu0 %v63079_v9  ;;  %46798 = vmatprep.mubr.f32.mxu0 %v56174_v1 }
 0x908   : > { %54801 = vmatprep.subr.bf16.mxu0 %v54800_v10  ;;  %v47303_v50 = vand.u32 4294901760, %v47302_v38  ;;  %v47792_v38 = vsub.f32 %v63184_v0, %v63196_v3 }
 0x90a   : > { %v54824_v46 = vpack.c.bf16 %v47310_v26, %v47303_v50 }
 0x90b   : > { %52694 = vmatmul.mubr.f32.vlgmr.msra.gmra.mrb[0].mxu1 %v62910_v56  ;;  %v47696_v56 = vpop.permute.xlu0 %47695 }
 0x90c   : > { %54822 = vmatpush3.bf16.msra.mxu1 %v63095_v14  ;;  %52700 = vmatprep.mubr.msk.f32.mxu1 %vm56176_vm1, %v56174_v1  ;;  %v47706_v48 = vsel %vm47701_vm13, %v47696_v56, %v47698_v53 }
 0x90d   : > { %54823 = vmatprep.subr.bf16.mxu1 %v56175_v4  ;;  %v47716_v6 = vsel %vm234_vm2, %v47706_v48, 0 }
 0x90e   : > { %46804 = vmatmul.mubr.f32.vlgmr.msra.gmra.mrb[0].mxu0 %v46803_v59  ;;  %v47724_v15 = vand.u32 4294901760, %v47716_v6 }
 0x90f   : > { %54803 = vmatpush1.bf16.msra.mxu0 %v54802_v44  ;;  %46894 = vmatprep.mubr.f32.mxu0 %v56174_v1  ;;  %v47688_v42 = vpop.permute.xlu0 %47687 }
 0x910   : > { %54805 = vmatprep.subr.bf16.mxu0 %v54804_v52  ;;  %v47703_v45 = vsel %vm47701_vm13, %v47688_v42, %v47690_v18  ;;  %v63134_v47 = vsub.f32 %v47716_v6, %v47724_v15  ;;  %v47702_v2 = vsel %vm47701_vm13, %v47686_v55, %v47688_v42  ;;  %v48688_v18 = vpop.permute.xlu1 %48687 }
 0x911   : > { %v47720_v35 = vand.u32 4294901760, %v47703_v45  ;;  %v47722_v61 = vand.u32 4294901760, %v47702_v2 }
 0x912   : > { %v47814_v13 = vand.u32 4294901760, %v63134_v47 }
 0x913   : > { %52701 = vmatmul.mubr.f32.vlgmr.msra.gmra.mrb[0].mxu1 %v46803_v59  ;;  %v47694_v36 = vpop.permute.xlu0 %47693  ;;  %v63137_v62 = vsub.f32 %v47703_v45, %v47720_v35  ;;  %v63179_v7 = vsub.f32 %v47702_v2, %v47722_v61 }
 0x914   : > { %54825 = vmatpush3.bf16.msra.mxu1 %v54824_v46  ;;  %52707 = vmatprep.mubr.msk.f32.mxu1 %vm56176_vm1, %v56174_v1  ;;  %v47705_v49 = vsel %vm47701_vm13, %v47694_v36, %v47696_v56  ;;  %v47793_v46 = vand.u32 4294901760, %v47792_v38  ;;  %v48680_v36 = vpop.permute.xlu1 %48679 }
 0x915   : > { %54826 = vmatprep.subr.bf16.mxu1 %v56175_v4  ;;  %v47714_v51 = vsel %vm234_vm2, %v47705_v49, 0  ;;  %v47802_v39 = vand.u32 4294901760, %v63137_v62  ;;  %v47808_v43 = vand.u32 4294901760, %v63179_v7  ;;  %v54846_v42 = vpack.c.bf16 %v63134_v47, %v63137_v62 }
 0x916   : > { %46896 = vmatmul.mubr.f32.vlgmr.msra.gmra.mrb[0].mxu0 %v63036_v60  ;;  %v47726_v34 = vand.u32 4294901760, %v47714_v51 }
 0x917   : > { %54807 = vmatpush1.bf16.msra.mxu0 %v54806_v63  ;;  %46974 = vmatprep.mubr.f32.mxu0 %v56174_v1  ;;  %v47700_v32 = vpop.permute.xlu0 %47699  ;;  %v47803_v16 = vsub.f32 %v63137_v62, %v47802_v39  ;;  %v47809_v21 = vsub.f32 %v63179_v7, %v47808_v43  ;;  %v54854_v55 = vpack.c.bf16 %v47814_v13, %v47802_v39 }
 0x918   : > { %54809 = vmatprep.subr.bf16.mxu0 %v63043_v22  ;;  %v47707_v37 = vsel %vm47701_vm13, %v47698_v53, %v47700_v32  ;;  %v63177_v19 = vsub.f32 %v47714_v51, %v47726_v34  ;;  %v63205_v29 = vpack.c.bf16 %v47726_v34, %v47722_v61  ;;  %v48676_v32 = vpop.permute.xlu1 %48675 }
 0x919   : > { %v47718_v41 = vsel %vm234_vm2, %v47707_v37, 0  ;;  %v47804_v17 = vand.u32 4294901760, %v47803_v16  ;;  %v47810_v44 = vand.u32 4294901760, %v47809_v21 }
 0x91a   : > { %v48215_v30 = vand.u32 4294901760, %v47718_v41  ;;  %v47820_v10 = vand.u32 4294901760, %v63177_v19  ;;  %v54848_v48 = vpack.c.bf16 %v63177_v19, %v63179_v7 }
 0x91b   : > { %52708 = vmatmul.mubr.f32.vlgmr.msra.gmra.mrb[0].mxu1 %v63036_v60 }
 0x91c   : > { %54828 = vmatpush3.bf16.msra.mxu1 %v54827_v27  ;;  %52714 = vmatprep.mubr.msk.f32.mxu1 %vm56176_vm1, %v56174_v1  ;;  %v63191_v8 = vsub.f32 %v47718_v41, %v48215_v30  ;;  %v47821_v23 = vsub.f32 %v63177_v19, %v47820_v10  ;;  %v63221_v50 = vpack.c.bf16 %v48215_v30, %v48212_v25  ;;  %v48682_v41 = vpop.permute.xlu1 %48681 }
 0x91d   : > { %54829 = vmatprep.subr.bf16.mxu1 %v56175_v4  ;;  %v54856_v28 = vpack.c.bf16 %v47820_v10, %v47808_v43  ;;  %v48693_v30 = vsel %vm47701_vm13, %v48680_v36, %v48682_v41 }
 0x91e   : > { %46977 = vmatmul.mubr.f32.vlgmr.msra.gmra.mrb[0].mxu0 %v63058_v58  ;;  %v48298_v31 = vand.u32 4294901760, %v63191_v8  ;;  %v47822_v59 = vand.u32 4294901760, %v47821_v23  ;;  %v54869_v45 = vpack.c.bf16 %v63191_v8, %v63193_v57  ;;  %v49201_v43 = vand.u32 4294901760, %v48693_v30 }
 0x91f   : > { %54811 = vmatpush1.bf16.msra.mxu0 %v63079_v9  ;;  %47051 = vmatprep.mubr.f32.mxu0 %v56174_v1 }
 0x920   : > { %54813 = vmatprep.subr.bf16.mxu0 %v54812_v20  ;;  %v48299_v26 = vsub.f32 %v63191_v8, %v48298_v31  ;;  %v54844_v56 = vpack.c.bf16 %v47822_v59, %v47810_v44 }
 0x922   : > { %v48300_v63 = vand.u32 4294901760, %v48299_v26 }
 0x923   : > { %52715 = vmatmul.mubr.f32.vlgmr.msra.gmra.mrb[0].mxu1 %v63058_v58  ;;  %v47815_v58 = vsub.f32 %v63134_v47, %v47814_v13  ;;  %v49818_v47 = vld [vmem:[%s63392_s1 + $0x188] sm:$0xff] }
 0x924   : > { %54831 = vmatpush3.bf16.msra.mxu1 %v63095_v14  ;;  %52721 = vmatprep.mubr.msk.f32.mxu1 %vm56176_vm1, %v56174_v1  ;;  %v48701_v40 = vsel %vm230_vm0, %v49818_v47, 0 }
 0x925   : > { %54832 = vmatprep.subr.bf16.mxu1 %v56175_v4  ;;  %v63288_v19 = vand.u32 4294901760, %v48701_v40 }
 0x926   : > { %47055 = vmatmul.mubr.f32.vlgmr.msra.gmra.mrb[0].mxu0 %v63070_v12 }
 0x927   : > { %54815 = vmatpush1.bf16.msra.mxu0 %v54814_v54  ;;  %47137 = vmatprep.mubr.f32.mxu0 %v56174_v1  ;;  %v63310_v8 = vsub.f32 %v48701_v40, %v63288_v19 }
 0x928   : > { %54817 = vmatprep.subr.bf16.mxu0 %v63043_v22  ;;  %v63169_v22 = vpack.c.bf16 %v47724_v15, %v47720_v35 }
 0x92b   : > { %52722 = vmatmul.mubr.f32.vlgmr.msra.gmra.mrb[0].mxu1 %v63070_v12  ;;  %v47816_v12 = vand.u32 4294901760, %v47815_v58 }
 0x92c   : > { %54834 = vmatpush3.bf16.msra.mxu1 %v54833_v5  ;;  %52728 = vmatprep.mubr.msk.f32.mxu1 %vm56176_vm1, %v56174_v1 }
 0x92d   : > { %54835 = vmatprep.subr.bf16.mxu1 %v56175_v4 }
 0x92e   : > { %47139 = vmatmul.mubr.f32.vlgmr.msra.gmra.mrb[0].mxu0 %v63036_v60 }
 0x92f   : > { %54819 = vmatpush1.bf16.msra.mxu0 %v63079_v9  ;;  %47213 = vmatprep.mubr.f32.mxu0 %v56174_v1  ;;  %v54842_v9 = vpack.c.bf16 %v47816_v12, %v47804_v17 }
 0x930   : > { %54839 = vmatprep.subr.bf16.mxu0 %v63169_v22 }
 0x933   : > { %52729 = vmatmul.mubr.f32.vlgmr.msra.gmra.mrb[0].mxu1 %v63036_v60 }
 0x934   : > { %54837 = vmatpush3.bf16.msra.mxu1 %v63095_v14  ;;  %52735 = vmatprep.mubr.msk.f32.mxu1 %vm56176_vm1, %v56174_v1  ;;  %v48291_v14 = vand.u32 4294901760, %v63193_v57 }
 0x935   : > { %54862 = vmatprep.subr.bf16.mxu1 %v56175_v4 }
 0x936   : > { %47215 = vmatmul.mubr.f32.vlgmr.msra.gmra.mrb[0].mxu0 %v63036_v60  ;;  %v48292_v52 = vsub.f32 %v63193_v57, %v48291_v14  ;;  %v54875_v58 = vpack.c.bf16 %v48298_v31, %v48291_v14  ;;  %v63319_v31 = vsub.f32 %v48693_v30, %v49201_v43  ;;  %v63322_v14 = vand.u32 4294901760, %v63310_v8 }
 0x937   : > { %54841 = vmatpush1.bf16.msra.mxu0 %v63205_v29  ;;  %47788 = vmatprep.mubr.f32.mxu0 %v56174_v1 }
 0x938   : > { %54843 = vmatprep.subr.bf16.mxu0 %v54842_v9  ;;  %v48293_v53 = vand.u32 4294901760, %v48292_v52  ;;  %v49280_v52 = vand.u32 4294901760, %v63319_v31 }
 0x93a   : > { %v54866_v27 = vpack.c.bf16 %v48300_v63, %v48293_v53 }
 0x93b   : > { %52736 = vmatmul.mubr.f32.vlgmr.msra.gmra.mrb[0].mxu1 %v63036_v60  ;;  %v48686_v60 = vpop.permute.xlu0 %48685 }
 0x93c   : > { %54864 = vmatpush3.bf16.msra.mxu1 %v63221_v50  ;;  %52742 = vmatprep.mubr.msk.f32.mxu1 %vm56176_vm1, %v56174_v1  ;;  %v48695_v20 = vsel %vm47701_vm13, %v48686_v60, %v48688_v18 }
 0x93d   : > { %54865 = vmatprep.subr.bf16.mxu1 %v56175_v4  ;;  %v48705_v15 = vsel %vm234_vm2, %v48695_v20, 0 }
 0x93e   : > { %47794 = vmatmul.mubr.f32.vlgmr.msra.gmra.mrb[0].mxu0 %v47793_v46  ;;  %v48713_v33 = vand.u32 4294901760, %v48705_v15 }
 0x93f   : > { %54845 = vmatpush1.bf16.msra.mxu0 %v54844_v56  ;;  %47884 = vmatprep.mubr.f32.mxu0 %v56174_v1  ;;  %v48678_v6 = vpop.permute.xlu0 %48677 }
 0x940   : > { %54847 = vmatprep.subr.bf16.mxu0 %v54846_v42  ;;  %v48692_v35 = vsel %vm47701_vm13, %v48678_v6, %v48680_v36  ;;  %v63260_v2 = vsub.f32 %v48705_v15, %v48713_v33  ;;  %v48691_v37 = vsel %vm47701_vm13, %v48676_v32, %v48678_v6  ;;  %v49281_v42 = vsub.f32 %v63319_v31, %v49280_v52 }
 0x941   : > { %v48709_v54 = vand.u32 4294901760, %v48692_v35  ;;  %v48711_v16 = vand.u32 4294901760, %v48691_v37 }
 0x942   : > { %v48803_v34 = vand.u32 4294901760, %v63260_v2 }
 0x943   : > { %52743 = vmatmul.mubr.f32.vlgmr.msra.gmra.mrb[0].mxu1 %v47793_v46  ;;  %v48684_v49 = vpop.permute.xlu0 %48683  ;;  %v63263_v62 = vsub.f32 %v48692_v35, %v48709_v54  ;;  %v63305_v12 = vsub.f32 %v48691_v37, %v48711_v16 }
 0x944   : > { %54867 = vmatpush3.bf16.msra.mxu1 %v54866_v27  ;;  %52749 = vmatprep.mubr.msk.f32.mxu1 %vm56176_vm1, %v56174_v1  ;;  %v48694_v51 = vsel %vm47701_vm13, %v48684_v49, %v48686_v60 }
 0x945   : > { %54868 = vmatprep.subr.bf16.mxu1 %v56175_v4  ;;  %v48703_v39 = vsel %vm234_vm2, %v48694_v51, 0  ;;  %v48791_v61 = vand.u32 4294901760, %v63263_v62  ;;  %v48797_v23 = vand.u32 4294901760, %v63305_v12  ;;  %v54888_v6 = vpack.c.bf16 %v63260_v2, %v63263_v62 }
 0x946   : > { %47886 = vmatmul.mubr.f32.vlgmr.msra.gmra.mrb[0].mxu0 %v63162_v11  ;;  %v48715_v24 = vand.u32 4294901760, %v48703_v39 }
 0x947   : > { %54849 = vmatpush1.bf16.msra.mxu0 %v54848_v48  ;;  %47964 = vmatprep.mubr.f32.mxu0 %v56174_v1  ;;  %v48690_v13 = vpop.permute.xlu0 %48689  ;;  %v48792_v25 = vsub.f32 %v63263_v62, %v48791_v61  ;;  %v48798_v44 = vsub.f32 %v63305_v12, %v48797_v23  ;;  %v54896_v36 = vpack.c.bf16 %v48803_v34, %v48791_v61 }
 0x948   : > { %54851 = vmatprep.subr.bf16.mxu0 %v63169_v22  ;;  %v48696_v5 = vsel %vm47701_vm13, %v48688_v18, %v48690_v13  ;;  %v63303_v17 = vsub.f32 %v48703_v39, %v48715_v24  ;;  %v54882_v59 = vpack.c.bf16 %v48715_v24, %v48711_v16  ;;  %v49282_v18 = vand.u32 4294901760, %v49281_v42 }
 0x949   : > { %v48707_v7 = vsel %vm234_vm2, %v48696_v5, 0  ;;  %v48793_v57 = vand.u32 4294901760, %v48792_v25  ;;  %v48799_v56 = vand.u32 4294901760, %v48798_v44 }
 0x94a   : > { %v49204_v10 = vand.u32 4294901760, %v48707_v7  ;;  %v48809_v9 = vand.u32 4294901760, %v63303_v17 }
 0x94b   : > { %52750 = vmatmul.mubr.f32.vlgmr.msra.gmra.mrb[0].mxu1 %v63162_v11 }
 0x94c   : > { %54870 = vmatpush3.bf16.msra.mxu1 %v54869_v45  ;;  %52756 = vmatprep.mubr.msk.f32.mxu1 %vm56176_vm1, %v56174_v1  ;;  %v63317_v21 = vsub.f32 %v48707_v7, %v49204_v10  ;;  %v48810_v38 = vsub.f32 %v63303_v17, %v48809_v9  ;;  %v54905_v53 = vpack.c.bf16 %v49204_v10, %v49201_v43 }
 0x94d   : > { %54871 = vmatprep.subr.bf16.mxu1 %v56175_v4  ;;  %v54898_v15 = vpack.c.bf16 %v48809_v9, %v48797_v23 }
 0x94e   : > { %47967 = vmatmul.mubr.f32.vlgmr.msra.gmra.mrb[0].mxu0 %v63184_v0  ;;  %v49287_v26 = vand.u32 4294901760, %v63317_v21  ;;  %v48811_v46 = vand.u32 4294901760, %v48810_v38  ;;  %v54911_v20 = vpack.c.bf16 %v63317_v21, %v63319_v31 }
 0x94f   : > { %54853 = vmatpush1.bf16.msra.mxu0 %v63205_v29  ;;  %48041 = vmatprep.mubr.f32.mxu0 %v56174_v1 }
 0x950   : > { %54855 = vmatprep.subr.bf16.mxu0 %v54854_v55  ;;  %v49288_v63 = vsub.f32 %v63317_v21, %v49287_v26  ;;  %v54886_v60 = vpack.c.bf16 %v48811_v46, %v48799_v56  ;;  %v54917_v35 = vpack.c.bf16 %v49287_v26, %v49280_v52 }
 0x952   : > { %v49289_v48 = vand.u32 4294901760, %v49288_v63 }
 0x953   : > { %52757 = vmatmul.mubr.f32.vlgmr.msra.gmra.mrb[0].mxu1 %v63184_v0  ;;  %v48804_v0 = vsub.f32 %v63260_v2, %v48803_v34 }
 0x954   : > { %54873 = vmatpush3.bf16.msra.mxu1 %v63221_v50  ;;  %52763 = vmatprep.mubr.msk.f32.mxu1 %vm56176_vm1, %v56174_v1  ;;  %v54908_v45 = vpack.c.bf16 %v49289_v48, %v49282_v18 }
 0x955   : > { %54874 = vmatprep.subr.bf16.mxu1 %v56175_v4 }
 0x956   : > { %48045 = vmatmul.mubr.f32.vlgmr.msra.gmra.mrb[0].mxu0 %v63196_v3 }
 0x957   : > { %54857 = vmatpush1.bf16.msra.mxu0 %v54856_v28  ;;  %48127 = vmatprep.mubr.f32.mxu0 %v56174_v1 }
 0x958   : > { %54859 = vmatprep.subr.bf16.mxu0 %v63169_v22  ;;  %v63295_v22 = vpack.c.bf16 %v48713_v33, %v48709_v54 }
 0x95b   : > { %52764 = vmatmul.mubr.f32.vlgmr.msra.gmra.mrb[0].mxu1 %v63196_v3  ;;  %v48805_v3 = vand.u32 4294901760, %v48804_v0 }
 0x95c   : > { %54876 = vmatpush3.bf16.msra.mxu1 %v54875_v58  ;;  %52770 = vmatprep.mubr.msk.f32.mxu1 %vm56176_vm1, %v56174_v1 }
 0x95d   : > { %54877 = vmatprep.subr.bf16.mxu1 %v56175_v4 }
 0x95e   : > { %48129 = vmatmul.mubr.f32.vlgmr.msra.gmra.mrb[0].mxu0 %v63162_v11 }
 0x95f   : > { %54861 = vmatpush1.bf16.msra.mxu0 %v63205_v29  ;;  %48203 = vmatprep.mubr.f32.mxu0 %v56174_v1  ;;  %v54884_v29 = vpack.c.bf16 %v48805_v3, %v48793_v57 }
 0x960   : > { %54881 = vmatprep.subr.bf16.mxu0 %v63295_v22 }
 0x963   : > { %52771 = vmatmul.mubr.f32.vlgmr.msra.gmra.mrb[0].mxu1 %v63162_v11 }
 0x964   : > { %54879 = vmatpush3.bf16.msra.mxu1 %v63221_v50  ;;  %52777 = vmatprep.mubr.msk.f32.mxu1 %vm56176_vm1, %v56174_v1  ;;  %v48781_v50 = vsub.f32 %v63310_v8, %v63322_v14 }
 0x965   : > { %54904 = vmatprep.subr.bf16.mxu1 %v56175_v4 }
 0x966   : > { %48205 = vmatmul.mubr.f32.vlgmr.msra.gmra.mrb[0].mxu0 %v63162_v11  ;;  %v48782_v27 = vand.u32 4294901760, %v48781_v50 }
 0x967   : > { %54883 = vmatpush1.bf16.msra.mxu0 %v54882_v59  ;;  %48777 = vmatprep.mubr.f32.mxu0 %v56174_v1 }
 0x968   : > { %54885 = vmatprep.subr.bf16.mxu0 %v54884_v29 }
 0x96b   : > { %52778 = vmatmul.mubr.f32.vlgmr.msra.gmra.mrb[0].mxu1 %v63162_v11  ;;  %v54890_v11 = vpack.c.bf16 %v63303_v17, %v63305_v12 }
 0x96c   : > { %54906 = vmatpush3.bf16.msra.mxu1 %v54905_v53  ;;  %52784 = vmatprep.mubr.msk.f32.mxu1 %vm56176_vm1, %v56174_v1 }
 0x96d   : > { %54907 = vmatprep.subr.bf16.mxu1 %v56175_v4 }
 0x96e   : > { %48783 = vmatmul.mubr.f32.vlgmr.msra.gmra.mrb[0].mxu0 %v48782_v27 }
 0x96f   : > { %54887 = vmatpush1.bf16.msra.mxu0 %v54886_v60  ;;  %48873 = vmatprep.mubr.f32.mxu0 %v56174_v1 }
 0x970   : > { %54889 = vmatprep.subr.bf16.mxu0 %v54888_v6 }
 0x973   : > { %52785 = vmatmul.mubr.f32.vlgmr.msra.gmra.mrb[0].mxu1 %v48782_v27 }
 0x974   : > { %54909 = vmatpush3.bf16.msra.mxu1 %v54908_v45  ;;  %52791 = vmatprep.mubr.msk.f32.mxu1 %vm56176_vm1, %v56174_v1 }
 0x975   : > { %54910 = vmatprep.subr.bf16.mxu1 %v56175_v4 }
 0x976   : > { %48875 = vmatmul.mubr.f32.vlgmr.msra.gmra.mrb[0].mxu0 %v63288_v19 }
 0x977   : > { %54891 = vmatpush1.bf16.msra.mxu0 %v54890_v11  ;;  %48953 = vmatprep.mubr.f32.mxu0 %v56174_v1 }
 0x978   : > { %54893 = vmatprep.subr.bf16.mxu0 %v63295_v22 }
 0x97b   : > { %52792 = vmatmul.mubr.f32.vlgmr.msra.gmra.mrb[0].mxu1 %v63288_v19 }
 0x97c   : > { %54912 = vmatpush3.bf16.msra.mxu1 %v54911_v20  ;;  %52798 = vmatprep.mubr.msk.f32.mxu1 %vm56176_vm1, %v56174_v1 }
 0x97d   : > { %54913 = vmatprep.subr.bf16.mxu1 %v56175_v4 }
 0x97e   : > { %48956 = vmatmul.mubr.f32.vlgmr.msra.gmra.mrb[0].mxu0 %v63310_v8 }
 0x97f   : > { %54895 = vmatpush1.bf16.msra.mxu0 %v54882_v59  ;;  %49030 = vmatprep.mubr.f32.mxu0 %v56174_v1 }
 0x980   : > { %54897 = vmatprep.subr.bf16.mxu0 %v54896_v36 }
 0x983   : > { %52799 = vmatmul.mubr.f32.vlgmr.msra.gmra.mrb[0].mxu1 %v63310_v8 }
 0x984   : > { %54915 = vmatpush3.bf16.msra.mxu1 %v54905_v53  ;;  %52805 = vmatprep.mubr.msk.f32.mxu1 %vm56176_vm1, %v56174_v1 }
 0x985   : > { %54916 = vmatprep.subr.bf16.mxu1 %v56175_v4 }
 0x986   : > { %49034 = vmatmul.mubr.f32.vlgmr.msra.gmra.mrb[0].mxu0 %v63322_v14 }
 0x987   : > { %54899 = vmatpush1.bf16.msra.mxu0 %v54898_v15  ;;  %49116 = vmatprep.mubr.f32.mxu0 %v56174_v1 }
 0x988   : > { %54901 = vmatprep.subr.bf16.mxu0 %v63295_v22 }
 0x98b   : > { %52806 = vmatmul.mubr.f32.vlgmr.msra.gmra.mrb[0].mxu1 %v63322_v14 }
 0x98c   : > { %54918 = vmatpush3.bf16.msra.mxu1 %v54917_v35  ;;  %52812 = vmatprep.mubr.msk.f32.mxu1 %vm56176_vm1, %v56174_v1 }
 0x98d   : > { %54919 = vmatprep.subr.bf16.mxu1 %v56175_v4 }
 0x98e   : > { %49118 = vmatmul.mubr.f32.vlgmr.msra.gmra.mrb[0].mxu0 %v63288_v19 }
 0x98f   : > { %54903 = vmatpush1.bf16.msra.mxu0 %v54882_v59  ;;  %49192 = vmatprep.mubr.f32.mxu0 %v56174_v1 }
 0x993   : > { %52813 = vmatmul.mubr.f32.vlgmr.msra.gmra.mrb[0].mxu1 %v63288_v19 }
 0x994   : > { %54921 = vmatpush3.bf16.msra.mxu1 %v54905_v53  ;;  %52819 = vmatprep.mubr.msk.f32.mxu1 %vm56176_vm1, %v56174_v1 }
 0x996   : > { %49194 = vmatmul.mubr.f32.vlgmr.msra.gmra.mrb[0].mxu0 %v63288_v19 }
 0x99b   : > { %52820 = vmatmul.mubr.f32.vlgmr.msra.gmra.mrb[0].mxu1 %v63288_v19 }
 0xa69   : > { %v49195_v55 = vpop.f32.mrb[0].mxu0 }
 0xa6a   : > { %v49662_v49 = vsub.f32 0.0, %v49195_v55  ;;  %v49197_v33 = vpop.f32.mrb[1].mxu0 }
 0xa6b   : > { %v49663_v54 = vsub.f32 0.0, %v49197_v33 }
 0xa6c   : > { %v49665_v4 = vmul.f32 1.442695, %v49662_v49 }
 0xa6d   : > { %v49667_v32 = vmul.f32 1.442695, %v49663_v54 }
 0xa6e   : > { %56154 = vpow2.f32 %v49665_v4  ;;  %v49655_v51 = vpop.f32.mrb[0].mxu1 }
 0xa6f   : > { %56156 = vpow2.f32 %v49667_v32  ;;  %v49664_v2 = vsub.f32 0.0, %v49655_v51  ;;  %v52821_v62 = vpop.f32.mrb[1].mxu1 }
 0xa71   : > { %v49669_v47 = vmul.f32 1.442695, %v49664_v2 }
 0xa73   : > { %56158 = vpow2.f32 %v49669_v47 }
 0xa78   : > { %v56155_v28 = vpop.eup %56154 }
 0xa79   : > { %v56157_v1 = vpop.eup %56156  ;;  %v49671_v13 = vadd.f32 1.0, %v56155_v28 }
 0xa7a   : > { %v49672_v39 = vadd.f32 1.0, %v56157_v1 }
 0xa7b   : > { %56160 = vrcp.f32 %v49671_v13 }
 0xa7c   : > { %56162 = vrcp.f32 %v49672_v39 }
 0xa7d   : > { %v56159_v37 = vpop.eup %56158 }
 0xa7e   : > { %v49673_v40 = vadd.f32 1.0, %v56159_v37 }
 0xa80   : > { %56164 = vrcp.f32 %v49673_v40 }
 0xa85   : > { %v56161_v34 = vpop.eup %56160 }
 0xa86   : > { %v56163_v61 = vpop.eup %56162  ;;  %49680 = vst [vmem:[%s143_s12] sm:$0xff] %v56161_v34 }
 0xa87   : > { %49681 = vst [vmem:[%s143_s12 + $0x8] sm:$0xff] %v56163_v61 }
 0xa8a   : > { %v56165_v5 = vpop.eup %56164 }
 0xa8b   : > { %49682 = vst [vmem:[%s143_s12 + $0x10] sm:$0xff] %v56165_v5 }
 0xa8c PF: > { %s12_s9 = sadd.s32 1, %s56172_s9  }
 0xa8d   : > { %p9_p4 = scmp.ge.s32.totalorder %s12_s9, 4  }
 0xa8f   :  { %11 = sbr.rel (!%p9_p4) target bundleno = 1 (0x1), region = 110 }

</bundles_post_ra>
